<compile_context>
chip_gen: v6e
topology: v6e:2x2x1
jax: 0.10.0
libtpu: 0.0.40
codegen_flags: <defaults>
</compile_context>

<pallas_src>
import jax
import jax.numpy as jnp
from jax.experimental import pallas as pl
from jax.experimental.pallas import tpu as pltpu

HIDDEN = 1200        # fixed by the PyTorch module
HIDDEN_PAD = 1280    # 10 * 128, lane-dense padding


def get_template_kernel(
    s_ref, mask_ref, g_ref,
    w1_ref, b1_ref,
    w2_ref, b2_ref,
    w3_ref, b3_ref,
    w4_ref, b4_ref,
    out_ref,
):
    # Layer 1: Linear(state_dim, 1200) + BN(eval) folded -> ReLU
    x = s_ref[...].astype(jnp.bfloat16)
    h = jnp.dot(x, w1_ref[...], preferred_element_type=jnp.float32) + b1_ref[...]
    h = jnp.maximum(h, 0.0).astype(jnp.bfloat16)

    # Layer 2: Linear(1200, 1200) + BN(eval) folded -> ReLU
    h = jnp.dot(h, w2_ref[...], preferred_element_type=jnp.float32) + b2_ref[...]
    h = jnp.maximum(h, 0.0).astype(jnp.bfloat16)

    # Layer 3: Linear(1200, 1200) + BN(eval) folded -> ReLU
    h = jnp.dot(h, w3_ref[...], preferred_element_type=jnp.float32) + b3_ref[...]
    h = jnp.maximum(h, 0.0).astype(jnp.bfloat16)

    # Dropout(0.5): eval-mode identity.
    # TODO(synk): training-mode dropout / batch-stat BatchNorm not implemented
    # (eval semantics folded into the weights for a deterministic kernel).

    # Layer 4: Linear(1200, t_dim)
    f = jnp.dot(h, w4_ref[...], preferred_element_type=jnp.float32) + b4_ref[...]

    # Gumbel-softmax (soft), with 1/tau and 0.001 pre-folded into mask/g:
    #   z = (tanh(f) * T_mask + g * 0.001) / tau
    z = jnp.tanh(f) * mask_ref[...] + g_ref[...]
    z = z - jnp.max(z, axis=-1, keepdims=True)
    e = jnp.exp(z)
    out_ref[...] = e * pl.reciprocal(jnp.sum(e, axis=-1, keepdims=True), approx=True)


def make_params(key, state_dim, t_dim):
    """Synthetic PyTorch-like parameters with BN folded, padded, cast to bf16."""
    ks = jax.random.split(key, 4)
    eps = 1e-5

    def linear(k, fan_in, fan_out):
        bound = 1.0 / (fan_in ** 0.5)
        kw, kb = jax.random.split(k)
        w = jax.random.uniform(kw, (fan_in, fan_out), jnp.float32, -bound, bound)
        b = jax.random.uniform(kb, (fan_out,), jnp.float32, -bound, bound)
        return w, b

    w1, b1 = linear(ks[0], state_dim, HIDDEN)
    w2, b2 = linear(ks[1], HIDDEN, HIDDEN)
    w3, b3 = linear(ks[2], HIDDEN, HIDDEN)
    w4, b4 = linear(ks[3], HIDDEN, t_dim)

    # BatchNorm1d eval-mode stats (placeholders; a trained model supplies the
    # real running_mean/var + gamma/beta, and the same fold applies).
    gamma = jnp.ones((HIDDEN,), jnp.float32)
    beta = jnp.zeros((HIDDEN,), jnp.float32)
    r_mean = jnp.zeros((HIDDEN,), jnp.float32)
    r_var = jnp.ones((HIDDEN,), jnp.float32)

    scale = gamma / jnp.sqrt(r_var + eps)        # per-feature BN scale
    shift = beta - r_mean * scale                # per-feature BN shift

    def fold_bn(w, b):
        # BN(x @ W + b) == x @ (W * scale) + (b * scale + shift)
        return w * scale[None, :], b * scale + shift

    w1, b1 = fold_bn(w1, b1)
    w2, b2 = fold_bn(w2, b2)
    w3, b3 = fold_bn(w3, b3)

    # Zero-pad the hidden dimension 1200 -> 1280 (lane-dense). Padded output
    # columns have W'=0, b'=0 -> ReLU(0)=0; padded input rows are zero, so the
    # math is unchanged.
    P = HIDDEN_PAD - HIDDEN
    w1 = jnp.pad(w1, ((0, 0), (0, P)))
    b1 = jnp.pad(b1, ((0, P),))
    w2 = jnp.pad(w2, ((0, P), (0, P)))
    b2 = jnp.pad(b2, ((0, P),))
    w3 = jnp.pad(w3, ((0, P), (0, P)))
    b3 = jnp.pad(b3, ((0, P),))
    w4 = jnp.pad(w4, ((0, P), (0, 0)))

    return dict(
        w1=w1.astype(jnp.bfloat16), b1=b1.reshape(1, -1),
        w2=w2.astype(jnp.bfloat16), b2=b2.reshape(1, -1),
        w3=w3.astype(jnp.bfloat16), b3=b3.reshape(1, -1),
        w4=w4.astype(jnp.bfloat16), b4=b4.reshape(1, -1),
    )


def get_template_forward(s, T_mask, temp, gumbel_noise, params):
    B, state_dim = s.shape
    t_dim = params["w4"].shape[1]
    HP = HIDDEN_PAD

    # Fold 1/tau and the 0.001 gumbel ratio into the tiny (B, t_dim) inputs:
    #   (tanh(f)*mask + g*0.001)/tau == tanh(f)*(mask/tau) + g*(0.001/tau)
    inv_tau = 1.0 / jnp.asarray(temp, jnp.float32)
    mask_scaled = T_mask.astype(jnp.float32) * inv_tau
    g_scaled = gumbel_noise.astype(jnp.float32) * (0.001 * inv_tau)

    # Batch grid: weights stay resident in VMEM across grid steps (constant
    # index_map), so large batches amortize the weight stream and shard across
    # TensorCores via "parallel" semantics.
    if B >= 128 and B % 128 == 0:
        tm = 128
    else:
        tm = B
    grid = (B // tm,)

    def row_spec(cols):
        return pl.BlockSpec((tm, cols), lambda i: (i, 0))

    def const_spec(rows, cols):
        return pl.BlockSpec((rows, cols), lambda i: (0, 0))

    in_specs = [
        row_spec(state_dim),                              # s
        row_spec(t_dim),                                  # T_mask / tau
        row_spec(t_dim),                                  # gumbel * 0.001 / tau
        const_spec(state_dim, HP), const_spec(1, HP),     # w1, b1
        const_spec(HP, HP),        const_spec(1, HP),     # w2, b2
        const_spec(HP, HP),        const_spec(1, HP),     # w3, b3
        const_spec(HP, t_dim),     const_spec(1, t_dim),  # w4, b4
    ]

    return pl.pallas_call(
        get_template_kernel,
        out_shape=jax.ShapeDtypeStruct((B, t_dim), jnp.float32),
        grid=grid,
        in_specs=in_specs,
        out_specs=row_spec(t_dim),
        compiler_params=pltpu.CompilerParams(
            dimension_semantics=("parallel",),
            vmem_limit_bytes=32 * 1024 * 1024,
        ),
    )(
        s, mask_scaled, g_scaled,
        params["w1"], params["b1"],
        params["w2"], params["b2"],
        params["w3"], params["b3"],
        params["w4"], params["b4"],
    )


if __name__ == "__main__":
    B, STATE_DIM, T_DIM = 8, 32, 16
    TEMP = 0.5

    root = jax.random.PRNGKey(0)
    k_param, k_s, k_mask, k_gumbel = jax.random.split(root, 4)

    params = make_params(k_param, STATE_DIM, T_DIM)

    s = jax.random.normal(k_s, (B, STATE_DIM), jnp.float32)
    T_mask = jax.random.bernoulli(k_mask, 0.7, (B, T_DIM)).astype(jnp.float32)
    # standard Gumbel(0,1) noise, same distribution as -log(Exponential(1))
    gumbel_noise = jax.random.gumbel(k_gumbel, (B, T_DIM), jnp.float32)

    out = get_template_forward(s, T_mask, TEMP, gumbel_noise, params)
    out = jax.block_until_ready(out)

    assert out.shape == (B, T_DIM)
    assert bool(jnp.all(jnp.isfinite(out)))
    # rows of a softmax must sum to ~1 (approx reciprocal -> loose tolerance)
    assert bool(jnp.allclose(jnp.sum(out, axis=-1), 1.0, atol=5e-3))
    print("KERNEL_OK")
</pallas_src>

<mosaic_0001>
module attributes {stable_mosaic.version = 11 : i64} {
  func.func @get_template_kernel(%arg0: i32, %arg1: memref<8x32xf32, #tpu.memory_space<vmem>>, %arg2: memref<8x16xf32, #tpu.memory_space<vmem>>, %arg3: memref<8x16xf32, #tpu.memory_space<vmem>>, %arg4: memref<32x1280xbf16, #tpu.memory_space<vmem>>, %arg5: memref<1x1280xf32, #tpu.memory_space<vmem>>, %arg6: memref<1280x1280xbf16, #tpu.memory_space<vmem>>, %arg7: memref<1x1280xf32, #tpu.memory_space<vmem>>, %arg8: memref<1280x1280xbf16, #tpu.memory_space<vmem>>, %arg9: memref<1x1280xf32, #tpu.memory_space<vmem>>, %arg10: memref<1280x16xbf16, #tpu.memory_space<vmem>>, %arg11: memref<1x16xf32, #tpu.memory_space<vmem>>, %arg12: memref<8x16xf32, #tpu.memory_space<vmem>>) attributes {dimension_semantics = [#tpu.dimension_semantics<parallel>], iteration_bounds = array<i64: 1>, scalar_prefetch = 0 : i64, scratch_operands = 0 : i64, tpu.core_type = #tpu.core_type<tc>, window_params = [{transform_indices = @transform_0, window_bounds = array<i64: 8, 32>}, {transform_indices = @transform_1, window_bounds = array<i64: 8, 16>}, {transform_indices = @transform_2, window_bounds = array<i64: 8, 16>}, {pipeline_mode = #tpu.pipeline_mode<synchronous>, transform_indices = @transform_3, window_bounds = array<i64: 32, 1280>}, {pipeline_mode = #tpu.pipeline_mode<synchronous>, transform_indices = @transform_4, window_bounds = array<i64: 1, 1280>}, {pipeline_mode = #tpu.pipeline_mode<synchronous>, transform_indices = @transform_5, window_bounds = array<i64: 1280, 1280>}, {pipeline_mode = #tpu.pipeline_mode<synchronous>, transform_indices = @transform_6, window_bounds = array<i64: 1, 1280>}, {pipeline_mode = #tpu.pipeline_mode<synchronous>, transform_indices = @transform_7, window_bounds = array<i64: 1280, 1280>}, {pipeline_mode = #tpu.pipeline_mode<synchronous>, transform_indices = @transform_8, window_bounds = array<i64: 1, 1280>}, {pipeline_mode = #tpu.pipeline_mode<synchronous>, transform_indices = @transform_9, window_bounds = array<i64: 1280, 16>}, {pipeline_mode = #tpu.pipeline_mode<synchronous>, transform_indices = @transform_10, window_bounds = array<i64: 1, 16>}, {transform_indices = @transform_11, window_bounds = array<i64: 8, 16>}]} {
    %c0 = arith.constant 0 : index
    %c0_0 = arith.constant 0 : index
    %0 = vector.load %arg1[%c0, %c0_0] : memref<8x32xf32, #tpu.memory_space<vmem>>, vector<8x32xf32>
    %1 = arith.truncf %0 : vector<8x32xf32> to vector<8x32xbf16>
    %c0_1 = arith.constant 0 : index
    %c0_2 = arith.constant 0 : index
    %2 = vector.load %arg4[%c0_1, %c0_2] : memref<32x1280xbf16, #tpu.memory_space<vmem>>, vector<32x1280xbf16>
    %cst = arith.constant dense<0.000000e+00> : vector<8x1280xf32>
    %3 = tpu.matmul %1, %2, %cst {dimension_numbers = #tpu.dot_dimension_numbers<[1], [0], [0], [1], [0, 0, 1, 1], [], []>} : vector<8x32xbf16>, vector<32x1280xbf16>, vector<8x1280xf32> -> vector<8x1280xf32>
    %c0_3 = arith.constant 0 : index
    %c0_4 = arith.constant 0 : index
    %4 = vector.load %arg5[%c0_3, %c0_4] : memref<1x1280xf32, #tpu.memory_space<vmem>>, vector<1x1280xf32>
    %5 = vector.broadcast %4 : vector<1x1280xf32> to vector<8x1280xf32>
    %6 = arith.addf %3, %5 : vector<8x1280xf32>
    %cst_5 = arith.constant 0.000000e+00 : f32
    %7 = vector.broadcast %cst_5 : f32 to vector<8x1280xf32>
    %8 = arith.maximumf %6, %7 : vector<8x1280xf32>
    %9 = arith.truncf %8 : vector<8x1280xf32> to vector<8x1280xbf16>
    %c0_6 = arith.constant 0 : index
    %c0_7 = arith.constant 0 : index
    %10 = vector.load %arg6[%c0_6, %c0_7] : memref<1280x1280xbf16, #tpu.memory_space<vmem>>, vector<1280x1280xbf16>
    %cst_8 = arith.constant dense<0.000000e+00> : vector<8x1280xf32>
    %11 = tpu.matmul %9, %10, %cst_8 {dimension_numbers = #tpu.dot_dimension_numbers<[1], [0], [0], [1], [0, 0, 1, 1], [], []>} : vector<8x1280xbf16>, vector<1280x1280xbf16>, vector<8x1280xf32> -> vector<8x1280xf32>
    %c0_9 = arith.constant 0 : index
    %c0_10 = arith.constant 0 : index
    %12 = vector.load %arg7[%c0_9, %c0_10] : memref<1x1280xf32, #tpu.memory_space<vmem>>, vector<1x1280xf32>
    %13 = vector.broadcast %12 : vector<1x1280xf32> to vector<8x1280xf32>
    %14 = arith.addf %11, %13 : vector<8x1280xf32>
    %cst_11 = arith.constant 0.000000e+00 : f32
    %15 = vector.broadcast %cst_11 : f32 to vector<8x1280xf32>
    %16 = arith.maximumf %14, %15 : vector<8x1280xf32>
    %17 = arith.truncf %16 : vector<8x1280xf32> to vector<8x1280xbf16>
    %c0_12 = arith.constant 0 : index
    %c0_13 = arith.constant 0 : index
    %18 = vector.load %arg8[%c0_12, %c0_13] : memref<1280x1280xbf16, #tpu.memory_space<vmem>>, vector<1280x1280xbf16>
    %cst_14 = arith.constant dense<0.000000e+00> : vector<8x1280xf32>
    %19 = tpu.matmul %17, %18, %cst_14 {dimension_numbers = #tpu.dot_dimension_numbers<[1], [0], [0], [1], [0, 0, 1, 1], [], []>} : vector<8x1280xbf16>, vector<1280x1280xbf16>, vector<8x1280xf32> -> vector<8x1280xf32>
    %c0_15 = arith.constant 0 : index
    %c0_16 = arith.constant 0 : index
    %20 = vector.load %arg9[%c0_15, %c0_16] : memref<1x1280xf32, #tpu.memory_space<vmem>>, vector<1x1280xf32>
    %21 = vector.broadcast %20 : vector<1x1280xf32> to vector<8x1280xf32>
    %22 = arith.addf %19, %21 : vector<8x1280xf32>
    %cst_17 = arith.constant 0.000000e+00 : f32
    %23 = vector.broadcast %cst_17 : f32 to vector<8x1280xf32>
    %24 = arith.maximumf %22, %23 : vector<8x1280xf32>
    %25 = arith.truncf %24 : vector<8x1280xf32> to vector<8x1280xbf16>
    %c0_18 = arith.constant 0 : index
    %c0_19 = arith.constant 0 : index
    %26 = vector.load %arg10[%c0_18, %c0_19] : memref<1280x16xbf16, #tpu.memory_space<vmem>>, vector<1280x16xbf16>
    %cst_20 = arith.constant dense<0.000000e+00> : vector<8x16xf32>
    %27 = tpu.matmul %25, %26, %cst_20 {dimension_numbers = #tpu.dot_dimension_numbers<[1], [0], [0], [1], [0, 0, 1, 1], [], []>} : vector<8x1280xbf16>, vector<1280x16xbf16>, vector<8x16xf32> -> vector<8x16xf32>
    %c0_21 = arith.constant 0 : index
    %c0_22 = arith.constant 0 : index
    %28 = vector.load %arg11[%c0_21, %c0_22] : memref<1x16xf32, #tpu.memory_space<vmem>>, vector<1x16xf32>
    %29 = vector.broadcast %28 : vector<1x16xf32> to vector<8x16xf32>
    %30 = arith.addf %27, %29 : vector<8x16xf32>
    %31 = math.tanh %30 : vector<8x16xf32>
    %c0_23 = arith.constant 0 : index
    %c0_24 = arith.constant 0 : index
    %32 = vector.load %arg2[%c0_23, %c0_24] : memref<8x16xf32, #tpu.memory_space<vmem>>, vector<8x16xf32>
    %33 = arith.mulf %31, %32 : vector<8x16xf32>
    %c0_25 = arith.constant 0 : index
    %c0_26 = arith.constant 0 : index
    %34 = vector.load %arg3[%c0_25, %c0_26] : memref<8x16xf32, #tpu.memory_space<vmem>>, vector<8x16xf32>
    %35 = arith.addf %33, %34 : vector<8x16xf32>
    %cst_27 = arith.constant dense<0xFF800000> : vector<8xf32>
    %36 = vector.multi_reduction <maximumf>, %35, %cst_27 [1] : vector<8x16xf32> to vector<8xf32>
    %37 = vector.shape_cast %36 : vector<8xf32> to vector<8x1xf32>
    %38 = vector.broadcast %37 : vector<8x1xf32> to vector<8x16xf32>
    %39 = arith.subf %35, %38 : vector<8x16xf32>
    %40 = math.exp %39 : vector<8x16xf32>
    %cst_28 = arith.constant dense<0.000000e+00> : vector<8xf32>
    %41 = vector.multi_reduction <add>, %40, %cst_28 [1] : vector<8x16xf32> to vector<8xf32>
    %42 = vector.shape_cast %41 : vector<8xf32> to vector<8x1xf32>
    %43 = tpu.reciprocal %42 {approx = true} : vector<8x1xf32> -> vector<8x1xf32>
    %44 = vector.broadcast %43 : vector<8x1xf32> to vector<8x16xf32>
    %45 = arith.mulf %40, %44 : vector<8x16xf32>
    %c0_29 = arith.constant 0 : index
    %c0_30 = arith.constant 0 : index
    %46 = vector.load %arg12[%c0_29, %c0_30] : memref<8x16xf32, #tpu.memory_space<vmem>>, vector<8x16xf32>
    tpu.vector_store %arg12[%c0_29, %c0_30], %45 {strides = array<i32>} : memref<8x16xf32, #tpu.memory_space<vmem>>, vector<8x16xf32>,
    return
  }
  func.func @transform_0(%arg0: i32) -> (i32, i32) {
    %c0_i32 = arith.constant 0 : i32
    %c0_i32_0 = arith.constant 0 : i32
    return %arg0, %c0_i32 : i32, i32
  }
  func.func @transform_1(%arg0: i32) -> (i32, i32) {
    %c0_i32 = arith.constant 0 : i32
    %c0_i32_0 = arith.constant 0 : i32
    return %arg0, %c0_i32 : i32, i32
  }
  func.func @transform_2(%arg0: i32) -> (i32, i32) {
    %c0_i32 = arith.constant 0 : i32
    %c0_i32_0 = arith.constant 0 : i32
    return %arg0, %c0_i32 : i32, i32
  }
  func.func @transform_3(%arg0: i32) -> (i32, i32) {
    %c0_i32 = arith.constant 0 : i32
    %c0_i32_0 = arith.constant 0 : i32
    %c0_i32_1 = arith.constant 0 : i32
    return %c0_i32, %c0_i32_0 : i32, i32
  }
  func.func @transform_4(%arg0: i32) -> (i32, i32) {
    %c0_i32 = arith.constant 0 : i32
    %c0_i32_0 = arith.constant 0 : i32
    %c0_i32_1 = arith.constant 0 : i32
    return %c0_i32, %c0_i32_0 : i32, i32
  }
  func.func @transform_5(%arg0: i32) -> (i32, i32) {
    %c0_i32 = arith.constant 0 : i32
    %c0_i32_0 = arith.constant 0 : i32
    %c0_i32_1 = arith.constant 0 : i32
    return %c0_i32, %c0_i32_0 : i32, i32
  }
  func.func @transform_6(%arg0: i32) -> (i32, i32) {
    %c0_i32 = arith.constant 0 : i32
    %c0_i32_0 = arith.constant 0 : i32
    %c0_i32_1 = arith.constant 0 : i32
    return %c0_i32, %c0_i32_0 : i32, i32
  }
  func.func @transform_7(%arg0: i32) -> (i32, i32) {
    %c0_i32 = arith.constant 0 : i32
    %c0_i32_0 = arith.constant 0 : i32
    %c0_i32_1 = arith.constant 0 : i32
    return %c0_i32, %c0_i32_0 : i32, i32
  }
  func.func @transform_8(%arg0: i32) -> (i32, i32) {
    %c0_i32 = arith.constant 0 : i32
    %c0_i32_0 = arith.constant 0 : i32
    %c0_i32_1 = arith.constant 0 : i32
    return %c0_i32, %c0_i32_0 : i32, i32
  }
  func.func @transform_9(%arg0: i32) -> (i32, i32) {
    %c0_i32 = arith.constant 0 : i32
    %c0_i32_0 = arith.constant 0 : i32
    %c0_i32_1 = arith.constant 0 : i32
    return %c0_i32, %c0_i32_0 : i32, i32
  }
  func.func @transform_10(%arg0: i32) -> (i32, i32) {
    %c0_i32 = arith.constant 0 : i32
    %c0_i32_0 = arith.constant 0 : i32
    %c0_i32_1 = arith.constant 0 : i32
    return %c0_i32, %c0_i32_0 : i32, i32
  }
  func.func @transform_11(%arg0: i32) -> (i32, i32) {
    %c0_i32 = arith.constant 0 : i32
    %c0_i32_0 = arith.constant 0 : i32
    return %arg0, %c0_i32 : i32, i32
  }
}

</mosaic_0001>

<bundles_post_ra>
// kernel: tpu_custom_call.1
= control target key start
LH: loop header
LB: loop body
LE: loop exit
PB: predicated region body
PF: predicated region fallthrough
CT: control target
= control target key end

     0   :  { %16 = vsyncpa [#allocation3], 0  ;;  %s18592_s0 = inlined_call_operand.hbm [shape: f32[8,32], index: 0, kind: input, shape index: {}]   ;;  %s18593_s1 = inlined_call_operand.hbm [shape: f32[8,16], index: 1, kind: input, shape index: {}]   ;;  %s18594_s2 = inlined_call_operand.hbm [shape: f32[8,16], index: 2, kind: input, shape index: {}]   ;;  %s18595_s3 = inlined_call_operand.hbm [shape: bf16[32,1280], index: 3, kind: input, shape index: {}]   ;;  %s18596_s4 = inlined_call_operand.hbm [shape: f32[1,1280], index: 4, kind: input, shape index: {}]   ;;  %s18597_s5 = inlined_call_operand.hbm [shape: bf16[1280,1280], index: 5, kind: input, shape index: {}]   ;;  %s18598_s6 = inlined_call_operand.hbm [shape: f32[1,1280], index: 6, kind: input, shape index: {}]   ;;  %s18599_s7 = inlined_call_operand.hbm [shape: bf16[1280,1280], index: 7, kind: input, shape index: {}]   ;;  %s18600_s8 = inlined_call_operand.hbm [shape: f32[1,1280], index: 8, kind: input, shape index: {}]   ;;  %s18601_s9 = inlined_call_operand.vmem [shape: bf16[1280,16], index: 9, kind: input, shape index: {}]   ;;  %s18602_s10 = inlined_call_operand.hbm [shape: f32[1,16], index: 10, kind: input, shape index: {}]   ;;  %s18603_s11 = inlined_call_operand.hbm [shape: f32[8,16], index: 11, kind: output, shape index: {}]  }
   0x1   :  { %17 = vsyncpa [#allocation6], 0 }
   0x2   :  { %18 = vsyncpa [#allocation9], 0 }
   0x3   :  { %19 = vsyncpa [#allocation12], 0 }
   0x4   :  { %20 = vsyncpa [#allocation15], 0 }
   0x5   :  { %21 = vsyncpa [#allocation18], 0 }
   0x6   :  { %22 = vsyncpa [#allocation4], 0  ;;  %s17834_s17 = smov [#allocation5]   ;;  %s17835_s19 = smov [#allocation8]  }
   0x7   :  { %s39_s18 = sshll.u32 %s17834_s17, 4  ;;  %s58_s20 = sshll.u32 %s17835_s19, 4  ;;  %s40_s18 = int_to_ptr.vmem [resolvable:$true] %s39_s18  ;;  %s59_s20 = int_to_ptr.vmem [resolvable:$true] %s58_s20 }
   0x8   :  { %s17608_s21 = scalar_lea.vmem %s40_s18, 128  ;;  %p17613_p1 = scmp.lt.s32.totalorder %s40_s18, %s40_s18 }
   0x9   :  { %p17609_p0 = scmp.ne.s32.totalorder %s40_s18, %s17608_s21  ;;  %p17614_p2 = scmp.lt.s32.totalorder %s17608_s21, %s17608_s21 }
   0xb   :  { %p17615_p3 = por %p17614_p2, %p17613_p1 }
   0xd   :  { %p17616_p4 = pnand %p17615_p3, %p17609_p0 }
   0xf   :  { %17619 = shalt.err (!%p17616_p4)
}
  0x10   :  { %42 = dma.hbm_to_vmem [thread:$0]  %s18593_s1, 128, %s40_s18, [#allocation6]  }
  0x11   :  { %s17628_s24 = scalar_lea.vmem %s59_s20, 2560  ;;  %p17633_p6 = scmp.lt.s32.totalorder %s59_s20, %s59_s20 }
  0x12   :  { %p17629_p5 = scmp.ne.s32.totalorder %s59_s20, %s17628_s24  ;;  %p17634_p7 = scmp.lt.s32.totalorder %s17628_s24, %s17628_s24 }
  0x14   :  { %p17635_p8 = por %p17634_p7, %p17633_p6 }
  0x16   :  { %p17636_p9 = pnand %p17635_p8, %p17629_p5 }
  0x18   :  { %17639 = shalt.err (!%p17636_p9)
}
  0x19   :  { %s17836_s25 = smov 640   ;;  %s17837_s26 = smov 40  }
  0x1a   :  { %64 = dma.hbm_to_vmem [thread:$0]  %s18595_s3, 2560, %s59_s20, [#allocation9], %s17836_s25, %s17836_s25, %s17837_s26  }
  0x1b   :  { %s17838_s29 = smov [#allocation11]   ;;  %s17839_s12 = smov [#allocation14]  }
  0x1c   :  { %s80_s30 = sshll.u32 %s17838_s29, 4  ;;  %s102_s13 = sshll.u32 %s17839_s12, 4  ;;  %s81_s30 = int_to_ptr.vmem [resolvable:$true] %s80_s30  ;;  %s103_s13 = int_to_ptr.vmem [resolvable:$true] %s102_s13 }
  0x1d   :  { %s17648_s1 = scalar_lea.vmem %s81_s30, 102400  ;;  %p17653_p11 = scmp.lt.s32.totalorder %s81_s30, %s81_s30 }
  0x1e   :  { %p17649_p10 = scmp.ne.s32.totalorder %s81_s30, %s17648_s1  ;;  %p17654_p12 = scmp.lt.s32.totalorder %s17648_s1, %s17648_s1 }
  0x20   :  { %p17655_p13 = por %p17654_p12, %p17653_p11 }
  0x22   :  { %p17656_p0 = pnand %p17655_p13, %p17649_p10 }
  0x24   :  { %17659 = shalt.err (!%p17656_p0)
}
  0x25   :  { %86 = dma.hbm_to_vmem [thread:$0]  %s18597_s5, 102400, %s81_s30, [#allocation12], %s17836_s25, %s17836_s25, %s17837_s26  }
  0x26   :  { %s17668_s16 = scalar_lea.vmem %s103_s13, 102400  ;;  %p17673_p2 = scmp.lt.s32.totalorder %s103_s13, %s103_s13 }
  0x27   :  { %p17669_p1 = scmp.ne.s32.totalorder %s103_s13, %s17668_s16  ;;  %p17674_p3 = scmp.lt.s32.totalorder %s17668_s16, %s17668_s16 }
  0x29   :  { %p17675_p4 = por %p17674_p3, %p17673_p2 }
  0x2b   :  { %p17676_p5 = pnand %p17675_p4, %p17669_p1 }
  0x2d   :  { %17679 = shalt.err (!%p17676_p5)
}
  0x2e   :  { %108 = dma.hbm_to_vmem [thread:$0]  %s18599_s7, 102400, %s103_s13, [#allocation15], %s17836_s25, %s17836_s25, %s17837_s26  }
  0x2f   :  { %s17840_s18 = smov [#allocation2]   ;;  %s17841_s20 = smov [#allocation7]  }
  0x30   :  { %s29_s19 = sshll.u32 %s17840_s18, 4  ;;  %s49_s21 = sshll.u32 %s17841_s20, 4  ;;  %s30_s19 = int_to_ptr.vmem [resolvable:$true] %s29_s19  ;;  %s50_s21 = int_to_ptr.vmem [resolvable:$true] %s49_s21 }
  0x31   :  { %s17688_s22 = scalar_lea.vmem %s30_s19, 128  ;;  %p17693_p7 = scmp.lt.s32.totalorder %s30_s19, %s30_s19 }
  0x32   :  { %p17689_p6 = scmp.ne.s32.totalorder %s30_s19, %s17688_s22  ;;  %p17694_p8 = scmp.lt.s32.totalorder %s17688_s22, %s17688_s22 }
  0x34   :  { %p17695_p9 = por %p17694_p8, %p17693_p7 }
  0x36   :  { %p17696_p10 = pnand %p17695_p9, %p17689_p6 }
  0x38   :  { %17699 = shalt.err (!%p17696_p10)
}
  0x39   :  { %32 = dma.hbm_to_vmem [thread:$0]  %s18592_s0, 128, %s30_s19, [#allocation3]  }
  0x3a   :  { %s17708_s24 = scalar_lea.vmem %s50_s21, 128  ;;  %p17713_p12 = scmp.lt.s32.totalorder %s50_s21, %s50_s21 }
  0x3b   :  { %p17709_p11 = scmp.ne.s32.totalorder %s50_s21, %s17708_s24  ;;  %p17714_p13 = scmp.lt.s32.totalorder %s17708_s24, %s17708_s24 }
  0x3d   :  { %p17715_p0 = por %p17714_p13, %p17713_p12 }
  0x3f   :  { %p17716_p1 = pnand %p17715_p0, %p17709_p11 }
  0x41   :  { %17719 = shalt.err (!%p17716_p1)
}
  0x42   :  { %52 = dma.hbm_to_vmem [thread:$0]  %s18594_s2, 128, %s50_s21, [#allocation6]  }
  0x43   :  { %s17842_s26 = smov [#allocation10]   ;;  %s17843_s28 = smov [#allocation13]  }
  0x44   :  { %s71_s27 = sshll.u32 %s17842_s26, 4  ;;  %s93_s29 = sshll.u32 %s17843_s28, 4  ;;  %s72_s27 = int_to_ptr.vmem [resolvable:$true] %s71_s27  ;;  %s94_s29 = int_to_ptr.vmem [resolvable:$true] %s93_s29 }
  0x45   :  { %s17728_s30 = scalar_lea.vmem %s72_s27, 160  ;;  %p17733_p3 = scmp.lt.s32.totalorder %s72_s27, %s72_s27 }
  0x46   :  { %p17729_p2 = scmp.ne.s32.totalorder %s72_s27, %s17728_s30  ;;  %p17734_p4 = scmp.lt.s32.totalorder %s17728_s30, %s17728_s30 }
  0x48   :  { %p17735_p5 = por %p17734_p4, %p17733_p3 }
  0x4a   :  { %p17736_p6 = pnand %p17735_p5, %p17729_p2 }
  0x4c   :  { %17739 = shalt.err (!%p17736_p6)
}
  0x4d   :  { %74 = dma.hbm_to_vmem [thread:$0]  %s18596_s4, 160, %s72_s27, [#allocation9]  }
  0x4e   :  { %s17748_s13 = scalar_lea.vmem %s94_s29, 160  ;;  %p17753_p8 = scmp.lt.s32.totalorder %s94_s29, %s94_s29 }
  0x4f   :  { %p17749_p7 = scmp.ne.s32.totalorder %s94_s29, %s17748_s13  ;;  %p17754_p9 = scmp.lt.s32.totalorder %s17748_s13, %s17748_s13 }
  0x51   :  { %p17755_p10 = por %p17754_p9, %p17753_p8 }
  0x53   :  { %p17756_p11 = pnand %p17755_p10, %p17749_p7 }
  0x55   :  { %17759 = shalt.err (!%p17756_p11)
}
  0x56   :  { %96 = dma.hbm_to_vmem [thread:$0]  %s18598_s6, 160, %s94_s29, [#allocation12]  }
  0x57   :  { %s17844_s14 = smov [#allocation16]   ;;  %s17845_s16 = smov [#allocation17]  }
  0x58   :  { %s115_s15 = sshll.u32 %s17844_s14, 4  ;;  %s127_s3 = sshll.u32 %s17845_s16, 4  ;;  %s116_s15 = int_to_ptr.vmem [resolvable:$true] %s115_s15  ;;  %s128_s3 = int_to_ptr.vmem [resolvable:$true] %s127_s3 }
  0x59   :  { %s17768_s17 = scalar_lea.vmem %s116_s15, 160  ;;  %p17773_p13 = scmp.lt.s32.totalorder %s116_s15, %s116_s15 }
  0x5a   :  { %p17769_p12 = scmp.ne.s32.totalorder %s116_s15, %s17768_s17  ;;  %p17774_p0 = scmp.lt.s32.totalorder %s17768_s17, %s17768_s17 }
  0x5c   :  { %p17775_p1 = por %p17774_p0, %p17773_p13 }
  0x5e   :  { %p17776_p2 = pnand %p17775_p1, %p17769_p12 }
  0x60   :  { %17779 = shalt.err (!%p17776_p2)
}
  0x61   :  { %118 = dma.hbm_to_vmem [thread:$0]  %s18600_s8, 160, %s116_s15, [#allocation15]  }
  0x62   :  { %s17788_s19 = scalar_lea.vmem %s128_s3, 16  ;;  %s17792_s6 = scalar_lea.vmem %s128_s3, 32 }
  0x63   :  { %p17789_p3 = scmp.ne.s32.totalorder %s128_s3, %s17788_s19  ;;  %p17793_p4 = scmp.lt.s32.totalorder %s128_s3, %s128_s3 }
  0x64   :  { %p17794_p5 = scmp.lt.s32.totalorder %s17792_s6, %s17788_s19 }
  0x66   :  { %p17795_p6 = por %p17794_p5, %p17793_p4 }
  0x68   :  { %p17796_p7 = pnand %p17795_p6, %p17789_p3 }
  0x6a   :  { %17799 = shalt.err (!%p17796_p7)
}
  0x6b   :  { %130 = dma.hbm_to_vmem [thread:$0]  %s18602_s10, 16, %s128_s3, [#allocation18]  }
  0x6c   :  { %17820 = dma.done.wait [#allocation3], 128  }
  0x6d   :  { %17821 = vsyncadd [#allocation3], 4294967168 }
  0x6e   :  { %17822 = dma.done.wait [#allocation6], 256  }
  0x6f   :  { %17823 = vsyncadd [#allocation6], 4294967040 }
  0x70   :  { %17824 = dma.done.wait [#allocation9], 2720  }
  0x71   :  { %17825 = vsyncadd [#allocation9], 4294964576 }
  0x72   :  { %17826 = dma.done.wait [#allocation12], 102560  }
  0x73   :  { %17827 = vsyncadd [#allocation12], 4294864736 }
  0x74   :  { %17828 = dma.done.wait [#allocation15], 102560  }
  0x75   :  { %17829 = vsyncadd [#allocation15], 4294864736 }
  0x76   :  { %17830 = dma.done.wait [#allocation18], 16  }
  0x77   :  { %17831 = vsyncadd [#allocation18], 4294967280  ;;  %v17846_v0 = vmov 0   ;;  %v15080_v1 = vld [vmem:[#allocation8 + $0x54] ss:$40 sps:$4 sm:$0xff]   ;;  %v162_v5 = vld [vmem:[#allocation2] sm:$0xff] }
  0x78   :  { %374 = vmatprep.mubr.bf16.mxu0 %v17846_v0  ;;  %497 = vmatprep.mubr.bf16.mxu1 %v17846_v0  ;;  %v15082_v2 = vld [vmem:[#allocation8 + $0x50] ss:$40 sps:$4 sm:$0xff]   ;;  %v15083_v3 = vld [vmem:[#allocation8 + $0x4] ss:$40 sps:$4 sm:$0xff]   ;;  %v15085_v4 = vld [vmem:[#allocation8] ss:$40 sps:$4 sm:$0xff]   ;;  %v17938_v7 = vpack.c.bf16 %v162_v5, %v162_v5 }
  0x79   :  { %354 = vmatprep.subr.bf16.mxu0 %v15080_v1  ;;  %v15088_v6 = vld [vmem:[#allocation8 + $0x5c] ss:$40 sps:$4 sm:$0xff]   ;;  %vm338_vm0 = vcmask 261120   ;;  %v15086_v8 = vld [vmem:[#allocation8 + $0x58] ss:$40 sps:$4 sm:$0xff]   ;;  %vm13217_vm1 = vcmask 130048  }
  0x7a   :  { %355 = vmatpush1.bf16.msra.mxu0 %v15082_v2  ;;  %v15091_v9 = vld [vmem:[#allocation8 + $0xc] ss:$40 sps:$4 sm:$0xff]   ;;  %v15100_v11 = vld [vmem:[#allocation8 + $0x68] ss:$40 sps:$4 sm:$0xff]   ;;  %v15101_v12 = vld [vmem:[#allocation8 + $0x1c] ss:$40 sps:$4 sm:$0xff]  }
  0x7b   :  { %356 = vmatprep.subr.bf16.mxu0 %v15083_v3  ;;  %v15098_v10 = vld [vmem:[#allocation8 + $0x6c] ss:$40 sps:$4 sm:$0xff]   ;;  %v15089_v13 = vld [vmem:[#allocation8 + $0x8] ss:$40 sps:$4 sm:$0xff]   ;;  %v15103_v15 = vld [vmem:[#allocation8 + $0x18] ss:$40 sps:$4 sm:$0xff]  }
  0x7c   :  { %v15094_v14 = vld [vmem:[#allocation8 + $0x64] ss:$40 sps:$4 sm:$0xff]   ;;  %477 = vmatprep.subr.bf16.mxu1 %v15098_v10  ;;  %v15092_v17 = vld [vmem:[#allocation8 + $0x60] ss:$40 sps:$4 sm:$0xff]   ;;  %v15097_v18 = vld [vmem:[#allocation8 + $0x14] ss:$40 sps:$4 sm:$0xff]  }
  0x7d   :  { %478 = vmatpush1.bf16.msra.mxu1 %v15100_v11  ;;  %v15112_v16 = vld [vmem:[#allocation11 + $0x234] ss:$40 sps:$4 sm:$0xff]   ;;  %v15110_v19 = vld [vmem:[#allocation11 + $0x230] ss:$40 sps:$4 sm:$0xff]   ;;  %v15115_v20 = vld [vmem:[#allocation11 + $0x1e4] ss:$40 sps:$4 sm:$0xff]  }
  0x7e   :  { %357 = vmatpush1.bf16.msra.mxu0 %v15085_v4  ;;  %479 = vmatprep.subr.bf16.mxu1 %v15101_v12  ;;  %v15095_v21 = vld [vmem:[#allocation8 + $0x10] ss:$40 sps:$4 sm:$0xff]   ;;  %v15106_v22 = vld [vmem:[#allocation8 + $0x74] ss:$40 sps:$4 sm:$0xff]   ;;  %v15109_v26 = vld [vmem:[#allocation8 + $0x24] ss:$40 sps:$4 sm:$0xff]  }
  0x7f   :  { %395 = vmatprep.subr.bf16.mxu0 %v15088_v6  ;;  %v15113_v23 = vld [vmem:[#allocation11 + $0x1e0] ss:$40 sps:$4 sm:$0xff]   ;;  %v15118_v24 = vld [vmem:[#allocation11 + $0x194] ss:$40 sps:$4 sm:$0xff]   ;;  %v15116_v27 = vld [vmem:[#allocation11 + $0x190] ss:$40 sps:$4 sm:$0xff]  }
  0x80   :  { %v15104_v25 = vld [vmem:[#allocation8 + $0x70] ss:$40 sps:$4 sm:$0xff]   ;;  %v15107_v29 = vld [vmem:[#allocation8 + $0x20] ss:$40 sps:$4 sm:$0xff]  }
  0x81   :  { %13270 = vmatmul.mubr.msk.bf16.vlgmr.msra.gmra.mxu0 %vm338_vm0, %v17938_v7  ;;  %480 = vmatpush1.bf16.msra.mxu1 %v15103_v15  ;;  %v15124_v28 = vld [vmem:[#allocation11 + $0x144] ss:$40 sps:$4 sm:$0xff]   ;;  %v15121_v30 = vld [vmem:[#allocation11 + $0x734] ss:$40 sps:$4 sm:$0xff]   ;;  %v15122_v31 = vld [vmem:[#allocation11 + $0x140] ss:$40 sps:$4 sm:$0xff]  }
  0x82   :  { %396 = vmatpush1.bf16.msra.mxu0 %v15086_v8  ;;  %415 = vmatprep.mubr.bf16.mxu0 %v17846_v0  ;;  %v15130_v32 = vld [vmem:[#allocation11 + $0xf4] ss:$40 sps:$4 sm:$0xff]   ;;  %v15119_v33 = vld [vmem:[#allocation11 + $0x730] ss:$40 sps:$4 sm:$0xff]   ;;  %v15127_v34 = vld [vmem:[#allocation11 + $0x6e4] ss:$40 sps:$4 sm:$0xff]  }
  0x83   :  { %397 = vmatprep.subr.bf16.mxu0 %v15091_v9  ;;  %5421 = vmatprep.subr.bf16.mxu1 %v15112_v16  ;;  %v15128_v35 = vld [vmem:[#allocation11 + $0xf0] ss:$40 sps:$4 sm:$0xff]   ;;  %v15136_v36 = vld [vmem:[#allocation11 + $0xa4] ss:$40 sps:$4 sm:$0xff]   ;;  %v15125_v37 = vld [vmem:[#allocation11 + $0x6e0] ss:$40 sps:$4 sm:$0xff]  }
  0x84   :  { %13273 = vmatmul.mubr.msk.bf16.vlgmr.msra.gmra.mxu1 %vm338_vm0, %v17938_v7  ;;  %v15133_v38 = vld [vmem:[#allocation11 + $0x694] ss:$40 sps:$4 sm:$0xff]   ;;  %v15134_v39 = vld [vmem:[#allocation11 + $0xa0] ss:$40 sps:$4 sm:$0xff]   ;;  %v15131_v41 = vld [vmem:[#allocation11 + $0x690] ss:$40 sps:$4 sm:$0xff]  }
  0x85   :  { %5422 = vmatpush1.bf16.msra.mxu1 %v15110_v19  ;;  %v15142_v40 = vld [vmem:[#allocation11 + $0x54] ss:$40 sps:$4 sm:$0xff]   ;;  %v15139_v42 = vld [vmem:[#allocation11 + $0x644] ss:$40 sps:$4 sm:$0xff]   ;;  %v15140_v43 = vld [vmem:[#allocation11 + $0x50] ss:$40 sps:$4 sm:$0xff]  }
  0x86   :  { %398 = vmatpush1.bf16.msra.mxu0 %v15089_v13  ;;  %5423 = vmatprep.subr.bf16.mxu1 %v15115_v20  ;;  %v15148_v44 = vld [vmem:[#allocation11 + $0x4] ss:$40 sps:$4 sm:$0xff]   ;;  %v15137_v45 = vld [vmem:[#allocation11 + $0x640] ss:$40 sps:$4 sm:$0xff]   ;;  %v15145_v46 = vld [vmem:[#allocation11 + $0x5f4] ss:$40 sps:$4 sm:$0xff]  }
  0x87   :  { %436 = vmatprep.subr.bf16.mxu0 %v15094_v14  ;;  %v15146_v47 = vld [vmem:[#allocation11] ss:$40 sps:$4 sm:$0xff]   ;;  %v15143_v48 = vld [vmem:[#allocation11 + $0x5f0] ss:$40 sps:$4 sm:$0xff]   ;;  %v15154_v49 = vld [vmem:[#allocation11 + $0x4b4] ss:$40 sps:$4 sm:$0xff]  }
  0x88   :  { %v15151_v50 = vld [vmem:[#allocation11 + $0x5a4] ss:$40 sps:$4 sm:$0xff]   ;;  %v15152_v51 = vld [vmem:[#allocation11 + $0x4b0] ss:$40 sps:$4 sm:$0xff]   ;;  %v15149_v53 = vld [vmem:[#allocation11 + $0x5a0] ss:$40 sps:$4 sm:$0xff]  }
  0x89   :  { %13271 = vmatmul.mubr.msk.bf16.vlgmr.msra.gmra.mxu0 %vm338_vm0, %v17938_v7  ;;  %5424 = vmatpush1.bf16.msra.mxu1 %v15113_v23  ;;  %v15160_v52 = vld [vmem:[#allocation11 + $0x464] ss:$40 sps:$4 sm:$0xff]   ;;  %v15157_v54 = vld [vmem:[#allocation11 + $0x554] ss:$40 sps:$4 sm:$0xff]   ;;  %v15158_v55 = vld [vmem:[#allocation11 + $0x460] ss:$40 sps:$4 sm:$0xff]  }
  0x8a   :  { %437 = vmatpush1.bf16.msra.mxu0 %v15092_v17  ;;  %456 = vmatprep.mubr.bf16.mxu0 %v17846_v0  ;;  %v15166_v56 = vld [vmem:[#allocation11 + $0x414] ss:$40 sps:$4 sm:$0xff]   ;;  %v15155_v57 = vld [vmem:[#allocation11 + $0x550] ss:$40 sps:$4 sm:$0xff]   ;;  %v15163_v58 = vld [vmem:[#allocation11 + $0x504] ss:$40 sps:$4 sm:$0xff]  }
  0x8b   :  { %438 = vmatprep.subr.bf16.mxu0 %v15097_v18  ;;  %5425 = vmatprep.subr.bf16.mxu1 %v15118_v24  ;;  %v15164_v59 = vld [vmem:[#allocation11 + $0x410] ss:$40 sps:$4 sm:$0xff]   ;;  %v15172_v60 = vld [vmem:[#allocation11 + $0x3c4] ss:$40 sps:$4 sm:$0xff]   ;;  %v15161_v61 = vld [vmem:[#allocation11 + $0x500] ss:$40 sps:$4 sm:$0xff]  }
  0x8c   :  { %v15169_v62 = vld [vmem:[#allocation11 + $0x9b4] ss:$40 sps:$4 sm:$0xff]   ;;  %v15170_v63 = vld [vmem:[#allocation11 + $0x3c0] ss:$40 sps:$4 sm:$0xff]   ;;  %v15167_v1 = vld [vmem:[#allocation11 + $0x9b0] ss:$40 sps:$4 sm:$0xff]  }
  0x8d   :  { %5426 = vmatpush1.bf16.msra.mxu1 %v15116_v27  ;;  %v15175_v2 = vld [vmem:[#allocation11 + $0x964] ss:$40 sps:$4 sm:$0xff]   ;;  %v15176_v3 = vld [vmem:[#allocation11 + $0x370] ss:$40 sps:$4 sm:$0xff]   ;;  %v15173_v5 = vld [vmem:[#allocation11 + $0x960] ss:$40 sps:$4 sm:$0xff]  }
  0x8e   :  { %439 = vmatpush1.bf16.msra.mxu0 %v15095_v21  ;;  %5427 = vmatprep.subr.bf16.mxu1 %v15124_v28  ;;  %v15184_v4 = vld [vmem:[#allocation11 + $0x324] ss:$40 sps:$4 sm:$0xff]   ;;  %v15181_v6 = vld [vmem:[#allocation11 + $0x914] ss:$40 sps:$4 sm:$0xff]   ;;  %v15179_v8 = vld [vmem:[#allocation11 + $0x910] ss:$40 sps:$4 sm:$0xff]  }
  0x8f   :  { %518 = vmatprep.subr.bf16.mxu0 %v15106_v22  ;;  %v15187_v9 = vld [vmem:[#allocation11 + $0x8c4] ss:$40 sps:$4 sm:$0xff]   ;;  %v15185_v10 = vld [vmem:[#allocation11 + $0x8c0] ss:$40 sps:$4 sm:$0xff]   ;;  %v15190_v11 = vld [vmem:[#allocation11 + $0x2d4] ss:$40 sps:$4 sm:$0xff]  }
  0x90   :  { %v15188_v12 = vld [vmem:[#allocation11 + $0x2d0] ss:$40 sps:$4 sm:$0xff]   ;;  %v15193_v13 = vld [vmem:[#allocation11 + $0x874] ss:$40 sps:$4 sm:$0xff]   ;;  %v15196_v15 = vld [vmem:[#allocation11 + $0x284] ss:$40 sps:$4 sm:$0xff]  }
  0x91   :  { %13272 = vmatmul.mubr.msk.bf16.vlgmr.msra.gmra.mxu0 %vm338_vm0, %v17938_v7  ;;  %5428 = vmatpush1.bf16.msra.mxu1 %v15122_v31  ;;  %v15191_v14 = vld [vmem:[#allocation11 + $0x870] ss:$40 sps:$4 sm:$0xff]   ;;  %v15194_v16 = vld [vmem:[#allocation11 + $0x280] ss:$40 sps:$4 sm:$0xff]   ;;  %v15199_v17 = vld [vmem:[#allocation11 + $0x824] ss:$40 sps:$4 sm:$0xff]  }
  0x92   :  { %519 = vmatpush1.bf16.msra.mxu0 %v15104_v25  ;;  %538 = vmatprep.mubr.bf16.mxu0 %v17846_v0  ;;  %v15178_v0 = vld [vmem:[#allocation11 + $0x374] ss:$40 sps:$4 sm:$0xff]   ;;  %v15197_v19 = vld [vmem:[#allocation11 + $0x820] ss:$40 sps:$4 sm:$0xff]   ;;  %v15200_v21 = vld [vmem:[#allocation11 + $0x7d0] ss:$40 sps:$4 sm:$0xff]   ;;  %v188_v25 = vlaneseq }
  0x93   :  { %520 = vmatprep.subr.bf16.mxu0 %v15109_v26  ;;  %5429 = vmatprep.subr.bf16.mxu1 %v15130_v32  ;;  %v15205_v18 = vld [vmem:[#allocation11 + $0xc34] ss:$40 sps:$4 sm:$0xff]   ;;  %v15208_v22 = vld [vmem:[#allocation11 + $0x784] ss:$40 sps:$4 sm:$0xff]   ;;  %v15206_v23 = vld [vmem:[#allocation11 + $0x780] ss:$40 sps:$4 sm:$0xff]  }
  0x94   :  { %v15202_v20 = vld [vmem:[#allocation11 + $0x7d4] ss:$40 sps:$4 sm:$0xff]   ;;  %v17950_v26 = vshrl.u32 %v188_v25, 7  ;;  %v15235_v25 = vld [vmem:[#allocation11 + $0x1044] ss:$40 sps:$4 sm:$0xff]  }
  0x95   :  { %5430 = vmatpush1.bf16.msra.mxu1 %v15128_v35  ;;  %v15217_v24 = vld [vmem:[#allocation11 + $0x1134] ss:$40 sps:$4 sm:$0xff]  }
  0x96   :  { %521 = vmatpush1.bf16.msra.mxu0 %v15107_v29  ;;  %5431 = vmatprep.subr.bf16.mxu1 %v15136_v36  ;;  %v17952_v27 = vld [vmem:[#allocation10] sm:$0xff]  ;;  %v17955_v28 = vsub.s32 0, %v17950_v26  ;;  %v17958_v29 = vsub.s32 1, %v17950_v26 }
  0x97   :  { %5462 = vmatprep.subr.bf16.mxu0 %v15121_v30 }
  0x98   :  { %v191_v30 = vrot.slane %v17952_v27, %v17955_v28  ;;  %v195_v31 = vrot.slane %v17952_v27, %v17958_v29 }
  0x99   :  { %13274 = vmatmul.mubr.msk.bf16.vlgmr.msra.gmra.mxu0 %vm338_vm0, %v17938_v7  ;;  %5432 = vmatpush1.bf16.msra.mxu1 %v15134_v39  ;;  %v15182_v7 = vld [vmem:[#allocation11 + $0x320] ss:$40 sps:$4 sm:$0xff]  }
  0x9a   :  { %5463 = vmatpush1.bf16.msra.mxu0 %v15119_v33  ;;  %5433 = vmatprep.subr.bf16.mxu1 %v15142_v40 }
  0x9b   :  { %5464 = vmatprep.subr.bf16.mxu0 %v15127_v34  ;;  %v17965_v34 = vsub.s32 2, %v17950_v26 }
  0x9d   :  { %5434 = vmatpush1.bf16.msra.mxu1 %v15140_v43  ;;  %v17973_v43 = vsub.s32 7, %v17950_v26 }
  0x9e   :  { %5465 = vmatpush1.bf16.msra.mxu0 %v15125_v37  ;;  %5435 = vmatprep.subr.bf16.mxu1 %v15148_v44  ;;  %v17968_v37 = vsub.s32 3, %v17950_v26 }
  0x9f   :  { %5466 = vmatprep.subr.bf16.mxu0 %v15133_v38 }
  0xa1   :  { %5436 = vmatpush1.bf16.msra.mxu1 %v15146_v47  ;;  %v203_v47 = vrot.slane %v17952_v27, %v17968_v37 }
  0xa2   :  { %5467 = vmatpush1.bf16.msra.mxu0 %v15131_v41  ;;  %5437 = vmatprep.subr.bf16.mxu1 %v15154_v49  ;;  %v199_v41 = vrot.slane %v17952_v27, %v17965_v34 }
  0xa3   :  { %5468 = vmatprep.subr.bf16.mxu0 %v15139_v42  ;;  %v15203_v42 = vld [vmem:[#allocation11 + $0xc30] ss:$40 sps:$4 sm:$0xff]  }
  0xa5   :  { %5438 = vmatpush2.bf16.msra.mxu1 %v15152_v51  ;;  %v219_v51 = vrot.slane %v17952_v27, %v17973_v43 }
  0xa6   :  { %5469 = vmatpush1.bf16.msra.mxu0 %v15137_v45  ;;  %5439 = vmatprep.subr.bf16.mxu1 %v15160_v52  ;;  %v15211_v45 = vld [vmem:[#allocation11 + $0xbe4] ss:$40 sps:$4 sm:$0xff]  }
  0xa7   :  { %5470 = vmatprep.subr.bf16.mxu0 %v15145_v46 }
  0xa9   :  { %5440 = vmatpush2.bf16.msra.mxu1 %v15158_v55 }
  0xaa   :  { %5471 = vmatpush1.bf16.msra.mxu0 %v15143_v48  ;;  %5441 = vmatprep.subr.bf16.mxu1 %v15166_v56 }
  0xab   :  { %5472 = vmatprep.subr.bf16.mxu0 %v15151_v50 }
  0xad   :  { %5442 = vmatpush2.bf16.msra.mxu1 %v15164_v59 }
  0xae   :  { %5473 = vmatpush1.bf16.msra.mxu0 %v15149_v53  ;;  %5443 = vmatprep.subr.bf16.mxu1 %v15172_v60  ;;  %v15209_v53 = vld [vmem:[#allocation11 + $0xbe0] ss:$40 sps:$4 sm:$0xff]  }
  0xaf   :  { %5474 = vmatprep.subr.bf16.mxu0 %v15157_v54 }
  0xb1   :  { %5444 = vmatpush2.bf16.msra.mxu1 %v15170_v63  ;;  %v15215_v63 = vld [vmem:[#allocation11 + $0x1130] ss:$40 sps:$4 sm:$0xff]  }
  0xb2   :  { %5475 = vmatpush1.bf16.msra.mxu0 %v15155_v57  ;;  %5445 = vmatprep.subr.bf16.mxu1 %v15178_v0  ;;  %v17988_v57 = vsub.s32 5, %v17950_v26 }
  0xb3   :  { %5476 = vmatprep.subr.bf16.mxu0 %v15163_v58  ;;  %v15214_v58 = vld [vmem:[#allocation11 + $0xb94] ss:$40 sps:$4 sm:$0xff]  }
  0xb5   :  { %5446 = vmatpush2.bf16.msra.mxu1 %v15176_v3  ;;  %v15223_v3 = vld [vmem:[#allocation11 + $0x10e4] ss:$40 sps:$4 sm:$0xff]  }
  0xb6   :  { %5477 = vmatpush1.bf16.msra.mxu0 %v15161_v61  ;;  %5447 = vmatprep.subr.bf16.mxu1 %v15184_v4 }
  0xb7   :  { %5478 = vmatprep.subr.bf16.mxu0 %v15169_v62  ;;  %v15212_v62 = vld [vmem:[#allocation11 + $0xb90] ss:$40 sps:$4 sm:$0xff]  }
  0xb9   :  { %5448 = vmatpush2.bf16.msra.mxu1 %v15182_v7  ;;  %v211_v7 = vrot.slane %v17952_v27, %v17988_v57 }
  0xba   :  { %5479 = vmatpush2.bf16.msra.mxu0 %v15167_v1  ;;  %5449 = vmatprep.subr.bf16.mxu1 %v15190_v11 }
  0xbb   :  { %5480 = vmatprep.subr.bf16.mxu0 %v15175_v2  ;;  %v15220_v2 = vld [vmem:[#allocation11 + $0xb44] ss:$40 sps:$4 sm:$0xff]  }
  0xbd   :  { %5450 = vmatpush2.bf16.msra.mxu1 %v15188_v12  ;;  %v15218_v12 = vld [vmem:[#allocation11 + $0xb40] ss:$40 sps:$4 sm:$0xff]  }
  0xbe   :  { %5481 = vmatpush2.bf16.msra.mxu0 %v15173_v5  ;;  %5451 = vmatprep.subr.bf16.mxu1 %v15196_v15 }
  0xbf   :  { %5482 = vmatprep.subr.bf16.mxu0 %v15181_v6 }
  0xc1   :  { %5452 = vmatpush2.bf16.msra.mxu1 %v15194_v16  ;;  %v15226_v16 = vld [vmem:[#allocation11 + $0xaf4] ss:$40 sps:$4 sm:$0xff]  }
  0xc2   :  { %5483 = vmatpush2.bf16.msra.mxu0 %v15179_v8  ;;  %5503 = vmatprep.subr.bf16.mxu1 %v15205_v18 }
  0xc3   :  { %5484 = vmatprep.subr.bf16.mxu0 %v15187_v9 }
  0xc6   :  { %5485 = vmatpush2.bf16.msra.mxu0 %v15185_v10 }
  0xc7   :  { %5486 = vmatprep.subr.bf16.mxu0 %v15193_v13  ;;  %v15221_v13 = vld [vmem:[#allocation11 + $0x10e0] ss:$40 sps:$4 sm:$0xff]  }
  0xca   :  { %5487 = vmatpush2.bf16.msra.mxu0 %v15191_v14 }
  0xcb   :  { %5488 = vmatprep.subr.bf16.mxu0 %v15199_v17  ;;  %v15229_v17 = vld [vmem:[#allocation11 + $0x1094] ss:$40 sps:$4 sm:$0xff]  }
  0xce   :  { %5489 = vmatpush2.bf16.msra.mxu0 %v15197_v19 }
  0xcf   :  { %5490 = vmatprep.subr.bf16.mxu0 %v15202_v20 }
  0xd2   :  { %5491 = vmatpush2.bf16.msra.mxu0 %v15200_v21  ;;  %v15224_v21 = vld [vmem:[#allocation11 + $0xaf0] ss:$40 sps:$4 sm:$0xff]  }
  0xd3   :  { %5492 = vmatprep.subr.bf16.mxu0 %v15208_v22  ;;  %v15227_v22 = vld [vmem:[#allocation11 + $0x1090] ss:$40 sps:$4 sm:$0xff]  }
  0xd6   :  { %5493 = vmatpush2.bf16.msra.mxu0 %v15206_v23 }
  0xd7   :  { %5544 = vmatprep.subr.bf16.mxu0 %v15217_v24  ;;  %v15232_v24 = vld [vmem:[#allocation11 + $0xaa4] ss:$40 sps:$4 sm:$0xff]  }
 0x141   :  { %v376_v32 = vpop.f32.mrf.mxu0 }
 0x142   :  { %v377_v33 = vadd.f32 %v376_v32, %v191_v30  ;;  %v15230_v32 = vld [vmem:[#allocation11 + $0xaa0] ss:$40 sps:$4 sm:$0xff]  }
 0x143   :  { %v378_v35 = vpop.f32.mrf.mxu0 }
 0x144   :  { %v379_v36 = vadd.f32 %v378_v35, %v195_v31  ;;  %v547_v38 = vmax.f32 %v377_v33, 0.0  ;;  %v17985_v54 = vpop.f32.mrf.mxu1  ;;  %v15233_v33 = vld [vmem:[#allocation11 + $0x1040] ss:$40 sps:$4 sm:$0xff]   ;;  %v15238_v35 = vld [vmem:[#allocation11 + $0xa54] ss:$40 sps:$4 sm:$0xff]  }
 0x145   :  { %v380_v39 = vpop.f32.mrf.mxu0 }
 0x146   :  { %v548_v40 = vmax.f32 %v379_v36, 0.0  ;;  %v17979_v48 = vpack.c.bf16 %v547_v38, %v547_v38  ;;  %v501_v60 = vpop.f32.mrf.mxu1  ;;  %v15241_v36 = vld [vmem:[#allocation11 + $0xff4] ss:$40 sps:$4 sm:$0xff]  }
 0x147   :  { %v381_v44 = vpop.f32.mrf.mxu0  ;;  %v502_v0 = vadd.f32 %v501_v60, %v219_v51  ;;  %v15248_v51 = vld [vmem:[#allocation11 + $0xeb0] ss:$40 sps:$4 sm:$0xff]   ;;  %v15265_v60 = vld [vmem:[#allocation11 + $0x13b4] ss:$40 sps:$4 sm:$0xff]  }
 0x148   :  { %v17975_v46 = vpack.c.bf16 %v548_v40, %v548_v40  ;;  %v503_v5 = vpop.f32.mrf.mxu1  ;;  %v15236_v40 = vld [vmem:[#allocation11 + $0xa50] ss:$40 sps:$4 sm:$0xff]   ;;  %v15247_v44 = vld [vmem:[#allocation11 + $0xfa4] ss:$40 sps:$4 sm:$0xff]  }
 0x149   :  { %v417_v49 = vpop.f32.mrf.mxu0  ;;  %v554_v8 = vmax.f32 %v502_v0, 0.0  ;;  %v15271_v0 = vld [vmem:[#allocation11 + $0x1364] ss:$40 sps:$4 sm:$0xff]   ;;  %v15277_v5 = vld [vmem:[#allocation11 + $0x1314] ss:$40 sps:$4 sm:$0xff]  }
 0x14a   :  { %v418_v50 = vadd.f32 %v417_v49, %v199_v41  ;;  %5453 = vmatprep.mubr.bf16.mxu1 %v17975_v46  ;;  %v504_v10 = vpop.f32.mrf.mxu1  ;;  %v15239_v41 = vld [vmem:[#allocation11 + $0xff0] ss:$40 sps:$4 sm:$0xff]   ;;  %v15250_v49 = vld [vmem:[#allocation11 + $0xeb4] ss:$40 sps:$4 sm:$0xff]  }
 0x14b   :  { %v419_v52 = vpop.f32.mrf.mxu0  ;;  %5454 = vmatmul.mubr.bf16.vlgmr.msra.gmra.mxu1 %v17979_v48  ;;  %v17999_v11 = vpack.c.bf16 %v554_v8, %v554_v8  ;;  %v15275_v8 = vld [vmem:[#allocation11 + $0x1310] ss:$40 sps:$4 sm:$0xff]   ;;  %v15280_v10 = vld [vmem:[#allocation11 + $0xd24] ss:$40 sps:$4 sm:$0xff]  }
 0x14c   :  { %v549_v55 = vmax.f32 %v418_v50, 0.0  ;;  %v420_v56 = vadd.f32 %v419_v52, %v203_v47  ;;  %5504 = vmatpush1.bf16.msra.mxu1 %v15203_v42  ;;  %v15244_v42 = vld [vmem:[#allocation11 + $0xa04] ss:$40 sps:$4 sm:$0xff]   ;;  %v15245_v47 = vld [vmem:[#allocation11 + $0xfa0] ss:$40 sps:$4 sm:$0xff]  }
 0x14d   :  { %5505 = vmatprep.subr.bf16.mxu1 %v15211_v45  ;;  %v421_v59 = vpop.f32.mrf.mxu0  ;;  %v15242_v45 = vld [vmem:[#allocation11 + $0xa00] ss:$40 sps:$4 sm:$0xff]   ;;  %v15253_v50 = vld [vmem:[#allocation11 + $0xf54] ss:$40 sps:$4 sm:$0xff]   ;;  %v15251_v52 = vld [vmem:[#allocation11 + $0xf50] ss:$40 sps:$4 sm:$0xff]  }
 0x14e   :  { %v550_v61 = vmax.f32 %v420_v56, 0.0  ;;  %v17990_v1 = vpack.c.bf16 %v549_v55, %v549_v55  ;;  %v15259_v55 = vld [vmem:[#allocation11 + $0xf04] ss:$40 sps:$4 sm:$0xff]   ;;  %v15254_v56 = vld [vmem:[#allocation11 + $0xe60] ss:$40 sps:$4 sm:$0xff]  }
 0x14f   :  { %v422_v4 = vpop.f32.mrf.mxu0  ;;  %v15262_v59 = vld [vmem:[#allocation11 + $0xe14] ss:$40 sps:$4 sm:$0xff]  }
 0x150   :  { %v17992_v6 = vpack.c.bf16 %v550_v61, %v550_v61  ;;  %5506 = vmatpush1.bf16.msra.mxu1 %v15209_v53  ;;  %v15256_v53 = vld [vmem:[#allocation11 + $0xe64] ss:$40 sps:$4 sm:$0xff]   ;;  %v15260_v61 = vld [vmem:[#allocation11 + $0xe10] ss:$40 sps:$4 sm:$0xff]   ;;  %v15274_v4 = vld [vmem:[#allocation11 + $0xd74] ss:$40 sps:$4 sm:$0xff]  }
 0x151   :  { %5507 = vmatprep.subr.bf16.mxu1 %v15214_v58  ;;  %v17996_v9 = vpop.f32.mrf.mxu0  ;;  %v15257_v58 = vld [vmem:[#allocation11 + $0xf00] ss:$40 sps:$4 sm:$0xff]  }
 0x152   :  { %5494 = vmatprep.mubr.bf16.mxu0 %v17992_v6 }
 0x153   :  { %5495 = vmatmul.mubr.bf16.vlgmr.msra.gmra.mxu0 %v17990_v1  ;;  %v460_v14 = vpop.f32.mrf.mxu0 }
 0x154   :  { %5508 = vmatpush1.bf16.msra.mxu1 %v15212_v62  ;;  %5545 = vmatpush1.bf16.msra.mxu0 %v15215_v63  ;;  %v461_v15 = vadd.f32 %v460_v14, %v211_v7  ;;  %v15263_v62 = vld [vmem:[#allocation11 + $0x13b0] ss:$40 sps:$4 sm:$0xff]   ;;  %v15268_v63 = vld [vmem:[#allocation11 + $0xdc4] ss:$40 sps:$4 sm:$0xff]   ;;  %v18013_v14 = vld [vmem:[#allocation10 + $0x8] sm:$0x3] }
 0x155   :  { %5509 = vmatprep.subr.bf16.mxu1 %v15220_v2  ;;  %5546 = vmatprep.subr.bf16.mxu0 %v15223_v3  ;;  %v462_v18 = vpop.f32.mrf.mxu0  ;;  %v15266_v2 = vld [vmem:[#allocation11 + $0xdc0] ss:$40 sps:$4 sm:$0xff]   ;;  %v15272_v7 = vld [vmem:[#allocation11 + $0xd70] ss:$40 sps:$4 sm:$0xff]  }
 0x156   :  { %v552_v19 = vmax.f32 %v461_v15, 0.0  ;;  %5576 = vmatprep.mubr.bf16.mxu0 %v17999_v11  ;;  %v15269_v3 = vld [vmem:[#allocation11 + $0x1360] ss:$40 sps:$4 sm:$0xff]   ;;  %v15286_v18 = vld [vmem:[#allocation11 + $0xcd4] ss:$40 sps:$4 sm:$0xff]  }
 0x157   :  { %v463_v20 = vpop.f32.mrf.mxu0  ;;  %v15278_v15 = vld [vmem:[#allocation11 + $0xd20] ss:$40 sps:$4 sm:$0xff]  }
 0x158   :  { %5510 = vmatpush1.bf16.msra.mxu1 %v15218_v12  ;;  %5547 = vmatpush1.bf16.msra.mxu0 %v15221_v13  ;;  %v18003_v23 = vpack.c.bf16 %v552_v19, %v552_v19  ;;  %v18011_v12 = vsub.s32 4, %v17950_v26  ;;  %v15283_v13 = vld [vmem:[#allocation11 + $0x12c4] ss:$40 sps:$4 sm:$0xff]   ;;  %v15289_v19 = vld [vmem:[#allocation11 + $0x1274] ss:$40 sps:$4 sm:$0xff]   ;;  %v227_v20 = vrot.slane %v18013_v14, %v17958_v29 }
 0x159   :  { %5511 = vmatprep.subr.bf16.mxu1 %v15226_v16  ;;  %5548 = vmatprep.subr.bf16.mxu0 %v15229_v17  ;;  %v18005_v30 = vpop.f32.mrf.mxu0  ;;  %v15281_v16 = vld [vmem:[#allocation11 + $0x12c0] ss:$40 sps:$4 sm:$0xff]  }
 0x15a   :  { %5535 = vmatprep.mubr.bf16.mxu1 %v18003_v23  ;;  %v207_v17 = vrot.slane %v17952_v27, %v18011_v12 }
 0x15b   :  { %v18008_v31 = vpop.f32.mrf.mxu0 }
 0x15c   :  { %5512 = vmatpush1.bf16.msra.mxu1 %v15224_v21  ;;  %5549 = vmatpush1.bf16.msra.mxu0 %v15227_v22  ;;  %v18020_v21 = vsub.s32 6, %v17950_v26  ;;  %v15284_v22 = vld [vmem:[#allocation11 + $0xcd0] ss:$40 sps:$4 sm:$0xff]   ;;  %v15293_v26 = vld [vmem:[#allocation11 + $0x1220] ss:$40 sps:$4 sm:$0xff]  }
 0x15d   :  { %5513 = vmatprep.subr.bf16.mxu1 %v15232_v24  ;;  %5550 = vmatprep.subr.bf16.mxu0 %v15235_v25  ;;  %v544_v38 = vpop.f32.mrf.mxu0  ;;  %v15287_v24 = vld [vmem:[#allocation11 + $0x1270] ss:$40 sps:$4 sm:$0xff]   ;;  %v459_v25 = vadd.f32 %v17996_v9, %v207_v17  ;;  %v15340_v17 = vld [vmem:[#allocation11 + $0x1404] ss:$40 sps:$4 sm:$0xff]  }
 0x15e   :  { %v15290_v38 = vld [vmem:[#allocation11 + $0xc80] ss:$40 sps:$4 sm:$0xff]   ;;  %v15299_v9 = vld [vmem:[#allocation11 + $0x1630] ss:$40 sps:$4 sm:$0xff]  }
 0x15f   :  { %v545_v39 = vpop.f32.mrf.mxu0 }
 0x160   :  { %5514 = vmatpush1.bf16.msra.mxu1 %v15230_v32  ;;  %5551 = vmatpush1.bf16.msra.mxu0 %v15233_v33  ;;  %v15292_v32 = vld [vmem:[#allocation11 + $0xc84] ss:$40 sps:$4 sm:$0xff]   ;;  %v551_v39 = vmax.f32 %v459_v25, 0.0  ;;  %v15344_v25 = vld [vmem:[#allocation11 + $0x18b0] ss:$40 sps:$4 sm:$0xff]  }
 0x161   :  { %5515 = vmatprep.subr.bf16.mxu1 %v15238_v35  ;;  %5552 = vmatprep.subr.bf16.mxu0 %v15241_v36  ;;  %v15295_v33 = vld [vmem:[#allocation11 + $0x1224] ss:$40 sps:$4 sm:$0xff]   ;;  %v543_v35 = vadd.f32 %v18008_v31, %v227_v20  ;;  %v215_v36 = vrot.slane %v17952_v27, %v18020_v21  ;;  %v15302_v27 = vld [vmem:[#allocation11 + $0x1180] ss:$40 sps:$4 sm:$0xff]  }
 0x162   :  { %v18027_v31 = vpack.c.bf16 %v551_v39, %v551_v39  ;;  %v15341_v20 = vld [vmem:[#allocation11 + $0xa8] ss:$40 sps:$4 sm:$0xff]   ;;  %v15361_v39 = vld [vmem:[#allocation11 + $0x4bc] ss:$40 sps:$4 sm:$0xff]  }
 0x164   :  { %5516 = vmatpush1.bf16.msra.mxu1 %v15236_v40  ;;  %5553 = vmatpush1.bf16.msra.mxu0 %v15239_v41  ;;  %v15298_v40 = vld [vmem:[#allocation11 + $0x11d4] ss:$40 sps:$4 sm:$0xff]  }
 0x165   :  { %5517 = vmatprep.subr.bf16.mxu1 %v15244_v42  ;;  %5554 = vmatprep.subr.bf16.mxu0 %v15247_v44  ;;  %v15301_v41 = vld [vmem:[#allocation11 + $0x1634] ss:$40 sps:$4 sm:$0xff]   ;;  %v15296_v42 = vld [vmem:[#allocation11 + $0x11d0] ss:$40 sps:$4 sm:$0xff]   ;;  %v556_v44 = vmax.f32 %v543_v35, 0.0 }
 0x166   :  { %v15355_v35 = vld [vmem:[#allocation11 + $0xc] ss:$40 sps:$4 sm:$0xff]  }
 0x168   :  { %5518 = vmatpush1.bf16.msra.mxu1 %v15242_v45  ;;  %5555 = vmatpush1.bf16.msra.mxu0 %v15245_v47  ;;  %v500_v45 = vadd.f32 %v17985_v54, %v215_v36  ;;  %v15304_v47 = vld [vmem:[#allocation11 + $0x1184] ss:$40 sps:$4 sm:$0xff]   ;;  %v15308_v54 = vld [vmem:[#allocation11 + $0x1590] ss:$40 sps:$4 sm:$0xff]   ;;  %v15350_v36 = vld [vmem:[#allocation11 + $0x1860] ss:$40 sps:$4 sm:$0xff]  }
 0x169   :  { %5519 = vmatprep.subr.bf16.mxu1 %v15250_v49  ;;  %5556 = vmatprep.subr.bf16.mxu0 %v15253_v50  ;;  %v15307_v49 = vld [vmem:[#allocation11 + $0x15e4] ss:$40 sps:$4 sm:$0xff]   ;;  %v15305_v50 = vld [vmem:[#allocation11 + $0x15e0] ss:$40 sps:$4 sm:$0xff]  }
 0x16c   :  { %5520 = vmatpush2.bf16.msra.mxu1 %v15248_v51  ;;  %5557 = vmatpush1.bf16.msra.mxu0 %v15251_v52  ;;  %v18029_v51 = vpack.c.bf16 %v556_v44, %v556_v44  ;;  %v553_v52 = vmax.f32 %v500_v45, 0.0  ;;  %v15362_v44 = vld [vmem:[#allocation11 + $0x17c0] ss:$40 sps:$4 sm:$0xff]  }
 0x16d   :  { %5521 = vmatprep.subr.bf16.mxu1 %v15256_v53  ;;  %5558 = vmatprep.subr.bf16.mxu0 %v15259_v55  ;;  %v15310_v53 = vld [vmem:[#allocation11 + $0x1594] ss:$40 sps:$4 sm:$0xff]   ;;  %v15365_v45 = vld [vmem:[#allocation11 + $0x468] ss:$40 sps:$4 sm:$0xff]  }
 0x16e   :  { %v15313_v55 = vld [vmem:[#allocation11 + $0x23c] ss:$40 sps:$4 sm:$0xff]  }
 0x170   :  { %5522 = vmatpush2.bf16.msra.mxu1 %v15254_v56  ;;  %5559 = vmatpush1.bf16.msra.mxu0 %v15257_v58  ;;  %v15311_v56 = vld [vmem:[#allocation11 + $0x238] ss:$40 sps:$4 sm:$0xff]   ;;  %v18033_v58 = vpack.c.bf16 %v553_v52, %v553_v52  ;;  %v15376_v52 = vld [vmem:[#allocation11 + $0x1724] ss:$40 sps:$4 sm:$0xff]  }
 0x171   :  { %5523 = vmatprep.subr.bf16.mxu1 %v15262_v59  ;;  %5560 = vmatprep.subr.bf16.mxu0 %v15265_v60  ;;  %v15316_v59 = vld [vmem:[#allocation11 + $0x1544] ss:$40 sps:$4 sm:$0xff]   ;;  %v15314_v60 = vld [vmem:[#allocation11 + $0x1540] ss:$40 sps:$4 sm:$0xff]  }
 0x174   :  { %5524 = vmatpush2.bf16.msra.mxu1 %v15260_v61  ;;  %5561 = vmatpush2.bf16.msra.mxu0 %v15263_v62  ;;  %v15317_v61 = vld [vmem:[#allocation11 + $0x1e8] ss:$40 sps:$4 sm:$0xff]   ;;  %v15319_v62 = vld [vmem:[#allocation11 + $0x1ec] ss:$40 sps:$4 sm:$0xff]  }
 0x175   :  { %5525 = vmatprep.subr.bf16.mxu1 %v15268_v63  ;;  %5562 = vmatprep.subr.bf16.mxu0 %v15271_v0  ;;  %v15322_v63 = vld [vmem:[#allocation11 + $0x14f4] ss:$40 sps:$4 sm:$0xff]  }
 0x176   :  { %v15325_v0 = vld [vmem:[#allocation11 + $0x19c] ss:$40 sps:$4 sm:$0xff]  }
 0x178   :  { %5526 = vmatpush2.bf16.msra.mxu1 %v15266_v2  ;;  %5563 = vmatpush2.bf16.msra.mxu0 %v15269_v3  ;;  %v15320_v2 = vld [vmem:[#allocation11 + $0x14f0] ss:$40 sps:$4 sm:$0xff]  }
 0x179   :  { %5527 = vmatprep.subr.bf16.mxu1 %v15274_v4  ;;  %5564 = vmatprep.subr.bf16.mxu0 %v15277_v5  ;;  %v15323_v3 = vld [vmem:[#allocation11 + $0x198] ss:$40 sps:$4 sm:$0xff]   ;;  %v15328_v4 = vld [vmem:[#allocation11 + $0x14a4] ss:$40 sps:$4 sm:$0xff]  }
 0x17a   :  { %v15331_v5 = vld [vmem:[#allocation11 + $0x14c] ss:$40 sps:$4 sm:$0xff]  }
 0x17c   :  { %5528 = vmatpush2.bf16.msra.mxu1 %v15272_v7  ;;  %5565 = vmatpush2.bf16.msra.mxu0 %v15275_v8  ;;  %v15326_v7 = vld [vmem:[#allocation11 + $0x14a0] ss:$40 sps:$4 sm:$0xff]  }
 0x17d   :  { %5529 = vmatprep.subr.bf16.mxu1 %v15280_v10  ;;  %5566 = vmatprep.subr.bf16.mxu0 %v15283_v13  ;;  %v15329_v8 = vld [vmem:[#allocation11 + $0x148] ss:$40 sps:$4 sm:$0xff]   ;;  %v15334_v10 = vld [vmem:[#allocation11 + $0x1454] ss:$40 sps:$4 sm:$0xff]  }
 0x17e   :  { %v15337_v13 = vld [vmem:[#allocation11 + $0xfc] ss:$40 sps:$4 sm:$0xff]  }
 0x180   :  { %5530 = vmatpush2.bf16.msra.mxu1 %v15278_v15  ;;  %5567 = vmatpush2.bf16.msra.mxu0 %v15281_v16  ;;  %v15332_v15 = vld [vmem:[#allocation11 + $0x1450] ss:$40 sps:$4 sm:$0xff]  }
 0x181   :  { %5531 = vmatprep.subr.bf16.mxu1 %v15286_v18  ;;  %5568 = vmatprep.subr.bf16.mxu0 %v15289_v19  ;;  %v15335_v16 = vld [vmem:[#allocation11 + $0xf8] ss:$40 sps:$4 sm:$0xff]   ;;  %v15343_v18 = vld [vmem:[#allocation11 + $0xac] ss:$40 sps:$4 sm:$0xff]  }
 0x182   :  { %v15338_v19 = vld [vmem:[#allocation11 + $0x1400] ss:$40 sps:$4 sm:$0xff]  }
 0x184   :  { %5532 = vmatpush2.bf16.msra.mxu1 %v15284_v22  ;;  %5569 = vmatpush2.bf16.msra.mxu0 %v15287_v24  ;;  %v15346_v22 = vld [vmem:[#allocation11 + $0x18b4] ss:$40 sps:$4 sm:$0xff]  }
 0x185   :  { %5533 = vmatprep.subr.bf16.mxu1 %v15292_v32  ;;  %5570 = vmatprep.subr.bf16.mxu0 %v15295_v33  ;;  %v15349_v24 = vld [vmem:[#allocation11 + $0x5c] ss:$40 sps:$4 sm:$0xff]   ;;  %v15347_v32 = vld [vmem:[#allocation11 + $0x58] ss:$40 sps:$4 sm:$0xff]  }
 0x186   :  { %v15352_v33 = vld [vmem:[#allocation11 + $0x1864] ss:$40 sps:$4 sm:$0xff]  }
 0x188   :  { %5534 = vmatpush2.bf16.msra.mxu1 %v15290_v38  ;;  %5571 = vmatpush2.bf16.msra.mxu0 %v15293_v26  ;;  %v15353_v38 = vld [vmem:[#allocation11 + $0x8] ss:$40 sps:$4 sm:$0xff]   ;;  %v15358_v26 = vld [vmem:[#allocation11 + $0x1814] ss:$40 sps:$4 sm:$0xff]  }
 0x189   :  { %5572 = vmatprep.subr.bf16.mxu0 %v15298_v40  ;;  %5585 = vmatprep.subr.bf16.mxu1 %v15301_v41  ;;  %v15356_v40 = vld [vmem:[#allocation11 + $0x1810] ss:$40 sps:$4 sm:$0xff]  }
 0x18a   :  { %v15359_v41 = vld [vmem:[#allocation11 + $0x4b8] ss:$40 sps:$4 sm:$0xff]  }
 0x18b   :  { %5536 = vmatmul.mubr.bf16.vlgmr.msra.gmra.mxu1 %v18027_v31 }
 0x18c   :  { %5573 = vmatpush2.bf16.msra.mxu0 %v15296_v42  ;;  %5586 = vmatpush1.bf16.msra.mxu1 %v15299_v9  ;;  %v15364_v42 = vld [vmem:[#allocation11 + $0x17c4] ss:$40 sps:$4 sm:$0xff]  }
 0x18d   :  { %5574 = vmatprep.subr.bf16.mxu0 %v15304_v47  ;;  %5587 = vmatprep.subr.bf16.mxu1 %v15307_v49  ;;  %v15367_v9 = vld [vmem:[#allocation11 + $0x46c] ss:$40 sps:$4 sm:$0xff]   ;;  %v15373_v49 = vld [vmem:[#allocation11 + $0x41c] ss:$40 sps:$4 sm:$0xff]  }
 0x18e   :  { %5617 = vmatprep.mubr.bf16.mxu1 %v18029_v51  ;;  %v15370_v47 = vld [vmem:[#allocation11 + $0x1774] ss:$40 sps:$4 sm:$0xff]  }
 0x190   :  { %5575 = vmatpush2.bf16.msra.mxu0 %v15302_v27  ;;  %5588 = vmatpush1.bf16.msra.mxu1 %v15305_v50  ;;  %v15368_v27 = vld [vmem:[#allocation11 + $0x1770] ss:$40 sps:$4 sm:$0xff]  }
 0x191   :  { %5589 = vmatprep.subr.bf16.mxu1 %v15310_v53  ;;  %5626 = vmatprep.subr.bf16.mxu0 %v15313_v55  ;;  %v15371_v50 = vld [vmem:[#allocation11 + $0x418] ss:$40 sps:$4 sm:$0xff]   ;;  %v15379_v53 = vld [vmem:[#allocation11 + $0x3cc] ss:$40 sps:$4 sm:$0xff]  }
 0x192   :  { %v15374_v55 = vld [vmem:[#allocation11 + $0x1720] ss:$40 sps:$4 sm:$0xff]  }
 0x193   :  { %5577 = vmatmul.mubr.bf16.vlgmr.msra.gmra.mxu0 %v18033_v58 }
 0x194   :  { %5590 = vmatpush1.bf16.msra.mxu1 %v15308_v54  ;;  %5627 = vmatpush1.bf16.msra.mxu0 %v15311_v56  ;;  %v15377_v54 = vld [vmem:[#allocation11 + $0x3c8] ss:$40 sps:$4 sm:$0xff]   ;;  %v223_v56 = vrot.slane %v18013_v14, %v17955_v28  ;;  %v15394_v14 = vld [vmem:[#allocation11 + $0x2dc] ss:$40 sps:$4 sm:$0xff]  }
 0x195   :  { %5658 = vmatprep.mubr.bf16.mxu0 %v17975_v46  ;;  %5591 = vmatprep.subr.bf16.mxu1 %v15316_v59  ;;  %v15382_v59 = vld [vmem:[#allocation11 + $0x16d4] ss:$40 sps:$4 sm:$0xff]  }
 0x196   :  { %5628 = vmatprep.subr.bf16.mxu0 %v15319_v62  ;;  %v15383_v62 = vld [vmem:[#allocation11 + $0x378] ss:$40 sps:$4 sm:$0xff]  }
 0x198   :  { %5592 = vmatpush1.bf16.msra.mxu1 %v15314_v60  ;;  %5629 = vmatpush1.bf16.msra.mxu0 %v15317_v61  ;;  %v15385_v60 = vld [vmem:[#allocation11 + $0x37c] ss:$40 sps:$4 sm:$0xff]   ;;  %v15380_v61 = vld [vmem:[#allocation11 + $0x16d0] ss:$40 sps:$4 sm:$0xff]  }
 0x199   :  { %5593 = vmatprep.subr.bf16.mxu1 %v15322_v63  ;;  %5630 = vmatprep.subr.bf16.mxu0 %v15325_v0  ;;  %v541_v63 = vadd.f32 %v18005_v30, %v223_v56  ;;  %v15388_v0 = vld [vmem:[#allocation11 + $0x1684] ss:$40 sps:$4 sm:$0xff]   ;;  %v15398_v30 = vld [vmem:[#allocation11 + $0x288] ss:$40 sps:$4 sm:$0xff]   ;;  %v15443_v56 = vld [vmem:[#allocation11 + $0xa58] ss:$40 sps:$4 sm:$0xff]  }
 0x19c   :  { %5594 = vmatpush1.bf16.msra.mxu1 %v15320_v2  ;;  %5631 = vmatpush1.bf16.msra.mxu0 %v15323_v3  ;;  %v15391_v2 = vld [vmem:[#allocation11 + $0x32c] ss:$40 sps:$4 sm:$0xff]   ;;  %v15386_v3 = vld [vmem:[#allocation11 + $0x1680] ss:$40 sps:$4 sm:$0xff]  }
 0x19d   :  { %5595 = vmatprep.subr.bf16.mxu1 %v15328_v4  ;;  %5632 = vmatprep.subr.bf16.mxu0 %v15331_v5  ;;  %v15389_v4 = vld [vmem:[#allocation11 + $0x328] ss:$40 sps:$4 sm:$0xff]   ;;  %v555_v5 = vmax.f32 %v541_v63, 0.0  ;;  %v15454_v63 = vld [vmem:[#allocation11 + $0x91c] ss:$40 sps:$4 sm:$0xff]  }
 0x1a0   :  { %5596 = vmatpush1.bf16.msra.mxu1 %v15326_v7  ;;  %5633 = vmatpush1.bf16.msra.mxu0 %v15329_v8  ;;  %v15397_v7 = vld [vmem:[#allocation11 + $0x73c] ss:$40 sps:$4 sm:$0xff]   ;;  %v15392_v8 = vld [vmem:[#allocation11 + $0x2d8] ss:$40 sps:$4 sm:$0xff]  }
 0x1a1   :  { %5597 = vmatprep.subr.bf16.mxu1 %v15334_v10  ;;  %5634 = vmatprep.subr.bf16.mxu0 %v15337_v13  ;;  %v15395_v10 = vld [vmem:[#allocation11 + $0x738] ss:$40 sps:$4 sm:$0xff]   ;;  %v15400_v13 = vld [vmem:[#allocation11 + $0x28c] ss:$40 sps:$4 sm:$0xff]  }
 0x1a4   :  { %5598 = vmatpush1.bf16.msra.mxu1 %v15332_v15  ;;  %5635 = vmatpush1.bf16.msra.mxu0 %v15335_v16  ;;  %v18040_v15 = vpack.c.bf16 %v555_v5, %v555_v5  ;;  %v15401_v16 = vld [vmem:[#allocation11 + $0x6e8] ss:$40 sps:$4 sm:$0xff]   ;;  %v15463_v5 = vld [vmem:[#allocation11 + $0xe6c] ss:$40 sps:$4 sm:$0xff]  }
 0x1a5   :  { %5599 = vmatprep.subr.bf16.mxu1 %v15340_v17  ;;  %5636 = vmatprep.subr.bf16.mxu0 %v15343_v18  ;;  %v15403_v17 = vld [vmem:[#allocation11 + $0x6ec] ss:$40 sps:$4 sm:$0xff]   ;;  %v15406_v18 = vld [vmem:[#allocation11 + $0x69c] ss:$40 sps:$4 sm:$0xff]  }
 0x1a8   :  { %5600 = vmatpush1.bf16.msra.mxu1 %v15338_v19  ;;  %5637 = vmatpush1.bf16.msra.mxu0 %v15341_v20  ;;  %v15409_v19 = vld [vmem:[#allocation11 + $0xc3c] ss:$40 sps:$4 sm:$0xff]   ;;  %v15404_v20 = vld [vmem:[#allocation11 + $0x698] ss:$40 sps:$4 sm:$0xff]  }
 0x1a9   :  { %5601 = vmatprep.subr.bf16.mxu1 %v15346_v22  ;;  %5638 = vmatprep.subr.bf16.mxu0 %v15349_v24  ;;  %v15407_v22 = vld [vmem:[#allocation11 + $0xc38] ss:$40 sps:$4 sm:$0xff]   ;;  %v15412_v24 = vld [vmem:[#allocation11 + $0x64c] ss:$40 sps:$4 sm:$0xff]  }
 0x1ac   :  { %5602 = vmatpush2.bf16.msra.mxu1 %v15344_v25  ;;  %5639 = vmatpush1.bf16.msra.mxu0 %v15347_v32  ;;  %v15410_v25 = vld [vmem:[#allocation11 + $0x648] ss:$40 sps:$4 sm:$0xff]  }
 0x1ad   :  { %5603 = vmatprep.subr.bf16.mxu1 %v15352_v33  ;;  %5640 = vmatprep.subr.bf16.mxu0 %v15355_v35  ;;  %v15413_v32 = vld [vmem:[#allocation11 + $0xbe8] ss:$40 sps:$4 sm:$0xff]   ;;  %v15415_v33 = vld [vmem:[#allocation11 + $0xbec] ss:$40 sps:$4 sm:$0xff]   ;;  %v15418_v35 = vld [vmem:[#allocation11 + $0x5fc] ss:$40 sps:$4 sm:$0xff]  }
 0x1b0   :  { %5604 = vmatpush2.bf16.msra.mxu1 %v15350_v36  ;;  %5641 = vmatpush1.bf16.msra.mxu0 %v15353_v38  ;;  %v15421_v36 = vld [vmem:[#allocation11 + $0xb9c] ss:$40 sps:$4 sm:$0xff]   ;;  %v15416_v38 = vld [vmem:[#allocation11 + $0x5f8] ss:$40 sps:$4 sm:$0xff]  }
 0x1b1   :  { %5605 = vmatprep.subr.bf16.mxu1 %v15358_v26  ;;  %5642 = vmatprep.subr.bf16.mxu0 %v15361_v39  ;;  %v15419_v26 = vld [vmem:[#allocation11 + $0xb98] ss:$40 sps:$4 sm:$0xff]   ;;  %v15424_v39 = vld [vmem:[#allocation11 + $0x5ac] ss:$40 sps:$4 sm:$0xff]  }
 0x1b4   :  { %5606 = vmatpush2.bf16.msra.mxu1 %v15356_v40  ;;  %5643 = vmatpush2.bf16.msra.mxu0 %v15359_v41  ;;  %v15427_v40 = vld [vmem:[#allocation11 + $0xb4c] ss:$40 sps:$4 sm:$0xff]   ;;  %v15422_v41 = vld [vmem:[#allocation11 + $0x5a8] ss:$40 sps:$4 sm:$0xff]  }
 0x1b5   :  { %5607 = vmatprep.subr.bf16.mxu1 %v15364_v42  ;;  %5644 = vmatprep.subr.bf16.mxu0 %v15367_v9  ;;  %v15425_v42 = vld [vmem:[#allocation11 + $0xb48] ss:$40 sps:$4 sm:$0xff]   ;;  %v15430_v9 = vld [vmem:[#allocation11 + $0x55c] ss:$40 sps:$4 sm:$0xff]  }
 0x1b8   :  { %5608 = vmatpush2.bf16.msra.mxu1 %v15362_v44  ;;  %5645 = vmatpush2.bf16.msra.mxu0 %v15365_v45  ;;  %v15433_v44 = vld [vmem:[#allocation11 + $0xafc] ss:$40 sps:$4 sm:$0xff]   ;;  %v15428_v45 = vld [vmem:[#allocation11 + $0x558] ss:$40 sps:$4 sm:$0xff]  }
 0x1b9   :  { %5609 = vmatprep.subr.bf16.mxu1 %v15370_v47  ;;  %5646 = vmatprep.subr.bf16.mxu0 %v15373_v49  ;;  %v15431_v47 = vld [vmem:[#allocation11 + $0xaf8] ss:$40 sps:$4 sm:$0xff]   ;;  %v15436_v49 = vld [vmem:[#allocation11 + $0x50c] ss:$40 sps:$4 sm:$0xff]  }
 0x1bc   :  { %5610 = vmatpush2.bf16.msra.mxu1 %v15368_v27  ;;  %5647 = vmatpush2.bf16.msra.mxu0 %v15371_v50  ;;  %v15439_v27 = vld [vmem:[#allocation11 + $0xaac] ss:$40 sps:$4 sm:$0xff]   ;;  %v15434_v50 = vld [vmem:[#allocation11 + $0x508] ss:$40 sps:$4 sm:$0xff]  }
 0x1bd   :  { %5611 = vmatprep.subr.bf16.mxu1 %v15376_v52  ;;  %5648 = vmatprep.subr.bf16.mxu0 %v15379_v53  ;;  %v15437_v52 = vld [vmem:[#allocation11 + $0xaa8] ss:$40 sps:$4 sm:$0xff]   ;;  %v15442_v53 = vld [vmem:[#allocation11 + $0x9bc] ss:$40 sps:$4 sm:$0xff]  }
 0x1c0   :  { %5612 = vmatpush2.bf16.msra.mxu1 %v15374_v55  ;;  %5649 = vmatpush2.bf16.msra.mxu0 %v15377_v54  ;;  %v15445_v55 = vld [vmem:[#allocation11 + $0xa5c] ss:$40 sps:$4 sm:$0xff]   ;;  %v15440_v54 = vld [vmem:[#allocation11 + $0x9b8] ss:$40 sps:$4 sm:$0xff]  }
 0x1c1   :  { %5613 = vmatprep.subr.bf16.mxu1 %v15382_v59  ;;  %5650 = vmatprep.subr.bf16.mxu0 %v15385_v60  ;;  %v15448_v59 = vld [vmem:[#allocation11 + $0x96c] ss:$40 sps:$4 sm:$0xff]  }
 0x1c2   :  { %v15451_v60 = vld [vmem:[#allocation11 + $0xa0c] ss:$40 sps:$4 sm:$0xff]  }
 0x1c4   :  { %5614 = vmatpush2.bf16.msra.mxu1 %v15380_v61  ;;  %5651 = vmatpush2.bf16.msra.mxu0 %v15383_v62  ;;  %v15446_v61 = vld [vmem:[#allocation11 + $0x968] ss:$40 sps:$4 sm:$0xff]  }
 0x1c5   :  { %5615 = vmatprep.subr.bf16.mxu1 %v15388_v0  ;;  %5652 = vmatprep.subr.bf16.mxu0 %v15391_v2  ;;  %v15449_v62 = vld [vmem:[#allocation11 + $0xa08] ss:$40 sps:$4 sm:$0xff]   ;;  %v15457_v0 = vld [vmem:[#allocation11 + $0xebc] ss:$40 sps:$4 sm:$0xff]   ;;  %v15452_v2 = vld [vmem:[#allocation11 + $0x918] ss:$40 sps:$4 sm:$0xff]  }
 0x1c8   :  { %5616 = vmatpush2.bf16.msra.mxu1 %v15386_v3  ;;  %5653 = vmatpush2.bf16.msra.mxu0 %v15389_v4  ;;  %v15455_v3 = vld [vmem:[#allocation11 + $0xeb8] ss:$40 sps:$4 sm:$0xff]   ;;  %v15460_v4 = vld [vmem:[#allocation11 + $0x8cc] ss:$40 sps:$4 sm:$0xff]  }
 0x1c9   :  { %5654 = vmatprep.subr.bf16.mxu0 %v15394_v14  ;;  %5667 = vmatprep.subr.bf16.mxu1 %v15397_v7  ;;  %v15458_v14 = vld [vmem:[#allocation11 + $0x8c8] ss:$40 sps:$4 sm:$0xff]  }
 0x1ca   :  { %v15461_v7 = vld [vmem:[#allocation11 + $0xe68] ss:$40 sps:$4 sm:$0xff]  }
 0x1cb   :  { %5618 = vmatmul.mubr.bf16.vlgmr.msra.gmra.mxu1 %v18040_v15 }
 0x1cc   :  { %5655 = vmatpush2.bf16.msra.mxu0 %v15392_v8  ;;  %5668 = vmatpush1.bf16.msra.mxu1 %v15395_v10  ;;  %v15466_v8 = vld [vmem:[#allocation11 + $0x87c] ss:$40 sps:$4 sm:$0xff]  }
 0x1cd   :  { %5699 = vmatprep.mubr.bf16.mxu1 %v17992_v6  ;;  %5656 = vmatprep.subr.bf16.mxu0 %v15400_v13  ;;  %v15469_v10 = vld [vmem:[#allocation11 + $0xe1c] ss:$40 sps:$4 sm:$0xff]   ;;  %v15464_v13 = vld [vmem:[#allocation11 + $0x878] ss:$40 sps:$4 sm:$0xff]  }
 0x1ce   :  { %5669 = vmatprep.subr.bf16.mxu1 %v15403_v17  ;;  %v15475_v17 = vld [vmem:[#allocation11 + $0xdcc] ss:$40 sps:$4 sm:$0xff]  }
 0x1d0   :  { %5657 = vmatpush2.bf16.msra.mxu0 %v15398_v30  ;;  %5670 = vmatpush1.bf16.msra.mxu1 %v15401_v16  ;;  %v15467_v30 = vld [vmem:[#allocation11 + $0xe18] ss:$40 sps:$4 sm:$0xff]   ;;  %v15472_v16 = vld [vmem:[#allocation11 + $0x82c] ss:$40 sps:$4 sm:$0xff]  }
 0x1d1   :  { %5671 = vmatprep.subr.bf16.mxu1 %v15406_v18  ;;  %5708 = vmatprep.subr.bf16.mxu0 %v15409_v19  ;;  %v15470_v18 = vld [vmem:[#allocation11 + $0x828] ss:$40 sps:$4 sm:$0xff]  }
 0x1d2   :  { %v15473_v19 = vld [vmem:[#allocation11 + $0xdc8] ss:$40 sps:$4 sm:$0xff]  }
 0x1d3   :  { %5659 = vmatmul.mubr.bf16.vlgmr.msra.gmra.mxu0 %v17979_v48 }
 0x1d4   :  { %5672 = vmatpush1.bf16.msra.mxu1 %v15404_v20  ;;  %5709 = vmatpush1.bf16.msra.mxu0 %v15407_v22  ;;  %v15478_v20 = vld [vmem:[#allocation11 + $0x7dc] ss:$40 sps:$4 sm:$0xff]  }
 0x1d5   :  { %5740 = vmatprep.mubr.bf16.mxu0 %v18003_v23  ;;  %5673 = vmatprep.subr.bf16.mxu1 %v15412_v24  ;;  %v15481_v22 = vld [vmem:[#allocation11 + $0xd7c] ss:$40 sps:$4 sm:$0xff]   ;;  %v15476_v24 = vld [vmem:[#allocation11 + $0x7d8] ss:$40 sps:$4 sm:$0xff]  }
 0x1d6   :  { %5710 = vmatprep.subr.bf16.mxu0 %v15415_v33  ;;  %v15487_v33 = vld [vmem:[#allocation11 + $0xd2c] ss:$40 sps:$4 sm:$0xff]  }
 0x1d8   :  { %5674 = vmatpush1.bf16.msra.mxu1 %v15410_v25  ;;  %5711 = vmatpush1.bf16.msra.mxu0 %v15413_v32  ;;  %v15479_v25 = vld [vmem:[#allocation11 + $0xd78] ss:$40 sps:$4 sm:$0xff]   ;;  %v15484_v32 = vld [vmem:[#allocation11 + $0x78c] ss:$40 sps:$4 sm:$0xff]  }
 0x1d9   :  { %5675 = vmatprep.subr.bf16.mxu1 %v15418_v35  ;;  %5712 = vmatprep.subr.bf16.mxu0 %v15421_v36  ;;  %v15482_v35 = vld [vmem:[#allocation11 + $0x788] ss:$40 sps:$4 sm:$0xff]  }
 0x1da   :  { %v15485_v36 = vld [vmem:[#allocation11 + $0xd28] ss:$40 sps:$4 sm:$0xff]  }
 0x1dc   :  { %5676 = vmatpush1.bf16.msra.mxu1 %v15416_v38  ;;  %5713 = vmatpush1.bf16.msra.mxu0 %v15419_v26  ;;  %v15490_v38 = vld [vmem:[#allocation11 + $0xcdc] ss:$40 sps:$4 sm:$0xff]  }
 0x1dd   :  { %5677 = vmatprep.subr.bf16.mxu1 %v15424_v39  ;;  %5714 = vmatprep.subr.bf16.mxu0 %v15427_v40  ;;  %v15493_v26 = vld [vmem:[#allocation11 + $0x113c] ss:$40 sps:$4 sm:$0xff]   ;;  %v15488_v39 = vld [vmem:[#allocation11 + $0xcd8] ss:$40 sps:$4 sm:$0xff]  }
 0x1de   :  { %v15491_v40 = vld [vmem:[#allocation11 + $0x1138] ss:$40 sps:$4 sm:$0xff]  }
 0x1e0   :  { %5678 = vmatpush1.bf16.msra.mxu1 %v15422_v41  ;;  %5715 = vmatpush1.bf16.msra.mxu0 %v15425_v42  ;;  %v15496_v41 = vld [vmem:[#allocation11 + $0xc8c] ss:$40 sps:$4 sm:$0xff]   ;;  %v1367_v42 = vld [vmem:[#allocation13] sm:$0xff] }
 0x1e1   :  { %5679 = vmatprep.subr.bf16.mxu1 %v15430_v9  ;;  %5716 = vmatprep.subr.bf16.mxu0 %v15433_v44  ;;  %v15494_v9 = vld [vmem:[#allocation11 + $0xc88] ss:$40 sps:$4 sm:$0xff]  }
 0x1e2   :  { %v15497_v44 = vld [vmem:[#allocation11 + $0x10e8] ss:$40 sps:$4 sm:$0xff]  }
 0x1e4   :  { %5680 = vmatpush1.bf16.msra.mxu1 %v15428_v45  ;;  %5717 = vmatpush1.bf16.msra.mxu0 %v15431_v47  ;;  %v15499_v45 = vld [vmem:[#allocation11 + $0x10ec] ss:$40 sps:$4 sm:$0xff]  }
 0x1e5   :  { %5681 = vmatprep.subr.bf16.mxu1 %v15436_v49  ;;  %5718 = vmatprep.subr.bf16.mxu0 %v15439_v27  ;;  %v15502_v49 = vld [vmem:[#allocation11 + $0x109c] ss:$40 sps:$4 sm:$0xff]  }
 0x1e6   :  { %v15505_v27 = vld [vmem:[#allocation11 + $0x163c] ss:$40 sps:$4 sm:$0xff]  }
 0x1e8   :  { %5682 = vmatpush1.bf16.msra.mxu1 %v15434_v50  ;;  %5719 = vmatpush1.bf16.msra.mxu0 %v15437_v52  ;;  %v1374_v52 = vrot.slane %v1367_v42, %v17955_v28 }
 0x1e9   :  { %5683 = vmatprep.subr.bf16.mxu1 %v15442_v53  ;;  %5720 = vmatprep.subr.bf16.mxu0 %v15445_v55  ;;  %v15500_v53 = vld [vmem:[#allocation11 + $0x1098] ss:$40 sps:$4 sm:$0xff]  }
 0x1ec   :  { %5684 = vmatpush2.bf16.msra.mxu1 %v15440_v54  ;;  %5721 = vmatpush1.bf16.msra.mxu0 %v15443_v56  ;;  %v15503_v54 = vld [vmem:[#allocation11 + $0x1638] ss:$40 sps:$4 sm:$0xff]   ;;  %v15508_v56 = vld [vmem:[#allocation11 + $0x104c] ss:$40 sps:$4 sm:$0xff]  }
 0x1ed   :  { %5685 = vmatprep.subr.bf16.mxu1 %v15448_v59  ;;  %5722 = vmatprep.subr.bf16.mxu0 %v15451_v60  ;;  %v1378_v59 = vrot.slane %v1367_v42, %v17958_v29  ;;  %v15544_v42 = vld [vmem:[#allocation11 + $0x136c] ss:$40 sps:$4 sm:$0xff]  }
 0x1f0   :  { %5686 = vmatpush2.bf16.msra.mxu1 %v15446_v61  ;;  %5723 = vmatpush1.bf16.msra.mxu0 %v15449_v62  ;;  %v15506_v62 = vld [vmem:[#allocation11 + $0x1048] ss:$40 sps:$4 sm:$0xff]  }
 0x1f1   :  { %5687 = vmatprep.subr.bf16.mxu1 %v15454_v63  ;;  %5724 = vmatprep.subr.bf16.mxu0 %v15457_v0  ;;  %v15509_v63 = vld [vmem:[#allocation11 + $0x15e8] ss:$40 sps:$4 sm:$0xff]   ;;  %v15511_v0 = vld [vmem:[#allocation11 + $0x15ec] ss:$40 sps:$4 sm:$0xff]  }
 0x1f4   :  { %5688 = vmatpush2.bf16.msra.mxu1 %v15452_v2  ;;  %5725 = vmatpush2.bf16.msra.mxu0 %v15455_v3  ;;  %v15514_v3 = vld [vmem:[#allocation11 + $0xffc] ss:$40 sps:$4 sm:$0xff]  }
 0x1f5   :  { %5689 = vmatprep.subr.bf16.mxu1 %v15460_v4  ;;  %5726 = vmatprep.subr.bf16.mxu0 %v15463_v5  ;;  %v15517_v4 = vld [vmem:[#allocation11 + $0x159c] ss:$40 sps:$4 sm:$0xff]  }
 0x1f8   :  { %5690 = vmatpush2.bf16.msra.mxu1 %v15458_v14  ;;  %5727 = vmatpush2.bf16.msra.mxu0 %v15461_v7 }
 0x1f9   :  { %5691 = vmatprep.subr.bf16.mxu1 %v15466_v8  ;;  %5728 = vmatprep.subr.bf16.mxu0 %v15469_v10  ;;  %v15512_v10 = vld [vmem:[#allocation11 + $0xff8] ss:$40 sps:$4 sm:$0xff]  }
 0x1fc   :  { %5692 = vmatpush2.bf16.msra.mxu1 %v15464_v13  ;;  %5729 = vmatpush2.bf16.msra.mxu0 %v15467_v30  ;;  %v15515_v13 = vld [vmem:[#allocation11 + $0x1598] ss:$40 sps:$4 sm:$0xff]  }
 0x1fd   :  { %5693 = vmatprep.subr.bf16.mxu1 %v15472_v16  ;;  %5730 = vmatprep.subr.bf16.mxu0 %v15475_v17  ;;  %v15520_v16 = vld [vmem:[#allocation11 + $0xfac] ss:$40 sps:$4 sm:$0xff]  }
 0x1fe   :  { %v15523_v17 = vld [vmem:[#allocation11 + $0x154c] ss:$40 sps:$4 sm:$0xff]  }
 0x200   :  { %5694 = vmatpush2.bf16.msra.mxu1 %v15470_v18  ;;  %5731 = vmatpush2.bf16.msra.mxu0 %v15473_v19  ;;  %v15518_v19 = vld [vmem:[#allocation11 + $0xfa8] ss:$40 sps:$4 sm:$0xff]  }
 0x201   :  { %5695 = vmatprep.subr.bf16.mxu1 %v15478_v20  ;;  %5732 = vmatprep.subr.bf16.mxu0 %v15481_v22  ;;  %v15521_v20 = vld [vmem:[#allocation11 + $0x1548] ss:$40 sps:$4 sm:$0xff]   ;;  %v15526_v22 = vld [vmem:[#allocation11 + $0xf5c] ss:$40 sps:$4 sm:$0xff]  }
 0x204   :  { %5696 = vmatpush2.bf16.msra.mxu1 %v15476_v24  ;;  %5733 = vmatpush2.bf16.msra.mxu0 %v15479_v25  ;;  %v15529_v24 = vld [vmem:[#allocation11 + $0x14fc] ss:$40 sps:$4 sm:$0xff]   ;;  %v15524_v25 = vld [vmem:[#allocation11 + $0xf58] ss:$40 sps:$4 sm:$0xff]  }
 0x205   :  { %5697 = vmatprep.subr.bf16.mxu1 %v15484_v32  ;;  %5734 = vmatprep.subr.bf16.mxu0 %v15487_v33  ;;  %v15527_v32 = vld [vmem:[#allocation11 + $0x14f8] ss:$40 sps:$4 sm:$0xff]   ;;  %v15532_v33 = vld [vmem:[#allocation11 + $0xf0c] ss:$40 sps:$4 sm:$0xff]  }
 0x208   :  { %5698 = vmatpush2.bf16.msra.mxu1 %v15482_v35  ;;  %5735 = vmatpush2.bf16.msra.mxu0 %v15485_v36  ;;  %v15535_v35 = vld [vmem:[#allocation11 + $0x14ac] ss:$40 sps:$4 sm:$0xff]   ;;  %v15530_v36 = vld [vmem:[#allocation11 + $0xf08] ss:$40 sps:$4 sm:$0xff]  }
 0x209   :  { %5736 = vmatprep.subr.bf16.mxu0 %v15490_v38  ;;  %5749 = vmatprep.subr.bf16.mxu1 %v15493_v26  ;;  %v15533_v38 = vld [vmem:[#allocation11 + $0x14a8] ss:$40 sps:$4 sm:$0xff]   ;;  %v15538_v26 = vld [vmem:[#allocation11 + $0x13bc] ss:$40 sps:$4 sm:$0xff]  }
 0x20b   :  { %5700 = vmatmul.mubr.bf16.vlgmr.msra.gmra.mxu1 %v17990_v1  ;;  %v5455_v47 = vpop.f32.mrf.mxu1 }
 0x20c   :  { %5737 = vmatpush2.bf16.msra.mxu0 %v15488_v39  ;;  %5750 = vmatpush1.bf16.msra.mxu1 %v15491_v40  ;;  %v5456_v61 = vadd.f32 %v5455_v47, %v1374_v52  ;;  %v15541_v39 = vld [vmem:[#allocation11 + $0x145c] ss:$40 sps:$4 sm:$0xff]   ;;  %v15536_v40 = vld [vmem:[#allocation11 + $0x13b8] ss:$40 sps:$4 sm:$0xff]   ;;  %v15556_v52 = vld [vmem:[#allocation11 + $0x12cc] ss:$40 sps:$4 sm:$0xff]  }
 0x20d   :  { %5781 = vmatprep.mubr.bf16.mxu1 %v17999_v11  ;;  %v5457_v50 = vpop.f32.mrf.mxu1  ;;  %5738 = vmatprep.subr.bf16.mxu0 %v15496_v41  ;;  %v15539_v41 = vld [vmem:[#allocation11 + $0x1458] ss:$40 sps:$4 sm:$0xff]   ;;  %v15550_v47 = vld [vmem:[#allocation11 + $0x131c] ss:$40 sps:$4 sm:$0xff]  }
 0x20e   :  { %5751 = vmatprep.subr.bf16.mxu1 %v15499_v45  ;;  %v5458_v5 = vadd.f32 %v5457_v50, %v1378_v59  ;;  %v15545_v45 = vld [vmem:[#allocation11 + $0x1408] ss:$40 sps:$4 sm:$0xff]   ;;  %v15551_v50 = vld [vmem:[#allocation11 + $0x18b8] ss:$40 sps:$4 sm:$0xff]   ;;  %v15565_v59 = vld [vmem:[#allocation11 + $0x181c] ss:$40 sps:$4 sm:$0xff]  }
 0x20f   :  { %v5459_v55 = vpop.f32.mrf.mxu1 }
 0x210   :  { %5739 = vmatpush2.bf16.msra.mxu0 %v15494_v9  ;;  %5752 = vmatpush1.bf16.msra.mxu1 %v15497_v44  ;;  %v15547_v9 = vld [vmem:[#allocation11 + $0x140c] ss:$40 sps:$4 sm:$0xff]   ;;  %v15542_v44 = vld [vmem:[#allocation11 + $0x1368] ss:$40 sps:$4 sm:$0xff]  }
 0x211   :  { %v5460_v60 = vpop.f32.mrf.mxu1  ;;  %5753 = vmatprep.subr.bf16.mxu1 %v15502_v49  ;;  %5790 = vmatprep.subr.bf16.mxu0 %v15505_v27  ;;  %v15553_v49 = vld [vmem:[#allocation11 + $0x18bc] ss:$40 sps:$4 sm:$0xff]   ;;  %v15548_v27 = vld [vmem:[#allocation11 + $0x1318] ss:$40 sps:$4 sm:$0xff]   ;;  %v15554_v55 = vld [vmem:[#allocation11 + $0x12c8] ss:$40 sps:$4 sm:$0xff]  }
 0x212   :  { %v15560_v60 = vld [vmem:[#allocation11 + $0x1278] ss:$40 sps:$4 sm:$0xff]  }
 0x213   :  { %5741 = vmatmul.mubr.bf16.vlgmr.msra.gmra.mxu0 %v18027_v31  ;;  %v5496_v2 = vpop.f32.mrf.mxu0 }
 0x214   :  { %v18051_v14 = vadd.f32 %v5496_v2, %v5456_v61  ;;  %5754 = vmatpush1.bf16.msra.mxu1 %v15500_v53  ;;  %5791 = vmatpush1.bf16.msra.mxu0 %v15503_v54  ;;  %v15559_v53 = vld [vmem:[#allocation11 + $0x186c] ss:$40 sps:$4 sm:$0xff]   ;;  %v15557_v54 = vld [vmem:[#allocation11 + $0x1868] ss:$40 sps:$4 sm:$0xff]   ;;  %v15563_v61 = vld [vmem:[#allocation11 + $0x1818] ss:$40 sps:$4 sm:$0xff]  }
 0x215   :  { %5822 = vmatprep.mubr.bf16.mxu0 %v18029_v51  ;;  %v5498_v7 = vpop.f32.mrf.mxu0  ;;  %5755 = vmatprep.subr.bf16.mxu1 %v15508_v56  ;;  %v15562_v56 = vld [vmem:[#allocation11 + $0x127c] ss:$40 sps:$4 sm:$0xff]   ;;  %v15569_v2 = vld [vmem:[#allocation11 + $0x17c8] ss:$40 sps:$4 sm:$0xff]  }
 0x216   :  { %v18054_v8 = vadd.f32 %v5498_v7, %v5458_v5  ;;  %5792 = vmatprep.subr.bf16.mxu0 %v15511_v0  ;;  %v15566_v0 = vld [vmem:[#allocation11 + $0x1228] ss:$40 sps:$4 sm:$0xff]   ;;  %v15572_v5 = vld [vmem:[#allocation11 + $0x11d8] ss:$40 sps:$4 sm:$0xff]  }
 0x217   :  { %v5500_v30 = vpop.f32.mrf.mxu0  ;;  %v15575_v7 = vld [vmem:[#allocation11 + $0x1778] ss:$40 sps:$4 sm:$0xff]  }
 0x218   :  { %5756 = vmatpush1.bf16.msra.mxu1 %v15506_v62  ;;  %5793 = vmatpush1.bf16.msra.mxu0 %v15509_v63  ;;  %v15568_v62 = vld [vmem:[#allocation11 + $0x122c] ss:$40 sps:$4 sm:$0xff]   ;;  %v15578_v30 = vld [vmem:[#allocation11 + $0x1188] ss:$40 sps:$4 sm:$0xff]  }
 0x219   :  { %5757 = vmatprep.subr.bf16.mxu1 %v15514_v3  ;;  %5794 = vmatprep.subr.bf16.mxu0 %v15517_v4  ;;  %v5501_v18 = vpop.f32.mrf.mxu0  ;;  %v15571_v63 = vld [vmem:[#allocation11 + $0x17cc] ss:$40 sps:$4 sm:$0xff]   ;;  %v15574_v3 = vld [vmem:[#allocation11 + $0x11dc] ss:$40 sps:$4 sm:$0xff]  }
 0x21a   :  { %v15577_v4 = vld [vmem:[#allocation11 + $0x177c] ss:$40 sps:$4 sm:$0xff]  }
 0x21b   :  { %v15589_v18 = vld [vmem:[#allocation11 + $0x244] ss:$40 sps:$4 sm:$0xff]  }
 0x21c   :  { %5758 = vmatpush1.bf16.msra.mxu1 %v15512_v10  ;;  %5795 = vmatpush1.bf16.msra.mxu0 %v15515_v13  ;;  %v15580_v10 = vld [vmem:[#allocation11 + $0x118c] ss:$40 sps:$4 sm:$0xff]  }
 0x21d   :  { %5759 = vmatprep.subr.bf16.mxu1 %v15520_v16  ;;  %5796 = vmatprep.subr.bf16.mxu0 %v15523_v17  ;;  %v15583_v13 = vld [vmem:[#allocation11 + $0x172c] ss:$40 sps:$4 sm:$0xff]   ;;  %v15581_v16 = vld [vmem:[#allocation11 + $0x1728] ss:$40 sps:$4 sm:$0xff]   ;;  %v15586_v17 = vld [vmem:[#allocation11 + $0x16dc] ss:$40 sps:$4 sm:$0xff]  }
 0x220   :  { %5760 = vmatpush1.bf16.msra.mxu1 %v15518_v19  ;;  %5797 = vmatpush1.bf16.msra.mxu0 %v15521_v20  ;;  %v15584_v19 = vld [vmem:[#allocation11 + $0x16d8] ss:$40 sps:$4 sm:$0xff]  }
 0x221   :  { %5761 = vmatprep.subr.bf16.mxu1 %v15526_v22  ;;  %5798 = vmatprep.subr.bf16.mxu0 %v15529_v24  ;;  %v15587_v20 = vld [vmem:[#allocation11 + $0x240] ss:$40 sps:$4 sm:$0xff]   ;;  %v15592_v22 = vld [vmem:[#allocation11 + $0x168c] ss:$40 sps:$4 sm:$0xff]  }
 0x222   :  { %v15595_v24 = vld [vmem:[#allocation11 + $0x1f4] ss:$40 sps:$4 sm:$0xff]  }
 0x224   :  { %5762 = vmatpush1.bf16.msra.mxu1 %v15524_v25  ;;  %5799 = vmatpush1.bf16.msra.mxu0 %v15527_v32  ;;  %v15590_v25 = vld [vmem:[#allocation11 + $0x1688] ss:$40 sps:$4 sm:$0xff]  }
 0x225   :  { %5763 = vmatprep.subr.bf16.mxu1 %v15532_v33  ;;  %5800 = vmatprep.subr.bf16.mxu0 %v15535_v35  ;;  %v15593_v32 = vld [vmem:[#allocation11 + $0x1f0] ss:$40 sps:$4 sm:$0xff]   ;;  %v15598_v35 = vld [vmem:[#allocation11 + $0x1a4] ss:$40 sps:$4 sm:$0xff]  }
 0x228   :  { %5764 = vmatpush1.bf16.msra.mxu1 %v15530_v36  ;;  %5801 = vmatpush1.bf16.msra.mxu0 %v15533_v38  ;;  %v15601_v36 = vld [vmem:[#allocation11 + $0x744] ss:$40 sps:$4 sm:$0xff]  }
 0x229   :  { %5765 = vmatprep.subr.bf16.mxu1 %v15538_v26  ;;  %5802 = vmatprep.subr.bf16.mxu0 %v15541_v39 }
 0x22c   :  { %5766 = vmatpush2.bf16.msra.mxu1 %v15536_v40  ;;  %5803 = vmatpush1.bf16.msra.mxu0 %v15539_v41  ;;  %v15596_v40 = vld [vmem:[#allocation11 + $0x1a0] ss:$40 sps:$4 sm:$0xff]  }
 0x22d   :  { %5767 = vmatprep.subr.bf16.mxu1 %v15544_v42  ;;  %5804 = vmatprep.subr.bf16.mxu0 %v15547_v9  ;;  %v15599_v42 = vld [vmem:[#allocation11 + $0x740] ss:$40 sps:$4 sm:$0xff]   ;;  %v15604_v9 = vld [vmem:[#allocation11 + $0x154] ss:$40 sps:$4 sm:$0xff]  }
 0x230   :  { %5768 = vmatpush2.bf16.msra.mxu1 %v15542_v44  ;;  %5805 = vmatpush1.bf16.msra.mxu0 %v15545_v45  ;;  %v15602_v45 = vld [vmem:[#allocation11 + $0x150] ss:$40 sps:$4 sm:$0xff]  }
 0x231   :  { %5769 = vmatprep.subr.bf16.mxu1 %v15550_v47  ;;  %5806 = vmatprep.subr.bf16.mxu0 %v15553_v49  ;;  %v15607_v47 = vld [vmem:[#allocation11 + $0x6f4] ss:$40 sps:$4 sm:$0xff]  }
 0x234   :  { %5770 = vmatpush2.bf16.msra.mxu1 %v15548_v27  ;;  %5807 = vmatpush2.bf16.msra.mxu0 %v15551_v50  ;;  %v15610_v27 = vld [vmem:[#allocation11 + $0x104] ss:$40 sps:$4 sm:$0xff]  }
 0x235   :  { %5771 = vmatprep.subr.bf16.mxu1 %v15556_v52  ;;  %5808 = vmatprep.subr.bf16.mxu0 %v15559_v53  ;;  %v15613_v50 = vld [vmem:[#allocation11 + $0x6a4] ss:$40 sps:$4 sm:$0xff]  }
 0x238   :  { %5772 = vmatpush2.bf16.msra.mxu1 %v15554_v55  ;;  %5809 = vmatpush2.bf16.msra.mxu0 %v15557_v54  ;;  %v15608_v55 = vld [vmem:[#allocation11 + $0x100] ss:$40 sps:$4 sm:$0xff]  }
 0x239   :  { %5773 = vmatprep.subr.bf16.mxu1 %v15562_v56  ;;  %5810 = vmatprep.subr.bf16.mxu0 %v15565_v59  ;;  %v15611_v54 = vld [vmem:[#allocation11 + $0x6a0] ss:$40 sps:$4 sm:$0xff]   ;;  %v15616_v59 = vld [vmem:[#allocation11 + $0xb4] ss:$40 sps:$4 sm:$0xff]  }
 0x23c   :  { %5774 = vmatpush2.bf16.msra.mxu1 %v15560_v60  ;;  %5811 = vmatpush2.bf16.msra.mxu0 %v15563_v61  ;;  %v15619_v60 = vld [vmem:[#allocation11 + $0x654] ss:$40 sps:$4 sm:$0xff]  }
 0x23d   :  { %5775 = vmatprep.subr.bf16.mxu1 %v15568_v62  ;;  %5812 = vmatprep.subr.bf16.mxu0 %v15571_v63  ;;  %v15614_v62 = vld [vmem:[#allocation11 + $0xb0] ss:$40 sps:$4 sm:$0xff]  }
 0x23e   :  { %v15617_v63 = vld [vmem:[#allocation11 + $0x650] ss:$40 sps:$4 sm:$0xff]  }
 0x240   :  { %5776 = vmatpush2.bf16.msra.mxu1 %v15566_v0  ;;  %5813 = vmatpush2.bf16.msra.mxu0 %v15569_v2  ;;  %v15622_v0 = vld [vmem:[#allocation11 + $0x64] ss:$40 sps:$4 sm:$0xff]  }
 0x241   :  { %5777 = vmatprep.subr.bf16.mxu1 %v15574_v3  ;;  %5814 = vmatprep.subr.bf16.mxu0 %v15577_v4  ;;  %v15625_v2 = vld [vmem:[#allocation11 + $0x604] ss:$40 sps:$4 sm:$0xff]   ;;  %v15620_v3 = vld [vmem:[#allocation11 + $0x60] ss:$40 sps:$4 sm:$0xff]  }
 0x242   :  { %v15623_v4 = vld [vmem:[#allocation11 + $0x600] ss:$40 sps:$4 sm:$0xff]  }
 0x244   :  { %5778 = vmatpush2.bf16.msra.mxu1 %v15572_v5  ;;  %5815 = vmatpush2.bf16.msra.mxu0 %v15575_v7  ;;  %v15628_v5 = vld [vmem:[#allocation11 + $0x14] ss:$40 sps:$4 sm:$0xff]  }
 0x245   :  { %5779 = vmatprep.subr.bf16.mxu1 %v15580_v10  ;;  %5816 = vmatprep.subr.bf16.mxu0 %v15583_v13  ;;  %v15631_v7 = vld [vmem:[#allocation11 + $0x5b4] ss:$40 sps:$4 sm:$0xff]   ;;  %v15626_v10 = vld [vmem:[#allocation11 + $0x10] ss:$40 sps:$4 sm:$0xff]  }
 0x246   :  { %v15629_v13 = vld [vmem:[#allocation11 + $0x5b0] ss:$40 sps:$4 sm:$0xff]  }
 0x248   :  { %5780 = vmatpush2.bf16.msra.mxu1 %v15578_v30  ;;  %5817 = vmatpush2.bf16.msra.mxu0 %v15581_v16  ;;  %v15634_v30 = vld [vmem:[#allocation11 + $0x4c4] ss:$40 sps:$4 sm:$0xff]  }
 0x249   :  { %5818 = vmatprep.subr.bf16.mxu0 %v15586_v17  ;;  %5831 = vmatprep.subr.bf16.mxu1 %v15589_v18  ;;  %v15637_v16 = vld [vmem:[#allocation11 + $0x564] ss:$40 sps:$4 sm:$0xff]   ;;  %v15632_v17 = vld [vmem:[#allocation11 + $0x4c0] ss:$40 sps:$4 sm:$0xff]  }
 0x24a   :  { %v15635_v18 = vld [vmem:[#allocation11 + $0x560] ss:$40 sps:$4 sm:$0xff]  }
 0x24b   :  { %v5537_v33 = vpop.f32.mrf.mxu1  ;;  %5782 = vmatmul.mubr.bf16.vlgmr.msra.gmra.mxu1 %v18033_v58 }
 0x24c   :  { %v5538_v38 = vadd.f32 %v5537_v33, %v18051_v14  ;;  %5819 = vmatpush2.bf16.msra.mxu0 %v15584_v19  ;;  %5832 = vmatpush1.bf16.msra.mxu1 %v15587_v20  ;;  %v15605_v14 = vld [vmem:[#allocation11 + $0x6f0] ss:$40 sps:$4 sm:$0xff]   ;;  %v15640_v19 = vld [vmem:[#allocation11 + $0x474] ss:$40 sps:$4 sm:$0xff]   ;;  %v15644_v33 = vld [vmem:[#allocation11 + $0x420] ss:$40 sps:$4 sm:$0xff]  }
 0x24d   :  { %5863 = vmatprep.mubr.bf16.mxu1 %v17975_v46  ;;  %v5539_v26 = vpop.f32.mrf.mxu1  ;;  %5820 = vmatprep.subr.bf16.mxu0 %v15592_v22  ;;  %v15643_v20 = vld [vmem:[#allocation11 + $0x514] ss:$40 sps:$4 sm:$0xff]   ;;  %v15638_v22 = vld [vmem:[#allocation11 + $0x470] ss:$40 sps:$4 sm:$0xff]  }
 0x24e   :  { %v5540_v39 = vadd.f32 %v5539_v26, %v18054_v8  ;;  %5833 = vmatprep.subr.bf16.mxu1 %v15595_v24  ;;  %v15641_v24 = vld [vmem:[#allocation11 + $0x510] ss:$40 sps:$4 sm:$0xff]  }
 0x24f   :  { %v5541_v41 = vpop.f32.mrf.mxu1  ;;  %v15650_v26 = vld [vmem:[#allocation11 + $0x3d0] ss:$40 sps:$4 sm:$0xff]  }
 0x250   :  { %5821 = vmatpush2.bf16.msra.mxu0 %v15590_v25  ;;  %5834 = vmatpush1.bf16.msra.mxu1 %v15593_v32  ;;  %v15646_v25 = vld [vmem:[#allocation11 + $0x424] ss:$40 sps:$4 sm:$0xff]  }
 0x251   :  { %v5542_v44 = vpop.f32.mrf.mxu1  ;;  %5835 = vmatprep.subr.bf16.mxu1 %v15598_v35  ;;  %5872 = vmatprep.subr.bf16.mxu0 %v15601_v36  ;;  %v15649_v32 = vld [vmem:[#allocation11 + $0x9c4] ss:$40 sps:$4 sm:$0xff]   ;;  %v15647_v35 = vld [vmem:[#allocation11 + $0x9c0] ss:$40 sps:$4 sm:$0xff]   ;;  %v15652_v36 = vld [vmem:[#allocation11 + $0x3d4] ss:$40 sps:$4 sm:$0xff]  }
 0x252   :  { %v15661_v41 = vld [vmem:[#allocation11 + $0x924] ss:$40 sps:$4 sm:$0xff]   ;;  %v15664_v44 = vld [vmem:[#allocation11 + $0x334] ss:$40 sps:$4 sm:$0xff]  }
 0x253   :  { %v5578_v49 = vpop.f32.mrf.mxu0  ;;  %5823 = vmatmul.mubr.bf16.vlgmr.msra.gmra.mxu0 %v18040_v15 }
 0x254   :  { %v18061_v52 = vadd.f32 %v5578_v49, %v5538_v38  ;;  %5836 = vmatpush1.bf16.msra.mxu1 %v15596_v40  ;;  %5873 = vmatpush1.bf16.msra.mxu0 %v15599_v42  ;;  %v15655_v38 = vld [vmem:[#allocation11 + $0x974] ss:$40 sps:$4 sm:$0xff]   ;;  %v15658_v40 = vld [vmem:[#allocation11 + $0x384] ss:$40 sps:$4 sm:$0xff]   ;;  %v15656_v42 = vld [vmem:[#allocation11 + $0x380] ss:$40 sps:$4 sm:$0xff]  }
 0x255   :  { %5904 = vmatprep.mubr.bf16.mxu0 %v17992_v6  ;;  %v5580_v8 = vpop.f32.mrf.mxu0  ;;  %5837 = vmatprep.subr.bf16.mxu1 %v15604_v9  ;;  %v15659_v9 = vld [vmem:[#allocation11 + $0x920] ss:$40 sps:$4 sm:$0xff]   ;;  %v15670_v49 = vld [vmem:[#allocation11 + $0x2e4] ss:$40 sps:$4 sm:$0xff]  }
 0x256   :  { %v18064_v53 = vadd.f32 %v5580_v8, %v5540_v39  ;;  %5874 = vmatprep.subr.bf16.mxu0 %v15607_v47  ;;  %v15653_v39 = vld [vmem:[#allocation11 + $0x970] ss:$40 sps:$4 sm:$0xff]   ;;  %v15671_v8 = vld [vmem:[#allocation11 + $0x880] ss:$40 sps:$4 sm:$0xff]  }
 0x257   :  { %v5582_v56 = vpop.f32.mrf.mxu0  ;;  %v15665_v47 = vld [vmem:[#allocation11 + $0x8d0] ss:$40 sps:$4 sm:$0xff]  }
 0x258   :  { %5838 = vmatpush1.bf16.msra.mxu1 %v15602_v45  ;;  %5875 = vmatpush1.bf16.msra.mxu0 %v15605_v14  ;;  %v15667_v45 = vld [vmem:[#allocation11 + $0x8d4] ss:$40 sps:$4 sm:$0xff]   ;;  %v15662_v14 = vld [vmem:[#allocation11 + $0x330] ss:$40 sps:$4 sm:$0xff]  }
 0x259   :  { %5839 = vmatprep.subr.bf16.mxu1 %v15610_v27  ;;  %5876 = vmatprep.subr.bf16.mxu0 %v15613_v50  ;;  %v5583_v61 = vpop.f32.mrf.mxu0  ;;  %v15673_v27 = vld [vmem:[#allocation11 + $0x884] ss:$40 sps:$4 sm:$0xff]   ;;  %v15668_v50 = vld [vmem:[#allocation11 + $0x2e0] ss:$40 sps:$4 sm:$0xff]   ;;  %v15674_v56 = vld [vmem:[#allocation11 + $0x290] ss:$40 sps:$4 sm:$0xff]  }
 0x25a   :  { %v15685_v61 = vld [vmem:[#allocation11 + $0xc44] ss:$40 sps:$4 sm:$0xff]  }
 0x25c   :  { %5840 = vmatpush1.bf16.msra.mxu1 %v15608_v55  ;;  %5877 = vmatpush1.bf16.msra.mxu0 %v15611_v54  ;;  %v15676_v55 = vld [vmem:[#allocation11 + $0x294] ss:$40 sps:$4 sm:$0xff]  }
 0x25d   :  { %5841 = vmatprep.subr.bf16.mxu1 %v15616_v59  ;;  %5878 = vmatprep.subr.bf16.mxu0 %v15619_v60  ;;  %v15679_v54 = vld [vmem:[#allocation11 + $0x834] ss:$40 sps:$4 sm:$0xff]   ;;  %v15677_v59 = vld [vmem:[#allocation11 + $0x830] ss:$40 sps:$4 sm:$0xff]   ;;  %v15682_v60 = vld [vmem:[#allocation11 + $0x7e4] ss:$40 sps:$4 sm:$0xff]  }
 0x260   :  { %5842 = vmatpush1.bf16.msra.mxu1 %v15614_v62  ;;  %5879 = vmatpush1.bf16.msra.mxu0 %v15617_v63  ;;  %v15680_v62 = vld [vmem:[#allocation11 + $0x7e0] ss:$40 sps:$4 sm:$0xff]  }
 0x261   :  { %5843 = vmatprep.subr.bf16.mxu1 %v15622_v0  ;;  %5880 = vmatprep.subr.bf16.mxu0 %v15625_v2  ;;  %v15683_v63 = vld [vmem:[#allocation11 + $0xc40] ss:$40 sps:$4 sm:$0xff]   ;;  %v15688_v0 = vld [vmem:[#allocation11 + $0x794] ss:$40 sps:$4 sm:$0xff]  }
 0x262   :  { %v15691_v2 = vld [vmem:[#allocation11 + $0xbf4] ss:$40 sps:$4 sm:$0xff]  }
 0x264   :  { %5844 = vmatpush1.bf16.msra.mxu1 %v15620_v3  ;;  %5881 = vmatpush1.bf16.msra.mxu0 %v15623_v4  ;;  %v15686_v3 = vld [vmem:[#allocation11 + $0x790] ss:$40 sps:$4 sm:$0xff]  }
 0x265   :  { %5845 = vmatprep.subr.bf16.mxu1 %v15628_v5  ;;  %5882 = vmatprep.subr.bf16.mxu0 %v15631_v7  ;;  %v15689_v4 = vld [vmem:[#allocation11 + $0xbf0] ss:$40 sps:$4 sm:$0xff]   ;;  %v15694_v7 = vld [vmem:[#allocation11 + $0xba4] ss:$40 sps:$4 sm:$0xff]  }
 0x268   :  { %5846 = vmatpush1.bf16.msra.mxu1 %v15626_v10  ;;  %5883 = vmatpush1.bf16.msra.mxu0 %v15629_v13  ;;  %v15697_v10 = vld [vmem:[#allocation11 + $0x1144] ss:$40 sps:$4 sm:$0xff]  }
 0x269   :  { %5847 = vmatprep.subr.bf16.mxu1 %v15634_v30  ;;  %5884 = vmatprep.subr.bf16.mxu0 %v15637_v16 }
 0x26c   :  { %5848 = vmatpush2.bf16.msra.mxu1 %v15632_v17  ;;  %5885 = vmatpush1.bf16.msra.mxu0 %v15635_v18  ;;  %v15692_v17 = vld [vmem:[#allocation11 + $0xba0] ss:$40 sps:$4 sm:$0xff]  }
 0x26d   :  { %5849 = vmatprep.subr.bf16.mxu1 %v15640_v19  ;;  %5886 = vmatprep.subr.bf16.mxu0 %v15643_v20  ;;  %v15695_v19 = vld [vmem:[#allocation11 + $0x1140] ss:$40 sps:$4 sm:$0xff]   ;;  %v15700_v20 = vld [vmem:[#allocation11 + $0xb54] ss:$40 sps:$4 sm:$0xff]  }
 0x270   :  { %5850 = vmatpush2.bf16.msra.mxu1 %v15638_v22  ;;  %5887 = vmatpush1.bf16.msra.mxu0 %v15641_v24  ;;  %v15703_v22 = vld [vmem:[#allocation11 + $0x10f4] ss:$40 sps:$4 sm:$0xff]  }
 0x271   :  { %5851 = vmatprep.subr.bf16.mxu1 %v15646_v25  ;;  %5888 = vmatprep.subr.bf16.mxu0 %v15649_v32  ;;  %v15701_v25 = vld [vmem:[#allocation11 + $0x10f0] ss:$40 sps:$4 sm:$0xff]  }
 0x274   :  { %5852 = vmatpush2.bf16.msra.mxu1 %v15644_v33  ;;  %5889 = vmatpush2.bf16.msra.mxu0 %v15647_v35  ;;  %v15706_v33 = vld [vmem:[#allocation11 + $0xb04] ss:$40 sps:$4 sm:$0xff]  }
 0x275   :  { %5853 = vmatprep.subr.bf16.mxu1 %v15652_v36  ;;  %5890 = vmatprep.subr.bf16.mxu0 %v15655_v38  ;;  %v15704_v36 = vld [vmem:[#allocation11 + $0xb00] ss:$40 sps:$4 sm:$0xff]  }
 0x276   :  { %v15707_v38 = vld [vmem:[#allocation11 + $0x10a0] ss:$40 sps:$4 sm:$0xff]  }
 0x278   :  { %5854 = vmatpush2.bf16.msra.mxu1 %v15650_v26  ;;  %5891 = vmatpush2.bf16.msra.mxu0 %v15653_v39  ;;  %v15712_v39 = vld [vmem:[#allocation11 + $0xab4] ss:$40 sps:$4 sm:$0xff]  }
 0x279   :  { %5855 = vmatprep.subr.bf16.mxu1 %v15658_v40  ;;  %5892 = vmatprep.subr.bf16.mxu0 %v15661_v41  ;;  %v15715_v40 = vld [vmem:[#allocation11 + $0x1054] ss:$40 sps:$4 sm:$0xff]  }
 0x27c   :  { %5856 = vmatpush2.bf16.msra.mxu1 %v15656_v42  ;;  %5893 = vmatpush2.bf16.msra.mxu0 %v15659_v9  ;;  %v15710_v42 = vld [vmem:[#allocation11 + $0xab0] ss:$40 sps:$4 sm:$0xff]  }
 0x27d   :  { %5857 = vmatprep.subr.bf16.mxu1 %v15664_v44  ;;  %5894 = vmatprep.subr.bf16.mxu0 %v15667_v45  ;;  %v15713_v9 = vld [vmem:[#allocation11 + $0x1050] ss:$40 sps:$4 sm:$0xff]   ;;  %v15718_v44 = vld [vmem:[#allocation11 + $0xa64] ss:$40 sps:$4 sm:$0xff]  }
 0x27e   :  { %v15721_v45 = vld [vmem:[#allocation11 + $0x1004] ss:$40 sps:$4 sm:$0xff]  }
 0x280   :  { %5858 = vmatpush2.bf16.msra.mxu1 %v15662_v14  ;;  %5895 = vmatpush2.bf16.msra.mxu0 %v15665_v47  ;;  %v15716_v14 = vld [vmem:[#allocation11 + $0xa60] ss:$40 sps:$4 sm:$0xff]  }
 0x281   :  { %5859 = vmatprep.subr.bf16.mxu1 %v15670_v49  ;;  %5896 = vmatprep.subr.bf16.mxu0 %v15673_v27  ;;  %v15719_v47 = vld [vmem:[#allocation11 + $0x1000] ss:$40 sps:$4 sm:$0xff]   ;;  %v15724_v49 = vld [vmem:[#allocation11 + $0xa14] ss:$40 sps:$4 sm:$0xff]  }
 0x282   :  { %v15727_v27 = vld [vmem:[#allocation11 + $0xfb4] ss:$40 sps:$4 sm:$0xff]  }
 0x284   :  { %5860 = vmatpush2.bf16.msra.mxu1 %v15668_v50  ;;  %5897 = vmatpush2.bf16.msra.mxu0 %v15671_v8  ;;  %v15722_v50 = vld [vmem:[#allocation11 + $0xa10] ss:$40 sps:$4 sm:$0xff]  }
 0x285   :  { %5861 = vmatprep.subr.bf16.mxu1 %v15676_v55  ;;  %5898 = vmatprep.subr.bf16.mxu0 %v15679_v54  ;;  %v15725_v8 = vld [vmem:[#allocation11 + $0xfb0] ss:$40 sps:$4 sm:$0xff]   ;;  %v15730_v55 = vld [vmem:[#allocation11 + $0xec4] ss:$40 sps:$4 sm:$0xff]  }
 0x286   :  { %v15733_v54 = vld [vmem:[#allocation11 + $0xf64] ss:$40 sps:$4 sm:$0xff]  }
 0x288   :  { %5862 = vmatpush2.bf16.msra.mxu1 %v15674_v56  ;;  %5899 = vmatpush2.bf16.msra.mxu0 %v15677_v59  ;;  %v15728_v56 = vld [vmem:[#allocation11 + $0xec0] ss:$40 sps:$4 sm:$0xff]  }
 0x289   :  { %5900 = vmatprep.subr.bf16.mxu0 %v15682_v60  ;;  %5913 = vmatprep.subr.bf16.mxu1 %v15685_v61  ;;  %v15731_v59 = vld [vmem:[#allocation11 + $0xf60] ss:$40 sps:$4 sm:$0xff]   ;;  %v15736_v60 = vld [vmem:[#allocation11 + $0xe74] ss:$40 sps:$4 sm:$0xff]  }
 0x28a   :  { %v15739_v61 = vld [vmem:[#allocation11 + $0xf14] ss:$40 sps:$4 sm:$0xff]  }
 0x28b   :  { %v5619_v5 = vpop.f32.mrf.mxu1  ;;  %5864 = vmatmul.mubr.bf16.vlgmr.msra.gmra.mxu1 %v17979_v48 }
 0x28c   :  { %v18068_v13 = vadd.f32 %v5619_v5, %v18061_v52  ;;  %5901 = vmatpush2.bf16.msra.mxu0 %v15680_v62  ;;  %5914 = vmatpush1.bf16.msra.mxu1 %v15683_v63  ;;  %v15698_v52 = vld [vmem:[#allocation11 + $0xb50] ss:$40 sps:$4 sm:$0xff]   ;;  %v15748_v5 = vld [vmem:[#allocation11 + $0xdd4] ss:$40 sps:$4 sm:$0xff]  }
 0x28d   :  { %5945 = vmatprep.mubr.bf16.mxu1 %v18003_v23  ;;  %v5621_v30 = vpop.f32.mrf.mxu1  ;;  %5902 = vmatprep.subr.bf16.mxu0 %v15688_v0  ;;  %v15734_v62 = vld [vmem:[#allocation11 + $0xe70] ss:$40 sps:$4 sm:$0xff]   ;;  %v15742_v0 = vld [vmem:[#allocation11 + $0xe24] ss:$40 sps:$4 sm:$0xff]  }
 0x28e   :  { %v18072_v16 = vadd.f32 %v5621_v30, %v18064_v53  ;;  %5915 = vmatprep.subr.bf16.mxu1 %v15691_v2  ;;  %v15709_v53 = vld [vmem:[#allocation11 + $0x10a4] ss:$40 sps:$4 sm:$0xff]   ;;  %v15737_v63 = vld [vmem:[#allocation11 + $0xf10] ss:$40 sps:$4 sm:$0xff]  }
 0x28f   :  { %v5623_v18 = vpop.f32.mrf.mxu1  ;;  %v15745_v2 = vld [vmem:[#allocation11 + $0x13c4] ss:$40 sps:$4 sm:$0xff]   ;;  %v15749_v30 = vld [vmem:[#allocation11 + $0x1370] ss:$40 sps:$4 sm:$0xff]  }
 0x290   :  { %5903 = vmatpush2.bf16.msra.mxu0 %v15686_v3  ;;  %5916 = vmatpush1.bf16.msra.mxu1 %v15689_v4  ;;  %v15740_v3 = vld [vmem:[#allocation11 + $0xe20] ss:$40 sps:$4 sm:$0xff]   ;;  %v15757_v18 = vld [vmem:[#allocation11 + $0x1324] ss:$40 sps:$4 sm:$0xff]  }
 0x291   :  { %v5624_v24 = vpop.f32.mrf.mxu1  ;;  %5917 = vmatprep.subr.bf16.mxu1 %v15694_v7  ;;  %5954 = vmatprep.subr.bf16.mxu0 %v15697_v10  ;;  %v15743_v4 = vld [vmem:[#allocation11 + $0x13c0] ss:$40 sps:$4 sm:$0xff]   ;;  %v15751_v7 = vld [vmem:[#allocation11 + $0x1374] ss:$40 sps:$4 sm:$0xff]   ;;  %v15746_v10 = vld [vmem:[#allocation11 + $0xdd0] ss:$40 sps:$4 sm:$0xff]  }
 0x292   :  { %v15763_v24 = vld [vmem:[#allocation11 + $0x12d4] ss:$40 sps:$4 sm:$0xff]  }
 0x293   :  { %v18074_v32 = vpop.f32.mrf.mxu0  ;;  %5905 = vmatmul.mubr.bf16.vlgmr.msra.gmra.mxu0 %v17990_v1 }
 0x294   :  { %5918 = vmatpush1.bf16.msra.mxu1 %v15692_v17  ;;  %5955 = vmatpush1.bf16.msra.mxu0 %v15695_v19  ;;  %v15754_v17 = vld [vmem:[#allocation11 + $0xd84] ss:$40 sps:$4 sm:$0xff]   ;;  %v15752_v19 = vld [vmem:[#allocation11 + $0xd80] ss:$40 sps:$4 sm:$0xff]  }
 0x295   :  { %5986 = vmatprep.mubr.bf16.mxu0 %v17999_v11  ;;  %v18078_v35 = vpop.f32.mrf.mxu0  ;;  %5919 = vmatprep.subr.bf16.mxu1 %v15700_v20  ;;  %v15755_v20 = vld [vmem:[#allocation11 + $0x1320] ss:$40 sps:$4 sm:$0xff]  }
 0x296   :  { %5956 = vmatprep.subr.bf16.mxu0 %v15703_v22  ;;  %v15760_v22 = vld [vmem:[#allocation11 + $0xd34] ss:$40 sps:$4 sm:$0xff]  }
 0x297   :  { %v5664_v26 = vpop.f32.mrf.mxu0 }
 0x298   :  { %5920 = vmatpush1.bf16.msra.mxu1 %v15698_v52  ;;  %5957 = vmatpush1.bf16.msra.mxu0 %v15701_v25  ;;  %v15758_v52 = vld [vmem:[#allocation11 + $0xd30] ss:$40 sps:$4 sm:$0xff]   ;;  %v15772_v26 = vld [vmem:[#allocation11 + $0xc94] ss:$40 sps:$4 sm:$0xff]  }
 0x299   :  { %v5665_v41 = vpop.f32.mrf.mxu0  ;;  %5921 = vmatprep.subr.bf16.mxu1 %v15706_v33  ;;  %5958 = vmatprep.subr.bf16.mxu0 %v15709_v53  ;;  %v15761_v25 = vld [vmem:[#allocation11 + $0x12d0] ss:$40 sps:$4 sm:$0xff]   ;;  %v15766_v33 = vld [vmem:[#allocation11 + $0xce4] ss:$40 sps:$4 sm:$0xff]  }
 0x29a   :  { %v15769_v53 = vld [vmem:[#allocation11 + $0x1284] ss:$40 sps:$4 sm:$0xff]   ;;  %v15773_v41 = vld [vmem:[#allocation11 + $0x1230] ss:$40 sps:$4 sm:$0xff]  }
 0x29c   :  { %5922 = vmatpush1.bf16.msra.mxu1 %v15704_v36  ;;  %5959 = vmatpush1.bf16.msra.mxu0 %v15707_v38  ;;  %v15764_v36 = vld [vmem:[#allocation11 + $0xce0] ss:$40 sps:$4 sm:$0xff]  }
 0x29d   :  { %5923 = vmatprep.subr.bf16.mxu1 %v15712_v39  ;;  %5960 = vmatprep.subr.bf16.mxu0 %v15715_v40  ;;  %v15767_v38 = vld [vmem:[#allocation11 + $0x1280] ss:$40 sps:$4 sm:$0xff]   ;;  %v15775_v39 = vld [vmem:[#allocation11 + $0x1234] ss:$40 sps:$4 sm:$0xff]   ;;  %v15770_v40 = vld [vmem:[#allocation11 + $0xc90] ss:$40 sps:$4 sm:$0xff]  }
 0x2a0   :  { %5924 = vmatpush1.bf16.msra.mxu1 %v15710_v42  ;;  %5961 = vmatpush1.bf16.msra.mxu0 %v15713_v9  ;;  %v15778_v42 = vld [vmem:[#allocation11 + $0x11e4] ss:$40 sps:$4 sm:$0xff]  }
 0x2a1   :  { %5925 = vmatprep.subr.bf16.mxu1 %v15718_v44  ;;  %5962 = vmatprep.subr.bf16.mxu0 %v15721_v45  ;;  %v15781_v9 = vld [vmem:[#allocation11 + $0x1644] ss:$40 sps:$4 sm:$0xff]  }
 0x2a2   :  { %v17596_v44 = vld [vmem:[#allocation13] sm:$0xff] }
 0x2a3   :  { %v1382_v45 = vrot.slane %v17596_v44, %v17965_v34 }
 0x2a4   :  { %5926 = vmatpush1.bf16.msra.mxu1 %v15716_v14  ;;  %5963 = vmatpush1.bf16.msra.mxu0 %v15719_v47  ;;  %v15776_v14 = vld [vmem:[#allocation11 + $0x11e0] ss:$40 sps:$4 sm:$0xff]  }
 0x2a5   :  { %5927 = vmatprep.subr.bf16.mxu1 %v15724_v49  ;;  %5964 = vmatprep.subr.bf16.mxu0 %v15727_v27  ;;  %v15779_v47 = vld [vmem:[#allocation11 + $0x1640] ss:$40 sps:$4 sm:$0xff]   ;;  %v15784_v49 = vld [vmem:[#allocation11 + $0x1194] ss:$40 sps:$4 sm:$0xff]   ;;  %v1386_v27 = vrot.slane %v17596_v44, %v17968_v37 }
 0x2a6   :  { %v15823_v44 = vld [vmem:[#allocation11 + $0xbc] ss:$40 sps:$4 sm:$0xff]  }
 0x2a8   :  { %5928 = vmatpush1.bf16.msra.mxu1 %v15722_v50  ;;  %5965 = vmatpush1.bf16.msra.mxu0 %v15725_v8  ;;  %v15787_v50 = vld [vmem:[#allocation11 + $0x15f4] ss:$40 sps:$4 sm:$0xff]   ;;  %v5661_v8 = vadd.f32 %v18074_v32, %v1382_v45  ;;  %v15818_v45 = vld [vmem:[#allocation11 + $0x1410] ss:$40 sps:$4 sm:$0xff]  }
 0x2a9   :  { %5929 = vmatprep.subr.bf16.mxu1 %v15730_v55  ;;  %5966 = vmatprep.subr.bf16.mxu0 %v15733_v54  ;;  %v15782_v55 = vld [vmem:[#allocation11 + $0x1190] ss:$40 sps:$4 sm:$0xff]  }
 0x2aa   :  { %v15785_v54 = vld [vmem:[#allocation11 + $0x15f0] ss:$40 sps:$4 sm:$0xff]  }
 0x2ac   :  { %5930 = vmatpush2.bf16.msra.mxu1 %v15728_v56  ;;  %5967 = vmatpush1.bf16.msra.mxu0 %v15731_v59  ;;  %v15790_v59 = vld [vmem:[#allocation11 + $0x15a4] ss:$40 sps:$4 sm:$0xff]  }
 0x2ad   :  { %5931 = vmatprep.subr.bf16.mxu1 %v15736_v60  ;;  %5968 = vmatprep.subr.bf16.mxu0 %v15739_v61  ;;  %v15793_v60 = vld [vmem:[#allocation11 + $0x24c] ss:$40 sps:$4 sm:$0xff]   ;;  %v5663_v61 = vadd.f32 %v18078_v35, %v1386_v27  ;;  %v15794_v35 = vld [vmem:[#allocation11 + $0x1550] ss:$40 sps:$4 sm:$0xff]   ;;  %v15824_v27 = vld [vmem:[#allocation11 + $0x18c0] ss:$40 sps:$4 sm:$0xff]  }
 0x2b0   :  { %5932 = vmatpush2.bf16.msra.mxu1 %v15734_v62  ;;  %5969 = vmatpush1.bf16.msra.mxu0 %v15737_v63 }
 0x2b1   :  { %5933 = vmatprep.subr.bf16.mxu1 %v15742_v0  ;;  %5970 = vmatprep.subr.bf16.mxu0 %v15745_v2  ;;  %v15788_v2 = vld [vmem:[#allocation11 + $0x15a0] ss:$40 sps:$4 sm:$0xff]  }
 0x2b4   :  { %5934 = vmatpush2.bf16.msra.mxu1 %v15740_v3  ;;  %5971 = vmatpush2.bf16.msra.mxu0 %v15743_v4  ;;  %v15791_v3 = vld [vmem:[#allocation11 + $0x248] ss:$40 sps:$4 sm:$0xff]   ;;  %v15796_v4 = vld [vmem:[#allocation11 + $0x1554] ss:$40 sps:$4 sm:$0xff]  }
 0x2b5   :  { %5935 = vmatprep.subr.bf16.mxu1 %v15748_v5  ;;  %5972 = vmatprep.subr.bf16.mxu0 %v15751_v7  ;;  %v15799_v5 = vld [vmem:[#allocation11 + $0x1fc] ss:$40 sps:$4 sm:$0xff]  }
 0x2b8   :  { %5936 = vmatpush2.bf16.msra.mxu1 %v15746_v10  ;;  %5973 = vmatpush2.bf16.msra.mxu0 %v15749_v30  ;;  %v15797_v10 = vld [vmem:[#allocation11 + $0x1f8] ss:$40 sps:$4 sm:$0xff]  }
 0x2b9   :  { %5937 = vmatprep.subr.bf16.mxu1 %v15754_v17  ;;  %5974 = vmatprep.subr.bf16.mxu0 %v15757_v18  ;;  %v15802_v17 = vld [vmem:[#allocation11 + $0x1504] ss:$40 sps:$4 sm:$0xff]  }
 0x2ba   :  { %v15805_v18 = vld [vmem:[#allocation11 + $0x1ac] ss:$40 sps:$4 sm:$0xff]  }
 0x2bc   :  { %5938 = vmatpush2.bf16.msra.mxu1 %v15752_v19  ;;  %5975 = vmatpush2.bf16.msra.mxu0 %v15755_v20 }
 0x2bd   :  { %5939 = vmatprep.subr.bf16.mxu1 %v15760_v22  ;;  %5976 = vmatprep.subr.bf16.mxu0 %v15763_v24 }
 0x2c0   :  { %5940 = vmatpush2.bf16.msra.mxu1 %v15758_v52  ;;  %5977 = vmatpush2.bf16.msra.mxu0 %v15761_v25  ;;  %v15800_v52 = vld [vmem:[#allocation11 + $0x1500] ss:$40 sps:$4 sm:$0xff]  }
 0x2c1   :  { %5941 = vmatprep.subr.bf16.mxu1 %v15766_v33  ;;  %5978 = vmatprep.subr.bf16.mxu0 %v15769_v53  ;;  %v15803_v25 = vld [vmem:[#allocation11 + $0x1a8] ss:$40 sps:$4 sm:$0xff]   ;;  %v15808_v53 = vld [vmem:[#allocation11 + $0x14b4] ss:$40 sps:$4 sm:$0xff]  }
 0x2c4   :  { %5942 = vmatpush2.bf16.msra.mxu1 %v15764_v36  ;;  %5979 = vmatpush2.bf16.msra.mxu0 %v15767_v38  ;;  %v15811_v36 = vld [vmem:[#allocation11 + $0x15c] ss:$40 sps:$4 sm:$0xff]   ;;  %v15806_v38 = vld [vmem:[#allocation11 + $0x14b0] ss:$40 sps:$4 sm:$0xff]  }
 0x2c5   :  { %5943 = vmatprep.subr.bf16.mxu1 %v15772_v26  ;;  %5980 = vmatprep.subr.bf16.mxu0 %v15775_v39  ;;  %v15809_v26 = vld [vmem:[#allocation11 + $0x158] ss:$40 sps:$4 sm:$0xff]   ;;  %v15814_v39 = vld [vmem:[#allocation11 + $0x1464] ss:$40 sps:$4 sm:$0xff]  }
 0x2c8   :  { %5944 = vmatpush2.bf16.msra.mxu1 %v15770_v40  ;;  %5981 = vmatpush2.bf16.msra.mxu0 %v15773_v41  ;;  %v15817_v40 = vld [vmem:[#allocation11 + $0x10c] ss:$40 sps:$4 sm:$0xff]   ;;  %v15812_v41 = vld [vmem:[#allocation11 + $0x1460] ss:$40 sps:$4 sm:$0xff]  }
 0x2c9   :  { %5982 = vmatprep.subr.bf16.mxu0 %v15778_v42  ;;  %5995 = vmatprep.subr.bf16.mxu1 %v15781_v9  ;;  %v15815_v42 = vld [vmem:[#allocation11 + $0x108] ss:$40 sps:$4 sm:$0xff]   ;;  %v15820_v9 = vld [vmem:[#allocation11 + $0x1414] ss:$40 sps:$4 sm:$0xff]  }
 0x2cb   :  { %v5701_v56 = vpop.f32.mrf.mxu1  ;;  %5946 = vmatmul.mubr.bf16.vlgmr.msra.gmra.mxu1 %v18027_v31 }
 0x2cc   :  { %v5702_v62 = vadd.f32 %v5701_v56, %v5661_v8  ;;  %5983 = vmatpush2.bf16.msra.mxu0 %v15776_v14  ;;  %5996 = vmatpush1.bf16.msra.mxu1 %v15779_v47  ;;  %v15821_v14 = vld [vmem:[#allocation11 + $0xb8] ss:$40 sps:$4 sm:$0xff]   ;;  %v15826_v47 = vld [vmem:[#allocation11 + $0x18c4] ss:$40 sps:$4 sm:$0xff]   ;;  %v15832_v8 = vld [vmem:[#allocation11 + $0x1874] ss:$40 sps:$4 sm:$0xff]  }
 0x2cd   :  { %6027 = vmatprep.mubr.bf16.mxu1 %v18029_v51  ;;  %v5703_v63 = vpop.f32.mrf.mxu1  ;;  %5984 = vmatprep.subr.bf16.mxu0 %v15784_v49  ;;  %v15829_v49 = vld [vmem:[#allocation11 + $0x6c] ss:$40 sps:$4 sm:$0xff]   ;;  %v15833_v56 = vld [vmem:[#allocation11 + $0x18] ss:$40 sps:$4 sm:$0xff]  }
 0x2ce   :  { %v5704_v0 = vadd.f32 %v5703_v63, %v5663_v61  ;;  %5997 = vmatprep.subr.bf16.mxu1 %v15787_v50  ;;  %v15827_v50 = vld [vmem:[#allocation11 + $0x68] ss:$40 sps:$4 sm:$0xff]   ;;  %v15844_v63 = vld [vmem:[#allocation11 + $0x17d4] ss:$40 sps:$4 sm:$0xff]  }
 0x2cf   :  { %v5705_v32 = vpop.f32.mrf.mxu1  ;;  %v15836_v61 = vld [vmem:[#allocation11 + $0x1820] ss:$40 sps:$4 sm:$0xff]  }
 0x2d0   :  { %5985 = vmatpush2.bf16.msra.mxu0 %v15782_v55  ;;  %5998 = vmatpush1.bf16.msra.mxu1 %v15785_v54  ;;  %v15835_v55 = vld [vmem:[#allocation11 + $0x1c] ss:$40 sps:$4 sm:$0xff]   ;;  %v15830_v54 = vld [vmem:[#allocation11 + $0x1870] ss:$40 sps:$4 sm:$0xff]  }
 0x2d1   :  { %v5706_v7 = vpop.f32.mrf.mxu1  ;;  %5999 = vmatprep.subr.bf16.mxu1 %v15790_v59  ;;  %6036 = vmatprep.subr.bf16.mxu0 %v15793_v60  ;;  %v15838_v59 = vld [vmem:[#allocation11 + $0x1824] ss:$40 sps:$4 sm:$0xff]   ;;  %v15845_v32 = vld [vmem:[#allocation11 + $0x478] ss:$40 sps:$4 sm:$0xff]  }
 0x2d2   :  { %v15841_v60 = vld [vmem:[#allocation11 + $0x4cc] ss:$40 sps:$4 sm:$0xff]   ;;  %v15851_v7 = vld [vmem:[#allocation11 + $0x428] ss:$40 sps:$4 sm:$0xff]  }
 0x2d3   :  { %v5742_v30 = vpop.f32.mrf.mxu0  ;;  %5987 = vmatmul.mubr.bf16.vlgmr.msra.gmra.mxu0 %v18033_v58 }
 0x2d4   :  { %v18087_v19 = vadd.f32 %v5742_v30, %v5702_v62  ;;  %6000 = vmatpush1.bf16.msra.mxu1 %v15788_v2  ;;  %6037 = vmatpush1.bf16.msra.mxu0 %v15791_v3  ;;  %v15839_v62 = vld [vmem:[#allocation11 + $0x4c8] ss:$40 sps:$4 sm:$0xff]   ;;  %v15850_v3 = vld [vmem:[#allocation11 + $0x1784] ss:$40 sps:$4 sm:$0xff]  }
 0x2d5   :  { %6068 = vmatprep.mubr.bf16.mxu0 %v17975_v46  ;;  %v5744_v20 = vpop.f32.mrf.mxu0  ;;  %6001 = vmatprep.subr.bf16.mxu1 %v15796_v4  ;;  %v15842_v2 = vld [vmem:[#allocation11 + $0x17d0] ss:$40 sps:$4 sm:$0xff]   ;;  %v15853_v4 = vld [vmem:[#allocation11 + $0x42c] ss:$40 sps:$4 sm:$0xff]  }
 0x2d6   :  { %v18090_v22 = vadd.f32 %v5744_v20, %v5704_v0  ;;  %6038 = vmatprep.subr.bf16.mxu0 %v15799_v5  ;;  %v15847_v0 = vld [vmem:[#allocation11 + $0x47c] ss:$40 sps:$4 sm:$0xff]   ;;  %v15848_v5 = vld [vmem:[#allocation11 + $0x1780] ss:$40 sps:$4 sm:$0xff]   ;;  %v15854_v30 = vld [vmem:[#allocation11 + $0x1730] ss:$40 sps:$4 sm:$0xff]  }
 0x2d7   :  { %v5746_v24 = vpop.f32.mrf.mxu0  ;;  %v15865_v20 = vld [vmem:[#allocation11 + $0x38c] ss:$40 sps:$4 sm:$0xff]  }
 0x2d8   :  { %6002 = vmatpush1.bf16.msra.mxu1 %v15794_v35  ;;  %6039 = vmatpush1.bf16.msra.mxu0 %v15797_v10  ;;  %v15856_v35 = vld [vmem:[#allocation11 + $0x1734] ss:$40 sps:$4 sm:$0xff]   ;;  %v15860_v24 = vld [vmem:[#allocation11 + $0x16e0] ss:$40 sps:$4 sm:$0xff]  }
 0x2d9   :  { %v5747_v33 = vpop.f32.mrf.mxu0  ;;  %6003 = vmatprep.subr.bf16.mxu1 %v15802_v17  ;;  %6040 = vmatprep.subr.bf16.mxu0 %v15805_v18  ;;  %v15859_v10 = vld [vmem:[#allocation11 + $0x3dc] ss:$40 sps:$4 sm:$0xff]   ;;  %v15857_v17 = vld [vmem:[#allocation11 + $0x3d8] ss:$40 sps:$4 sm:$0xff]  }
 0x2da   :  { %v15862_v18 = vld [vmem:[#allocation11 + $0x16e4] ss:$40 sps:$4 sm:$0xff]  }
 0x2db   :  { %v15871_v33 = vld [vmem:[#allocation11 + $0x33c] ss:$40 sps:$4 sm:$0xff]  }
 0x2dc   :  { %6004 = vmatpush1.bf16.msra.mxu1 %v15800_v52  ;;  %6041 = vmatpush1.bf16.msra.mxu0 %v15803_v25  ;;  %v15863_v52 = vld [vmem:[#allocation11 + $0x388] ss:$40 sps:$4 sm:$0xff]   ;;  %v15868_v25 = vld [vmem:[#allocation11 + $0x1694] ss:$40 sps:$4 sm:$0xff]  }
 0x2dd   :  { %6005 = vmatprep.subr.bf16.mxu1 %v15808_v53  ;;  %6042 = vmatprep.subr.bf16.mxu0 %v15811_v36  ;;  %v15866_v53 = vld [vmem:[#allocation11 + $0x1690] ss:$40 sps:$4 sm:$0xff]  }
 0x2de   :  { %v15869_v36 = vld [vmem:[#allocation11 + $0x338] ss:$40 sps:$4 sm:$0xff]  }
 0x2e0   :  { %6006 = vmatpush1.bf16.msra.mxu1 %v15806_v38  ;;  %6043 = vmatpush1.bf16.msra.mxu0 %v15809_v26  ;;  %v15874_v38 = vld [vmem:[#allocation11 + $0x2ec] ss:$40 sps:$4 sm:$0xff]  }
 0x2e1   :  { %6007 = vmatprep.subr.bf16.mxu1 %v15814_v39  ;;  %6044 = vmatprep.subr.bf16.mxu0 %v15817_v40  ;;  %v15877_v26 = vld [vmem:[#allocation11 + $0x74c] ss:$40 sps:$4 sm:$0xff]   ;;  %v15872_v39 = vld [vmem:[#allocation11 + $0x2e8] ss:$40 sps:$4 sm:$0xff]  }
 0x2e2   :  { %v15875_v40 = vld [vmem:[#allocation11 + $0x748] ss:$40 sps:$4 sm:$0xff]  }
 0x2e4   :  { %6008 = vmatpush1.bf16.msra.mxu1 %v15812_v41  ;;  %6045 = vmatpush1.bf16.msra.mxu0 %v15815_v42  ;;  %v15880_v41 = vld [vmem:[#allocation11 + $0x29c] ss:$40 sps:$4 sm:$0xff]  }
 0x2e5   :  { %6009 = vmatprep.subr.bf16.mxu1 %v15820_v9  ;;  %6046 = vmatprep.subr.bf16.mxu0 %v15823_v44  ;;  %v15883_v42 = vld [vmem:[#allocation11 + $0x6fc] ss:$40 sps:$4 sm:$0xff]   ;;  %v15878_v9 = vld [vmem:[#allocation11 + $0x298] ss:$40 sps:$4 sm:$0xff]  }
 0x2e6   :  { %v15881_v44 = vld [vmem:[#allocation11 + $0x6f8] ss:$40 sps:$4 sm:$0xff]  }
 0x2e8   :  { %6010 = vmatpush1.bf16.msra.mxu1 %v15818_v45  ;;  %6047 = vmatpush1.bf16.msra.mxu0 %v15821_v14  ;;  %v15886_v14 = vld [vmem:[#allocation11 + $0x6ac] ss:$40 sps:$4 sm:$0xff]  }
 0x2e9   :  { %6011 = vmatprep.subr.bf16.mxu1 %v15826_v47  ;;  %6048 = vmatprep.subr.bf16.mxu0 %v15829_v49  ;;  %v15889_v47 = vld [vmem:[#allocation11 + $0xc4c] ss:$40 sps:$4 sm:$0xff]  }
 0x2ec   :  { %6012 = vmatpush2.bf16.msra.mxu1 %v15824_v27  ;;  %6049 = vmatpush1.bf16.msra.mxu0 %v15827_v50 }
 0x2ed   :  { %6013 = vmatprep.subr.bf16.mxu1 %v15832_v8  ;;  %6050 = vmatprep.subr.bf16.mxu0 %v15835_v55  ;;  %v15884_v8 = vld [vmem:[#allocation11 + $0x6a8] ss:$40 sps:$4 sm:$0xff]  }
 0x2f0   :  { %6014 = vmatpush2.bf16.msra.mxu1 %v15830_v54  ;;  %6051 = vmatpush1.bf16.msra.mxu0 %v15833_v56  ;;  %v15887_v54 = vld [vmem:[#allocation11 + $0xc48] ss:$40 sps:$4 sm:$0xff]   ;;  %v15892_v56 = vld [vmem:[#allocation11 + $0x65c] ss:$40 sps:$4 sm:$0xff]  }
 0x2f1   :  { %6015 = vmatprep.subr.bf16.mxu1 %v15838_v59  ;;  %6052 = vmatprep.subr.bf16.mxu0 %v15841_v60  ;;  %v15895_v59 = vld [vmem:[#allocation11 + $0xbfc] ss:$40 sps:$4 sm:$0xff]  }
 0x2f4   :  { %6016 = vmatpush2.bf16.msra.mxu1 %v15836_v61  ;;  %6053 = vmatpush2.bf16.msra.mxu0 %v15839_v62  ;;  %v15893_v61 = vld [vmem:[#allocation11 + $0xbf8] ss:$40 sps:$4 sm:$0xff]  }
 0x2f5   :  { %6017 = vmatprep.subr.bf16.mxu1 %v15844_v63  ;;  %6054 = vmatprep.subr.bf16.mxu0 %v15847_v0  ;;  %v15898_v63 = vld [vmem:[#allocation11 + $0x60c] ss:$40 sps:$4 sm:$0xff]  }
 0x2f6   :  { %v15901_v0 = vld [vmem:[#allocation11 + $0xbac] ss:$40 sps:$4 sm:$0xff]  }
 0x2f8   :  { %6018 = vmatpush2.bf16.msra.mxu1 %v15842_v2  ;;  %6055 = vmatpush2.bf16.msra.mxu0 %v15845_v32 }
 0x2f9   :  { %6019 = vmatprep.subr.bf16.mxu1 %v15850_v3  ;;  %6056 = vmatprep.subr.bf16.mxu0 %v15853_v4  ;;  %v15896_v4 = vld [vmem:[#allocation11 + $0x608] ss:$40 sps:$4 sm:$0xff]  }
 0x2fc   :  { %6020 = vmatpush2.bf16.msra.mxu1 %v15848_v5  ;;  %6057 = vmatpush2.bf16.msra.mxu0 %v15851_v7  ;;  %v15899_v5 = vld [vmem:[#allocation11 + $0xba8] ss:$40 sps:$4 sm:$0xff]  }
 0x2fd   :  { %6021 = vmatprep.subr.bf16.mxu1 %v15856_v35  ;;  %6058 = vmatprep.subr.bf16.mxu0 %v15859_v10  ;;  %v15904_v35 = vld [vmem:[#allocation11 + $0x5bc] ss:$40 sps:$4 sm:$0xff]  }
 0x2fe   :  { %v15907_v10 = vld [vmem:[#allocation11 + $0xb5c] ss:$40 sps:$4 sm:$0xff]  }
 0x300   :  { %6022 = vmatpush2.bf16.msra.mxu1 %v15854_v30  ;;  %6059 = vmatpush2.bf16.msra.mxu0 %v15857_v17  ;;  %v15902_v30 = vld [vmem:[#allocation11 + $0x5b8] ss:$40 sps:$4 sm:$0xff]  }
 0x301   :  { %6023 = vmatprep.subr.bf16.mxu1 %v15862_v18  ;;  %6060 = vmatprep.subr.bf16.mxu0 %v15865_v20  ;;  %v15905_v17 = vld [vmem:[#allocation11 + $0xb58] ss:$40 sps:$4 sm:$0xff]   ;;  %v15910_v18 = vld [vmem:[#allocation11 + $0x56c] ss:$40 sps:$4 sm:$0xff]  }
 0x302   :  { %v15913_v20 = vld [vmem:[#allocation11 + $0xb0c] ss:$40 sps:$4 sm:$0xff]  }
 0x304   :  { %6024 = vmatpush2.bf16.msra.mxu1 %v15860_v24  ;;  %6061 = vmatpush2.bf16.msra.mxu0 %v15863_v52  ;;  %v15908_v24 = vld [vmem:[#allocation11 + $0x568] ss:$40 sps:$4 sm:$0xff]  }
 0x305   :  { %6025 = vmatprep.subr.bf16.mxu1 %v15868_v25  ;;  %6062 = vmatprep.subr.bf16.mxu0 %v15871_v33  ;;  %v15911_v52 = vld [vmem:[#allocation11 + $0xb08] ss:$40 sps:$4 sm:$0xff]   ;;  %v15916_v25 = vld [vmem:[#allocation11 + $0x51c] ss:$40 sps:$4 sm:$0xff]  }
 0x306   :  { %v15919_v33 = vld [vmem:[#allocation11 + $0xabc] ss:$40 sps:$4 sm:$0xff]  }
 0x308   :  { %6026 = vmatpush2.bf16.msra.mxu1 %v15866_v53  ;;  %6063 = vmatpush2.bf16.msra.mxu0 %v15869_v36  ;;  %v15914_v53 = vld [vmem:[#allocation11 + $0x518] ss:$40 sps:$4 sm:$0xff]  }
 0x309   :  { %6064 = vmatprep.subr.bf16.mxu0 %v15874_v38  ;;  %6077 = vmatprep.subr.bf16.mxu1 %v15877_v26  ;;  %v15917_v36 = vld [vmem:[#allocation11 + $0xab8] ss:$40 sps:$4 sm:$0xff]   ;;  %v15922_v38 = vld [vmem:[#allocation11 + $0x9cc] ss:$40 sps:$4 sm:$0xff]  }
 0x30a   :  { %v15925_v26 = vld [vmem:[#allocation11 + $0xa6c] ss:$40 sps:$4 sm:$0xff]  }
 0x30b   :  { %v5783_v45 = vpop.f32.mrf.mxu1  ;;  %6028 = vmatmul.mubr.bf16.vlgmr.msra.gmra.mxu1 %v18040_v15 }
 0x30c   :  { %v5784_v49 = vadd.f32 %v5783_v45, %v18087_v19  ;;  %6065 = vmatpush2.bf16.msra.mxu0 %v15872_v39  ;;  %6078 = vmatpush1.bf16.msra.mxu1 %v15875_v40  ;;  %v15890_v19 = vld [vmem:[#allocation11 + $0x658] ss:$40 sps:$4 sm:$0xff]   ;;  %v15920_v39 = vld [vmem:[#allocation11 + $0x9c8] ss:$40 sps:$4 sm:$0xff]   ;;  %v15934_v45 = vld [vmem:[#allocation11 + $0x92c] ss:$40 sps:$4 sm:$0xff]  }
 0x30d   :  { %6109 = vmatprep.mubr.bf16.mxu1 %v17992_v6  ;;  %v5785_v27 = vpop.f32.mrf.mxu1  ;;  %6066 = vmatprep.subr.bf16.mxu0 %v15880_v41  ;;  %v15923_v40 = vld [vmem:[#allocation11 + $0xa68] ss:$40 sps:$4 sm:$0xff]   ;;  %v15928_v41 = vld [vmem:[#allocation11 + $0x97c] ss:$40 sps:$4 sm:$0xff]  }
 0x30e   :  { %v5786_v50 = vadd.f32 %v5785_v27, %v18090_v22  ;;  %6079 = vmatprep.subr.bf16.mxu1 %v15883_v42  ;;  %v15931_v42 = vld [vmem:[#allocation11 + $0xa1c] ss:$40 sps:$4 sm:$0xff]  }
 0x30f   :  { %v5787_v55 = vpop.f32.mrf.mxu1  ;;  %v15940_v27 = vld [vmem:[#allocation11 + $0x8dc] ss:$40 sps:$4 sm:$0xff]  }
 0x310   :  { %6067 = vmatpush2.bf16.msra.mxu0 %v15878_v9  ;;  %6080 = vmatpush1.bf16.msra.mxu1 %v15881_v44  ;;  %v15926_v9 = vld [vmem:[#allocation11 + $0x978] ss:$40 sps:$4 sm:$0xff]  }
 0x311   :  { %v5788_v60 = vpop.f32.mrf.mxu1  ;;  %6081 = vmatprep.subr.bf16.mxu1 %v15886_v14  ;;  %6118 = vmatprep.subr.bf16.mxu0 %v15889_v47  ;;  %v15929_v44 = vld [vmem:[#allocation11 + $0xa18] ss:$40 sps:$4 sm:$0xff]   ;;  %v15937_v14 = vld [vmem:[#allocation11 + $0xecc] ss:$40 sps:$4 sm:$0xff]   ;;  %v15932_v47 = vld [vmem:[#allocation11 + $0x928] ss:$40 sps:$4 sm:$0xff]  }
 0x312   :  { %v15941_v55 = vld [vmem:[#allocation11 + $0xe78] ss:$40 sps:$4 sm:$0xff]   ;;  %v15947_v60 = vld [vmem:[#allocation11 + $0xe28] ss:$40 sps:$4 sm:$0xff]  }
 0x313   :  { %v5824_v62 = vpop.f32.mrf.mxu0  ;;  %6069 = vmatmul.mubr.bf16.vlgmr.msra.gmra.mxu0 %v17979_v48 }
 0x314   :  { %v18097_v2 = vadd.f32 %v5824_v62, %v5784_v49  ;;  %6082 = vmatpush1.bf16.msra.mxu1 %v15884_v8  ;;  %6119 = vmatpush1.bf16.msra.mxu0 %v15887_v54  ;;  %v15935_v49 = vld [vmem:[#allocation11 + $0xec8] ss:$40 sps:$4 sm:$0xff]   ;;  %v15938_v8 = vld [vmem:[#allocation11 + $0x8d8] ss:$40 sps:$4 sm:$0xff]   ;;  %v15946_v54 = vld [vmem:[#allocation11 + $0x88c] ss:$40 sps:$4 sm:$0xff]  }
 0x315   :  { %6150 = vmatprep.mubr.bf16.mxu0 %v18003_v23  ;;  %v5826_v22 = vpop.f32.mrf.mxu0  ;;  %6083 = vmatprep.subr.bf16.mxu1 %v15892_v56  ;;  %v15949_v56 = vld [vmem:[#allocation11 + $0xe2c] ss:$40 sps:$4 sm:$0xff]   ;;  %v15950_v62 = vld [vmem:[#allocation11 + $0x838] ss:$40 sps:$4 sm:$0xff]  }
 0x316   :  { %v18100_v32 = vadd.f32 %v5826_v22, %v5786_v50  ;;  %6120 = vmatprep.subr.bf16.mxu0 %v15895_v59  ;;  %v15943_v50 = vld [vmem:[#allocation11 + $0xe7c] ss:$40 sps:$4 sm:$0xff]   ;;  %v15944_v59 = vld [vmem:[#allocation11 + $0x888] ss:$40 sps:$4 sm:$0xff]   ;;  %v15961_v22 = vld [vmem:[#allocation11 + $0xd8c] ss:$40 sps:$4 sm:$0xff]  }
 0x317   :  { %v5828_v3 = vpop.f32.mrf.mxu0 }
 0x318   :  { %6084 = vmatpush1.bf16.msra.mxu1 %v15890_v19  ;;  %6121 = vmatpush1.bf16.msra.mxu0 %v15893_v61  ;;  %v15952_v19 = vld [vmem:[#allocation11 + $0x83c] ss:$40 sps:$4 sm:$0xff]   ;;  %v15956_v3 = vld [vmem:[#allocation11 + $0x7e8] ss:$40 sps:$4 sm:$0xff]  }
 0x319   :  { %v5829_v7 = vpop.f32.mrf.mxu0  ;;  %6085 = vmatprep.subr.bf16.mxu1 %v15898_v63  ;;  %6122 = vmatprep.subr.bf16.mxu0 %v15901_v0  ;;  %v15955_v61 = vld [vmem:[#allocation11 + $0xddc] ss:$40 sps:$4 sm:$0xff]   ;;  %v15953_v63 = vld [vmem:[#allocation11 + $0xdd8] ss:$40 sps:$4 sm:$0xff]   ;;  %v15958_v0 = vld [vmem:[#allocation11 + $0x7ec] ss:$40 sps:$4 sm:$0xff]  }
 0x31a   :  { %v15967_v7 = vld [vmem:[#allocation11 + $0xd3c] ss:$40 sps:$4 sm:$0xff]  }
 0x31c   :  { %6086 = vmatpush1.bf16.msra.mxu1 %v15896_v4  ;;  %6123 = vmatpush1.bf16.msra.mxu0 %v15899_v5  ;;  %v15959_v4 = vld [vmem:[#allocation11 + $0xd88] ss:$40 sps:$4 sm:$0xff]   ;;  %v15964_v5 = vld [vmem:[#allocation11 + $0x79c] ss:$40 sps:$4 sm:$0xff]  }
 0x31d   :  { %6087 = vmatprep.subr.bf16.mxu1 %v15904_v35  ;;  %6124 = vmatprep.subr.bf16.mxu0 %v15907_v10  ;;  %v15962_v35 = vld [vmem:[#allocation11 + $0x798] ss:$40 sps:$4 sm:$0xff]  }
 0x31e   :  { %v15965_v10 = vld [vmem:[#allocation11 + $0xd38] ss:$40 sps:$4 sm:$0xff]  }
 0x320   :  { %6088 = vmatpush1.bf16.msra.mxu1 %v15902_v30  ;;  %6125 = vmatpush1.bf16.msra.mxu0 %v15905_v17  ;;  %v15970_v30 = vld [vmem:[#allocation11 + $0xcec] ss:$40 sps:$4 sm:$0xff]  }
 0x321   :  { %6089 = vmatprep.subr.bf16.mxu1 %v15910_v18  ;;  %6126 = vmatprep.subr.bf16.mxu0 %v15913_v20  ;;  %v15973_v17 = vld [vmem:[#allocation11 + $0x114c] ss:$40 sps:$4 sm:$0xff]   ;;  %v15968_v18 = vld [vmem:[#allocation11 + $0xce8] ss:$40 sps:$4 sm:$0xff]  }
 0x322   :  { %v15971_v20 = vld [vmem:[#allocation11 + $0x1148] ss:$40 sps:$4 sm:$0xff]  }
 0x324   :  { %6090 = vmatpush1.bf16.msra.mxu1 %v15908_v24  ;;  %6127 = vmatpush1.bf16.msra.mxu0 %v15911_v52  ;;  %v15976_v24 = vld [vmem:[#allocation11 + $0xc9c] ss:$40 sps:$4 sm:$0xff]  }
 0x325   :  { %6091 = vmatprep.subr.bf16.mxu1 %v15916_v25  ;;  %6128 = vmatprep.subr.bf16.mxu0 %v15919_v33  ;;  %v15979_v52 = vld [vmem:[#allocation11 + $0x10fc] ss:$40 sps:$4 sm:$0xff]   ;;  %v15974_v25 = vld [vmem:[#allocation11 + $0xc98] ss:$40 sps:$4 sm:$0xff]  }
 0x326   :  { %v15977_v33 = vld [vmem:[#allocation11 + $0x10f8] ss:$40 sps:$4 sm:$0xff]  }
 0x328   :  { %6092 = vmatpush1.bf16.msra.mxu1 %v15914_v53  ;;  %6129 = vmatpush1.bf16.msra.mxu0 %v15917_v36  ;;  %v15982_v36 = vld [vmem:[#allocation11 + $0x10ac] ss:$40 sps:$4 sm:$0xff]  }
 0x329   :  { %6093 = vmatprep.subr.bf16.mxu1 %v15922_v38  ;;  %6130 = vmatprep.subr.bf16.mxu0 %v15925_v26  ;;  %v15985_v38 = vld [vmem:[#allocation11 + $0x164c] ss:$40 sps:$4 sm:$0xff]  }
 0x32c   :  { %6094 = vmatpush2.bf16.msra.mxu1 %v15920_v39  ;;  %6131 = vmatpush1.bf16.msra.mxu0 %v15923_v40  ;;  %v17597_v39 = vld [vmem:[#allocation13] sm:$0xff] }
 0x32d   :  { %6095 = vmatprep.subr.bf16.mxu1 %v15928_v41  ;;  %6132 = vmatprep.subr.bf16.mxu0 %v15931_v42  ;;  %v1390_v40 = vrot.slane %v17597_v39, %v18011_v12  ;;  %v15980_v41 = vld [vmem:[#allocation11 + $0x10a8] ss:$40 sps:$4 sm:$0xff]  }
 0x330   :  { %6096 = vmatpush2.bf16.msra.mxu1 %v15926_v9  ;;  %6133 = vmatpush1.bf16.msra.mxu0 %v15929_v44  ;;  %v15983_v9 = vld [vmem:[#allocation11 + $0x1648] ss:$40 sps:$4 sm:$0xff]   ;;  %v15988_v44 = vld [vmem:[#allocation11 + $0x105c] ss:$40 sps:$4 sm:$0xff]  }
 0x331   :  { %6097 = vmatprep.subr.bf16.mxu1 %v15934_v45  ;;  %6134 = vmatprep.subr.bf16.mxu0 %v15937_v14  ;;  %v1394_v45 = vrot.slane %v17597_v39, %v17988_v57  ;;  %v15991_v14 = vld [vmem:[#allocation11 + $0x15fc] ss:$40 sps:$4 sm:$0xff]   ;;  %v16025_v39 = vld [vmem:[#allocation11 + $0x1418] ss:$40 sps:$4 sm:$0xff]  }
 0x334   :  { %6098 = vmatpush2.bf16.msra.mxu1 %v15932_v47  ;;  %6135 = vmatpush2.bf16.msra.mxu0 %v15935_v49 }
 0x335   :  { %6099 = vmatprep.subr.bf16.mxu1 %v15940_v27  ;;  %6136 = vmatprep.subr.bf16.mxu0 %v15943_v50  ;;  %v15986_v27 = vld [vmem:[#allocation11 + $0x1058] ss:$40 sps:$4 sm:$0xff]  }
 0x336   :  { %v15989_v50 = vld [vmem:[#allocation11 + $0x15f8] ss:$40 sps:$4 sm:$0xff]  }
 0x338   :  { %6100 = vmatpush2.bf16.msra.mxu1 %v15938_v8  ;;  %6137 = vmatpush2.bf16.msra.mxu0 %v15941_v55  ;;  %v15994_v55 = vld [vmem:[#allocation11 + $0x100c] ss:$40 sps:$4 sm:$0xff]  }
 0x339   :  { %6101 = vmatprep.subr.bf16.mxu1 %v15946_v54  ;;  %6138 = vmatprep.subr.bf16.mxu0 %v15949_v56  ;;  %v15997_v54 = vld [vmem:[#allocation11 + $0x15ac] ss:$40 sps:$4 sm:$0xff]  }
 0x33c   :  { %6102 = vmatpush2.bf16.msra.mxu1 %v15944_v59  ;;  %6139 = vmatpush2.bf16.msra.mxu0 %v15947_v60 }
 0x33d   :  { %6103 = vmatprep.subr.bf16.mxu1 %v15952_v19  ;;  %6140 = vmatprep.subr.bf16.mxu0 %v15955_v61 }
 0x340   :  { %6104 = vmatpush2.bf16.msra.mxu1 %v15950_v62  ;;  %6141 = vmatpush2.bf16.msra.mxu0 %v15953_v63  ;;  %v15992_v62 = vld [vmem:[#allocation11 + $0x1008] ss:$40 sps:$4 sm:$0xff]  }
 0x341   :  { %6105 = vmatprep.subr.bf16.mxu1 %v15958_v0  ;;  %6142 = vmatprep.subr.bf16.mxu0 %v15961_v22  ;;  %v15995_v63 = vld [vmem:[#allocation11 + $0x15a8] ss:$40 sps:$4 sm:$0xff]   ;;  %v16000_v22 = vld [vmem:[#allocation11 + $0xfbc] ss:$40 sps:$4 sm:$0xff]  }
 0x344   :  { %6106 = vmatpush2.bf16.msra.mxu1 %v15956_v3  ;;  %6143 = vmatpush2.bf16.msra.mxu0 %v15959_v4  ;;  %v16003_v3 = vld [vmem:[#allocation11 + $0x155c] ss:$40 sps:$4 sm:$0xff]   ;;  %v15998_v4 = vld [vmem:[#allocation11 + $0xfb8] ss:$40 sps:$4 sm:$0xff]  }
 0x345   :  { %6107 = vmatprep.subr.bf16.mxu1 %v15964_v5  ;;  %6144 = vmatprep.subr.bf16.mxu0 %v15967_v7  ;;  %v16001_v5 = vld [vmem:[#allocation11 + $0x1558] ss:$40 sps:$4 sm:$0xff]   ;;  %v16006_v7 = vld [vmem:[#allocation11 + $0xf6c] ss:$40 sps:$4 sm:$0xff]  }
 0x348   :  { %6108 = vmatpush2.bf16.msra.mxu1 %v15962_v35  ;;  %6145 = vmatpush2.bf16.msra.mxu0 %v15965_v10  ;;  %v16009_v35 = vld [vmem:[#allocation11 + $0x150c] ss:$40 sps:$4 sm:$0xff]   ;;  %v16004_v10 = vld [vmem:[#allocation11 + $0xf68] ss:$40 sps:$4 sm:$0xff]  }
 0x349   :  { %6146 = vmatprep.subr.bf16.mxu0 %v15970_v30  ;;  %6159 = vmatprep.subr.bf16.mxu1 %v15973_v17  ;;  %v16007_v30 = vld [vmem:[#allocation11 + $0x1508] ss:$40 sps:$4 sm:$0xff]   ;;  %v16012_v17 = vld [vmem:[#allocation11 + $0xf1c] ss:$40 sps:$4 sm:$0xff]  }
 0x34b   :  { %v5865_v53 = vpop.f32.mrf.mxu1  ;;  %6110 = vmatmul.mubr.bf16.vlgmr.msra.gmra.mxu1 %v17990_v1 }
 0x34c   :  { %6147 = vmatpush2.bf16.msra.mxu0 %v15968_v18  ;;  %6160 = vmatpush1.bf16.msra.mxu1 %v15971_v20  ;;  %v5866_v49 = vadd.f32 %v5865_v53, %v1390_v40  ;;  %v16015_v18 = vld [vmem:[#allocation11 + $0x14bc] ss:$40 sps:$4 sm:$0xff]   ;;  %v16010_v20 = vld [vmem:[#allocation11 + $0xf18] ss:$40 sps:$4 sm:$0xff]   ;;  %v16019_v53 = vld [vmem:[#allocation11 + $0x1468] ss:$40 sps:$4 sm:$0xff]  }
 0x34d   :  { %6191 = vmatprep.mubr.bf16.mxu1 %v17999_v11  ;;  %v5867_v26 = vpop.f32.mrf.mxu1  ;;  %6148 = vmatprep.subr.bf16.mxu0 %v15976_v24  ;;  %v16013_v24 = vld [vmem:[#allocation11 + $0x14b8] ss:$40 sps:$4 sm:$0xff]   ;;  %v16030_v40 = vld [vmem:[#allocation11 + $0x132c] ss:$40 sps:$4 sm:$0xff]  }
 0x34e   :  { %6161 = vmatprep.subr.bf16.mxu1 %v15979_v52  ;;  %v5868_v56 = vadd.f32 %v5867_v26, %v1394_v45  ;;  %v16018_v52 = vld [vmem:[#allocation11 + $0x13cc] ss:$40 sps:$4 sm:$0xff]   ;;  %v16022_v26 = vld [vmem:[#allocation11 + $0x1378] ss:$40 sps:$4 sm:$0xff]   ;;  %v16039_v45 = vld [vmem:[#allocation11 + $0x187c] ss:$40 sps:$4 sm:$0xff]  }
 0x34f   :  { %v5869_v42 = vpop.f32.mrf.mxu1 }
 0x350   :  { %6149 = vmatpush2.bf16.msra.mxu0 %v15974_v25  ;;  %6162 = vmatpush1.bf16.msra.mxu1 %v15977_v33  ;;  %v16021_v25 = vld [vmem:[#allocation11 + $0x146c] ss:$40 sps:$4 sm:$0xff]   ;;  %v16016_v33 = vld [vmem:[#allocation11 + $0x13c8] ss:$40 sps:$4 sm:$0xff]  }
 0x351   :  { %v5870_v47 = vpop.f32.mrf.mxu1  ;;  %6163 = vmatprep.subr.bf16.mxu1 %v15982_v36  ;;  %6200 = vmatprep.subr.bf16.mxu0 %v15985_v38  ;;  %v16024_v36 = vld [vmem:[#allocation11 + $0x137c] ss:$40 sps:$4 sm:$0xff]   ;;  %v16028_v42 = vld [vmem:[#allocation11 + $0x1328] ss:$40 sps:$4 sm:$0xff]  }
 0x352   :  { %v16027_v38 = vld [vmem:[#allocation11 + $0x141c] ss:$40 sps:$4 sm:$0xff]   ;;  %v16037_v47 = vld [vmem:[#allocation11 + $0x1878] ss:$40 sps:$4 sm:$0xff]  }
 0x353   :  { %v5906_v8 = vpop.f32.mrf.mxu0  ;;  %6151 = vmatmul.mubr.bf16.vlgmr.msra.gmra.mxu0 %v18027_v31 }
 0x354   :  { %v18107_v59 = vadd.f32 %v5906_v8, %v5866_v49  ;;  %6164 = vmatpush1.bf16.msra.mxu1 %v15980_v41  ;;  %6201 = vmatpush1.bf16.msra.mxu0 %v15983_v9  ;;  %v16033_v41 = vld [vmem:[#allocation11 + $0x18cc] ss:$40 sps:$4 sm:$0xff]   ;;  %v16031_v9 = vld [vmem:[#allocation11 + $0x18c8] ss:$40 sps:$4 sm:$0xff]  }
 0x355   :  { %6232 = vmatprep.mubr.bf16.mxu0 %v18029_v51  ;;  %v5908_v60 = vpop.f32.mrf.mxu0  ;;  %6165 = vmatprep.subr.bf16.mxu1 %v15988_v44  ;;  %v16036_v44 = vld [vmem:[#allocation11 + $0x12dc] ss:$40 sps:$4 sm:$0xff]   ;;  %v16042_v49 = vld [vmem:[#allocation11 + $0x128c] ss:$40 sps:$4 sm:$0xff]   ;;  %v16043_v8 = vld [vmem:[#allocation11 + $0x1828] ss:$40 sps:$4 sm:$0xff]  }
 0x356   :  { %v18110_v19 = vadd.f32 %v5908_v60, %v5868_v56  ;;  %6202 = vmatprep.subr.bf16.mxu0 %v15991_v14  ;;  %v16034_v14 = vld [vmem:[#allocation11 + $0x12d8] ss:$40 sps:$4 sm:$0xff]  }
 0x357   :  { %v5910_v61 = vpop.f32.mrf.mxu0  ;;  %v16046_v56 = vld [vmem:[#allocation11 + $0x1238] ss:$40 sps:$4 sm:$0xff]  }
 0x358   :  { %6166 = vmatpush1.bf16.msra.mxu1 %v15986_v27  ;;  %6203 = vmatpush1.bf16.msra.mxu0 %v15989_v50  ;;  %v16045_v27 = vld [vmem:[#allocation11 + $0x182c] ss:$40 sps:$4 sm:$0xff]   ;;  %v16040_v50 = vld [vmem:[#allocation11 + $0x1288] ss:$40 sps:$4 sm:$0xff]   ;;  %v16049_v60 = vld [vmem:[#allocation11 + $0x17d8] ss:$40 sps:$4 sm:$0xff]  }
 0x359   :  { %v5911_v0 = vpop.f32.mrf.mxu0  ;;  %6167 = vmatprep.subr.bf16.mxu1 %v15994_v55  ;;  %6204 = vmatprep.subr.bf16.mxu0 %v15997_v54  ;;  %v16048_v55 = vld [vmem:[#allocation11 + $0x123c] ss:$40 sps:$4 sm:$0xff]   ;;  %v16054_v61 = vld [vmem:[#allocation11 + $0x11ec] ss:$40 sps:$4 sm:$0xff]  }
 0x35a   :  { %v16051_v54 = vld [vmem:[#allocation11 + $0x17dc] ss:$40 sps:$4 sm:$0xff]   ;;  %v16055_v0 = vld [vmem:[#allocation11 + $0x1788] ss:$40 sps:$4 sm:$0xff]  }
 0x35c   :  { %6168 = vmatpush1.bf16.msra.mxu1 %v15992_v62  ;;  %6205 = vmatpush1.bf16.msra.mxu0 %v15995_v63  ;;  %v16057_v62 = vld [vmem:[#allocation11 + $0x178c] ss:$40 sps:$4 sm:$0xff]   ;;  %v16052_v63 = vld [vmem:[#allocation11 + $0x11e8] ss:$40 sps:$4 sm:$0xff]  }
 0x35d   :  { %6169 = vmatprep.subr.bf16.mxu1 %v16000_v22  ;;  %6206 = vmatprep.subr.bf16.mxu0 %v16003_v3  ;;  %v16060_v22 = vld [vmem:[#allocation11 + $0x119c] ss:$40 sps:$4 sm:$0xff]  }
 0x35e   :  { %v16063_v3 = vld [vmem:[#allocation11 + $0x173c] ss:$40 sps:$4 sm:$0xff]  }
 0x360   :  { %6170 = vmatpush1.bf16.msra.mxu1 %v15998_v4  ;;  %6207 = vmatpush1.bf16.msra.mxu0 %v16001_v5  ;;  %v16058_v4 = vld [vmem:[#allocation11 + $0x1198] ss:$40 sps:$4 sm:$0xff]  }
 0x361   :  { %6171 = vmatprep.subr.bf16.mxu1 %v16006_v7  ;;  %6208 = vmatprep.subr.bf16.mxu0 %v16009_v35  ;;  %v16061_v5 = vld [vmem:[#allocation11 + $0x1738] ss:$40 sps:$4 sm:$0xff]   ;;  %v16066_v7 = vld [vmem:[#allocation11 + $0x16ec] ss:$40 sps:$4 sm:$0xff]  }
 0x362   :  { %v16069_v35 = vld [vmem:[#allocation11 + $0x254] ss:$40 sps:$4 sm:$0xff]  }
 0x364   :  { %6172 = vmatpush1.bf16.msra.mxu1 %v16004_v10  ;;  %6209 = vmatpush1.bf16.msra.mxu0 %v16007_v30  ;;  %v16064_v10 = vld [vmem:[#allocation11 + $0x16e8] ss:$40 sps:$4 sm:$0xff]  }
 0x365   :  { %6173 = vmatprep.subr.bf16.mxu1 %v16012_v17  ;;  %6210 = vmatprep.subr.bf16.mxu0 %v16015_v18  ;;  %v16067_v30 = vld [vmem:[#allocation11 + $0x250] ss:$40 sps:$4 sm:$0xff]   ;;  %v16072_v17 = vld [vmem:[#allocation11 + $0x169c] ss:$40 sps:$4 sm:$0xff]  }
 0x366   :  { %v16075_v18 = vld [vmem:[#allocation11 + $0x204] ss:$40 sps:$4 sm:$0xff]  }
 0x368   :  { %6174 = vmatpush1.bf16.msra.mxu1 %v16010_v20  ;;  %6211 = vmatpush1.bf16.msra.mxu0 %v16013_v24  ;;  %v16070_v20 = vld [vmem:[#allocation11 + $0x1698] ss:$40 sps:$4 sm:$0xff]  }
 0x369   :  { %6175 = vmatprep.subr.bf16.mxu1 %v16018_v52  ;;  %6212 = vmatprep.subr.bf16.mxu0 %v16021_v25  ;;  %v16073_v24 = vld [vmem:[#allocation11 + $0x200] ss:$40 sps:$4 sm:$0xff]   ;;  %v16078_v25 = vld [vmem:[#allocation11 + $0x1b4] ss:$40 sps:$4 sm:$0xff]  }
 0x36c   :  { %6176 = vmatpush2.bf16.msra.mxu1 %v16016_v33  ;;  %6213 = vmatpush1.bf16.msra.mxu0 %v16019_v53  ;;  %v16081_v33 = vld [vmem:[#allocation11 + $0x754] ss:$40 sps:$4 sm:$0xff]  }
 0x36d   :  { %6177 = vmatprep.subr.bf16.mxu1 %v16024_v36  ;;  %6214 = vmatprep.subr.bf16.mxu0 %v16027_v38 }
 0x370   :  { %6178 = vmatpush2.bf16.msra.mxu1 %v16022_v26  ;;  %6215 = vmatpush1.bf16.msra.mxu0 %v16025_v39  ;;  %v16076_v26 = vld [vmem:[#allocation11 + $0x1b0] ss:$40 sps:$4 sm:$0xff]  }
 0x371   :  { %6179 = vmatprep.subr.bf16.mxu1 %v16030_v40  ;;  %6216 = vmatprep.subr.bf16.mxu0 %v16033_v41  ;;  %v16079_v40 = vld [vmem:[#allocation11 + $0x750] ss:$40 sps:$4 sm:$0xff]   ;;  %v16084_v41 = vld [vmem:[#allocation11 + $0x164] ss:$40 sps:$4 sm:$0xff]  }
 0x374   :  { %6180 = vmatpush2.bf16.msra.mxu1 %v16028_v42  ;;  %6217 = vmatpush2.bf16.msra.mxu0 %v16031_v9  ;;  %v16087_v42 = vld [vmem:[#allocation11 + $0x704] ss:$40 sps:$4 sm:$0xff]  }
 0x375   :  { %6181 = vmatprep.subr.bf16.mxu1 %v16036_v44  ;;  %6218 = vmatprep.subr.bf16.mxu0 %v16039_v45  ;;  %v16085_v44 = vld [vmem:[#allocation11 + $0x700] ss:$40 sps:$4 sm:$0xff]  }
 0x378   :  { %6182 = vmatpush2.bf16.msra.mxu1 %v16034_v14  ;;  %6219 = vmatpush2.bf16.msra.mxu0 %v16037_v47  ;;  %v16093_v14 = vld [vmem:[#allocation11 + $0x6b4] ss:$40 sps:$4 sm:$0xff]  }
 0x379   :  { %6183 = vmatprep.subr.bf16.mxu1 %v16042_v49  ;;  %6220 = vmatprep.subr.bf16.mxu0 %v16045_v27 }
 0x37c   :  { %6184 = vmatpush2.bf16.msra.mxu1 %v16040_v50  ;;  %6221 = vmatpush2.bf16.msra.mxu0 %v16043_v8  ;;  %v16088_v50 = vld [vmem:[#allocation11 + $0x110] ss:$40 sps:$4 sm:$0xff]  }
 0x37d   :  { %6185 = vmatprep.subr.bf16.mxu1 %v16048_v55  ;;  %6222 = vmatprep.subr.bf16.mxu0 %v16051_v54  ;;  %v16091_v8 = vld [vmem:[#allocation11 + $0x6b0] ss:$40 sps:$4 sm:$0xff]   ;;  %v16096_v54 = vld [vmem:[#allocation11 + $0xc4] ss:$40 sps:$4 sm:$0xff]  }
 0x380   :  { %6186 = vmatpush2.bf16.msra.mxu1 %v16046_v56  ;;  %6223 = vmatpush2.bf16.msra.mxu0 %v16049_v60  ;;  %v16099_v56 = vld [vmem:[#allocation11 + $0x664] ss:$40 sps:$4 sm:$0xff]   ;;  %v16094_v60 = vld [vmem:[#allocation11 + $0xc0] ss:$40 sps:$4 sm:$0xff]  }
 0x381   :  { %6187 = vmatprep.subr.bf16.mxu1 %v16054_v61  ;;  %6224 = vmatprep.subr.bf16.mxu0 %v16057_v62  ;;  %v16097_v61 = vld [vmem:[#allocation11 + $0x660] ss:$40 sps:$4 sm:$0xff]   ;;  %v16105_v62 = vld [vmem:[#allocation11 + $0x614] ss:$40 sps:$4 sm:$0xff]  }
 0x384   :  { %6188 = vmatpush2.bf16.msra.mxu1 %v16052_v63  ;;  %6225 = vmatpush2.bf16.msra.mxu0 %v16055_v0  ;;  %v16100_v63 = vld [vmem:[#allocation11 + $0x70] ss:$40 sps:$4 sm:$0xff]  }
 0x385   :  { %6189 = vmatprep.subr.bf16.mxu1 %v16060_v22  ;;  %6226 = vmatprep.subr.bf16.mxu0 %v16063_v3  ;;  %v16103_v0 = vld [vmem:[#allocation11 + $0x610] ss:$40 sps:$4 sm:$0xff]   ;;  %v16108_v22 = vld [vmem:[#allocation11 + $0x24] ss:$40 sps:$4 sm:$0xff]  }
 0x386   :  { %v16111_v3 = vld [vmem:[#allocation11 + $0x5c4] ss:$40 sps:$4 sm:$0xff]  }
 0x388   :  { %6190 = vmatpush2.bf16.msra.mxu1 %v16058_v4  ;;  %6227 = vmatpush2.bf16.msra.mxu0 %v16061_v5  ;;  %v16106_v4 = vld [vmem:[#allocation11 + $0x20] ss:$40 sps:$4 sm:$0xff]  }
 0x389   :  { %6228 = vmatprep.subr.bf16.mxu0 %v16066_v7  ;;  %6241 = vmatprep.subr.bf16.mxu1 %v16069_v35  ;;  %v16109_v5 = vld [vmem:[#allocation11 + $0x5c0] ss:$40 sps:$4 sm:$0xff]   ;;  %v16114_v7 = vld [vmem:[#allocation11 + $0x4d4] ss:$40 sps:$4 sm:$0xff]  }
 0x38a   :  { %v16117_v35 = vld [vmem:[#allocation11 + $0x574] ss:$40 sps:$4 sm:$0xff]  }
 0x38b   :  { %v5947_v52 = vpop.f32.mrf.mxu1  ;;  %6192 = vmatmul.mubr.bf16.vlgmr.msra.gmra.mxu1 %v18033_v58 }
 0x38c   :  { %v5948_v53 = vadd.f32 %v5947_v52, %v18107_v59  ;;  %6229 = vmatpush2.bf16.msra.mxu0 %v16064_v10  ;;  %6242 = vmatpush1.bf16.msra.mxu1 %v16067_v30  ;;  %v16082_v59 = vld [vmem:[#allocation11 + $0x160] ss:$40 sps:$4 sm:$0xff]   ;;  %v16112_v10 = vld [vmem:[#allocation11 + $0x4d0] ss:$40 sps:$4 sm:$0xff]   ;;  %v16126_v52 = vld [vmem:[#allocation11 + $0x434] ss:$40 sps:$4 sm:$0xff]  }
 0x38d   :  { %6273 = vmatprep.mubr.bf16.mxu1 %v17975_v46  ;;  %v5949_v36 = vpop.f32.mrf.mxu1  ;;  %6230 = vmatprep.subr.bf16.mxu0 %v16072_v17  ;;  %v16090_v46 = vld [vmem:[#allocation11 + $0x114] ss:$40 sps:$4 sm:$0xff]   ;;  %v16115_v30 = vld [vmem:[#allocation11 + $0x570] ss:$40 sps:$4 sm:$0xff]   ;;  %v16120_v17 = vld [vmem:[#allocation11 + $0x484] ss:$40 sps:$4 sm:$0xff]  }
 0x38e   :  { %v5950_v38 = vadd.f32 %v5949_v36, %v18110_v19  ;;  %6243 = vmatprep.subr.bf16.mxu1 %v16075_v18  ;;  %v16123_v18 = vld [vmem:[#allocation11 + $0x524] ss:$40 sps:$4 sm:$0xff]  }
 0x38f   :  { %v5951_v39 = vpop.f32.mrf.mxu1  ;;  %v16132_v36 = vld [vmem:[#allocation11 + $0x3e4] ss:$40 sps:$4 sm:$0xff]  }
 0x390   :  { %6231 = vmatpush2.bf16.msra.mxu0 %v16070_v20  ;;  %6244 = vmatpush1.bf16.msra.mxu1 %v16073_v24  ;;  %v16118_v20 = vld [vmem:[#allocation11 + $0x480] ss:$40 sps:$4 sm:$0xff]  }
 0x391   :  { %v5952_v9 = vpop.f32.mrf.mxu1  ;;  %6245 = vmatprep.subr.bf16.mxu1 %v16078_v25  ;;  %6282 = vmatprep.subr.bf16.mxu0 %v16081_v33  ;;  %v16121_v24 = vld [vmem:[#allocation11 + $0x520] ss:$40 sps:$4 sm:$0xff]   ;;  %v16129_v25 = vld [vmem:[#allocation11 + $0x9d4] ss:$40 sps:$4 sm:$0xff]   ;;  %v16124_v33 = vld [vmem:[#allocation11 + $0x430] ss:$40 sps:$4 sm:$0xff]  }
 0x392   :  { %v16133_v39 = vld [vmem:[#allocation11 + $0x980] ss:$40 sps:$4 sm:$0xff]   ;;  %v16139_v9 = vld [vmem:[#allocation11 + $0x930] ss:$40 sps:$4 sm:$0xff]  }
 0x393   :  { %v5988_v45 = vpop.f32.mrf.mxu0  ;;  %6233 = vmatmul.mubr.bf16.vlgmr.msra.gmra.mxu0 %v18040_v15 }
 0x394   :  { %v18117_v47 = vadd.f32 %v5988_v45, %v5948_v53  ;;  %6246 = vmatpush1.bf16.msra.mxu1 %v16076_v26  ;;  %6283 = vmatpush1.bf16.msra.mxu0 %v16079_v40  ;;  %v16127_v53 = vld [vmem:[#allocation11 + $0x9d0] ss:$40 sps:$4 sm:$0xff]   ;;  %v16130_v26 = vld [vmem:[#allocation11 + $0x3e0] ss:$40 sps:$4 sm:$0xff]   ;;  %v16138_v40 = vld [vmem:[#allocation11 + $0x394] ss:$40 sps:$4 sm:$0xff]  }
 0x395   :  { %6314 = vmatprep.mubr.bf16.mxu0 %v17992_v6  ;;  %v5990_v19 = vpop.f32.mrf.mxu0  ;;  %6247 = vmatprep.subr.bf16.mxu1 %v16084_v41  ;;  %v16102_v6 = vld [vmem:[#allocation11 + $0x74] ss:$40 sps:$4 sm:$0xff]   ;;  %v16142_v45 = vld [vmem:[#allocation11 + $0x340] ss:$40 sps:$4 sm:$0xff]  }
 0x396   :  { %v18120_v49 = vadd.f32 %v5990_v19, %v5950_v38  ;;  %6284 = vmatprep.subr.bf16.mxu0 %v16087_v42  ;;  %v16135_v38 = vld [vmem:[#allocation11 + $0x984] ss:$40 sps:$4 sm:$0xff]   ;;  %v16141_v41 = vld [vmem:[#allocation11 + $0x934] ss:$40 sps:$4 sm:$0xff]   ;;  %v16136_v42 = vld [vmem:[#allocation11 + $0x390] ss:$40 sps:$4 sm:$0xff]  }
 0x397   :  { %v5992_v27 = vpop.f32.mrf.mxu0  ;;  %v16153_v19 = vld [vmem:[#allocation11 + $0x894] ss:$40 sps:$4 sm:$0xff]  }
 0x398   :  { %6248 = vmatpush1.bf16.msra.mxu1 %v16082_v59  ;;  %6285 = vmatpush1.bf16.msra.mxu0 %v16085_v44  ;;  %v16144_v59 = vld [vmem:[#allocation11 + $0x344] ss:$40 sps:$4 sm:$0xff]   ;;  %v16148_v27 = vld [vmem:[#allocation11 + $0x2f0] ss:$40 sps:$4 sm:$0xff]  }
 0x399   :  { %v5993_v55 = vpop.f32.mrf.mxu0  ;;  %6249 = vmatprep.subr.bf16.mxu1 %v16090_v46  ;;  %6286 = vmatprep.subr.bf16.mxu0 %v16093_v14  ;;  %v16147_v44 = vld [vmem:[#allocation11 + $0x8e4] ss:$40 sps:$4 sm:$0xff]   ;;  %v16145_v46 = vld [vmem:[#allocation11 + $0x8e0] ss:$40 sps:$4 sm:$0xff]   ;;  %v16150_v14 = vld [vmem:[#allocation11 + $0x2f4] ss:$40 sps:$4 sm:$0xff]  }
 0x39a   :  { %v16159_v55 = vld [vmem:[#allocation11 + $0x844] ss:$40 sps:$4 sm:$0xff]  }
 0x39c   :  { %6250 = vmatpush1.bf16.msra.mxu1 %v16088_v50  ;;  %6287 = vmatpush1.bf16.msra.mxu0 %v16091_v8  ;;  %v16151_v50 = vld [vmem:[#allocation11 + $0x890] ss:$40 sps:$4 sm:$0xff]   ;;  %v16156_v8 = vld [vmem:[#allocation11 + $0x2a4] ss:$40 sps:$4 sm:$0xff]  }
 0x39d   :  { %6251 = vmatprep.subr.bf16.mxu1 %v16096_v54  ;;  %6288 = vmatprep.subr.bf16.mxu0 %v16099_v56  ;;  %v16154_v54 = vld [vmem:[#allocation11 + $0x2a0] ss:$40 sps:$4 sm:$0xff]  }
 0x39e   :  { %v16157_v56 = vld [vmem:[#allocation11 + $0x840] ss:$40 sps:$4 sm:$0xff]  }
 0x3a0   :  { %6252 = vmatpush1.bf16.msra.mxu1 %v16094_v60  ;;  %6289 = vmatpush1.bf16.msra.mxu0 %v16097_v61  ;;  %v16162_v60 = vld [vmem:[#allocation11 + $0x7f4] ss:$40 sps:$4 sm:$0xff]  }
 0x3a1   :  { %6253 = vmatprep.subr.bf16.mxu1 %v16102_v6  ;;  %6290 = vmatprep.subr.bf16.mxu0 %v16105_v62  ;;  %v16165_v61 = vld [vmem:[#allocation11 + $0xc54] ss:$40 sps:$4 sm:$0xff]   ;;  %v16160_v6 = vld [vmem:[#allocation11 + $0x7f0] ss:$40 sps:$4 sm:$0xff]  }
 0x3a2   :  { %v16163_v62 = vld [vmem:[#allocation11 + $0xc50] ss:$40 sps:$4 sm:$0xff]  }
 0x3a4   :  { %6254 = vmatpush1.bf16.msra.mxu1 %v16100_v63  ;;  %6291 = vmatpush1.bf16.msra.mxu0 %v16103_v0  ;;  %v16168_v63 = vld [vmem:[#allocation11 + $0x7a4] ss:$40 sps:$4 sm:$0xff]  }
 0x3a5   :  { %6255 = vmatprep.subr.bf16.mxu1 %v16108_v22  ;;  %6292 = vmatprep.subr.bf16.mxu0 %v16111_v3  ;;  %v16171_v0 = vld [vmem:[#allocation11 + $0xc04] ss:$40 sps:$4 sm:$0xff]   ;;  %v16166_v22 = vld [vmem:[#allocation11 + $0x7a0] ss:$40 sps:$4 sm:$0xff]  }
 0x3a6   :  { %v16169_v3 = vld [vmem:[#allocation11 + $0xc00] ss:$40 sps:$4 sm:$0xff]  }
 0x3a8   :  { %6256 = vmatpush1.bf16.msra.mxu1 %v16106_v4  ;;  %6293 = vmatpush1.bf16.msra.mxu0 %v16109_v5  ;;  %v16174_v5 = vld [vmem:[#allocation11 + $0xbb4] ss:$40 sps:$4 sm:$0xff]  }
 0x3a9   :  { %6257 = vmatprep.subr.bf16.mxu1 %v16114_v7  ;;  %6294 = vmatprep.subr.bf16.mxu0 %v16117_v35  ;;  %v16177_v7 = vld [vmem:[#allocation11 + $0x1154] ss:$40 sps:$4 sm:$0xff]  }
 0x3ac   :  { %6258 = vmatpush2.bf16.msra.mxu1 %v16112_v10  ;;  %6295 = vmatpush1.bf16.msra.mxu0 %v16115_v30 }
 0x3ad   :  { %6259 = vmatprep.subr.bf16.mxu1 %v16120_v17  ;;  %6296 = vmatprep.subr.bf16.mxu0 %v16123_v18  ;;  %v16172_v17 = vld [vmem:[#allocation11 + $0xbb0] ss:$40 sps:$4 sm:$0xff]  }
 0x3b0   :  { %6260 = vmatpush2.bf16.msra.mxu1 %v16118_v20  ;;  %6297 = vmatpush1.bf16.msra.mxu0 %v16121_v24  ;;  %v16175_v20 = vld [vmem:[#allocation11 + $0x1150] ss:$40 sps:$4 sm:$0xff]   ;;  %v16180_v24 = vld [vmem:[#allocation11 + $0xb64] ss:$40 sps:$4 sm:$0xff]  }
 0x3b1   :  { %6261 = vmatprep.subr.bf16.mxu1 %v16126_v52  ;;  %6298 = vmatprep.subr.bf16.mxu0 %v16129_v25  ;;  %v16181_v25 = vld [vmem:[#allocation11 + $0x1100] ss:$40 sps:$4 sm:$0xff]  }
 0x3b4   :  { %6262 = vmatpush2.bf16.msra.mxu1 %v16124_v33  ;;  %6299 = vmatpush2.bf16.msra.mxu0 %v16127_v53 }
 0x3b5   :  { %6263 = vmatprep.subr.bf16.mxu1 %v16132_v36  ;;  %6300 = vmatprep.subr.bf16.mxu0 %v16135_v38  ;;  %v16184_v36 = vld [vmem:[#allocation11 + $0xb10] ss:$40 sps:$4 sm:$0xff]  }
 0x3b6   :  { %v16187_v38 = vld [vmem:[#allocation11 + $0x10b0] ss:$40 sps:$4 sm:$0xff]  }
 0x3b8   :  { %6264 = vmatpush2.bf16.msra.mxu1 %v16130_v26  ;;  %6301 = vmatpush2.bf16.msra.mxu0 %v16133_v39  ;;  %v16192_v39 = vld [vmem:[#allocation11 + $0xac4] ss:$40 sps:$4 sm:$0xff]  }
 0x3b9   :  { %6265 = vmatprep.subr.bf16.mxu1 %v16138_v40  ;;  %6302 = vmatprep.subr.bf16.mxu0 %v16141_v41  ;;  %v16195_v40 = vld [vmem:[#allocation11 + $0x1064] ss:$40 sps:$4 sm:$0xff]  }
 0x3bc   :  { %6266 = vmatpush2.bf16.msra.mxu1 %v16136_v42  ;;  %6303 = vmatpush2.bf16.msra.mxu0 %v16139_v9  ;;  %v16193_v42 = vld [vmem:[#allocation11 + $0x1060] ss:$40 sps:$4 sm:$0xff]   ;;  %v16201_v9 = vld [vmem:[#allocation11 + $0x1014] ss:$40 sps:$4 sm:$0xff]  }
 0x3bd   :  { %6267 = vmatprep.subr.bf16.mxu1 %v16144_v59  ;;  %6304 = vmatprep.subr.bf16.mxu0 %v16147_v44  ;;  %v16196_v59 = vld [vmem:[#allocation11 + $0xa70] ss:$40 sps:$4 sm:$0xff]  }
 0x3be   :  { %v16199_v44 = vld [vmem:[#allocation11 + $0x1010] ss:$40 sps:$4 sm:$0xff]  }
 0x3c0   :  { %6268 = vmatpush2.bf16.msra.mxu1 %v16142_v45  ;;  %6305 = vmatpush2.bf16.msra.mxu0 %v16145_v46  ;;  %v16204_v45 = vld [vmem:[#allocation11 + $0xa24] ss:$40 sps:$4 sm:$0xff]  }
 0x3c1   :  { %6269 = vmatprep.subr.bf16.mxu1 %v16150_v14  ;;  %6306 = vmatprep.subr.bf16.mxu0 %v16153_v19  ;;  %v16207_v46 = vld [vmem:[#allocation11 + $0xfc4] ss:$40 sps:$4 sm:$0xff]   ;;  %v16202_v14 = vld [vmem:[#allocation11 + $0xa20] ss:$40 sps:$4 sm:$0xff]  }
 0x3c2   :  { %v16205_v19 = vld [vmem:[#allocation11 + $0xfc0] ss:$40 sps:$4 sm:$0xff]  }
 0x3c4   :  { %6270 = vmatpush2.bf16.msra.mxu1 %v16148_v27  ;;  %6307 = vmatpush2.bf16.msra.mxu0 %v16151_v50  ;;  %v16210_v27 = vld [vmem:[#allocation11 + $0xed4] ss:$40 sps:$4 sm:$0xff]  }
 0x3c5   :  { %6271 = vmatprep.subr.bf16.mxu1 %v16156_v8  ;;  %6308 = vmatprep.subr.bf16.mxu0 %v16159_v55  ;;  %v16213_v50 = vld [vmem:[#allocation11 + $0xf74] ss:$40 sps:$4 sm:$0xff]   ;;  %v16208_v8 = vld [vmem:[#allocation11 + $0xed0] ss:$40 sps:$4 sm:$0xff]  }
 0x3c6   :  { %v16211_v55 = vld [vmem:[#allocation11 + $0xf70] ss:$40 sps:$4 sm:$0xff]  }
 0x3c8   :  { %6272 = vmatpush2.bf16.msra.mxu1 %v16154_v54  ;;  %6309 = vmatpush2.bf16.msra.mxu0 %v16157_v56  ;;  %v16216_v54 = vld [vmem:[#allocation11 + $0xe84] ss:$40 sps:$4 sm:$0xff]  }
 0x3c9   :  { %6310 = vmatprep.subr.bf16.mxu0 %v16162_v60  ;;  %6323 = vmatprep.subr.bf16.mxu1 %v16165_v61  ;;  %v16219_v56 = vld [vmem:[#allocation11 + $0xf24] ss:$40 sps:$4 sm:$0xff]   ;;  %v16214_v60 = vld [vmem:[#allocation11 + $0xe80] ss:$40 sps:$4 sm:$0xff]  }
 0x3ca   :  { %v16217_v61 = vld [vmem:[#allocation11 + $0xf20] ss:$40 sps:$4 sm:$0xff]  }
 0x3cb   :  { %v6029_v4 = vpop.f32.mrf.mxu1  ;;  %6274 = vmatmul.mubr.bf16.vlgmr.msra.gmra.mxu1 %v17979_v48  ;;  %v16183_v48 = vld [vmem:[#allocation11 + $0x1104] ss:$40 sps:$4 sm:$0xff]  }
 0x3cc   :  { %v18124_v35 = vadd.f32 %v6029_v4, %v18117_v47  ;;  %6311 = vmatpush2.bf16.msra.mxu0 %v16160_v6  ;;  %6324 = vmatpush1.bf16.msra.mxu1 %v16163_v62  ;;  %v16178_v47 = vld [vmem:[#allocation11 + $0xb60] ss:$40 sps:$4 sm:$0xff]   ;;  %v16222_v6 = vld [vmem:[#allocation11 + $0xe34] ss:$40 sps:$4 sm:$0xff]  }
 0x3cd   :  { %6355 = vmatprep.mubr.bf16.mxu1 %v18003_v23  ;;  %v6031_v10 = vpop.f32.mrf.mxu1  ;;  %6312 = vmatprep.subr.bf16.mxu0 %v16168_v63  ;;  %v16186_v23 = vld [vmem:[#allocation11 + $0xb14] ss:$40 sps:$4 sm:$0xff]   ;;  %v16220_v63 = vld [vmem:[#allocation11 + $0xe30] ss:$40 sps:$4 sm:$0xff]   ;;  %v16226_v4 = vld [vmem:[#allocation11 + $0xde0] ss:$40 sps:$4 sm:$0xff]  }
 0x3ce   :  { %v18128_v30 = vadd.f32 %v6031_v10, %v18120_v49  ;;  %6325 = vmatprep.subr.bf16.mxu1 %v16171_v0  ;;  %v16189_v49 = vld [vmem:[#allocation11 + $0x10b4] ss:$40 sps:$4 sm:$0xff]   ;;  %v16223_v0 = vld [vmem:[#allocation11 + $0x13d0] ss:$40 sps:$4 sm:$0xff]  }
 0x3cf   :  { %v6033_v18 = vpop.f32.mrf.mxu1  ;;  %v16225_v62 = vld [vmem:[#allocation11 + $0x13d4] ss:$40 sps:$4 sm:$0xff]  }
 0x3d0   :  { %6313 = vmatpush2.bf16.msra.mxu0 %v16166_v22  ;;  %6326 = vmatpush1.bf16.msra.mxu1 %v16169_v3  ;;  %v16228_v22 = vld [vmem:[#allocation11 + $0xde4] ss:$40 sps:$4 sm:$0xff]   ;;  %v16237_v10 = vld [vmem:[#allocation11 + $0x1334] ss:$40 sps:$4 sm:$0xff]   ;;  %v16235_v18 = vld [vmem:[#allocation11 + $0x1330] ss:$40 sps:$4 sm:$0xff]  }
 0x3d1   :  { %v6034_v52 = vpop.f32.mrf.mxu1  ;;  %6327 = vmatprep.subr.bf16.mxu1 %v16174_v5  ;;  %6364 = vmatprep.subr.bf16.mxu0 %v16177_v7  ;;  %v16231_v3 = vld [vmem:[#allocation11 + $0x1384] ss:$40 sps:$4 sm:$0xff]   ;;  %v16229_v5 = vld [vmem:[#allocation11 + $0x1380] ss:$40 sps:$4 sm:$0xff]   ;;  %v16234_v7 = vld [vmem:[#allocation11 + $0xd94] ss:$40 sps:$4 sm:$0xff]  }
 0x3d2   :  { %v16241_v52 = vld [vmem:[#allocation11 + $0x12e0] ss:$40 sps:$4 sm:$0xff]  }
 0x3d3   :  { %v18130_v33 = vpop.f32.mrf.mxu0  ;;  %6315 = vmatmul.mubr.bf16.vlgmr.msra.gmra.mxu0 %v17990_v1  ;;  %v16190_v1 = vld [vmem:[#allocation11 + $0xac0] ss:$40 sps:$4 sm:$0xff]  }
 0x3d4   :  { %6328 = vmatpush1.bf16.msra.mxu1 %v16172_v17  ;;  %6365 = vmatpush1.bf16.msra.mxu0 %v16175_v20  ;;  %v16232_v17 = vld [vmem:[#allocation11 + $0xd90] ss:$40 sps:$4 sm:$0xff]   ;;  %v16240_v20 = vld [vmem:[#allocation11 + $0xd44] ss:$40 sps:$4 sm:$0xff]  }
 0x3d5   :  { %6396 = vmatprep.mubr.bf16.mxu0 %v17999_v11  ;;  %v18134_v53 = vpop.f32.mrf.mxu0  ;;  %6329 = vmatprep.subr.bf16.mxu1 %v16180_v24  ;;  %v16198_v11 = vld [vmem:[#allocation11 + $0xa74] ss:$40 sps:$4 sm:$0xff]   ;;  %v16243_v24 = vld [vmem:[#allocation11 + $0x12e4] ss:$40 sps:$4 sm:$0xff]  }
 0x3d6   :  { %6366 = vmatprep.subr.bf16.mxu0 %v16183_v48  ;;  %v16238_v48 = vld [vmem:[#allocation11 + $0xd40] ss:$40 sps:$4 sm:$0xff]  }
 0x3d7   :  { %v6074_v26 = vpop.f32.mrf.mxu0 }
 0x3d8   :  { %6330 = vmatpush1.bf16.msra.mxu1 %v16178_v47  ;;  %6367 = vmatpush1.bf16.msra.mxu0 %v16181_v25  ;;  %v16246_v47 = vld [vmem:[#allocation11 + $0xcf4] ss:$40 sps:$4 sm:$0xff]   ;;  %v16250_v26 = vld [vmem:[#allocation11 + $0xca0] ss:$40 sps:$4 sm:$0xff]  }
 0x3d9   :  { %v6075_v41 = vpop.f32.mrf.mxu0  ;;  %6331 = vmatprep.subr.bf16.mxu1 %v16186_v23  ;;  %6368 = vmatprep.subr.bf16.mxu0 %v16189_v49  ;;  %v16249_v25 = vld [vmem:[#allocation11 + $0x1294] ss:$40 sps:$4 sm:$0xff]   ;;  %v16244_v23 = vld [vmem:[#allocation11 + $0xcf0] ss:$40 sps:$4 sm:$0xff]  }
 0x3da   :  { %v16247_v49 = vld [vmem:[#allocation11 + $0x1290] ss:$40 sps:$4 sm:$0xff]   ;;  %v16261_v41 = vld [vmem:[#allocation11 + $0x1654] ss:$40 sps:$4 sm:$0xff]  }
 0x3dc   :  { %6332 = vmatpush1.bf16.msra.mxu1 %v16184_v36  ;;  %6369 = vmatpush1.bf16.msra.mxu0 %v16187_v38  ;;  %v16252_v36 = vld [vmem:[#allocation11 + $0xca4] ss:$40 sps:$4 sm:$0xff]  }
 0x3dd   :  { %6333 = vmatprep.subr.bf16.mxu1 %v16192_v39  ;;  %6370 = vmatprep.subr.bf16.mxu0 %v16195_v40  ;;  %v16255_v38 = vld [vmem:[#allocation11 + $0x1244] ss:$40 sps:$4 sm:$0xff]   ;;  %v16253_v39 = vld [vmem:[#allocation11 + $0x1240] ss:$40 sps:$4 sm:$0xff]   ;;  %v16258_v40 = vld [vmem:[#allocation11 + $0x11f4] ss:$40 sps:$4 sm:$0xff]  }
 0x3e0   :  { %6334 = vmatpush1.bf16.msra.mxu1 %v16190_v1  ;;  %6371 = vmatpush1.bf16.msra.mxu0 %v16193_v42  ;;  %v17598_v1 = vld [vmem:[#allocation13] sm:$0xff] }
 0x3e1   :  { %6335 = vmatprep.subr.bf16.mxu1 %v16198_v11  ;;  %6372 = vmatprep.subr.bf16.mxu0 %v16201_v9  ;;  %v1398_v42 = vrot.slane %v17598_v1, %v18020_v21  ;;  %v1402_v11 = vrot.slane %v17598_v1, %v17973_v43  ;;  %v16256_v9 = vld [vmem:[#allocation11 + $0x11f0] ss:$40 sps:$4 sm:$0xff]   ;;  %v16309_v1 = vld [vmem:[#allocation14 + $0x54] ss:$40 sps:$4 sm:$0xff]  }
 0x3e4   :  { %6336 = vmatpush1.bf16.msra.mxu1 %v16196_v59  ;;  %6373 = vmatpush1.bf16.msra.mxu0 %v16199_v44  ;;  %v16259_v59 = vld [vmem:[#allocation11 + $0x1650] ss:$40 sps:$4 sm:$0xff]   ;;  %v16264_v44 = vld [vmem:[#allocation11 + $0x11a4] ss:$40 sps:$4 sm:$0xff]  }
 0x3e5   :  { %6337 = vmatprep.subr.bf16.mxu1 %v16204_v45  ;;  %6374 = vmatprep.subr.bf16.mxu0 %v16207_v46  ;;  %v6071_v45 = vadd.f32 %v18130_v33, %v1398_v42  ;;  %v16267_v46 = vld [vmem:[#allocation11 + $0x1604] ss:$40 sps:$4 sm:$0xff]   ;;  %v6447_v33 = vmax.f32 %v18072_v16, 0.0  ;;  %v16274_v16 = vld [vmem:[#allocation11 + $0x1560] ss:$40 sps:$4 sm:$0xff]  }
 0x3e6   :  { %v16304_v42 = vld [vmem:[#allocation11 + $0x18d0] ss:$40 sps:$4 sm:$0xff]  }
 0x3e8   :  { %6338 = vmatpush1.bf16.msra.mxu1 %v16202_v14  ;;  %6375 = vmatpush1.bf16.msra.mxu0 %v16205_v19  ;;  %v6073_v19 = vadd.f32 %v18134_v53, %v1402_v11  ;;  %v16271_v53 = vld [vmem:[#allocation14 + $0x230] ss:$40 sps:$4 sm:$0xff]  }
 0x3e9   :  { %6339 = vmatprep.subr.bf16.mxu1 %v16210_v27  ;;  %6376 = vmatprep.subr.bf16.mxu0 %v16213_v50  ;;  %v16262_v50 = vld [vmem:[#allocation11 + $0x11a0] ss:$40 sps:$4 sm:$0xff]  }
 0x3ea   :  { %v16307_v11 = vld [vmem:[#allocation14 + $0x50] ss:$40 sps:$4 sm:$0xff]  }
 0x3ec   :  { %6340 = vmatpush2.bf16.msra.mxu1 %v16208_v8  ;;  %6377 = vmatpush1.bf16.msra.mxu0 %v16211_v55  ;;  %v16265_v8 = vld [vmem:[#allocation11 + $0x1600] ss:$40 sps:$4 sm:$0xff]  }
 0x3ed   :  { %6341 = vmatprep.subr.bf16.mxu1 %v16216_v54  ;;  %6378 = vmatprep.subr.bf16.mxu0 %v16219_v56  ;;  %v16270_v54 = vld [vmem:[#allocation11 + $0x15b4] ss:$40 sps:$4 sm:$0xff]  }
 0x3ee   :  { %v16273_v56 = vld [vmem:[#allocation14 + $0x234] ss:$40 sps:$4 sm:$0xff]  }
 0x3f0   :  { %6342 = vmatpush2.bf16.msra.mxu1 %v16214_v60  ;;  %6379 = vmatpush1.bf16.msra.mxu0 %v16217_v61 }
 0x3f1   :  { %6343 = vmatprep.subr.bf16.mxu1 %v16222_v6  ;;  %6380 = vmatprep.subr.bf16.mxu0 %v16225_v62  ;;  %v16276_v62 = vld [vmem:[#allocation11 + $0x1564] ss:$40 sps:$4 sm:$0xff]  }
 0x3f4   :  { %6344 = vmatpush2.bf16.msra.mxu1 %v16220_v63  ;;  %6381 = vmatpush2.bf16.msra.mxu0 %v16223_v0  ;;  %v16279_v63 = vld [vmem:[#allocation14 + $0x1e4] ss:$40 sps:$4 sm:$0xff]   ;;  %v18143_v0 = vpack.c.bf16 %v6447_v33, %v6447_v33 }
 0x3f5   :  { %6345 = vmatprep.subr.bf16.mxu1 %v16228_v22  ;;  %6382 = vmatprep.subr.bf16.mxu0 %v16231_v3  ;;  %v16277_v3 = vld [vmem:[#allocation14 + $0x1e0] ss:$40 sps:$4 sm:$0xff]  }
 0x3f6   :  { %v16328_v33 = vld [vmem:[#allocation11 + $0x1790] ss:$40 sps:$4 sm:$0xff]  }
 0x3f8   :  { %6346 = vmatpush2.bf16.msra.mxu1 %v16226_v4  ;;  %6383 = vmatpush2.bf16.msra.mxu0 %v16229_v5  ;;  %v16282_v5 = vld [vmem:[#allocation11 + $0x1514] ss:$40 sps:$4 sm:$0xff]  }
 0x3f9   :  { %6347 = vmatprep.subr.bf16.mxu1 %v16234_v7  ;;  %6384 = vmatprep.subr.bf16.mxu0 %v16237_v10  ;;  %v16285_v7 = vld [vmem:[#allocation14 + $0x194] ss:$40 sps:$4 sm:$0xff]  }
 0x3fc   :  { %6348 = vmatpush2.bf16.msra.mxu1 %v16232_v17  ;;  %6385 = vmatpush2.bf16.msra.mxu0 %v16235_v18  ;;  %v16280_v18 = vld [vmem:[#allocation11 + $0x1510] ss:$40 sps:$4 sm:$0xff]  }
 0x3fd   :  { %6349 = vmatprep.subr.bf16.mxu1 %v16240_v20  ;;  %6386 = vmatprep.subr.bf16.mxu0 %v16243_v24  ;;  %v16288_v24 = vld [vmem:[#allocation11 + $0x14c4] ss:$40 sps:$4 sm:$0xff]  }
 0x400   :  { %6350 = vmatpush2.bf16.msra.mxu1 %v16238_v48  ;;  %6387 = vmatpush2.bf16.msra.mxu0 %v16241_v52  ;;  %v16291_v48 = vld [vmem:[#allocation14 + $0x144] ss:$40 sps:$4 sm:$0xff]   ;;  %v16286_v52 = vld [vmem:[#allocation11 + $0x14c0] ss:$40 sps:$4 sm:$0xff]  }
 0x401   :  { %6351 = vmatprep.subr.bf16.mxu1 %v16246_v47  ;;  %6388 = vmatprep.subr.bf16.mxu0 %v16249_v25  ;;  %v16289_v47 = vld [vmem:[#allocation14 + $0x140] ss:$40 sps:$4 sm:$0xff]  }
 0x402   :  { %v16294_v25 = vld [vmem:[#allocation11 + $0x1474] ss:$40 sps:$4 sm:$0xff]  }
 0x404   :  { %6352 = vmatpush2.bf16.msra.mxu1 %v16244_v23  ;;  %6389 = vmatpush2.bf16.msra.mxu0 %v16247_v49  ;;  %v16297_v23 = vld [vmem:[#allocation14 + $0xf4] ss:$40 sps:$4 sm:$0xff]   ;;  %v16292_v49 = vld [vmem:[#allocation11 + $0x1470] ss:$40 sps:$4 sm:$0xff]  }
 0x405   :  { %6353 = vmatprep.subr.bf16.mxu1 %v16252_v36  ;;  %6390 = vmatprep.subr.bf16.mxu0 %v16255_v38  ;;  %v16295_v36 = vld [vmem:[#allocation14 + $0xf0] ss:$40 sps:$4 sm:$0xff]  }
 0x406   :  { %v16300_v38 = vld [vmem:[#allocation11 + $0x1424] ss:$40 sps:$4 sm:$0xff]  }
 0x408   :  { %6354 = vmatpush2.bf16.msra.mxu1 %v16250_v26  ;;  %6391 = vmatpush2.bf16.msra.mxu0 %v16253_v39  ;;  %v16303_v26 = vld [vmem:[#allocation14 + $0xa4] ss:$40 sps:$4 sm:$0xff]   ;;  %v16298_v39 = vld [vmem:[#allocation11 + $0x1420] ss:$40 sps:$4 sm:$0xff]  }
 0x409   :  { %6392 = vmatprep.subr.bf16.mxu0 %v16258_v40  ;;  %6405 = vmatprep.subr.bf16.mxu1 %v16261_v41  ;;  %v16301_v40 = vld [vmem:[#allocation14 + $0xa0] ss:$40 sps:$4 sm:$0xff]  }
 0x40a   :  { %v16306_v41 = vld [vmem:[#allocation11 + $0x18d4] ss:$40 sps:$4 sm:$0xff]  }
 0x40b   :  { %v6111_v14 = vpop.f32.mrf.mxu1  ;;  %6356 = vmatmul.mubr.bf16.vlgmr.msra.gmra.mxu1 %v18027_v31  ;;  %v16268_v31 = vld [vmem:[#allocation11 + $0x15b0] ss:$40 sps:$4 sm:$0xff]  }
 0x40c   :  { %v6112_v27 = vadd.f32 %v6111_v14, %v6071_v45  ;;  %6393 = vmatpush2.bf16.msra.mxu0 %v16256_v9  ;;  %6406 = vmatpush1.bf16.msra.mxu1 %v16259_v59  ;;  %v16312_v9 = vld [vmem:[#allocation11 + $0x1884] ss:$40 sps:$4 sm:$0xff]  }
 0x40d   :  { %6437 = vmatprep.mubr.bf16.mxu1 %v18029_v51  ;;  %v6113_v55 = vpop.f32.mrf.mxu1  ;;  %6394 = vmatprep.subr.bf16.mxu0 %v16264_v44  ;;  %v16315_v59 = vld [vmem:[#allocation14 + $0x4] ss:$40 sps:$4 sm:$0xff]   ;;  %v16310_v44 = vld [vmem:[#allocation11 + $0x1880] ss:$40 sps:$4 sm:$0xff]  }
 0x40e   :  { %v6114_v60 = vadd.f32 %v6113_v55, %v6073_v19  ;;  %6407 = vmatprep.subr.bf16.mxu1 %v16267_v46  ;;  %v16313_v45 = vld [vmem:[#allocation14] ss:$40 sps:$4 sm:$0xff]   ;;  %v16321_v14 = vld [vmem:[#allocation14 + $0x4b4] ss:$40 sps:$4 sm:$0xff]  }
 0x40f   :  { %v6115_v61 = vpop.f32.mrf.mxu1  ;;  %v16318_v46 = vld [vmem:[#allocation11 + $0x1834] ss:$40 sps:$4 sm:$0xff]   ;;  %v16316_v19 = vld [vmem:[#allocation11 + $0x1830] ss:$40 sps:$4 sm:$0xff]   ;;  %v16322_v55 = vld [vmem:[#allocation11 + $0x17e0] ss:$40 sps:$4 sm:$0xff]  }
 0x410   :  { %6395 = vmatpush2.bf16.msra.mxu0 %v16262_v50  ;;  %6408 = vmatpush1.bf16.msra.mxu1 %v16265_v8  ;;  %v16324_v50 = vld [vmem:[#allocation11 + $0x17e4] ss:$40 sps:$4 sm:$0xff]  }
 0x411   :  { %v6116_v6 = vpop.f32.mrf.mxu1  ;;  %6409 = vmatprep.subr.bf16.mxu1 %v16270_v54  ;;  %11320 = vmatprep.subr.bf16.mxu0 %v16273_v56  ;;  %v16327_v8 = vld [vmem:[#allocation14 + $0x464] ss:$40 sps:$4 sm:$0xff]   ;;  %v16325_v54 = vld [vmem:[#allocation14 + $0x460] ss:$40 sps:$4 sm:$0xff]   ;;  %v16331_v61 = vld [vmem:[#allocation14 + $0x410] ss:$40 sps:$4 sm:$0xff]  }
 0x412   :  { %v16330_v56 = vld [vmem:[#allocation11 + $0x1794] ss:$40 sps:$4 sm:$0xff]   ;;  %v16334_v6 = vld [vmem:[#allocation11 + $0x1740] ss:$40 sps:$4 sm:$0xff]  }
 0x413   :  { %v6152_v51 = vpop.f32.mrf.mxu0  ;;  %6397 = vmatmul.mubr.bf16.vlgmr.msra.gmra.mxu0 %v18033_v58  ;;  %v16283_v58 = vld [vmem:[#allocation14 + $0x190] ss:$40 sps:$4 sm:$0xff]  }
 0x414   :  { %v18146_v22 = vadd.f32 %v6152_v51, %v6112_v27  ;;  %6410 = vmatpush1.bf16.msra.mxu1 %v16268_v31  ;;  %11321 = vmatpush1.bf16.msra.mxu0 %v16271_v53  ;;  %v16319_v27 = vld [vmem:[#allocation14 + $0x4b0] ss:$40 sps:$4 sm:$0xff]   ;;  %v16339_v53 = vld [vmem:[#allocation14 + $0x3c4] ss:$40 sps:$4 sm:$0xff]   ;;  %v16345_v51 = vld [vmem:[#allocation14 + $0x374] ss:$40 sps:$4 sm:$0xff]  }
 0x415   :  { %11352 = vmatprep.mubr.bf16.mxu0 %v18143_v0  ;;  %v6154_v4 = vpop.f32.mrf.mxu0  ;;  %6411 = vmatprep.subr.bf16.mxu1 %v16276_v62  ;;  %v16336_v31 = vld [vmem:[#allocation11 + $0x1744] ss:$40 sps:$4 sm:$0xff]  }
 0x416   :  { %v18149_v10 = vadd.f32 %v6154_v4, %v6114_v60  ;;  %11322 = vmatprep.subr.bf16.mxu0 %v16279_v63  ;;  %v16333_v60 = vld [vmem:[#allocation14 + $0x414] ss:$40 sps:$4 sm:$0xff]   ;;  %v16337_v62 = vld [vmem:[#allocation14 + $0x3c0] ss:$40 sps:$4 sm:$0xff]  }
 0x417   :  { %v6156_v17 = vpop.f32.mrf.mxu0  ;;  %v16342_v63 = vld [vmem:[#allocation11 + $0x16f4] ss:$40 sps:$4 sm:$0xff]   ;;  %v16348_v4 = vld [vmem:[#allocation11 + $0x16a4] ss:$40 sps:$4 sm:$0xff]  }
 0x418   :  { %6412 = vmatpush1.bf16.msra.mxu1 %v16274_v16  ;;  %11323 = vmatpush1.bf16.msra.mxu0 %v16277_v3  ;;  %v16340_v16 = vld [vmem:[#allocation11 + $0x16f0] ss:$40 sps:$4 sm:$0xff]  }
 0x419   :  { %v6157_v20 = vpop.f32.mrf.mxu0  ;;  %6413 = vmatprep.subr.bf16.mxu1 %v16282_v5  ;;  %11324 = vmatprep.subr.bf16.mxu0 %v16285_v7  ;;  %v16343_v3 = vld [vmem:[#allocation14 + $0x370] ss:$40 sps:$4 sm:$0xff]   ;;  %v16351_v5 = vld [vmem:[#allocation14 + $0x324] ss:$40 sps:$4 sm:$0xff]   ;;  %v16349_v17 = vld [vmem:[#allocation14 + $0x320] ss:$40 sps:$4 sm:$0xff]  }
 0x41a   :  { %v16346_v7 = vld [vmem:[#allocation11 + $0x16a0] ss:$40 sps:$4 sm:$0xff]   ;;  %v6449_v20 = vmax.f32 %v18100_v32, 0.0  ;;  %v6446_v32 = vmax.f32 %v18068_v13, 0.0  ;;  %v16372_v13 = vld [vmem:[#allocation14 + $0x644] ss:$40 sps:$4 sm:$0xff]  }
 0x41c   :  { %6414 = vmatpush1.bf16.msra.mxu1 %v16280_v18  ;;  %11325 = vmatpush1.bf16.msra.mxu0 %v16283_v58  ;;  %v16354_v18 = vld [vmem:[#allocation14 + $0x2d4] ss:$40 sps:$4 sm:$0xff]  }
 0x41d   :  { %6415 = vmatprep.subr.bf16.mxu1 %v16288_v24  ;;  %11326 = vmatprep.subr.bf16.mxu0 %v16291_v48  ;;  %v16357_v58 = vld [vmem:[#allocation14 + $0x734] ss:$40 sps:$4 sm:$0xff]   ;;  %v16352_v24 = vld [vmem:[#allocation14 + $0x2d0] ss:$40 sps:$4 sm:$0xff]  }
 0x41e   :  { %v16355_v48 = vld [vmem:[#allocation14 + $0x730] ss:$40 sps:$4 sm:$0xff]  }
 0x420   :  { %6416 = vmatpush1.bf16.msra.mxu1 %v16286_v52  ;;  %11327 = vmatpush1.bf16.msra.mxu0 %v16289_v47  ;;  %v16360_v52 = vld [vmem:[#allocation14 + $0x284] ss:$40 sps:$4 sm:$0xff]  }
 0x421   :  { %6417 = vmatprep.subr.bf16.mxu1 %v16294_v25  ;;  %11328 = vmatprep.subr.bf16.mxu0 %v16297_v23  ;;  %v16363_v47 = vld [vmem:[#allocation14 + $0x6e4] ss:$40 sps:$4 sm:$0xff]   ;;  %v18152_v25 = vpack.c.bf16 %v6449_v20, %v6449_v20  ;;  %v16406_v20 = vld [vmem:[#allocation14 + $0x960] ss:$40 sps:$4 sm:$0xff]  }
 0x424   :  { %6418 = vmatpush1.bf16.msra.mxu1 %v16292_v49  ;;  %11329 = vmatpush1.bf16.msra.mxu0 %v16295_v36  ;;  %v16358_v36 = vld [vmem:[#allocation14 + $0x280] ss:$40 sps:$4 sm:$0xff]  }
 0x425   :  { %6419 = vmatprep.subr.bf16.mxu1 %v16300_v38  ;;  %11330 = vmatprep.subr.bf16.mxu0 %v16303_v26  ;;  %v16361_v38 = vld [vmem:[#allocation14 + $0x6e0] ss:$40 sps:$4 sm:$0xff]  }
 0x428   :  { %6420 = vmatpush1.bf16.msra.mxu1 %v16298_v39  ;;  %11331 = vmatpush1.bf16.msra.mxu0 %v16301_v40  ;;  %v16366_v39 = vld [vmem:[#allocation14 + $0x694] ss:$40 sps:$4 sm:$0xff]  }
 0x429   :  { %6421 = vmatprep.subr.bf16.mxu1 %v16306_v41  ;;  %11332 = vmatprep.subr.bf16.mxu0 %v16309_v1  ;;  %v16369_v40 = vld [vmem:[#allocation14 + $0xc34] ss:$40 sps:$4 sm:$0xff]   ;;  %v6451_v41 = vmax.f32 %v18128_v30, 0.0  ;;  %v16370_v30 = vld [vmem:[#allocation14 + $0x640] ss:$40 sps:$4 sm:$0xff]  }
 0x42c   :  { %6422 = vmatpush2.bf16.msra.mxu1 %v16304_v42  ;;  %11333 = vmatpush1.bf16.msra.mxu0 %v16307_v11  ;;  %v18161_v42 = vpack.c.bf16 %v6446_v32, %v6446_v32  ;;  %v16421_v32 = vld [vmem:[#allocation14 + $0xe60] ss:$40 sps:$4 sm:$0xff]  }
 0x42d   :  { %6423 = vmatprep.subr.bf16.mxu1 %v16312_v9  ;;  %11334 = vmatprep.subr.bf16.mxu0 %v16315_v59  ;;  %v16375_v9 = vld [vmem:[#allocation14 + $0xbe4] ss:$40 sps:$4 sm:$0xff]   ;;  %v18163_v59 = vpack.c.bf16 %v6451_v41, %v6451_v41  ;;  %v16424_v41 = vld [vmem:[#allocation14 + $0x870] ss:$40 sps:$4 sm:$0xff]  }
 0x430   :  { %6424 = vmatpush2.bf16.msra.mxu1 %v16310_v44  ;;  %11335 = vmatpush1.bf16.msra.mxu0 %v16313_v45 }
 0x431   :  { %6425 = vmatprep.subr.bf16.mxu1 %v16318_v46  ;;  %11336 = vmatprep.subr.bf16.mxu0 %v16321_v14  ;;  %v16373_v46 = vld [vmem:[#allocation14 + $0xbe0] ss:$40 sps:$4 sm:$0xff]  }
 0x434   :  { %6426 = vmatpush2.bf16.msra.mxu1 %v16316_v19  ;;  %11337 = vmatpush2.bf16.msra.mxu0 %v16319_v27  ;;  %v16378_v19 = vld [vmem:[#allocation14 + $0x5f4] ss:$40 sps:$4 sm:$0xff]  }
 0x435   :  { %6427 = vmatprep.subr.bf16.mxu1 %v16324_v50  ;;  %11338 = vmatprep.subr.bf16.mxu0 %v16327_v8  ;;  %v16381_v27 = vld [vmem:[#allocation14 + $0xb94] ss:$40 sps:$4 sm:$0xff]   ;;  %v16376_v8 = vld [vmem:[#allocation14 + $0x5f0] ss:$40 sps:$4 sm:$0xff]  }
 0x438   :  { %6428 = vmatpush2.bf16.msra.mxu1 %v16322_v55  ;;  %11339 = vmatpush2.bf16.msra.mxu0 %v16325_v54  ;;  %v16379_v55 = vld [vmem:[#allocation14 + $0xb90] ss:$40 sps:$4 sm:$0xff]  }
 0x439   :  { %6429 = vmatprep.subr.bf16.mxu1 %v16330_v56  ;;  %11340 = vmatprep.subr.bf16.mxu0 %v16333_v60  ;;  %v16384_v56 = vld [vmem:[#allocation14 + $0x5a4] ss:$40 sps:$4 sm:$0xff]  }
 0x43a   :  { %v16387_v60 = vld [vmem:[#allocation14 + $0xb44] ss:$40 sps:$4 sm:$0xff]  }
 0x43c   :  { %6430 = vmatpush2.bf16.msra.mxu1 %v16328_v33  ;;  %11341 = vmatpush2.bf16.msra.mxu0 %v16331_v61  ;;  %v16382_v33 = vld [vmem:[#allocation14 + $0x5a0] ss:$40 sps:$4 sm:$0xff]  }
 0x43d   :  { %6431 = vmatprep.subr.bf16.mxu1 %v16336_v31  ;;  %11342 = vmatprep.subr.bf16.mxu0 %v16339_v53  ;;  %v16385_v61 = vld [vmem:[#allocation14 + $0xb40] ss:$40 sps:$4 sm:$0xff]   ;;  %v16390_v31 = vld [vmem:[#allocation14 + $0x554] ss:$40 sps:$4 sm:$0xff]  }
 0x43e   :  { %v16393_v53 = vld [vmem:[#allocation14 + $0xaf4] ss:$40 sps:$4 sm:$0xff]  }
 0x440   :  { %6432 = vmatpush2.bf16.msra.mxu1 %v16334_v6  ;;  %11343 = vmatpush2.bf16.msra.mxu0 %v16337_v62  ;;  %v16388_v6 = vld [vmem:[#allocation14 + $0x550] ss:$40 sps:$4 sm:$0xff]  }
 0x441   :  { %6433 = vmatprep.subr.bf16.mxu1 %v16342_v63  ;;  %11344 = vmatprep.subr.bf16.mxu0 %v16345_v51  ;;  %v16391_v62 = vld [vmem:[#allocation14 + $0xaf0] ss:$40 sps:$4 sm:$0xff]   ;;  %v16396_v63 = vld [vmem:[#allocation14 + $0x504] ss:$40 sps:$4 sm:$0xff]  }
 0x442   :  { %v16399_v51 = vld [vmem:[#allocation14 + $0xaa4] ss:$40 sps:$4 sm:$0xff]  }
 0x444   :  { %6434 = vmatpush2.bf16.msra.mxu1 %v16340_v16  ;;  %11345 = vmatpush2.bf16.msra.mxu0 %v16343_v3  ;;  %v16394_v16 = vld [vmem:[#allocation14 + $0x500] ss:$40 sps:$4 sm:$0xff]  }
 0x445   :  { %6435 = vmatprep.subr.bf16.mxu1 %v16348_v4  ;;  %11346 = vmatprep.subr.bf16.mxu0 %v16351_v5  ;;  %v16397_v3 = vld [vmem:[#allocation14 + $0xaa0] ss:$40 sps:$4 sm:$0xff]   ;;  %v16402_v4 = vld [vmem:[#allocation14 + $0x9b4] ss:$40 sps:$4 sm:$0xff]  }
 0x446   :  { %v16405_v5 = vld [vmem:[#allocation14 + $0xa54] ss:$40 sps:$4 sm:$0xff]  }
 0x448   :  { %6436 = vmatpush2.bf16.msra.mxu1 %v16346_v7  ;;  %11347 = vmatpush2.bf16.msra.mxu0 %v16349_v17  ;;  %v16400_v7 = vld [vmem:[#allocation14 + $0x9b0] ss:$40 sps:$4 sm:$0xff]  }
 0x449   :  { %11348 = vmatprep.subr.bf16.mxu0 %v16354_v18  ;;  %11361 = vmatprep.subr.bf16.mxu1 %v16357_v58  ;;  %v16403_v17 = vld [vmem:[#allocation14 + $0xa50] ss:$40 sps:$4 sm:$0xff]   ;;  %v16408_v18 = vld [vmem:[#allocation14 + $0x964] ss:$40 sps:$4 sm:$0xff]  }
 0x44a   :  { %v16411_v58 = vld [vmem:[#allocation14 + $0xa04] ss:$40 sps:$4 sm:$0xff]  }
 0x44b   :  { %v6193_v23 = vpop.f32.mrf.mxu1  ;;  %6438 = vmatmul.mubr.bf16.vlgmr.msra.gmra.mxu1 %v18040_v15  ;;  %v16364_v15 = vld [vmem:[#allocation14 + $0x690] ss:$40 sps:$4 sm:$0xff]  }
 0x44c   :  { %v6194_v49 = vadd.f32 %v6193_v23, %v18146_v22  ;;  %11349 = vmatpush2.bf16.msra.mxu0 %v16352_v24  ;;  %11362 = vmatpush1.bf16.msra.mxu1 %v16355_v48  ;;  %v16367_v22 = vld [vmem:[#allocation14 + $0xc30] ss:$40 sps:$4 sm:$0xff]   ;;  %v16409_v24 = vld [vmem:[#allocation14 + $0xa00] ss:$40 sps:$4 sm:$0xff]   ;;  %v16414_v48 = vld [vmem:[#allocation14 + $0x914] ss:$40 sps:$4 sm:$0xff]  }
 0x44d   :  { %11393 = vmatprep.mubr.bf16.mxu1 %v18152_v25  ;;  %v18158_v26 = vpop.f32.mrf.mxu1  ;;  %11350 = vmatprep.subr.bf16.mxu0 %v16360_v52  ;;  %v16417_v52 = vld [vmem:[#allocation14 + $0xeb4] ss:$40 sps:$4 sm:$0xff]   ;;  %v16415_v23 = vld [vmem:[#allocation14 + $0xeb0] ss:$40 sps:$4 sm:$0xff]  }
 0x44e   :  { %11363 = vmatprep.subr.bf16.mxu1 %v16363_v47  ;;  %v16412_v47 = vld [vmem:[#allocation14 + $0x910] ss:$40 sps:$4 sm:$0xff]  }
 0x44f   :  { %v6197_v1 = vpop.f32.mrf.mxu1 }
 0x450   :  { %11351 = vmatpush2.bf16.msra.mxu0 %v16358_v36  ;;  %11364 = vmatpush1.bf16.msra.mxu1 %v16361_v38  ;;  %v16423_v36 = vld [vmem:[#allocation14 + $0xe64] ss:$40 sps:$4 sm:$0xff]   ;;  %v16418_v38 = vld [vmem:[#allocation14 + $0x8c0] ss:$40 sps:$4 sm:$0xff]   ;;  %v16427_v1 = vld [vmem:[#allocation14 + $0xe10] ss:$40 sps:$4 sm:$0xff]  }
 0x451   :  { %v6198_v11 = vpop.f32.mrf.mxu1  ;;  %11365 = vmatprep.subr.bf16.mxu1 %v16366_v39  ;;  %11402 = vmatprep.subr.bf16.mxu0 %v16369_v40  ;;  %v16426_v39 = vld [vmem:[#allocation14 + $0x874] ss:$40 sps:$4 sm:$0xff]  }
 0x452   :  { %v16429_v40 = vld [vmem:[#allocation14 + $0xe14] ss:$40 sps:$4 sm:$0xff]   ;;  %v16430_v11 = vld [vmem:[#allocation14 + $0x820] ss:$40 sps:$4 sm:$0xff]  }
 0x453   :  { %v6234_v44 = vpop.f32.mrf.mxu0  ;;  %11353 = vmatmul.mubr.bf16.vlgmr.msra.gmra.mxu0 %v18161_v42 }
 0x454   :  { %v18166_v45 = vadd.f32 %v6234_v44, %v6194_v49  ;;  %11366 = vmatpush1.bf16.msra.mxu1 %v16364_v15  ;;  %11403 = vmatpush1.bf16.msra.mxu0 %v16367_v22  ;;  %v16420_v49 = vld [vmem:[#allocation14 + $0x8c4] ss:$40 sps:$4 sm:$0xff]   ;;  %v16441_v44 = vld [vmem:[#allocation14 + $0xd74] ss:$40 sps:$4 sm:$0xff]  }
 0x455   :  { %11434 = vmatprep.mubr.bf16.mxu0 %v18163_v59  ;;  %v18169_v14 = vpop.f32.mrf.mxu0  ;;  %11367 = vmatprep.subr.bf16.mxu1 %v16372_v13  ;;  %v16432_v15 = vld [vmem:[#allocation14 + $0x824] ss:$40 sps:$4 sm:$0xff]   ;;  %v16433_v13 = vld [vmem:[#allocation14 + $0xdc0] ss:$40 sps:$4 sm:$0xff]  }
 0x456   :  { %11404 = vmatprep.subr.bf16.mxu0 %v16375_v9  ;;  %v16435_v22 = vld [vmem:[#allocation14 + $0xdc4] ss:$40 sps:$4 sm:$0xff]   ;;  %v16438_v9 = vld [vmem:[#allocation14 + $0x7d4] ss:$40 sps:$4 sm:$0xff]  }
 0x457   :  { %v6238_v50 = vpop.f32.mrf.mxu0 }
 0x458   :  { %11368 = vmatpush1.bf16.msra.mxu1 %v16370_v30  ;;  %11405 = vmatpush1.bf16.msra.mxu0 %v16373_v46  ;;  %v16436_v30 = vld [vmem:[#allocation14 + $0x7d0] ss:$40 sps:$4 sm:$0xff]   ;;  %v16447_v50 = vld [vmem:[#allocation14 + $0xd24] ss:$40 sps:$4 sm:$0xff]  }
 0x459   :  { %v6239_v54 = vpop.f32.mrf.mxu0  ;;  %11369 = vmatprep.subr.bf16.mxu1 %v16378_v19  ;;  %11406 = vmatprep.subr.bf16.mxu0 %v16381_v27  ;;  %v16439_v46 = vld [vmem:[#allocation14 + $0xd70] ss:$40 sps:$4 sm:$0xff]   ;;  %v6196_v19 = vadd.f32 %v18158_v26, %v18149_v10  ;;  %v16444_v27 = vld [vmem:[#allocation14 + $0x784] ss:$40 sps:$4 sm:$0xff]  }
 0x45a   :  { %v16445_v54 = vld [vmem:[#allocation14 + $0xd20] ss:$40 sps:$4 sm:$0xff]   ;;  %v16448_v10 = vld [vmem:[#allocation14 + $0xcd0] ss:$40 sps:$4 sm:$0xff]  }
 0x45b   :  { %v16451_v26 = vld [vmem:[#allocation14 + $0x1130] ss:$40 sps:$4 sm:$0xff]  }
 0x45c   :  { %11370 = vmatpush1.bf16.msra.mxu1 %v16376_v8  ;;  %11407 = vmatpush1.bf16.msra.mxu0 %v16379_v55  ;;  %v6237_v8 = vadd.f32 %v18169_v14, %v6196_v19  ;;  %v16442_v55 = vld [vmem:[#allocation14 + $0x780] ss:$40 sps:$4 sm:$0xff]   ;;  %v16456_v14 = vld [vmem:[#allocation14 + $0xc84] ss:$40 sps:$4 sm:$0xff]   ;;  %v16474_v19 = vld [vmem:[#allocation14 + $0xf54] ss:$40 sps:$4 sm:$0xff]  }
 0x45d   :  { %11371 = vmatprep.subr.bf16.mxu1 %v16384_v56  ;;  %11408 = vmatprep.subr.bf16.mxu0 %v16387_v60  ;;  %v6448_v56 = vmax.f32 %v18097_v2, 0.0  ;;  %v16450_v60 = vld [vmem:[#allocation14 + $0xcd4] ss:$40 sps:$4 sm:$0xff]   ;;  %v16454_v2 = vld [vmem:[#allocation14 + $0xc80] ss:$40 sps:$4 sm:$0xff]  }
 0x460   :  { %11372 = vmatpush1.bf16.msra.mxu1 %v16382_v33  ;;  %11409 = vmatpush1.bf16.msra.mxu0 %v16385_v61  ;;  %v16453_v33 = vld [vmem:[#allocation14 + $0x1134] ss:$40 sps:$4 sm:$0xff]   ;;  %v6453_v61 = vmax.f32 %v6237_v8, 0.0  ;;  %v16535_v8 = vld [vmem:[#allocation14 + $0x14f0] ss:$40 sps:$4 sm:$0xff]  }
 0x461   :  { %11373 = vmatprep.subr.bf16.mxu1 %v16390_v31  ;;  %11410 = vmatprep.subr.bf16.mxu0 %v16393_v53  ;;  %v18175_v31 = vpack.c.bf16 %v6448_v56, %v6448_v56  ;;  %v16459_v53 = vld [vmem:[#allocation14 + $0x10e4] ss:$40 sps:$4 sm:$0xff]   ;;  %v16475_v56 = vld [vmem:[#allocation14 + $0xf00] ss:$40 sps:$4 sm:$0xff]  }
 0x464   :  { %11374 = vmatpush1.bf16.msra.mxu1 %v16388_v6  ;;  %11411 = vmatpush1.bf16.msra.mxu0 %v16391_v62  ;;  %v18177_v6 = vpack.c.bf16 %v6453_v61, %v6453_v61  ;;  %v1368_v62 = vld [vmem:[#allocation13 + $0x8] sm:$0x3] }
 0x465   :  { %11375 = vmatprep.subr.bf16.mxu1 %v16396_v63  ;;  %11412 = vmatprep.subr.bf16.mxu0 %v16399_v51  ;;  %v16457_v51 = vld [vmem:[#allocation14 + $0x10e0] ss:$40 sps:$4 sm:$0xff]   ;;  %v16549_v61 = vld [vmem:[#allocation14 + $0x1454] ss:$40 sps:$4 sm:$0xff]  }
 0x468   :  { %11376 = vmatpush1.bf16.msra.mxu1 %v16394_v16  ;;  %11413 = vmatpush1.bf16.msra.mxu0 %v16397_v3  ;;  %v6450_v16 = vmax.f32 %v18124_v35, 0.0  ;;  %v16465_v35 = vld [vmem:[#allocation14 + $0x1044] ss:$40 sps:$4 sm:$0xff]  }
 0x469   :  { %11377 = vmatprep.subr.bf16.mxu1 %v16402_v4  ;;  %11414 = vmatprep.subr.bf16.mxu0 %v16405_v5  ;;  %v16462_v4 = vld [vmem:[#allocation14 + $0x1094] ss:$40 sps:$4 sm:$0xff]  }
 0x46a   :  { %v16513_v5 = vld [vmem:[#allocation14 + $0x1634] ss:$40 sps:$4 sm:$0xff]  }
 0x46c   :  { %11378 = vmatpush2.bf16.msra.mxu1 %v16400_v7  ;;  %11415 = vmatpush1.bf16.msra.mxu0 %v16403_v17  ;;  %v1406_v7 = vrot.slane %v1368_v62, %v17955_v28 }
 0x46d   :  { %11379 = vmatprep.subr.bf16.mxu1 %v16408_v18  ;;  %11416 = vmatprep.subr.bf16.mxu0 %v16411_v58  ;;  %v1410_v18 = vrot.slane %v1368_v62, %v17958_v29  ;;  %v16460_v58 = vld [vmem:[#allocation14 + $0x1090] ss:$40 sps:$4 sm:$0xff]   ;;  %v16481_v62 = vld [vmem:[#allocation14 + $0x1360] ss:$40 sps:$4 sm:$0xff]  }
 0x470   :  { %11380 = vmatpush2.bf16.msra.mxu1 %v16406_v20  ;;  %11417 = vmatpush1.bf16.msra.mxu0 %v16409_v24  ;;  %v16511_v20 = vld [vmem:[#allocation14 + $0x1630] ss:$40 sps:$4 sm:$0xff]   ;;  %v18184_v24 = vpack.c.bf16 %v6450_v16, %v6450_v16 }
 0x471   :  { %11381 = vmatprep.subr.bf16.mxu1 %v16414_v48  ;;  %11418 = vmatprep.subr.bf16.mxu0 %v16417_v52  ;;  %v16519_v52 = vld [vmem:[#allocation14 + $0x15e4] ss:$40 sps:$4 sm:$0xff]   ;;  %v16484_v16 = vld [vmem:[#allocation14 + $0x1310] ss:$40 sps:$4 sm:$0xff]  }
 0x474   :  { %11382 = vmatpush2.bf16.msra.mxu1 %v16412_v47  ;;  %11419 = vmatpush2.bf16.msra.mxu0 %v16415_v23 }
 0x475   :  { %11383 = vmatprep.subr.bf16.mxu1 %v16420_v49  ;;  %11420 = vmatprep.subr.bf16.mxu0 %v16423_v36 }
 0x478   :  { %11384 = vmatpush2.bf16.msra.mxu1 %v16418_v38  ;;  %11421 = vmatpush2.bf16.msra.mxu0 %v16421_v32  ;;  %v16463_v38 = vld [vmem:[#allocation14 + $0x1040] ss:$40 sps:$4 sm:$0xff]  }
 0x479   :  { %11385 = vmatprep.subr.bf16.mxu1 %v16426_v39  ;;  %11422 = vmatprep.subr.bf16.mxu0 %v16429_v40  ;;  %v16517_v32 = vld [vmem:[#allocation14 + $0x15e0] ss:$40 sps:$4 sm:$0xff]   ;;  %v16468_v40 = vld [vmem:[#allocation14 + $0xff4] ss:$40 sps:$4 sm:$0xff]  }
 0x47c   :  { %11386 = vmatpush2.bf16.msra.mxu1 %v16424_v41  ;;  %11423 = vmatpush2.bf16.msra.mxu0 %v16427_v1  ;;  %v16525_v41 = vld [vmem:[#allocation14 + $0x1594] ss:$40 sps:$4 sm:$0xff]  }
 0x47d   :  { %11387 = vmatprep.subr.bf16.mxu1 %v16432_v15  ;;  %11424 = vmatprep.subr.bf16.mxu0 %v16435_v22  ;;  %v16466_v22 = vld [vmem:[#allocation14 + $0xff0] ss:$40 sps:$4 sm:$0xff]  }
 0x480   :  { %11388 = vmatpush2.bf16.msra.mxu1 %v16430_v11  ;;  %11425 = vmatpush2.bf16.msra.mxu0 %v16433_v13  ;;  %v16523_v11 = vld [vmem:[#allocation14 + $0x1590] ss:$40 sps:$4 sm:$0xff]  }
 0x481   :  { %11389 = vmatprep.subr.bf16.mxu1 %v16438_v9  ;;  %11426 = vmatprep.subr.bf16.mxu0 %v16441_v44  ;;  %v16471_v9 = vld [vmem:[#allocation14 + $0xfa4] ss:$40 sps:$4 sm:$0xff]  }
 0x482   :  { %v16531_v44 = vld [vmem:[#allocation14 + $0x1544] ss:$40 sps:$4 sm:$0xff]  }
 0x484   :  { %11390 = vmatpush2.bf16.msra.mxu1 %v16436_v30  ;;  %11427 = vmatpush2.bf16.msra.mxu0 %v16439_v46  ;;  %v16469_v30 = vld [vmem:[#allocation14 + $0xfa0] ss:$40 sps:$4 sm:$0xff]  }
 0x485   :  { %11391 = vmatprep.subr.bf16.mxu1 %v16444_v27  ;;  %11428 = vmatprep.subr.bf16.mxu0 %v16447_v50  ;;  %v16529_v46 = vld [vmem:[#allocation14 + $0x1540] ss:$40 sps:$4 sm:$0xff]   ;;  %v16537_v27 = vld [vmem:[#allocation14 + $0x14f4] ss:$40 sps:$4 sm:$0xff]   ;;  %v16472_v50 = vld [vmem:[#allocation14 + $0xf50] ss:$40 sps:$4 sm:$0xff]  }
 0x488   :  { %11392 = vmatpush2.bf16.msra.mxu1 %v16442_v55  ;;  %11429 = vmatpush2.bf16.msra.mxu0 %v16445_v54  ;;  %v16477_v55 = vld [vmem:[#allocation14 + $0xf04] ss:$40 sps:$4 sm:$0xff]  }
 0x489   :  { %11430 = vmatprep.subr.bf16.mxu0 %v16450_v60  ;;  %11443 = vmatprep.subr.bf16.mxu1 %v16453_v33  ;;  %v16543_v54 = vld [vmem:[#allocation14 + $0x14a4] ss:$40 sps:$4 sm:$0xff]   ;;  %v16541_v60 = vld [vmem:[#allocation14 + $0x14a0] ss:$40 sps:$4 sm:$0xff]   ;;  %v16480_v33 = vld [vmem:[#allocation14 + $0x13b4] ss:$40 sps:$4 sm:$0xff]  }
 0x48b   :  { %v6275_v63 = vpop.f32.mrf.mxu1  ;;  %11394 = vmatmul.mubr.bf16.vlgmr.msra.gmra.mxu1 %v18175_v31 }
 0x48c   :  { %11431 = vmatpush2.bf16.msra.mxu0 %v16448_v10  ;;  %11444 = vmatpush1.bf16.msra.mxu1 %v16451_v26  ;;  %v6276_v47 = vadd.f32 %v6275_v63, %v1406_v7  ;;  %v16478_v10 = vld [vmem:[#allocation14 + $0x13b0] ss:$40 sps:$4 sm:$0xff]   ;;  %v16553_v63 = vld [vmem:[#allocation14 + $0x1400] ss:$40 sps:$4 sm:$0xff]  }
 0x48d   :  { %11475 = vmatprep.mubr.bf16.mxu1 %v18177_v6  ;;  %v6277_v3 = vpop.f32.mrf.mxu1  ;;  %11432 = vmatprep.subr.bf16.mxu0 %v16456_v14  ;;  %v16547_v26 = vld [vmem:[#allocation14 + $0x1450] ss:$40 sps:$4 sm:$0xff]   ;;  %v16483_v14 = vld [vmem:[#allocation14 + $0x1364] ss:$40 sps:$4 sm:$0xff]   ;;  %v16487_v7 = vld [vmem:[#allocation14 + $0x12c0] ss:$40 sps:$4 sm:$0xff]  }
 0x48e   :  { %11445 = vmatprep.subr.bf16.mxu1 %v16459_v53  ;;  %v6278_v49 = vadd.f32 %v6277_v3, %v1410_v18  ;;  %v16555_v53 = vld [vmem:[#allocation14 + $0x1404] ss:$40 sps:$4 sm:$0xff]   ;;  %v16559_v3 = vld [vmem:[#allocation14 + $0x18b0] ss:$40 sps:$4 sm:$0xff]   ;;  %v16492_v18 = vld [vmem:[#allocation14 + $0x1274] ss:$40 sps:$4 sm:$0xff]  }
 0x48f   :  { %v6279_v17 = vpop.f32.mrf.mxu1 }
 0x490   :  { %11433 = vmatpush2.bf16.msra.mxu0 %v16454_v2  ;;  %11446 = vmatpush1.bf16.msra.mxu1 %v16457_v51  ;;  %v16486_v2 = vld [vmem:[#allocation14 + $0x1314] ss:$40 sps:$4 sm:$0xff]   ;;  %v16565_v17 = vld [vmem:[#allocation14 + $0x1860] ss:$40 sps:$4 sm:$0xff]  }
 0x491   :  { %v6280_v48 = vpop.f32.mrf.mxu1  ;;  %11447 = vmatprep.subr.bf16.mxu1 %v16462_v4  ;;  %11484 = vmatprep.subr.bf16.mxu0 %v16513_v5  ;;  %v16561_v51 = vld [vmem:[#allocation14 + $0x18b4] ss:$40 sps:$4 sm:$0xff]   ;;  %v16489_v4 = vld [vmem:[#allocation14 + $0x12c4] ss:$40 sps:$4 sm:$0xff]  }
 0x492   :  { %v16567_v5 = vld [vmem:[#allocation14 + $0x1864] ss:$40 sps:$4 sm:$0xff]   ;;  %v16571_v48 = vld [vmem:[#allocation14 + $0x1810] ss:$40 sps:$4 sm:$0xff]  }
 0x493   :  { %v6316_v23 = vpop.f32.mrf.mxu0  ;;  %11435 = vmatmul.mubr.bf16.vlgmr.msra.gmra.mxu0 %v18184_v24 }
 0x494   :  { %v18187_v36 = vadd.f32 %v6316_v23, %v6276_v47  ;;  %11448 = vmatpush1.bf16.msra.mxu1 %v16460_v58  ;;  %11485 = vmatpush1.bf16.msra.mxu0 %v16511_v20  ;;  %v16573_v58 = vld [vmem:[#allocation14 + $0x1814] ss:$40 sps:$4 sm:$0xff]   ;;  %v16490_v20 = vld [vmem:[#allocation14 + $0x1270] ss:$40 sps:$4 sm:$0xff]   ;;  %v16493_v47 = vld [vmem:[#allocation14 + $0x1220] ss:$40 sps:$4 sm:$0xff]  }
 0x495   :  { %v6318_v39 = vpop.f32.mrf.mxu0  ;;  %11449 = vmatprep.subr.bf16.mxu1 %v16465_v35  ;;  %11486 = vmatprep.subr.bf16.mxu0 %v16519_v52  ;;  %v16495_v35 = vld [vmem:[#allocation14 + $0x1224] ss:$40 sps:$4 sm:$0xff]   ;;  %v16577_v23 = vld [vmem:[#allocation14 + $0x17c0] ss:$40 sps:$4 sm:$0xff]  }
 0x496   :  { %v18189_v1 = vadd.f32 %v6318_v39, %v6278_v49  ;;  %v16579_v52 = vld [vmem:[#allocation14 + $0x17c4] ss:$40 sps:$4 sm:$0xff]   ;;  %v16498_v49 = vld [vmem:[#allocation14 + $0x11d4] ss:$40 sps:$4 sm:$0xff]   ;;  %v16583_v39 = vld [vmem:[#allocation14 + $0x1770] ss:$40 sps:$4 sm:$0xff]  }
 0x497   :  { %v6320_v15 = vpop.f32.mrf.mxu0 }
 0x498   :  { %11450 = vmatpush1.bf16.msra.mxu1 %v16463_v38  ;;  %11487 = vmatpush1.bf16.msra.mxu0 %v16517_v32  ;;  %v16585_v38 = vld [vmem:[#allocation14 + $0x1774] ss:$40 sps:$4 sm:$0xff]   ;;  %v16496_v32 = vld [vmem:[#allocation14 + $0x11d0] ss:$40 sps:$4 sm:$0xff]   ;;  %v16499_v15 = vld [vmem:[#allocation14 + $0x1180] ss:$40 sps:$4 sm:$0xff]  }
 0x499   :  { %v6321_v13 = vpop.f32.mrf.mxu0  ;;  %11451 = vmatprep.subr.bf16.mxu1 %v16468_v40  ;;  %11488 = vmatprep.subr.bf16.mxu0 %v16525_v41  ;;  %v16501_v40 = vld [vmem:[#allocation14 + $0x1184] ss:$40 sps:$4 sm:$0xff]  }
 0x49a   :  { %v16591_v41 = vld [vmem:[#allocation14 + $0x1724] ss:$40 sps:$4 sm:$0xff]  }
 0x49b   :  { %v16504_v13 = vld [vmem:[#allocation14 + $0x23c] ss:$40 sps:$4 sm:$0xff]  }
 0x49c   :  { %11452 = vmatpush1.bf16.msra.mxu1 %v16466_v22  ;;  %11489 = vmatpush1.bf16.msra.mxu0 %v16523_v11  ;;  %v16589_v22 = vld [vmem:[#allocation14 + $0x1720] ss:$40 sps:$4 sm:$0xff]   ;;  %v6452_v11 = vmax.f32 %v18166_v45, 0.0 }
 0x49d   :  { %11453 = vmatprep.subr.bf16.mxu1 %v16471_v9  ;;  %11490 = vmatprep.subr.bf16.mxu0 %v16531_v44  ;;  %v16597_v9 = vld [vmem:[#allocation14 + $0x16d4] ss:$40 sps:$4 sm:$0xff]   ;;  %v16502_v44 = vld [vmem:[#allocation14 + $0x238] ss:$40 sps:$4 sm:$0xff]   ;;  %v16505_v45 = vld [vmem:[#allocation14 + $0x1e8] ss:$40 sps:$4 sm:$0xff]  }
 0x4a0   :  { %11454 = vmatpush1.bf16.msra.mxu1 %v16469_v30  ;;  %11491 = vmatpush1.bf16.msra.mxu0 %v16529_v46  ;;  %v18192_v30 = vpack.c.bf16 %v6452_v11, %v6452_v11  ;;  %v16507_v46 = vld [vmem:[#allocation14 + $0x1ec] ss:$40 sps:$4 sm:$0xff]   ;;  %v16594_v11 = vld [vmem:[#allocation14 + $0xc3c] ss:$40 sps:$4 sm:$0xff]  }
 0x4a1   :  { %11455 = vmatprep.subr.bf16.mxu1 %v16474_v19  ;;  %11492 = vmatprep.subr.bf16.mxu0 %v16537_v27  ;;  %v16595_v19 = vld [vmem:[#allocation14 + $0x16d0] ss:$40 sps:$4 sm:$0xff]   ;;  %v16603_v27 = vld [vmem:[#allocation14 + $0x1684] ss:$40 sps:$4 sm:$0xff]  }
 0x4a4   :  { %11456 = vmatpush1.bf16.msra.mxu1 %v16472_v50  ;;  %11493 = vmatpush1.bf16.msra.mxu0 %v16535_v8 }
 0x4a5   :  { %11457 = vmatprep.subr.bf16.mxu1 %v16477_v55  ;;  %11494 = vmatprep.subr.bf16.mxu0 %v16543_v54  ;;  %v16510_v55 = vld [vmem:[#allocation14 + $0x19c] ss:$40 sps:$4 sm:$0xff]   ;;  %v16601_v54 = vld [vmem:[#allocation14 + $0x1680] ss:$40 sps:$4 sm:$0xff]  }
 0x4a8   :  { %11458 = vmatpush1.bf16.msra.mxu1 %v16475_v56  ;;  %11495 = vmatpush1.bf16.msra.mxu0 %v16541_v60  ;;  %v16609_v56 = vld [vmem:[#allocation14 + $0x73c] ss:$40 sps:$4 sm:$0xff]  }
 0x4a9   :  { %11459 = vmatprep.subr.bf16.mxu1 %v16480_v33  ;;  %11496 = vmatprep.subr.bf16.mxu0 %v16549_v61  ;;  %v16508_v33 = vld [vmem:[#allocation14 + $0x198] ss:$40 sps:$4 sm:$0xff]  }
 0x4ac   :  { %11460 = vmatpush2.bf16.msra.mxu1 %v16478_v10  ;;  %11497 = vmatpush1.bf16.msra.mxu0 %v16547_v26  ;;  %v16516_v10 = vld [vmem:[#allocation14 + $0x14c] ss:$40 sps:$4 sm:$0xff]  }
 0x4ad   :  { %11461 = vmatprep.subr.bf16.mxu1 %v16483_v14  ;;  %11498 = vmatprep.subr.bf16.mxu0 %v16555_v53  ;;  %v16514_v14 = vld [vmem:[#allocation14 + $0x148] ss:$40 sps:$4 sm:$0xff]  }
 0x4b0   :  { %11462 = vmatpush2.bf16.msra.mxu1 %v16481_v62  ;;  %11499 = vmatpush1.bf16.msra.mxu0 %v16553_v63  ;;  %v16522_v62 = vld [vmem:[#allocation14 + $0xfc] ss:$40 sps:$4 sm:$0xff]  }
 0x4b1   :  { %11463 = vmatprep.subr.bf16.mxu1 %v16486_v2  ;;  %11500 = vmatprep.subr.bf16.mxu0 %v16561_v51  ;;  %v16520_v2 = vld [vmem:[#allocation14 + $0xf8] ss:$40 sps:$4 sm:$0xff]  }
 0x4b4   :  { %11464 = vmatpush2.bf16.msra.mxu1 %v16484_v16  ;;  %11501 = vmatpush2.bf16.msra.mxu0 %v16559_v3  ;;  %v16528_v16 = vld [vmem:[#allocation14 + $0xac] ss:$40 sps:$4 sm:$0xff]   ;;  %v16526_v3 = vld [vmem:[#allocation14 + $0xa8] ss:$40 sps:$4 sm:$0xff]  }
 0x4b5   :  { %11465 = vmatprep.subr.bf16.mxu1 %v16489_v4  ;;  %11502 = vmatprep.subr.bf16.mxu0 %v16567_v5  ;;  %v16534_v4 = vld [vmem:[#allocation14 + $0x5c] ss:$40 sps:$4 sm:$0xff]   ;;  %v16532_v5 = vld [vmem:[#allocation14 + $0x58] ss:$40 sps:$4 sm:$0xff]  }
 0x4b8   :  { %11466 = vmatpush2.bf16.msra.mxu1 %v16487_v7  ;;  %11503 = vmatpush2.bf16.msra.mxu0 %v16565_v17  ;;  %v16540_v7 = vld [vmem:[#allocation14 + $0xc] ss:$40 sps:$4 sm:$0xff]   ;;  %v16538_v17 = vld [vmem:[#allocation14 + $0x8] ss:$40 sps:$4 sm:$0xff]  }
 0x4b9   :  { %11467 = vmatprep.subr.bf16.mxu1 %v16492_v18  ;;  %11504 = vmatprep.subr.bf16.mxu0 %v16573_v58  ;;  %v16546_v18 = vld [vmem:[#allocation14 + $0x4bc] ss:$40 sps:$4 sm:$0xff]   ;;  %v16544_v58 = vld [vmem:[#allocation14 + $0x4b8] ss:$40 sps:$4 sm:$0xff]  }
 0x4bc   :  { %11468 = vmatpush2.bf16.msra.mxu1 %v16490_v20  ;;  %11505 = vmatpush2.bf16.msra.mxu0 %v16571_v48  ;;  %v16552_v20 = vld [vmem:[#allocation14 + $0x46c] ss:$40 sps:$4 sm:$0xff]   ;;  %v16550_v48 = vld [vmem:[#allocation14 + $0x468] ss:$40 sps:$4 sm:$0xff]  }
 0x4bd   :  { %11469 = vmatprep.subr.bf16.mxu1 %v16495_v35  ;;  %11506 = vmatprep.subr.bf16.mxu0 %v16579_v52  ;;  %v16558_v35 = vld [vmem:[#allocation14 + $0x41c] ss:$40 sps:$4 sm:$0xff]   ;;  %v16556_v52 = vld [vmem:[#allocation14 + $0x418] ss:$40 sps:$4 sm:$0xff]  }
 0x4c0   :  { %11470 = vmatpush2.bf16.msra.mxu1 %v16493_v47  ;;  %11507 = vmatpush2.bf16.msra.mxu0 %v16577_v23  ;;  %v16564_v47 = vld [vmem:[#allocation14 + $0x3cc] ss:$40 sps:$4 sm:$0xff]   ;;  %v16562_v23 = vld [vmem:[#allocation14 + $0x3c8] ss:$40 sps:$4 sm:$0xff]  }
 0x4c1   :  { %11471 = vmatprep.subr.bf16.mxu1 %v16498_v49  ;;  %11508 = vmatprep.subr.bf16.mxu0 %v16585_v38  ;;  %v16570_v49 = vld [vmem:[#allocation14 + $0x37c] ss:$40 sps:$4 sm:$0xff]   ;;  %v16568_v38 = vld [vmem:[#allocation14 + $0x378] ss:$40 sps:$4 sm:$0xff]  }
 0x4c4   :  { %11472 = vmatpush2.bf16.msra.mxu1 %v16496_v32  ;;  %11509 = vmatpush2.bf16.msra.mxu0 %v16583_v39  ;;  %v16576_v32 = vld [vmem:[#allocation14 + $0x32c] ss:$40 sps:$4 sm:$0xff]   ;;  %v16574_v39 = vld [vmem:[#allocation14 + $0x328] ss:$40 sps:$4 sm:$0xff]  }
 0x4c5   :  { %11473 = vmatprep.subr.bf16.mxu1 %v16501_v40  ;;  %11510 = vmatprep.subr.bf16.mxu0 %v16591_v41  ;;  %v16582_v40 = vld [vmem:[#allocation14 + $0x2dc] ss:$40 sps:$4 sm:$0xff]   ;;  %v16580_v41 = vld [vmem:[#allocation14 + $0x2d8] ss:$40 sps:$4 sm:$0xff]  }
 0x4c8   :  { %11474 = vmatpush2.bf16.msra.mxu1 %v16499_v15  ;;  %11511 = vmatpush2.bf16.msra.mxu0 %v16589_v22  ;;  %v16588_v15 = vld [vmem:[#allocation14 + $0x28c] ss:$40 sps:$4 sm:$0xff]   ;;  %v16586_v22 = vld [vmem:[#allocation14 + $0x288] ss:$40 sps:$4 sm:$0xff]  }
 0x4c9   :  { %11525 = vmatprep.subr.bf16.mxu1 %v16504_v13  ;;  %11512 = vmatprep.subr.bf16.mxu0 %v16597_v9  ;;  %v16592_v9 = vld [vmem:[#allocation14 + $0xc38] ss:$40 sps:$4 sm:$0xff]  }
 0x4cb   :  { %v18194_v50 = vpop.f32.mrf.mxu1  ;;  %11476 = vmatmul.mubr.bf16.vlgmr.msra.gmra.mxu1 %v18192_v30 }
 0x4cc   :  { %11526 = vmatpush1.bf16.msra.mxu1 %v16502_v44  ;;  %11557 = vmatprep.mubr.bf16.mxu1 %v18143_v0  ;;  %v6358_v13 = vadd.f32 %v18194_v50, %v18187_v36  ;;  %v16600_v44 = vld [vmem:[#allocation14 + $0xbec] ss:$40 sps:$4 sm:$0xff]   ;;  %v16606_v36 = vld [vmem:[#allocation14 + $0xb9c] ss:$40 sps:$4 sm:$0xff]  }
 0x4cd   :  { %v18198_v8 = vpop.f32.mrf.mxu1  ;;  %11527 = vmatprep.subr.bf16.mxu1 %v16507_v46  ;;  %11513 = vmatpush2.bf16.msra.mxu0 %v16595_v19 }
 0x4ce   :  { %11514 = vmatprep.subr.bf16.mxu0 %v16603_v27  ;;  %v6360_v46 = vadd.f32 %v18198_v8, %v18189_v1  ;;  %v16612_v8 = vld [vmem:[#allocation14 + $0xb4c] ss:$40 sps:$4 sm:$0xff]  }
 0x4cf   :  { %v6361_v60 = vpop.f32.mrf.mxu1 }
 0x4d0   :  { %11528 = vmatpush1.bf16.msra.mxu1 %v16505_v45 }
 0x4d1   :  { %v6362_v61 = vpop.f32.mrf.mxu1  ;;  %11529 = vmatprep.subr.bf16.mxu1 %v16510_v55  ;;  %11515 = vmatpush2.bf16.msra.mxu0 %v16601_v54  ;;  %v16598_v54 = vld [vmem:[#allocation14 + $0xbe8] ss:$40 sps:$4 sm:$0xff]  }
 0x4d2   :  { %11566 = vmatprep.subr.bf16.mxu0 %v16609_v56 }
 0x4d3   :  { %v6398_v26 = vpop.f32.mrf.mxu0 }
 0x4d4   :  { %11530 = vmatpush1.bf16.msra.mxu1 %v16508_v33  ;;  %v6399_v19 = vadd.f32 %v6398_v26, %v6358_v13  ;;  %v16643_v13 = vld [vmem:[#allocation14 + $0x558] ss:$40 sps:$4 sm:$0xff]  }
 0x4d5   :  { %v6400_v53 = vpop.f32.mrf.mxu0  ;;  %11531 = vmatprep.subr.bf16.mxu1 %v16516_v10  ;;  %v16604_v10 = vld [vmem:[#allocation14 + $0xb98] ss:$40 sps:$4 sm:$0xff]  }
 0x4d6   :  { %v6401_v45 = vadd.f32 %v6400_v53, %v6360_v46  ;;  %v16654_v46 = vld [vmem:[#allocation14 + $0xe1c] ss:$40 sps:$4 sm:$0xff]  }
 0x4d7   :  { %v6402_v63 = vpop.f32.mrf.mxu0 }
 0x4d8   :  { %11532 = vmatpush1.bf16.msra.mxu1 %v16514_v14  ;;  %v16607_v14 = vld [vmem:[#allocation14 + $0x738] ss:$40 sps:$4 sm:$0xff]   ;;  %v16615_v63 = vld [vmem:[#allocation14 + $0x6ec] ss:$40 sps:$4 sm:$0xff]  }
 0x4d9   :  { %v6403_v51 = vpop.f32.mrf.mxu0  ;;  %11533 = vmatprep.subr.bf16.mxu1 %v16522_v62 }
 0x4dc   :  { %11534 = vmatpush1.bf16.msra.mxu1 %v16520_v2  ;;  %v16610_v2 = vld [vmem:[#allocation14 + $0xb48] ss:$40 sps:$4 sm:$0xff]  }
 0x4dd   :  { %11535 = vmatprep.subr.bf16.mxu1 %v16528_v16  ;;  %v16618_v16 = vld [vmem:[#allocation14 + $0xafc] ss:$40 sps:$4 sm:$0xff]  }
 0x4e0   :  { %11536 = vmatpush1.bf16.msra.mxu1 %v16526_v3  ;;  %v16613_v3 = vld [vmem:[#allocation14 + $0x6e8] ss:$40 sps:$4 sm:$0xff]  }
 0x4e1   :  { %11537 = vmatprep.subr.bf16.mxu1 %v16534_v4 }
 0x4e4   :  { %11538 = vmatpush1.bf16.msra.mxu1 %v16532_v5  ;;  %v16621_v5 = vld [vmem:[#allocation14 + $0x69c] ss:$40 sps:$4 sm:$0xff]  }
 0x4e5   :  { %11539 = vmatprep.subr.bf16.mxu1 %v16540_v7  ;;  %v16616_v7 = vld [vmem:[#allocation14 + $0xaf8] ss:$40 sps:$4 sm:$0xff]  }
 0x4e8   :  { %11540 = vmatpush1.bf16.msra.mxu1 %v16538_v17 }
 0x4e9   :  { %11541 = vmatprep.subr.bf16.mxu1 %v16546_v18  ;;  %v16624_v18 = vld [vmem:[#allocation14 + $0xaac] ss:$40 sps:$4 sm:$0xff]  }
 0x4ec   :  { %11542 = vmatpush2.bf16.msra.mxu1 %v16544_v58  ;;  %v16619_v58 = vld [vmem:[#allocation14 + $0x698] ss:$40 sps:$4 sm:$0xff]  }
 0x4ed   :  { %11543 = vmatprep.subr.bf16.mxu1 %v16552_v20  ;;  %v16627_v20 = vld [vmem:[#allocation14 + $0x64c] ss:$40 sps:$4 sm:$0xff]  }
 0x4f0   :  { %11544 = vmatpush2.bf16.msra.mxu1 %v16550_v48  ;;  %v16622_v48 = vld [vmem:[#allocation14 + $0xaa8] ss:$40 sps:$4 sm:$0xff]  }
 0x4f1   :  { %11545 = vmatprep.subr.bf16.mxu1 %v16558_v35  ;;  %v16630_v35 = vld [vmem:[#allocation14 + $0xa5c] ss:$40 sps:$4 sm:$0xff]  }
 0x4f4   :  { %11546 = vmatpush2.bf16.msra.mxu1 %v16556_v52  ;;  %v16625_v52 = vld [vmem:[#allocation14 + $0x648] ss:$40 sps:$4 sm:$0xff]  }
 0x4f5   :  { %11547 = vmatprep.subr.bf16.mxu1 %v16564_v47  ;;  %v16633_v47 = vld [vmem:[#allocation14 + $0x5fc] ss:$40 sps:$4 sm:$0xff]  }
 0x4f8   :  { %11548 = vmatpush2.bf16.msra.mxu1 %v16562_v23  ;;  %v16628_v23 = vld [vmem:[#allocation14 + $0xa58] ss:$40 sps:$4 sm:$0xff]  }
 0x4f9   :  { %11549 = vmatprep.subr.bf16.mxu1 %v16570_v49  ;;  %v16636_v49 = vld [vmem:[#allocation14 + $0xa0c] ss:$40 sps:$4 sm:$0xff]  }
 0x4fc   :  { %11550 = vmatpush2.bf16.msra.mxu1 %v16568_v38  ;;  %v16631_v38 = vld [vmem:[#allocation14 + $0x5f8] ss:$40 sps:$4 sm:$0xff]  }
 0x4fd   :  { %11551 = vmatprep.subr.bf16.mxu1 %v16576_v32  ;;  %v16639_v32 = vld [vmem:[#allocation14 + $0x5ac] ss:$40 sps:$4 sm:$0xff]  }
 0x500   :  { %11552 = vmatpush2.bf16.msra.mxu1 %v16574_v39  ;;  %v16634_v39 = vld [vmem:[#allocation14 + $0xa08] ss:$40 sps:$4 sm:$0xff]  }
 0x501   :  { %11553 = vmatprep.subr.bf16.mxu1 %v16582_v40  ;;  %v16642_v40 = vld [vmem:[#allocation14 + $0xebc] ss:$40 sps:$4 sm:$0xff]  }
 0x504   :  { %11554 = vmatpush2.bf16.msra.mxu1 %v16580_v41  ;;  %v16637_v41 = vld [vmem:[#allocation14 + $0x5a8] ss:$40 sps:$4 sm:$0xff]  }
 0x505   :  { %11555 = vmatprep.subr.bf16.mxu1 %v16588_v15  ;;  %v16645_v15 = vld [vmem:[#allocation14 + $0x55c] ss:$40 sps:$4 sm:$0xff]  }
 0x508   :  { %11556 = vmatpush2.bf16.msra.mxu1 %v16586_v22  ;;  %v16640_v22 = vld [vmem:[#allocation14 + $0xeb8] ss:$40 sps:$4 sm:$0xff]  }
 0x509   :  { %11607 = vmatprep.subr.bf16.mxu1 %v16594_v11  ;;  %v16648_v11 = vld [vmem:[#allocation14 + $0xe6c] ss:$40 sps:$4 sm:$0xff]  }
 0x50b   :  { %v6439_v27 = vpop.f32.mrf.mxu1  ;;  %11558 = vmatmul.mubr.bf16.vlgmr.msra.gmra.mxu1 %v18161_v42 }
 0x50c   :  { %v6440_v55 = vadd.f32 %v6439_v27, %v6399_v19  ;;  %11608 = vmatpush1.bf16.msra.mxu1 %v16592_v9  ;;  %11639 = vmatprep.mubr.bf16.mxu1 %v18163_v59  ;;  %v16651_v9 = vld [vmem:[#allocation14 + $0x50c] ss:$40 sps:$4 sm:$0xff]   ;;  %v16649_v19 = vld [vmem:[#allocation14 + $0x508] ss:$40 sps:$4 sm:$0xff]   ;;  %v16657_v27 = vld [vmem:[#allocation14 + $0x9bc] ss:$40 sps:$4 sm:$0xff]  }
 0x50d   :  { %v6441_v56 = vpop.f32.mrf.mxu1  ;;  %11609 = vmatprep.subr.bf16.mxu1 %v16600_v44  ;;  %v16646_v44 = vld [vmem:[#allocation14 + $0xe68] ss:$40 sps:$4 sm:$0xff]  }
 0x50e   :  { %v6442_v50 = vadd.f32 %v6441_v56, %v6401_v45  ;;  %v6454_v60 = vmax.f32 %v6440_v55, 0.0  ;;  %v16652_v45 = vld [vmem:[#allocation14 + $0xe18] ss:$40 sps:$4 sm:$0xff]   ;;  %v16660_v55 = vld [vmem:[#allocation14 + $0xdcc] ss:$40 sps:$4 sm:$0xff]  }
 0x50f   :  { %v6443_v33 = vpop.f32.mrf.mxu1  ;;  %v16663_v56 = vld [vmem:[#allocation14 + $0x96c] ss:$40 sps:$4 sm:$0xff]  }
 0x510   :  { %v6455_v61 = vmax.f32 %v6442_v50, 0.0  ;;  %11610 = vmatpush1.bf16.msra.mxu1 %v16598_v54  ;;  %v18208_v53 = vpack.c.bf16 %v6454_v60, %v6454_v60  ;;  %v16655_v54 = vld [vmem:[#allocation14 + $0x9b8] ss:$40 sps:$4 sm:$0xff]   ;;  %v16666_v50 = vld [vmem:[#allocation14 + $0xd7c] ss:$40 sps:$4 sm:$0xff]  }
 0x511   :  { %v6444_v1 = vpop.f32.mrf.mxu1  ;;  %11611 = vmatprep.subr.bf16.mxu1 %v16606_v36  ;;  %v16658_v36 = vld [vmem:[#allocation14 + $0xdc8] ss:$40 sps:$4 sm:$0xff]   ;;  %v16669_v33 = vld [vmem:[#allocation14 + $0x91c] ss:$40 sps:$4 sm:$0xff]  }
 0x512   :  { %v18206_v26 = vpack.c.bf16 %v6455_v61, %v6455_v61  ;;  %v16661_v60 = vld [vmem:[#allocation14 + $0x968] ss:$40 sps:$4 sm:$0xff]   ;;  %v16664_v61 = vld [vmem:[#allocation14 + $0xd78] ss:$40 sps:$4 sm:$0xff]  }
 0x513   :  { %v18210_v62 = vpop.f32.mrf.mxu0  ;;  %v16667_v1 = vld [vmem:[#allocation14 + $0x918] ss:$40 sps:$4 sm:$0xff]  }
 0x514   :  { %11516 = vmatprep.mubr.bf16.mxu0 %v18206_v26  ;;  %11612 = vmatpush1.bf16.msra.mxu1 %v16604_v10  ;;  %v16672_v10 = vld [vmem:[#allocation14 + $0xd2c] ss:$40 sps:$4 sm:$0xff]  }
 0x515   :  { %v18213_v51 = vpop.f32.mrf.mxu0  ;;  %11517 = vmatmul.mubr.bf16.vlgmr.msra.gmra.mxu0 %v18208_v53  ;;  %11613 = vmatprep.subr.bf16.mxu1 %v16612_v8  ;;  %v16675_v8 = vld [vmem:[#allocation14 + $0x8cc] ss:$40 sps:$4 sm:$0xff]  }
 0x516   :  { %11567 = vmatpush1.bf16.msra.mxu0 %v16607_v14  ;;  %11598 = vmatprep.mubr.bf16.mxu0 %v18152_v25  ;;  %v16670_v14 = vld [vmem:[#allocation14 + $0xd28] ss:$40 sps:$4 sm:$0xff]  }
 0x517   :  { %v11358_v4 = vpop.f32.mrf.mxu0  ;;  %11568 = vmatprep.subr.bf16.mxu0 %v16615_v63  ;;  %v16678_v63 = vld [vmem:[#allocation14 + $0xcdc] ss:$40 sps:$4 sm:$0xff]  }
 0x518   :  { %11614 = vmatpush1.bf16.msra.mxu1 %v16610_v2  ;;  %v16673_v2 = vld [vmem:[#allocation14 + $0x8c8] ss:$40 sps:$4 sm:$0xff]   ;;  %v16684_v4 = vld [vmem:[#allocation14 + $0xc8c] ss:$40 sps:$4 sm:$0xff]  }
 0x519   :  { %v11359_v17 = vpop.f32.mrf.mxu0  ;;  %11615 = vmatprep.subr.bf16.mxu1 %v16618_v16  ;;  %v16681_v16 = vld [vmem:[#allocation14 + $0x87c] ss:$40 sps:$4 sm:$0xff]  }
 0x51a   :  { %11569 = vmatpush1.bf16.msra.mxu0 %v16613_v3  ;;  %v16676_v3 = vld [vmem:[#allocation14 + $0xcd8] ss:$40 sps:$4 sm:$0xff]   ;;  %v16687_v17 = vld [vmem:[#allocation14 + $0x82c] ss:$40 sps:$4 sm:$0xff]  }
 0x51b   :  { %11570 = vmatprep.subr.bf16.mxu0 %v16621_v5  ;;  %v16679_v5 = vld [vmem:[#allocation14 + $0x878] ss:$40 sps:$4 sm:$0xff]  }
 0x51c   :  { %11616 = vmatpush1.bf16.msra.mxu1 %v16616_v7  ;;  %v18217_v7 = vld [vmem:[#allocation16] sm:$0xff] }
 0x51d   :  { %11617 = vmatprep.subr.bf16.mxu1 %v16624_v18  ;;  %v16682_v18 = vld [vmem:[#allocation14 + $0xc88] ss:$40 sps:$4 sm:$0xff]  }
 0x51e   :  { %11571 = vmatpush1.bf16.msra.mxu0 %v16619_v58  ;;  %v16690_v58 = vld [vmem:[#allocation14 + $0x163c] ss:$40 sps:$4 sm:$0xff]  }
 0x51f   :  { %11572 = vmatprep.subr.bf16.mxu0 %v16627_v20  ;;  %v7273_v20 = vrot.slane %v18217_v7, %v17955_v28 }
 0x520   :  { %11618 = vmatpush1.bf16.msra.mxu1 %v16622_v48  ;;  %v16685_v48 = vld [vmem:[#allocation14 + $0x828] ss:$40 sps:$4 sm:$0xff]  }
 0x521   :  { %11619 = vmatprep.subr.bf16.mxu1 %v16630_v35  ;;  %v16693_v35 = vld [vmem:[#allocation14 + $0x7dc] ss:$40 sps:$4 sm:$0xff]  }
 0x522   :  { %11573 = vmatpush1.bf16.msra.mxu0 %v16625_v52  ;;  %v7277_v52 = vrot.slane %v18217_v7, %v17958_v29 }
 0x523   :  { %11574 = vmatprep.subr.bf16.mxu0 %v16633_v47  ;;  %v16688_v47 = vld [vmem:[#allocation14 + $0x1638] ss:$40 sps:$4 sm:$0xff]  }
 0x524   :  { %11620 = vmatpush1.bf16.msra.mxu1 %v16628_v23  ;;  %v16696_v23 = vld [vmem:[#allocation14 + $0x15ec] ss:$40 sps:$4 sm:$0xff]  }
 0x525   :  { %11621 = vmatprep.subr.bf16.mxu1 %v16636_v49  ;;  %v11355_v49 = vadd.f32 %v18210_v62, %v7273_v20  ;;  %v16697_v62 = vld [vmem:[#allocation14 + $0x788] ss:$40 sps:$4 sm:$0xff]   ;;  %v16735_v20 = vld [vmem:[#allocation14 + $0xfac] ss:$40 sps:$4 sm:$0xff]  }
 0x526   :  { %11575 = vmatpush1.bf16.msra.mxu0 %v16631_v38  ;;  %v16691_v38 = vld [vmem:[#allocation14 + $0x7d8] ss:$40 sps:$4 sm:$0xff]  }
 0x527   :  { %11576 = vmatprep.subr.bf16.mxu0 %v16639_v32 }
 0x528   :  { %11622 = vmatpush1.bf16.msra.mxu1 %v16634_v39  ;;  %v16699_v39 = vld [vmem:[#allocation14 + $0x78c] ss:$40 sps:$4 sm:$0xff]  }
 0x529   :  { %11623 = vmatprep.subr.bf16.mxu1 %v16642_v40  ;;  %v11357_v40 = vadd.f32 %v18213_v51, %v7277_v52  ;;  %v16703_v51 = vld [vmem:[#allocation14 + $0x1138] ss:$40 sps:$4 sm:$0xff]   ;;  %v16733_v52 = vld [vmem:[#allocation14 + $0xfa8] ss:$40 sps:$4 sm:$0xff]  }
 0x52a   :  { %11577 = vmatpush1.bf16.msra.mxu0 %v16637_v41 }
 0x52b   :  { %11578 = vmatprep.subr.bf16.mxu0 %v16645_v15  ;;  %v16694_v15 = vld [vmem:[#allocation14 + $0x15e8] ss:$40 sps:$4 sm:$0xff]  }
 0x52c   :  { %11624 = vmatpush2.bf16.msra.mxu1 %v16640_v22 }
 0x52d   :  { %11625 = vmatprep.subr.bf16.mxu1 %v16648_v11  ;;  %v16702_v11 = vld [vmem:[#allocation14 + $0x159c] ss:$40 sps:$4 sm:$0xff]  }
 0x52e   :  { %11579 = vmatpush1.bf16.msra.mxu0 %v16643_v13 }
 0x52f   :  { %11580 = vmatprep.subr.bf16.mxu0 %v16651_v9 }
 0x530   :  { %11626 = vmatpush2.bf16.msra.mxu1 %v16646_v44  ;;  %v16705_v44 = vld [vmem:[#allocation14 + $0x113c] ss:$40 sps:$4 sm:$0xff]  }
 0x531   :  { %11627 = vmatprep.subr.bf16.mxu1 %v16654_v46  ;;  %v16700_v46 = vld [vmem:[#allocation14 + $0x1598] ss:$40 sps:$4 sm:$0xff]  }
 0x532   :  { %11581 = vmatpush1.bf16.msra.mxu0 %v16649_v19 }
 0x533   :  { %11582 = vmatprep.subr.bf16.mxu0 %v16657_v27  ;;  %v16708_v27 = vld [vmem:[#allocation14 + $0x154c] ss:$40 sps:$4 sm:$0xff]  }
 0x534   :  { %11628 = vmatpush2.bf16.msra.mxu1 %v16652_v45 }
 0x535   :  { %11629 = vmatprep.subr.bf16.mxu1 %v16660_v55  ;;  %v16711_v55 = vld [vmem:[#allocation14 + $0x10ec] ss:$40 sps:$4 sm:$0xff]  }
 0x536   :  { %11583 = vmatpush2.bf16.msra.mxu0 %v16655_v54 }
 0x537   :  { %11584 = vmatprep.subr.bf16.mxu0 %v16663_v56  ;;  %v16706_v56 = vld [vmem:[#allocation14 + $0x1548] ss:$40 sps:$4 sm:$0xff]  }
 0x538   :  { %11630 = vmatpush2.bf16.msra.mxu1 %v16658_v36 }
 0x539   :  { %11631 = vmatprep.subr.bf16.mxu1 %v16666_v50  ;;  %v16714_v50 = vld [vmem:[#allocation14 + $0x14fc] ss:$40 sps:$4 sm:$0xff]  }
 0x53a   :  { %11585 = vmatpush2.bf16.msra.mxu0 %v16661_v60 }
 0x53b   :  { %11586 = vmatprep.subr.bf16.mxu0 %v16669_v33  ;;  %v16709_v33 = vld [vmem:[#allocation14 + $0x10e8] ss:$40 sps:$4 sm:$0xff]  }
 0x53c   :  { %11632 = vmatpush2.bf16.msra.mxu1 %v16664_v61 }
 0x53d   :  { %11633 = vmatprep.subr.bf16.mxu1 %v16672_v10  ;;  %v16717_v10 = vld [vmem:[#allocation14 + $0x109c] ss:$40 sps:$4 sm:$0xff]  }
 0x53e   :  { %11587 = vmatpush2.bf16.msra.mxu0 %v16667_v1  ;;  %v16712_v1 = vld [vmem:[#allocation14 + $0x14f8] ss:$40 sps:$4 sm:$0xff]  }
 0x53f   :  { %11588 = vmatprep.subr.bf16.mxu0 %v16675_v8 }
 0x540   :  { %11634 = vmatpush2.bf16.msra.mxu1 %v16670_v14  ;;  %v16720_v14 = vld [vmem:[#allocation14 + $0x14ac] ss:$40 sps:$4 sm:$0xff]  }
 0x541   :  { %11635 = vmatprep.subr.bf16.mxu1 %v16678_v63  ;;  %v16715_v63 = vld [vmem:[#allocation14 + $0x1098] ss:$40 sps:$4 sm:$0xff]  }
 0x542   :  { %11589 = vmatpush2.bf16.msra.mxu0 %v16673_v2  ;;  %v16723_v2 = vld [vmem:[#allocation14 + $0x104c] ss:$40 sps:$4 sm:$0xff]  }
 0x543   :  { %11590 = vmatprep.subr.bf16.mxu0 %v16681_v16  ;;  %v16718_v16 = vld [vmem:[#allocation14 + $0x14a8] ss:$40 sps:$4 sm:$0xff]  }
 0x544   :  { %11636 = vmatpush2.bf16.msra.mxu1 %v16676_v3  ;;  %v16726_v3 = vld [vmem:[#allocation14 + $0x145c] ss:$40 sps:$4 sm:$0xff]  }
 0x545   :  { %11637 = vmatprep.subr.bf16.mxu1 %v16684_v4  ;;  %v16721_v4 = vld [vmem:[#allocation14 + $0x1048] ss:$40 sps:$4 sm:$0xff]  }
 0x546   :  { %11591 = vmatpush2.bf16.msra.mxu0 %v16679_v5  ;;  %v16729_v5 = vld [vmem:[#allocation14 + $0xffc] ss:$40 sps:$4 sm:$0xff]  }
 0x547   :  { %11592 = vmatprep.subr.bf16.mxu0 %v16687_v17  ;;  %v16724_v17 = vld [vmem:[#allocation14 + $0x1458] ss:$40 sps:$4 sm:$0xff]  }
 0x548   :  { %11638 = vmatpush2.bf16.msra.mxu1 %v16682_v18  ;;  %v16732_v18 = vld [vmem:[#allocation14 + $0x140c] ss:$40 sps:$4 sm:$0xff]  }
 0x549   :  { %11689 = vmatprep.subr.bf16.mxu1 %v16690_v58  ;;  %v16727_v58 = vld [vmem:[#allocation14 + $0xff8] ss:$40 sps:$4 sm:$0xff]  }
 0x54a   :  { %11593 = vmatpush2.bf16.msra.mxu0 %v16685_v48  ;;  %v16730_v48 = vld [vmem:[#allocation14 + $0x1408] ss:$40 sps:$4 sm:$0xff]  }
 0x54b   :  { %v11395_v32 = vpop.f32.mrf.mxu1  ;;  %11640 = vmatmul.mubr.bf16.vlgmr.msra.gmra.mxu1 %v18184_v24  ;;  %11594 = vmatprep.subr.bf16.mxu0 %v16693_v35  ;;  %v16738_v35 = vld [vmem:[#allocation14 + $0x18bc] ss:$40 sps:$4 sm:$0xff]  }
 0x54c   :  { %v11396_v41 = vadd.f32 %v11395_v32, %v11355_v49  ;;  %11690 = vmatpush1.bf16.msra.mxu1 %v16688_v47  ;;  %11721 = vmatprep.mubr.bf16.mxu1 %v18206_v26  ;;  %v16741_v47 = vld [vmem:[#allocation14 + $0xf5c] ss:$40 sps:$4 sm:$0xff]   ;;  %v16744_v49 = vld [vmem:[#allocation14 + $0x186c] ss:$40 sps:$4 sm:$0xff]  }
 0x54d   :  { %v11397_v22 = vpop.f32.mrf.mxu1  ;;  %11691 = vmatprep.subr.bf16.mxu1 %v16696_v23  ;;  %v16736_v23 = vld [vmem:[#allocation14 + $0x18b8] ss:$40 sps:$4 sm:$0xff]   ;;  %v16747_v32 = vld [vmem:[#allocation14 + $0xf0c] ss:$40 sps:$4 sm:$0xff]  }
 0x54e   :  { %v11398_v13 = vadd.f32 %v11397_v22, %v11357_v40  ;;  %11595 = vmatpush2.bf16.msra.mxu0 %v16691_v38  ;;  %v16739_v38 = vld [vmem:[#allocation14 + $0xf58] ss:$40 sps:$4 sm:$0xff]   ;;  %v16750_v40 = vld [vmem:[#allocation14 + $0x181c] ss:$40 sps:$4 sm:$0xff]  }
 0x54f   :  { %v11399_v9 = vpop.f32.mrf.mxu1  ;;  %11596 = vmatprep.subr.bf16.mxu0 %v16699_v39  ;;  %v16742_v39 = vld [vmem:[#allocation14 + $0x1868] ss:$40 sps:$4 sm:$0xff]   ;;  %v16748_v22 = vld [vmem:[#allocation14 + $0x1818] ss:$40 sps:$4 sm:$0xff]  }
 0x550   :  { %11692 = vmatpush1.bf16.msra.mxu1 %v16694_v15  ;;  %v16753_v15 = vld [vmem:[#allocation14 + $0x13bc] ss:$40 sps:$4 sm:$0xff]   ;;  %v16754_v9 = vld [vmem:[#allocation14 + $0x17c8] ss:$40 sps:$4 sm:$0xff]  }
 0x551   :  { %v11400_v19 = vpop.f32.mrf.mxu1  ;;  %11693 = vmatprep.subr.bf16.mxu1 %v16702_v11  ;;  %v16756_v11 = vld [vmem:[#allocation14 + $0x17cc] ss:$40 sps:$4 sm:$0xff]  }
 0x552   :  { %11597 = vmatpush2.bf16.msra.mxu0 %v16697_v62  ;;  %v16759_v62 = vld [vmem:[#allocation14 + $0x136c] ss:$40 sps:$4 sm:$0xff]   ;;  %v16765_v19 = vld [vmem:[#allocation14 + $0x131c] ss:$40 sps:$4 sm:$0xff]  }
 0x553   :  { %v11436_v45 = vpop.f32.mrf.mxu0  ;;  %11648 = vmatprep.subr.bf16.mxu0 %v16705_v44  ;;  %v16762_v44 = vld [vmem:[#allocation14 + $0x177c] ss:$40 sps:$4 sm:$0xff]  }
 0x554   :  { %v18227_v54 = vadd.f32 %v11436_v45, %v11396_v41  ;;  %11694 = vmatpush1.bf16.msra.mxu1 %v16700_v46  ;;  %v16745_v41 = vld [vmem:[#allocation14 + $0xf08] ss:$40 sps:$4 sm:$0xff]   ;;  %v16763_v45 = vld [vmem:[#allocation14 + $0x1318] ss:$40 sps:$4 sm:$0xff]  }
 0x555   :  { %11599 = vmatmul.mubr.bf16.vlgmr.msra.gmra.mxu0 %v18175_v31  ;;  %v11438_v36 = vpop.f32.mrf.mxu0  ;;  %11695 = vmatprep.subr.bf16.mxu1 %v16708_v27  ;;  %v16757_v46 = vld [vmem:[#allocation14 + $0x1368] ss:$40 sps:$4 sm:$0xff]   ;;  %v16760_v27 = vld [vmem:[#allocation14 + $0x1778] ss:$40 sps:$4 sm:$0xff]  }
 0x556   :  { %v18230_v60 = vadd.f32 %v11438_v36, %v11398_v13  ;;  %11649 = vmatpush1.bf16.msra.mxu0 %v16703_v51  ;;  %11680 = vmatprep.mubr.bf16.mxu0 %v18177_v6  ;;  %v16751_v13 = vld [vmem:[#allocation14 + $0x13b8] ss:$40 sps:$4 sm:$0xff]   ;;  %v16768_v51 = vld [vmem:[#allocation14 + $0x172c] ss:$40 sps:$4 sm:$0xff]   ;;  %v16774_v36 = vld [vmem:[#allocation14 + $0x16dc] ss:$40 sps:$4 sm:$0xff]  }
 0x557   :  { %v11440_v61 = vpop.f32.mrf.mxu0  ;;  %11650 = vmatprep.subr.bf16.mxu0 %v16711_v55  ;;  %v16771_v55 = vld [vmem:[#allocation14 + $0x12cc] ss:$40 sps:$4 sm:$0xff]  }
 0x558   :  { %11696 = vmatpush1.bf16.msra.mxu1 %v16706_v56  ;;  %v16766_v56 = vld [vmem:[#allocation14 + $0x1728] ss:$40 sps:$4 sm:$0xff]   ;;  %v16772_v61 = vld [vmem:[#allocation14 + $0x16d8] ss:$40 sps:$4 sm:$0xff]  }
 0x559   :  { %v11441_v8 = vpop.f32.mrf.mxu0  ;;  %11697 = vmatprep.subr.bf16.mxu1 %v16714_v50  ;;  %v16769_v50 = vld [vmem:[#allocation14 + $0x12c8] ss:$40 sps:$4 sm:$0xff]  }
 0x55a   :  { %11651 = vmatpush1.bf16.msra.mxu0 %v16709_v33  ;;  %v16777_v33 = vld [vmem:[#allocation14 + $0x127c] ss:$40 sps:$4 sm:$0xff]   ;;  %v16783_v8 = vld [vmem:[#allocation14 + $0x122c] ss:$40 sps:$4 sm:$0xff]  }
 0x55b   :  { %11652 = vmatprep.subr.bf16.mxu0 %v16717_v10  ;;  %v16780_v10 = vld [vmem:[#allocation14 + $0x168c] ss:$40 sps:$4 sm:$0xff]  }
 0x55c   :  { %11698 = vmatpush1.bf16.msra.mxu1 %v16712_v1  ;;  %v16775_v1 = vld [vmem:[#allocation14 + $0x1278] ss:$40 sps:$4 sm:$0xff]  }
 0x55d   :  { %11699 = vmatprep.subr.bf16.mxu1 %v16720_v14  ;;  %v16778_v14 = vld [vmem:[#allocation14 + $0x1688] ss:$40 sps:$4 sm:$0xff]  }
 0x55e   :  { %11653 = vmatpush1.bf16.msra.mxu0 %v16715_v63  ;;  %v16786_v63 = vld [vmem:[#allocation14 + $0x744] ss:$40 sps:$4 sm:$0xff]  }
 0x55f   :  { %11654 = vmatprep.subr.bf16.mxu0 %v16723_v2  ;;  %v16781_v2 = vld [vmem:[#allocation14 + $0x1228] ss:$40 sps:$4 sm:$0xff]  }
 0x560   :  { %11700 = vmatpush1.bf16.msra.mxu1 %v16718_v16  ;;  %v16789_v16 = vld [vmem:[#allocation14 + $0x11dc] ss:$40 sps:$4 sm:$0xff]  }
 0x561   :  { %11701 = vmatprep.subr.bf16.mxu1 %v16726_v3  ;;  %v16784_v3 = vld [vmem:[#allocation14 + $0x740] ss:$40 sps:$4 sm:$0xff]  }
 0x562   :  { %11655 = vmatpush1.bf16.msra.mxu0 %v16721_v4  ;;  %v16792_v4 = vld [vmem:[#allocation14 + $0x6f4] ss:$40 sps:$4 sm:$0xff]  }
 0x563   :  { %11656 = vmatprep.subr.bf16.mxu0 %v16729_v5  ;;  %v16787_v5 = vld [vmem:[#allocation14 + $0x11d8] ss:$40 sps:$4 sm:$0xff]  }
 0x564   :  { %11702 = vmatpush1.bf16.msra.mxu1 %v16724_v17 }
 0x565   :  { %11703 = vmatprep.subr.bf16.mxu1 %v16732_v18  ;;  %v16795_v18 = vld [vmem:[#allocation14 + $0x118c] ss:$40 sps:$4 sm:$0xff]  }
 0x566   :  { %11657 = vmatpush1.bf16.msra.mxu0 %v16727_v58 }
 0x567   :  { %11658 = vmatprep.subr.bf16.mxu0 %v16735_v20  ;;  %v16790_v20 = vld [vmem:[#allocation14 + $0x6f0] ss:$40 sps:$4 sm:$0xff]  }
 0x568   :  { %11704 = vmatpush1.bf16.msra.mxu1 %v16730_v48 }
 0x569   :  { %11705 = vmatprep.subr.bf16.mxu1 %v16738_v35  ;;  %v16798_v35 = vld [vmem:[#allocation14 + $0x6a4] ss:$40 sps:$4 sm:$0xff]  }
 0x56a   :  { %11659 = vmatpush1.bf16.msra.mxu0 %v16733_v52 }
 0x56b   :  { %11660 = vmatprep.subr.bf16.mxu0 %v16741_v47  ;;  %v16793_v47 = vld [vmem:[#allocation14 + $0x1188] ss:$40 sps:$4 sm:$0xff]  }
 0x56c   :  { %11706 = vmatpush2.bf16.msra.mxu1 %v16736_v23 }
 0x56d   :  { %11707 = vmatprep.subr.bf16.mxu1 %v16744_v49  ;;  %v16801_v49 = vld [vmem:[#allocation14 + $0x244] ss:$40 sps:$4 sm:$0xff]  }
 0x56e   :  { %11661 = vmatpush1.bf16.msra.mxu0 %v16739_v38  ;;  %v16796_v38 = vld [vmem:[#allocation14 + $0x6a0] ss:$40 sps:$4 sm:$0xff]  }
 0x56f   :  { %11662 = vmatprep.subr.bf16.mxu0 %v16747_v32 }
 0x570   :  { %11708 = vmatpush2.bf16.msra.mxu1 %v16742_v39  ;;  %v16799_v39 = vld [vmem:[#allocation14 + $0x240] ss:$40 sps:$4 sm:$0xff]  }
 0x571   :  { %11709 = vmatprep.subr.bf16.mxu1 %v16750_v40  ;;  %v16807_v40 = vld [vmem:[#allocation14 + $0x1f4] ss:$40 sps:$4 sm:$0xff]  }
 0x572   :  { %11663 = vmatpush1.bf16.msra.mxu0 %v16745_v41  ;;  %v16802_v41 = vld [vmem:[#allocation14 + $0x650] ss:$40 sps:$4 sm:$0xff]  }
 0x573   :  { %11664 = vmatprep.subr.bf16.mxu0 %v16753_v15  ;;  %v16805_v15 = vld [vmem:[#allocation14 + $0x1f0] ss:$40 sps:$4 sm:$0xff]  }
 0x574   :  { %11710 = vmatpush2.bf16.msra.mxu1 %v16748_v22  ;;  %v16813_v22 = vld [vmem:[#allocation14 + $0x1a4] ss:$40 sps:$4 sm:$0xff]  }
 0x575   :  { %11711 = vmatprep.subr.bf16.mxu1 %v16756_v11  ;;  %v16808_v11 = vld [vmem:[#allocation14 + $0x600] ss:$40 sps:$4 sm:$0xff]  }
 0x576   :  { %11665 = vmatpush2.bf16.msra.mxu0 %v16751_v13  ;;  %v16816_v13 = vld [vmem:[#allocation14 + $0x5b4] ss:$40 sps:$4 sm:$0xff]  }
 0x577   :  { %11666 = vmatprep.subr.bf16.mxu0 %v16759_v62  ;;  %v16811_v62 = vld [vmem:[#allocation14 + $0x1a0] ss:$40 sps:$4 sm:$0xff]  }
 0x578   :  { %11712 = vmatpush2.bf16.msra.mxu1 %v16754_v9  ;;  %v16819_v9 = vld [vmem:[#allocation14 + $0x154] ss:$40 sps:$4 sm:$0xff]  }
 0x579   :  { %11713 = vmatprep.subr.bf16.mxu1 %v16762_v44  ;;  %v16814_v44 = vld [vmem:[#allocation14 + $0x5b0] ss:$40 sps:$4 sm:$0xff]  }
 0x57a   :  { %11667 = vmatpush2.bf16.msra.mxu0 %v16757_v46  ;;  %v16822_v46 = vld [vmem:[#allocation14 + $0x564] ss:$40 sps:$4 sm:$0xff]  }
 0x57b   :  { %11668 = vmatprep.subr.bf16.mxu0 %v16765_v19  ;;  %v16817_v19 = vld [vmem:[#allocation14 + $0x150] ss:$40 sps:$4 sm:$0xff]  }
 0x57c   :  { %11714 = vmatpush2.bf16.msra.mxu1 %v16760_v27  ;;  %v16825_v27 = vld [vmem:[#allocation14 + $0x104] ss:$40 sps:$4 sm:$0xff]  }
 0x57d   :  { %11715 = vmatprep.subr.bf16.mxu1 %v16768_v51  ;;  %v16820_v51 = vld [vmem:[#allocation14 + $0x560] ss:$40 sps:$4 sm:$0xff]  }
 0x57e   :  { %11669 = vmatpush2.bf16.msra.mxu0 %v16763_v45  ;;  %v16828_v45 = vld [vmem:[#allocation14 + $0x514] ss:$40 sps:$4 sm:$0xff]  }
 0x57f   :  { %11670 = vmatprep.subr.bf16.mxu0 %v16771_v55  ;;  %v16823_v55 = vld [vmem:[#allocation14 + $0x100] ss:$40 sps:$4 sm:$0xff]  }
 0x580   :  { %11716 = vmatpush2.bf16.msra.mxu1 %v16766_v56  ;;  %v16831_v56 = vld [vmem:[#allocation14 + $0xb4] ss:$40 sps:$4 sm:$0xff]  }
 0x581   :  { %11717 = vmatprep.subr.bf16.mxu1 %v16774_v36  ;;  %v16826_v36 = vld [vmem:[#allocation14 + $0x510] ss:$40 sps:$4 sm:$0xff]  }
 0x582   :  { %11671 = vmatpush2.bf16.msra.mxu0 %v16769_v50  ;;  %v16834_v50 = vld [vmem:[#allocation14 + $0x9c4] ss:$40 sps:$4 sm:$0xff]  }
 0x583   :  { %11672 = vmatprep.subr.bf16.mxu0 %v16777_v33  ;;  %v16829_v33 = vld [vmem:[#allocation14 + $0xb0] ss:$40 sps:$4 sm:$0xff]  }
 0x584   :  { %11718 = vmatpush2.bf16.msra.mxu1 %v16772_v61  ;;  %v16837_v61 = vld [vmem:[#allocation14 + $0x64] ss:$40 sps:$4 sm:$0xff]  }
 0x585   :  { %11719 = vmatprep.subr.bf16.mxu1 %v16780_v10  ;;  %v16832_v10 = vld [vmem:[#allocation14 + $0x9c0] ss:$40 sps:$4 sm:$0xff]  }
 0x586   :  { %11673 = vmatpush2.bf16.msra.mxu0 %v16775_v1  ;;  %v16840_v1 = vld [vmem:[#allocation14 + $0x974] ss:$40 sps:$4 sm:$0xff]  }
 0x587   :  { %11674 = vmatprep.subr.bf16.mxu0 %v16783_v8  ;;  %v16835_v8 = vld [vmem:[#allocation14 + $0x60] ss:$40 sps:$4 sm:$0xff]  }
 0x588   :  { %11720 = vmatpush2.bf16.msra.mxu1 %v16778_v14  ;;  %v16843_v14 = vld [vmem:[#allocation14 + $0x14] ss:$40 sps:$4 sm:$0xff]  }
 0x589   :  { %11771 = vmatprep.subr.bf16.mxu1 %v16786_v63  ;;  %v16838_v63 = vld [vmem:[#allocation14 + $0x970] ss:$40 sps:$4 sm:$0xff]  }
 0x58a   :  { %11675 = vmatpush2.bf16.msra.mxu0 %v16781_v2  ;;  %v16846_v2 = vld [vmem:[#allocation14 + $0x924] ss:$40 sps:$4 sm:$0xff]  }
 0x58b   :  { %v11477_v17 = vpop.f32.mrf.mxu1  ;;  %11722 = vmatmul.mubr.bf16.vlgmr.msra.gmra.mxu1 %v18208_v53  ;;  %11676 = vmatprep.subr.bf16.mxu0 %v16789_v16  ;;  %v16841_v16 = vld [vmem:[#allocation14 + $0x10] ss:$40 sps:$4 sm:$0xff]  }
 0x58c   :  { %v18235_v58 = vadd.f32 %v11477_v17, %v18227_v54  ;;  %11772 = vmatpush1.bf16.msra.mxu1 %v16784_v3  ;;  %11803 = vmatprep.mubr.bf16.mxu1 %v18152_v25  ;;  %v16804_v54 = vld [vmem:[#allocation14 + $0x654] ss:$40 sps:$4 sm:$0xff]   ;;  %v16849_v3 = vld [vmem:[#allocation14 + $0x4c4] ss:$40 sps:$4 sm:$0xff]   ;;  %v16847_v17 = vld [vmem:[#allocation14 + $0x4c0] ss:$40 sps:$4 sm:$0xff]  }
 0x58d   :  { %v11479_v48 = vpop.f32.mrf.mxu1  ;;  %11773 = vmatprep.subr.bf16.mxu1 %v16792_v4  ;;  %v16844_v4 = vld [vmem:[#allocation14 + $0x920] ss:$40 sps:$4 sm:$0xff]  }
 0x58e   :  { %v18239_v52 = vadd.f32 %v11479_v48, %v18230_v60  ;;  %11677 = vmatpush2.bf16.msra.mxu0 %v16787_v5  ;;  %v16810_v60 = vld [vmem:[#allocation14 + $0x604] ss:$40 sps:$4 sm:$0xff]   ;;  %v16852_v5 = vld [vmem:[#allocation14 + $0x8d4] ss:$40 sps:$4 sm:$0xff]  }
 0x58f   :  { %v11481_v23 = vpop.f32.mrf.mxu1  ;;  %11678 = vmatprep.subr.bf16.mxu0 %v16795_v18  ;;  %v16855_v18 = vld [vmem:[#allocation14 + $0x474] ss:$40 sps:$4 sm:$0xff]   ;;  %v16858_v48 = vld [vmem:[#allocation14 + $0x884] ss:$40 sps:$4 sm:$0xff]  }
 0x590   :  { %11774 = vmatpush1.bf16.msra.mxu1 %v16790_v20  ;;  %v16850_v20 = vld [vmem:[#allocation14 + $0x8d0] ss:$40 sps:$4 sm:$0xff]   ;;  %v16856_v23 = vld [vmem:[#allocation14 + $0x880] ss:$40 sps:$4 sm:$0xff]  }
 0x591   :  { %v11482_v32 = vpop.f32.mrf.mxu1  ;;  %11775 = vmatprep.subr.bf16.mxu1 %v16798_v35  ;;  %v16853_v35 = vld [vmem:[#allocation14 + $0x470] ss:$40 sps:$4 sm:$0xff]  }
 0x592   :  { %11679 = vmatpush2.bf16.msra.mxu0 %v16793_v47  ;;  %v16861_v47 = vld [vmem:[#allocation14 + $0x424] ss:$40 sps:$4 sm:$0xff]   ;;  %v16867_v32 = vld [vmem:[#allocation14 + $0x3d4] ss:$40 sps:$4 sm:$0xff]  }
 0x593   :  { %11730 = vmatprep.subr.bf16.mxu0 %v16801_v49  ;;  %v16864_v49 = vld [vmem:[#allocation14 + $0x834] ss:$40 sps:$4 sm:$0xff]  }
 0x594   :  { %11776 = vmatpush1.bf16.msra.mxu1 %v16796_v38  ;;  %v16859_v38 = vld [vmem:[#allocation14 + $0x420] ss:$40 sps:$4 sm:$0xff]  }
 0x595   :  { %11681 = vmatmul.mubr.bf16.vlgmr.msra.gmra.mxu0 %v18192_v30  ;;  %11777 = vmatprep.subr.bf16.mxu1 %v16804_v54  ;;  %v16862_v54 = vld [vmem:[#allocation14 + $0x830] ss:$40 sps:$4 sm:$0xff]  }
 0x596   :  { %11731 = vmatpush1.bf16.msra.mxu0 %v16799_v39  ;;  %11762 = vmatprep.mubr.bf16.mxu0 %v18143_v0  ;;  %v16870_v39 = vld [vmem:[#allocation14 + $0x7e4] ss:$40 sps:$4 sm:$0xff]  }
 0x597   :  { %11732 = vmatprep.subr.bf16.mxu0 %v16807_v40  ;;  %v16865_v40 = vld [vmem:[#allocation14 + $0x3d0] ss:$40 sps:$4 sm:$0xff]  }
 0x598   :  { %11778 = vmatpush1.bf16.msra.mxu1 %v16802_v41  ;;  %v16873_v41 = vld [vmem:[#allocation14 + $0x384] ss:$40 sps:$4 sm:$0xff]  }
 0x599   :  { %11779 = vmatprep.subr.bf16.mxu1 %v16810_v60  ;;  %v16868_v60 = vld [vmem:[#allocation14 + $0x7e0] ss:$40 sps:$4 sm:$0xff]  }
 0x59a   :  { %11733 = vmatpush1.bf16.msra.mxu0 %v16805_v15  ;;  %v16876_v15 = vld [vmem:[#allocation14 + $0x794] ss:$40 sps:$4 sm:$0xff]  }
 0x59b   :  { %11734 = vmatprep.subr.bf16.mxu0 %v16813_v22  ;;  %v16871_v22 = vld [vmem:[#allocation14 + $0x380] ss:$40 sps:$4 sm:$0xff]  }
 0x59c   :  { %11780 = vmatpush1.bf16.msra.mxu1 %v16808_v11  ;;  %v16879_v11 = vld [vmem:[#allocation14 + $0x334] ss:$40 sps:$4 sm:$0xff]  }
 0x59d   :  { %11781 = vmatprep.subr.bf16.mxu1 %v16816_v13  ;;  %v16874_v13 = vld [vmem:[#allocation14 + $0x790] ss:$40 sps:$4 sm:$0xff]  }
 0x59e   :  { %11735 = vmatpush1.bf16.msra.mxu0 %v16811_v62  ;;  %v16882_v62 = vld [vmem:[#allocation14 + $0x1144] ss:$40 sps:$4 sm:$0xff]  }
 0x59f   :  { %11736 = vmatprep.subr.bf16.mxu0 %v16819_v9  ;;  %v16877_v9 = vld [vmem:[#allocation14 + $0x330] ss:$40 sps:$4 sm:$0xff]  }
 0x5a0   :  { %11782 = vmatpush1.bf16.msra.mxu1 %v16814_v44  ;;  %v16885_v44 = vld [vmem:[#allocation14 + $0x2e4] ss:$40 sps:$4 sm:$0xff]  }
 0x5a1   :  { %11783 = vmatprep.subr.bf16.mxu1 %v16822_v46  ;;  %v16880_v46 = vld [vmem:[#allocation14 + $0x1140] ss:$40 sps:$4 sm:$0xff]  }
 0x5a2   :  { %11737 = vmatpush1.bf16.msra.mxu0 %v16817_v19  ;;  %v16888_v19 = vld [vmem:[#allocation14 + $0x10f4] ss:$40 sps:$4 sm:$0xff]  }
 0x5a3   :  { %11738 = vmatprep.subr.bf16.mxu0 %v16825_v27  ;;  %v16883_v27 = vld [vmem:[#allocation14 + $0x2e0] ss:$40 sps:$4 sm:$0xff]  }
 0x5a4   :  { %11784 = vmatpush1.bf16.msra.mxu1 %v16820_v51 }
 0x5a5   :  { %11785 = vmatprep.subr.bf16.mxu1 %v16828_v45  ;;  %v16891_v45 = vld [vmem:[#allocation14 + $0x294] ss:$40 sps:$4 sm:$0xff]  }
 0x5a6   :  { %11739 = vmatpush1.bf16.msra.mxu0 %v16823_v55  ;;  %v16886_v55 = vld [vmem:[#allocation14 + $0x10f0] ss:$40 sps:$4 sm:$0xff]  }
 0x5a7   :  { %11740 = vmatprep.subr.bf16.mxu0 %v16831_v56 }
 0x5a8   :  { %11786 = vmatpush1.bf16.msra.mxu1 %v16826_v36  ;;  %v16894_v36 = vld [vmem:[#allocation14 + $0x10a4] ss:$40 sps:$4 sm:$0xff]  }
 0x5a9   :  { %11787 = vmatprep.subr.bf16.mxu1 %v16834_v50  ;;  %v16889_v50 = vld [vmem:[#allocation14 + $0x290] ss:$40 sps:$4 sm:$0xff]  }
 0x5aa   :  { %11741 = vmatpush1.bf16.msra.mxu0 %v16829_v33 }
 0x5ab   :  { %11742 = vmatprep.subr.bf16.mxu0 %v16837_v61  ;;  %v16897_v61 = vld [vmem:[#allocation14 + $0xc44] ss:$40 sps:$4 sm:$0xff]  }
 0x5ac   :  { %11788 = vmatpush2.bf16.msra.mxu1 %v16832_v10  ;;  %v16892_v10 = vld [vmem:[#allocation14 + $0x10a0] ss:$40 sps:$4 sm:$0xff]  }
 0x5ad   :  { %11789 = vmatprep.subr.bf16.mxu1 %v16840_v1 }
 0x5ae   :  { %11743 = vmatpush1.bf16.msra.mxu0 %v16835_v8  ;;  %v16900_v8 = vld [vmem:[#allocation14 + $0x1054] ss:$40 sps:$4 sm:$0xff]  }
 0x5af   :  { %11744 = vmatprep.subr.bf16.mxu0 %v16843_v14  ;;  %v16895_v14 = vld [vmem:[#allocation14 + $0xc40] ss:$40 sps:$4 sm:$0xff]  }
 0x5b0   :  { %11790 = vmatpush2.bf16.msra.mxu1 %v16838_v63  ;;  %v16903_v63 = vld [vmem:[#allocation14 + $0xbf4] ss:$40 sps:$4 sm:$0xff]  }
 0x5b1   :  { %11791 = vmatprep.subr.bf16.mxu1 %v16846_v2  ;;  %v16898_v2 = vld [vmem:[#allocation14 + $0x1050] ss:$40 sps:$4 sm:$0xff]  }
 0x5b2   :  { %11745 = vmatpush1.bf16.msra.mxu0 %v16841_v16 }
 0x5b3   :  { %11746 = vmatprep.subr.bf16.mxu0 %v16849_v3  ;;  %v16906_v3 = vld [vmem:[#allocation14 + $0x1004] ss:$40 sps:$4 sm:$0xff]  }
 0x5b4   :  { %11792 = vmatpush2.bf16.msra.mxu1 %v16844_v4 }
 0x5b5   :  { %11793 = vmatprep.subr.bf16.mxu1 %v16852_v5  ;;  %v16901_v5 = vld [vmem:[#allocation14 + $0xbf0] ss:$40 sps:$4 sm:$0xff]  }
 0x5b6   :  { %11747 = vmatpush2.bf16.msra.mxu0 %v16847_v17 }
 0x5b7   :  { %11748 = vmatprep.subr.bf16.mxu0 %v16855_v18  ;;  %v16909_v18 = vld [vmem:[#allocation14 + $0xba4] ss:$40 sps:$4 sm:$0xff]  }
 0x5b8   :  { %11794 = vmatpush2.bf16.msra.mxu1 %v16850_v20 }
 0x5b9   :  { %11795 = vmatprep.subr.bf16.mxu1 %v16858_v48  ;;  %v16904_v48 = vld [vmem:[#allocation14 + $0x1000] ss:$40 sps:$4 sm:$0xff]  }
 0x5ba   :  { %11749 = vmatpush2.bf16.msra.mxu0 %v16853_v35 }
 0x5bb   :  { %11750 = vmatprep.subr.bf16.mxu0 %v16861_v47  ;;  %v16912_v47 = vld [vmem:[#allocation14 + $0xfb4] ss:$40 sps:$4 sm:$0xff]  }
 0x5bc   :  { %11796 = vmatpush2.bf16.msra.mxu1 %v16856_v23  ;;  %v16907_v23 = vld [vmem:[#allocation14 + $0xba0] ss:$40 sps:$4 sm:$0xff]  }
 0x5bd   :  { %11797 = vmatprep.subr.bf16.mxu1 %v16864_v49 }
 0x5be   :  { %11751 = vmatpush2.bf16.msra.mxu0 %v16859_v38  ;;  %v16910_v38 = vld [vmem:[#allocation14 + $0xfb0] ss:$40 sps:$4 sm:$0xff]  }
 0x5bf   :  { %11752 = vmatprep.subr.bf16.mxu0 %v16867_v32  ;;  %v16918_v32 = vld [vmem:[#allocation14 + $0xf64] ss:$40 sps:$4 sm:$0xff]  }
 0x5c0   :  { %11798 = vmatpush2.bf16.msra.mxu1 %v16862_v54  ;;  %v16913_v54 = vld [vmem:[#allocation14 + $0xb50] ss:$40 sps:$4 sm:$0xff]  }
 0x5c1   :  { %11799 = vmatprep.subr.bf16.mxu1 %v16870_v39  ;;  %v16921_v39 = vld [vmem:[#allocation14 + $0xb04] ss:$40 sps:$4 sm:$0xff]  }
 0x5c2   :  { %11753 = vmatpush2.bf16.msra.mxu0 %v16865_v40  ;;  %v16924_v40 = vld [vmem:[#allocation14 + $0xf14] ss:$40 sps:$4 sm:$0xff]  }
 0x5c3   :  { %11754 = vmatprep.subr.bf16.mxu0 %v16873_v41  ;;  %v16919_v41 = vld [vmem:[#allocation14 + $0xb00] ss:$40 sps:$4 sm:$0xff]  }
 0x5c4   :  { %11800 = vmatpush2.bf16.msra.mxu1 %v16868_v60  ;;  %v16927_v60 = vld [vmem:[#allocation14 + $0xab4] ss:$40 sps:$4 sm:$0xff]  }
 0x5c5   :  { %11801 = vmatprep.subr.bf16.mxu1 %v16876_v15  ;;  %v16922_v15 = vld [vmem:[#allocation14 + $0xf10] ss:$40 sps:$4 sm:$0xff]  }
 0x5c6   :  { %11755 = vmatpush2.bf16.msra.mxu0 %v16871_v22  ;;  %v16930_v22 = vld [vmem:[#allocation14 + $0x13c4] ss:$40 sps:$4 sm:$0xff]  }
 0x5c7   :  { %11756 = vmatprep.subr.bf16.mxu0 %v16879_v11  ;;  %v16925_v11 = vld [vmem:[#allocation14 + $0xab0] ss:$40 sps:$4 sm:$0xff]  }
 0x5c8   :  { %11802 = vmatpush2.bf16.msra.mxu1 %v16874_v13  ;;  %v16933_v13 = vld [vmem:[#allocation14 + $0xa64] ss:$40 sps:$4 sm:$0xff]  }
 0x5c9   :  { %11853 = vmatprep.subr.bf16.mxu1 %v16882_v62  ;;  %v16928_v62 = vld [vmem:[#allocation14 + $0x13c0] ss:$40 sps:$4 sm:$0xff]  }
 0x5ca   :  { %11757 = vmatpush2.bf16.msra.mxu0 %v16877_v9  ;;  %v16936_v9 = vld [vmem:[#allocation14 + $0x1374] ss:$40 sps:$4 sm:$0xff]  }
 0x5cb   :  { %v18243_v51 = vpop.f32.mrf.mxu1  ;;  %11804 = vmatmul.mubr.bf16.vlgmr.msra.gmra.mxu1 %v18175_v31  ;;  %11758 = vmatprep.subr.bf16.mxu0 %v16885_v44  ;;  %v16931_v44 = vld [vmem:[#allocation14 + $0xa60] ss:$40 sps:$4 sm:$0xff]  }
 0x5cc   :  { %11854 = vmatpush1.bf16.msra.mxu1 %v16880_v46  ;;  %11885 = vmatprep.mubr.bf16.mxu1 %v18177_v6  ;;  %v16939_v46 = vld [vmem:[#allocation14 + $0xa14] ss:$40 sps:$4 sm:$0xff]  }
 0x5cd   :  { %v18247_v56 = vpop.f32.mrf.mxu1  ;;  %11855 = vmatprep.subr.bf16.mxu1 %v16888_v19  ;;  %v16934_v19 = vld [vmem:[#allocation14 + $0x1370] ss:$40 sps:$4 sm:$0xff]  }
 0x5ce   :  { %11759 = vmatpush2.bf16.msra.mxu0 %v16883_v27  ;;  %v16942_v27 = vld [vmem:[#allocation14 + $0x1324] ss:$40 sps:$4 sm:$0xff]  }
 0x5cf   :  { %v11563_v33 = vpop.f32.mrf.mxu1  ;;  %11760 = vmatprep.subr.bf16.mxu0 %v16891_v45  ;;  %v16937_v45 = vld [vmem:[#allocation14 + $0xa10] ss:$40 sps:$4 sm:$0xff]  }
 0x5d0   :  { %11856 = vmatpush1.bf16.msra.mxu1 %v16886_v55  ;;  %v16945_v55 = vld [vmem:[#allocation14 + $0xec4] ss:$40 sps:$4 sm:$0xff]   ;;  %v16943_v33 = vld [vmem:[#allocation14 + $0xec0] ss:$40 sps:$4 sm:$0xff]  }
 0x5d1   :  { %v11564_v1 = vpop.f32.mrf.mxu1  ;;  %11857 = vmatprep.subr.bf16.mxu1 %v16894_v36  ;;  %v16940_v36 = vld [vmem:[#allocation14 + $0x1320] ss:$40 sps:$4 sm:$0xff]  }
 0x5d2   :  { %11761 = vmatpush2.bf16.msra.mxu0 %v16889_v50  ;;  %v16948_v50 = vld [vmem:[#allocation14 + $0x12d4] ss:$40 sps:$4 sm:$0xff]   ;;  %v16954_v1 = vld [vmem:[#allocation14 + $0x1284] ss:$40 sps:$4 sm:$0xff]  }
 0x5d3   :  { %11812 = vmatprep.subr.bf16.mxu0 %v16897_v61  ;;  %v16951_v61 = vld [vmem:[#allocation14 + $0xe74] ss:$40 sps:$4 sm:$0xff]  }
 0x5d4   :  { %11858 = vmatpush1.bf16.msra.mxu1 %v16892_v10  ;;  %v16946_v10 = vld [vmem:[#allocation14 + $0x12d0] ss:$40 sps:$4 sm:$0xff]  }
 0x5d5   :  { %11763 = vmatmul.mubr.bf16.vlgmr.msra.gmra.mxu0 %v18161_v42  ;;  %v11518_v16 = vpop.f32.mrf.mxu0  ;;  %11859 = vmatprep.subr.bf16.mxu1 %v16900_v8  ;;  %v16949_v8 = vld [vmem:[#allocation14 + $0xe70] ss:$40 sps:$4 sm:$0xff]  }
 0x5d6   :  { %v18251_v4 = vadd.f32 %v11518_v16, %v18235_v58  ;;  %11813 = vmatpush1.bf16.msra.mxu0 %v16895_v14  ;;  %11844 = vmatprep.mubr.bf16.mxu0 %v18163_v59  ;;  %v16915_v58 = vld [vmem:[#allocation14 + $0xb54] ss:$40 sps:$4 sm:$0xff]   ;;  %v16957_v14 = vld [vmem:[#allocation14 + $0xe24] ss:$40 sps:$4 sm:$0xff]   ;;  %v16955_v16 = vld [vmem:[#allocation14 + $0xe20] ss:$40 sps:$4 sm:$0xff]  }
 0x5d7   :  { %v11520_v17 = vpop.f32.mrf.mxu0  ;;  %11814 = vmatprep.subr.bf16.mxu0 %v16903_v63  ;;  %v16952_v63 = vld [vmem:[#allocation14 + $0x1280] ss:$40 sps:$4 sm:$0xff]  }
 0x5d8   :  { %v18255_v20 = vadd.f32 %v11520_v17, %v18239_v52  ;;  %11860 = vmatpush1.bf16.msra.mxu1 %v16898_v2  ;;  %v16916_v52 = vld [vmem:[#allocation14 + $0xf60] ss:$40 sps:$4 sm:$0xff]   ;;  %v16960_v2 = vld [vmem:[#allocation14 + $0x1234] ss:$40 sps:$4 sm:$0xff]   ;;  %v16966_v17 = vld [vmem:[#allocation14 + $0x11e4] ss:$40 sps:$4 sm:$0xff]  }
 0x5d9   :  { %v11522_v35 = vpop.f32.mrf.mxu0  ;;  %11861 = vmatprep.subr.bf16.mxu1 %v16906_v3  ;;  %v16963_v3 = vld [vmem:[#allocation14 + $0xdd4] ss:$40 sps:$4 sm:$0xff]  }
 0x5da   :  { %11815 = vmatpush1.bf16.msra.mxu0 %v16901_v5  ;;  %v16958_v5 = vld [vmem:[#allocation14 + $0x1230] ss:$40 sps:$4 sm:$0xff]   ;;  %v16964_v35 = vld [vmem:[#allocation14 + $0x11e0] ss:$40 sps:$4 sm:$0xff]  }
 0x5db   :  { %v11523_v49 = vpop.f32.mrf.mxu0  ;;  %11816 = vmatprep.subr.bf16.mxu0 %v16909_v18  ;;  %v16961_v18 = vld [vmem:[#allocation14 + $0xdd0] ss:$40 sps:$4 sm:$0xff]  }
 0x5dc   :  { %11862 = vmatpush1.bf16.msra.mxu1 %v16904_v48  ;;  %v16969_v48 = vld [vmem:[#allocation14 + $0xd84] ss:$40 sps:$4 sm:$0xff]   ;;  %v16975_v49 = vld [vmem:[#allocation14 + $0xd34] ss:$40 sps:$4 sm:$0xff]  }
 0x5dd   :  { %11863 = vmatprep.subr.bf16.mxu1 %v16912_v47  ;;  %v16972_v47 = vld [vmem:[#allocation14 + $0x1194] ss:$40 sps:$4 sm:$0xff]  }
 0x5de   :  { %11817 = vmatpush1.bf16.msra.mxu0 %v16907_v23  ;;  %v16967_v23 = vld [vmem:[#allocation14 + $0xd80] ss:$40 sps:$4 sm:$0xff]  }
 0x5df   :  { %11818 = vmatprep.subr.bf16.mxu0 %v16915_v58  ;;  %v16970_v58 = vld [vmem:[#allocation14 + $0x1190] ss:$40 sps:$4 sm:$0xff]  }
 0x5e0   :  { %11864 = vmatpush1.bf16.msra.mxu1 %v16910_v38  ;;  %v16978_v38 = vld [vmem:[#allocation14 + $0x24c] ss:$40 sps:$4 sm:$0xff]  }
 0x5e1   :  { %11865 = vmatprep.subr.bf16.mxu1 %v16918_v32  ;;  %v16973_v32 = vld [vmem:[#allocation14 + $0xd30] ss:$40 sps:$4 sm:$0xff]  }
 0x5e2   :  { %11819 = vmatpush1.bf16.msra.mxu0 %v16913_v54  ;;  %v16981_v54 = vld [vmem:[#allocation14 + $0xce4] ss:$40 sps:$4 sm:$0xff]  }
 0x5e3   :  { %11820 = vmatprep.subr.bf16.mxu0 %v16921_v39  ;;  %v16976_v39 = vld [vmem:[#allocation14 + $0x248] ss:$40 sps:$4 sm:$0xff]  }
 0x5e4   :  { %11866 = vmatpush1.bf16.msra.mxu1 %v16916_v52  ;;  %v16984_v52 = vld [vmem:[#allocation14 + $0x1fc] ss:$40 sps:$4 sm:$0xff]  }
 0x5e5   :  { %11867 = vmatprep.subr.bf16.mxu1 %v16924_v40  ;;  %v16979_v40 = vld [vmem:[#allocation14 + $0xce0] ss:$40 sps:$4 sm:$0xff]  }
 0x5e6   :  { %11821 = vmatpush1.bf16.msra.mxu0 %v16919_v41 }
 0x5e7   :  { %11822 = vmatprep.subr.bf16.mxu0 %v16927_v60  ;;  %v16987_v60 = vld [vmem:[#allocation14 + $0xc94] ss:$40 sps:$4 sm:$0xff]  }
 0x5e8   :  { %11868 = vmatpush1.bf16.msra.mxu1 %v16922_v15  ;;  %v16982_v15 = vld [vmem:[#allocation14 + $0x1f8] ss:$40 sps:$4 sm:$0xff]  }
 0x5e9   :  { %11869 = vmatprep.subr.bf16.mxu1 %v16930_v22 }
 0x5ea   :  { %11823 = vmatpush1.bf16.msra.mxu0 %v16925_v11  ;;  %v16990_v11 = vld [vmem:[#allocation14 + $0x1ac] ss:$40 sps:$4 sm:$0xff]  }
 0x5eb   :  { %11824 = vmatprep.subr.bf16.mxu0 %v16933_v13  ;;  %v16985_v13 = vld [vmem:[#allocation14 + $0xc90] ss:$40 sps:$4 sm:$0xff]  }
 0x5ec   :  { %11870 = vmatpush2.bf16.msra.mxu1 %v16928_v62 }
 0x5ed   :  { %11871 = vmatprep.subr.bf16.mxu1 %v16936_v9  ;;  %v16993_v9 = vld [vmem:[#allocation14 + $0x1644] ss:$40 sps:$4 sm:$0xff]  }
 0x5ee   :  { %11825 = vmatpush1.bf16.msra.mxu0 %v16931_v44  ;;  %v7281_v44 = vrot.slane %v18217_v7, %v17965_v34  ;;  %v17002_v34 = vld [vmem:[#allocation14 + $0x10c] ss:$40 sps:$4 sm:$0xff]  }
 0x5ef   :  { %11826 = vmatprep.subr.bf16.mxu0 %v16939_v46  ;;  %v16988_v46 = vld [vmem:[#allocation14 + $0x1a8] ss:$40 sps:$4 sm:$0xff]  }
 0x5f0   :  { %11872 = vmatpush2.bf16.msra.mxu1 %v16934_v19 }
 0x5f1   :  { %11873 = vmatprep.subr.bf16.mxu1 %v16942_v27  ;;  %v16996_v27 = vld [vmem:[#allocation14 + $0x15c] ss:$40 sps:$4 sm:$0xff]  }
 0x5f2   :  { %11827 = vmatpush1.bf16.msra.mxu0 %v16937_v45  ;;  %v7285_v45 = vrot.slane %v18217_v7, %v17968_v37  ;;  %v16997_v37 = vld [vmem:[#allocation14 + $0x15f0] ss:$40 sps:$4 sm:$0xff]  }
 0x5f3   :  { %11828 = vmatprep.subr.bf16.mxu0 %v16945_v55  ;;  %v16991_v55 = vld [vmem:[#allocation14 + $0x1640] ss:$40 sps:$4 sm:$0xff]  }
 0x5f4   :  { %11874 = vmatpush2.bf16.msra.mxu1 %v16940_v36  ;;  %v16999_v36 = vld [vmem:[#allocation14 + $0x15f4] ss:$40 sps:$4 sm:$0xff]  }
 0x5f5   :  { %11875 = vmatprep.subr.bf16.mxu1 %v16948_v50  ;;  %v11560_v50 = vadd.f32 %v18243_v51, %v7281_v44  ;;  %v17000_v51 = vld [vmem:[#allocation14 + $0x108] ss:$40 sps:$4 sm:$0xff]   ;;  %v17044_v44 = vld [vmem:[#allocation14 + $0x3dc] ss:$40 sps:$4 sm:$0xff]  }
 0x5f6   :  { %11829 = vmatpush2.bf16.msra.mxu0 %v16943_v33  ;;  %v16994_v33 = vld [vmem:[#allocation14 + $0x158] ss:$40 sps:$4 sm:$0xff]  }
 0x5f7   :  { %11830 = vmatprep.subr.bf16.mxu0 %v16951_v61 }
 0x5f8   :  { %11876 = vmatpush2.bf16.msra.mxu1 %v16946_v10  ;;  %v11562_v10 = vadd.f32 %v18247_v56, %v7285_v45  ;;  %v17050_v45 = vld [vmem:[#allocation14 + $0x38c] ss:$40 sps:$4 sm:$0xff]  }
 0x5f9   :  { %11877 = vmatprep.subr.bf16.mxu1 %v16954_v1 }
 0x5fa   :  { %11831 = vmatpush2.bf16.msra.mxu0 %v16949_v8  ;;  %v17005_v8 = vld [vmem:[#allocation14 + $0x15a4] ss:$40 sps:$4 sm:$0xff]  }
 0x5fb   :  { %11832 = vmatprep.subr.bf16.mxu0 %v16957_v14 }
 0x5fc   :  { %11878 = vmatpush2.bf16.msra.mxu1 %v16952_v63 }
 0x5fd   :  { %11879 = vmatprep.subr.bf16.mxu1 %v16960_v2 }
 0x5fe   :  { %11833 = vmatpush2.bf16.msra.mxu0 %v16955_v16  ;;  %v17008_v16 = vld [vmem:[#allocation14 + $0xbc] ss:$40 sps:$4 sm:$0xff]  }
 0x5ff   :  { %11834 = vmatprep.subr.bf16.mxu0 %v16963_v3  ;;  %v17003_v3 = vld [vmem:[#allocation14 + $0x15a0] ss:$40 sps:$4 sm:$0xff]  }
 0x600   :  { %11880 = vmatpush2.bf16.msra.mxu1 %v16958_v5 }
 0x601   :  { %11881 = vmatprep.subr.bf16.mxu1 %v16966_v17  ;;  %v17011_v17 = vld [vmem:[#allocation14 + $0x1554] ss:$40 sps:$4 sm:$0xff]  }
 0x602   :  { %11835 = vmatpush2.bf16.msra.mxu0 %v16961_v18  ;;  %v17006_v18 = vld [vmem:[#allocation14 + $0xb8] ss:$40 sps:$4 sm:$0xff]  }
 0x603   :  { %11836 = vmatprep.subr.bf16.mxu0 %v16969_v48  ;;  %v17014_v48 = vld [vmem:[#allocation14 + $0x6c] ss:$40 sps:$4 sm:$0xff]  }
 0x604   :  { %11882 = vmatpush2.bf16.msra.mxu1 %v16964_v35  ;;  %v17009_v35 = vld [vmem:[#allocation14 + $0x1550] ss:$40 sps:$4 sm:$0xff]  }
 0x605   :  { %11883 = vmatprep.subr.bf16.mxu1 %v16972_v47  ;;  %v17017_v47 = vld [vmem:[#allocation14 + $0x1504] ss:$40 sps:$4 sm:$0xff]  }
 0x606   :  { %11837 = vmatpush2.bf16.msra.mxu0 %v16967_v23  ;;  %v17012_v23 = vld [vmem:[#allocation14 + $0x68] ss:$40 sps:$4 sm:$0xff]  }
 0x607   :  { %11838 = vmatprep.subr.bf16.mxu0 %v16975_v49  ;;  %v17020_v49 = vld [vmem:[#allocation14 + $0x1c] ss:$40 sps:$4 sm:$0xff]  }
 0x608   :  { %11884 = vmatpush2.bf16.msra.mxu1 %v16970_v58  ;;  %v17015_v58 = vld [vmem:[#allocation14 + $0x1500] ss:$40 sps:$4 sm:$0xff]  }
 0x609   :  { %11935 = vmatprep.subr.bf16.mxu1 %v16978_v38  ;;  %v17023_v38 = vld [vmem:[#allocation14 + $0x14b4] ss:$40 sps:$4 sm:$0xff]  }
 0x60a   :  { %11839 = vmatpush2.bf16.msra.mxu0 %v16973_v32  ;;  %v17018_v32 = vld [vmem:[#allocation14 + $0x18] ss:$40 sps:$4 sm:$0xff]  }
 0x60b   :  { %v11641_v41 = vpop.f32.mrf.mxu1  ;;  %11886 = vmatmul.mubr.bf16.vlgmr.msra.gmra.mxu1 %v18192_v30  ;;  %11840 = vmatprep.subr.bf16.mxu0 %v16981_v54  ;;  %v17026_v54 = vld [vmem:[#allocation14 + $0x4cc] ss:$40 sps:$4 sm:$0xff]  }
 0x60c   :  { %11936 = vmatpush1.bf16.msra.mxu1 %v16976_v39  ;;  %11967 = vmatprep.mubr.bf16.mxu1 %v18143_v0  ;;  %v17021_v39 = vld [vmem:[#allocation14 + $0x14b0] ss:$40 sps:$4 sm:$0xff]  }
 0x60d   :  { %v11643_v22 = vpop.f32.mrf.mxu1  ;;  %11937 = vmatprep.subr.bf16.mxu1 %v16984_v52  ;;  %v17029_v52 = vld [vmem:[#allocation14 + $0x1464] ss:$40 sps:$4 sm:$0xff]  }
 0x60e   :  { %11841 = vmatpush2.bf16.msra.mxu0 %v16979_v40  ;;  %v17024_v40 = vld [vmem:[#allocation14 + $0x4c8] ss:$40 sps:$4 sm:$0xff]  }
 0x60f   :  { %v11645_v62 = vpop.f32.mrf.mxu1  ;;  %11842 = vmatprep.subr.bf16.mxu0 %v16987_v60  ;;  %v17027_v60 = vld [vmem:[#allocation14 + $0x1460] ss:$40 sps:$4 sm:$0xff]  }
 0x610   :  { %11938 = vmatpush1.bf16.msra.mxu1 %v16982_v15  ;;  %v17035_v15 = vld [vmem:[#allocation14 + $0x1414] ss:$40 sps:$4 sm:$0xff]   ;;  %v17041_v62 = vld [vmem:[#allocation14 + $0x18c4] ss:$40 sps:$4 sm:$0xff]  }
 0x611   :  { %v11646_v19 = vpop.f32.mrf.mxu1  ;;  %11939 = vmatprep.subr.bf16.mxu1 %v16990_v11  ;;  %v17038_v11 = vld [vmem:[#allocation14 + $0x42c] ss:$40 sps:$4 sm:$0xff]  }
 0x612   :  { %11843 = vmatpush2.bf16.msra.mxu0 %v16985_v13  ;;  %v17033_v13 = vld [vmem:[#allocation14 + $0x1410] ss:$40 sps:$4 sm:$0xff]   ;;  %v17047_v19 = vld [vmem:[#allocation14 + $0x1874] ss:$40 sps:$4 sm:$0xff]  }
 0x613   :  { %11894 = vmatprep.subr.bf16.mxu0 %v16993_v9  ;;  %v17036_v9 = vld [vmem:[#allocation14 + $0x428] ss:$40 sps:$4 sm:$0xff]  }
 0x614   :  { %11940 = vmatpush1.bf16.msra.mxu1 %v16988_v46  ;;  %v17039_v46 = vld [vmem:[#allocation14 + $0x18c0] ss:$40 sps:$4 sm:$0xff]  }
 0x615   :  { %v11600_v61 = vpop.f32.mrf.mxu0  ;;  %11845 = vmatmul.mubr.bf16.vlgmr.msra.gmra.mxu0 %v18184_v24  ;;  %11941 = vmatprep.subr.bf16.mxu1 %v16996_v27  ;;  %v17042_v27 = vld [vmem:[#allocation14 + $0x3d8] ss:$40 sps:$4 sm:$0xff]  }
 0x616   :  { %v11601_v1 = vadd.f32 %v11600_v61, %v11560_v50  ;;  %11895 = vmatpush1.bf16.msra.mxu0 %v16991_v55  ;;  %11926 = vmatprep.mubr.bf16.mxu0 %v18206_v26  ;;  %v17045_v55 = vld [vmem:[#allocation14 + $0x1870] ss:$40 sps:$4 sm:$0xff]   ;;  %v17051_v61 = vld [vmem:[#allocation14 + $0x1820] ss:$40 sps:$4 sm:$0xff]  }
 0x617   :  { %v11602_v7 = vpop.f32.mrf.mxu0  ;;  %11896 = vmatprep.subr.bf16.mxu0 %v16999_v36  ;;  %v17053_v36 = vld [vmem:[#allocation14 + $0x1824] ss:$40 sps:$4 sm:$0xff]   ;;  %v17048_v50 = vld [vmem:[#allocation14 + $0x388] ss:$40 sps:$4 sm:$0xff]  }
 0x618   :  { %v11603_v14 = vadd.f32 %v11602_v7, %v11562_v10  ;;  %11942 = vmatpush1.bf16.msra.mxu1 %v16994_v33  ;;  %v18267_v63 = vadd.f32 %v11641_v41, %v11601_v1  ;;  %v17032_v41 = vld [vmem:[#allocation14 + $0x47c] ss:$40 sps:$4 sm:$0xff]   ;;  %v17054_v10 = vld [vmem:[#allocation14 + $0x338] ss:$40 sps:$4 sm:$0xff]   ;;  %v17062_v1 = vld [vmem:[#allocation14 + $0x2ec] ss:$40 sps:$4 sm:$0xff]  }
 0x619   :  { %v11604_v2 = vpop.f32.mrf.mxu0  ;;  %11943 = vmatprep.subr.bf16.mxu1 %v17002_v34  ;;  %v17056_v33 = vld [vmem:[#allocation14 + $0x33c] ss:$40 sps:$4 sm:$0xff]  }
 0x61a   :  { %11897 = vmatpush1.bf16.msra.mxu0 %v16997_v37  ;;  %v18269_v5 = vadd.f32 %v11643_v22, %v11603_v14  ;;  %v17030_v22 = vld [vmem:[#allocation14 + $0x478] ss:$40 sps:$4 sm:$0xff]   ;;  %v17059_v34 = vld [vmem:[#allocation14 + $0x17d4] ss:$40 sps:$4 sm:$0xff]   ;;  %v17065_v7 = vld [vmem:[#allocation14 + $0x1784] ss:$40 sps:$4 sm:$0xff]  }
 0x61b   :  { %v11605_v56 = vpop.f32.mrf.mxu0  ;;  %11898 = vmatprep.subr.bf16.mxu0 %v17005_v8  ;;  %v17057_v37 = vld [vmem:[#allocation14 + $0x17d0] ss:$40 sps:$4 sm:$0xff]   ;;  %v17068_v14 = vld [vmem:[#allocation14 + $0x29c] ss:$40 sps:$4 sm:$0xff]  }
 0x61c   :  { %11944 = vmatpush1.bf16.msra.mxu1 %v17000_v51  ;;  %v17060_v8 = vld [vmem:[#allocation14 + $0x2e8] ss:$40 sps:$4 sm:$0xff]   ;;  %v17071_v2 = vld [vmem:[#allocation14 + $0x1734] ss:$40 sps:$4 sm:$0xff]  }
 0x61d   :  { %11945 = vmatprep.subr.bf16.mxu1 %v17008_v16  ;;  %v17063_v51 = vld [vmem:[#allocation14 + $0x1780] ss:$40 sps:$4 sm:$0xff]   ;;  %v17069_v56 = vld [vmem:[#allocation14 + $0x1730] ss:$40 sps:$4 sm:$0xff]  }
 0x61e   :  { %11899 = vmatpush1.bf16.msra.mxu0 %v17003_v3  ;;  %v17066_v16 = vld [vmem:[#allocation14 + $0x298] ss:$40 sps:$4 sm:$0xff]   ;;  %v17074_v3 = vld [vmem:[#allocation14 + $0xc4c] ss:$40 sps:$4 sm:$0xff]  }
 0x61f   :  { %11900 = vmatprep.subr.bf16.mxu0 %v17011_v17  ;;  %v17077_v17 = vld [vmem:[#allocation14 + $0x16e4] ss:$40 sps:$4 sm:$0xff]  }
 0x620   :  { %11946 = vmatpush1.bf16.msra.mxu1 %v17006_v18  ;;  %v17072_v18 = vld [vmem:[#allocation14 + $0xc48] ss:$40 sps:$4 sm:$0xff]  }
 0x621   :  { %11947 = vmatprep.subr.bf16.mxu1 %v17014_v48  ;;  %v17080_v48 = vld [vmem:[#allocation14 + $0xbfc] ss:$40 sps:$4 sm:$0xff]  }
 0x622   :  { %11901 = vmatpush1.bf16.msra.mxu0 %v17009_v35  ;;  %v17075_v35 = vld [vmem:[#allocation14 + $0x16e0] ss:$40 sps:$4 sm:$0xff]  }
 0x623   :  { %11902 = vmatprep.subr.bf16.mxu0 %v17017_v47 }
 0x624   :  { %11948 = vmatpush1.bf16.msra.mxu1 %v17012_v23  ;;  %v17083_v23 = vld [vmem:[#allocation14 + $0x1694] ss:$40 sps:$4 sm:$0xff]  }
 0x625   :  { %11949 = vmatprep.subr.bf16.mxu1 %v17020_v49  ;;  %v17078_v49 = vld [vmem:[#allocation14 + $0xbf8] ss:$40 sps:$4 sm:$0xff]  }
 0x626   :  { %11903 = vmatpush1.bf16.msra.mxu0 %v17015_v58 }
 0x627   :  { %11904 = vmatprep.subr.bf16.mxu0 %v17023_v38  ;;  %v17086_v38 = vld [vmem:[#allocation14 + $0xbac] ss:$40 sps:$4 sm:$0xff]  }
 0x628   :  { %11950 = vmatpush1.bf16.msra.mxu1 %v17018_v32  ;;  %v17081_v32 = vld [vmem:[#allocation14 + $0x1690] ss:$40 sps:$4 sm:$0xff]  }
 0x629   :  { %11951 = vmatprep.subr.bf16.mxu1 %v17026_v54 }
 0x62a   :  { %11905 = vmatpush1.bf16.msra.mxu0 %v17021_v39  ;;  %v17089_v39 = vld [vmem:[#allocation14 + $0x74c] ss:$40 sps:$4 sm:$0xff]  }
 0x62b   :  { %11906 = vmatprep.subr.bf16.mxu0 %v17029_v52  ;;  %v17084_v52 = vld [vmem:[#allocation14 + $0xba8] ss:$40 sps:$4 sm:$0xff]  }
 0x62c   :  { %11952 = vmatpush2.bf16.msra.mxu1 %v17024_v40 }
 0x62d   :  { %11953 = vmatprep.subr.bf16.mxu1 %v17032_v41  ;;  %v17092_v41 = vld [vmem:[#allocation14 + $0xb5c] ss:$40 sps:$4 sm:$0xff]  }
 0x62e   :  { %11907 = vmatpush1.bf16.msra.mxu0 %v17027_v60  ;;  %v17087_v60 = vld [vmem:[#allocation14 + $0x748] ss:$40 sps:$4 sm:$0xff]  }
 0x62f   :  { %11908 = vmatprep.subr.bf16.mxu0 %v17035_v15  ;;  %v17095_v15 = vld [vmem:[#allocation14 + $0x6fc] ss:$40 sps:$4 sm:$0xff]  }
 0x630   :  { %11954 = vmatpush2.bf16.msra.mxu1 %v17030_v22  ;;  %v17090_v22 = vld [vmem:[#allocation14 + $0xb58] ss:$40 sps:$4 sm:$0xff]  }
 0x631   :  { %11955 = vmatprep.subr.bf16.mxu1 %v17038_v11 }
 0x632   :  { %11909 = vmatpush1.bf16.msra.mxu0 %v17033_v13  ;;  %v17098_v13 = vld [vmem:[#allocation14 + $0xb0c] ss:$40 sps:$4 sm:$0xff]  }
 0x633   :  { %11910 = vmatprep.subr.bf16.mxu0 %v17041_v62 }
 0x634   :  { %11956 = vmatpush2.bf16.msra.mxu1 %v17036_v9  ;;  %v17093_v9 = vld [vmem:[#allocation14 + $0x6f8] ss:$40 sps:$4 sm:$0xff]  }
 0x635   :  { %11957 = vmatprep.subr.bf16.mxu1 %v17044_v44 }
 0x636   :  { %11911 = vmatpush2.bf16.msra.mxu0 %v17039_v46  ;;  %v17101_v46 = vld [vmem:[#allocation14 + $0x6ac] ss:$40 sps:$4 sm:$0xff]  }
 0x637   :  { %11912 = vmatprep.subr.bf16.mxu0 %v17047_v19 }
 0x638   :  { %11958 = vmatpush2.bf16.msra.mxu1 %v17042_v27 }
 0x639   :  { %11959 = vmatprep.subr.bf16.mxu1 %v17050_v45  ;;  %v17096_v45 = vld [vmem:[#allocation14 + $0xb08] ss:$40 sps:$4 sm:$0xff]  }
 0x63a   :  { %11913 = vmatpush2.bf16.msra.mxu0 %v17045_v55 }
 0x63b   :  { %11914 = vmatprep.subr.bf16.mxu0 %v17053_v36  ;;  %v17104_v36 = vld [vmem:[#allocation14 + $0xabc] ss:$40 sps:$4 sm:$0xff]  }
 0x63c   :  { %11960 = vmatpush2.bf16.msra.mxu1 %v17048_v50 }
 0x63d   :  { %11961 = vmatprep.subr.bf16.mxu1 %v17056_v33 }
 0x63e   :  { %11915 = vmatpush2.bf16.msra.mxu0 %v17051_v61  ;;  %v17107_v61 = vld [vmem:[#allocation14 + $0x65c] ss:$40 sps:$4 sm:$0xff]  }
 0x63f   :  { %11916 = vmatprep.subr.bf16.mxu0 %v17059_v34  ;;  %v17102_v34 = vld [vmem:[#allocation14 + $0xab8] ss:$40 sps:$4 sm:$0xff]  }
 0x640   :  { %11962 = vmatpush2.bf16.msra.mxu1 %v17054_v10  ;;  %v17110_v10 = vld [vmem:[#allocation14 + $0xa6c] ss:$40 sps:$4 sm:$0xff]  }
 0x641   :  { %11963 = vmatprep.subr.bf16.mxu1 %v17062_v1  ;;  %v17105_v1 = vld [vmem:[#allocation14 + $0x658] ss:$40 sps:$4 sm:$0xff]  }
 0x642   :  { %11917 = vmatpush2.bf16.msra.mxu0 %v17057_v37  ;;  %v17108_v37 = vld [vmem:[#allocation14 + $0xa68] ss:$40 sps:$4 sm:$0xff]  }
 0x643   :  { %11918 = vmatprep.subr.bf16.mxu0 %v17065_v7  ;;  %v17116_v7 = vld [vmem:[#allocation14 + $0xa1c] ss:$40 sps:$4 sm:$0xff]  }
 0x644   :  { %11964 = vmatpush2.bf16.msra.mxu1 %v17060_v8  ;;  %v17111_v8 = vld [vmem:[#allocation14 + $0x608] ss:$40 sps:$4 sm:$0xff]  }
 0x645   :  { %11965 = vmatprep.subr.bf16.mxu1 %v17068_v14  ;;  %v17119_v14 = vld [vmem:[#allocation14 + $0x5bc] ss:$40 sps:$4 sm:$0xff]  }
 0x646   :  { %11919 = vmatpush2.bf16.msra.mxu0 %v17063_v51  ;;  %v17114_v51 = vld [vmem:[#allocation14 + $0xa18] ss:$40 sps:$4 sm:$0xff]  }
 0x647   :  { %11920 = vmatprep.subr.bf16.mxu0 %v17071_v2  ;;  %v17122_v2 = vld [vmem:[#allocation14 + $0xecc] ss:$40 sps:$4 sm:$0xff]  }
 0x648   :  { %11966 = vmatpush2.bf16.msra.mxu1 %v17066_v16  ;;  %v17117_v16 = vld [vmem:[#allocation14 + $0x5b8] ss:$40 sps:$4 sm:$0xff]  }
 0x649   :  { %12017 = vmatprep.subr.bf16.mxu1 %v17074_v3  ;;  %v17125_v3 = vld [vmem:[#allocation14 + $0x56c] ss:$40 sps:$4 sm:$0xff]  }
 0x64a   :  { %11921 = vmatpush2.bf16.msra.mxu0 %v17069_v56  ;;  %v17120_v56 = vld [vmem:[#allocation14 + $0xec8] ss:$40 sps:$4 sm:$0xff]  }
 0x64b   :  { %v11723_v47 = vpop.f32.mrf.mxu1  ;;  %11968 = vmatmul.mubr.bf16.vlgmr.msra.gmra.mxu1 %v18161_v42  ;;  %11922 = vmatprep.subr.bf16.mxu0 %v17077_v17  ;;  %v17128_v17 = vld [vmem:[#allocation14 + $0xe7c] ss:$40 sps:$4 sm:$0xff]  }
 0x64c   :  { %12018 = vmatpush1.bf16.msra.mxu1 %v17072_v18  ;;  %12049 = vmatprep.mubr.bf16.mxu1 %v18163_v59  ;;  %v17123_v18 = vld [vmem:[#allocation14 + $0x568] ss:$40 sps:$4 sm:$0xff]  }
 0x64d   :  { %v11725_v58 = vpop.f32.mrf.mxu1  ;;  %12019 = vmatprep.subr.bf16.mxu1 %v17080_v48  ;;  %v17131_v48 = vld [vmem:[#allocation14 + $0x51c] ss:$40 sps:$4 sm:$0xff]  }
 0x64e   :  { %11923 = vmatpush2.bf16.msra.mxu0 %v17075_v35  ;;  %v17126_v35 = vld [vmem:[#allocation14 + $0xe78] ss:$40 sps:$4 sm:$0xff]  }
 0x64f   :  { %v11727_v54 = vpop.f32.mrf.mxu1  ;;  %11924 = vmatprep.subr.bf16.mxu0 %v17083_v23  ;;  %v17129_v23 = vld [vmem:[#allocation14 + $0x518] ss:$40 sps:$4 sm:$0xff]  }
 0x650   :  { %12020 = vmatpush1.bf16.msra.mxu1 %v17078_v49  ;;  %v17137_v49 = vld [vmem:[#allocation14 + $0x9cc] ss:$40 sps:$4 sm:$0xff]   ;;  %v17143_v54 = vld [vmem:[#allocation14 + $0x97c] ss:$40 sps:$4 sm:$0xff]  }
 0x651   :  { %v11728_v40 = vpop.f32.mrf.mxu1  ;;  %12021 = vmatprep.subr.bf16.mxu1 %v17086_v38  ;;  %v17140_v38 = vld [vmem:[#allocation14 + $0xddc] ss:$40 sps:$4 sm:$0xff]  }
 0x652   :  { %11925 = vmatpush2.bf16.msra.mxu0 %v17081_v32  ;;  %v17135_v32 = vld [vmem:[#allocation14 + $0x9c8] ss:$40 sps:$4 sm:$0xff]   ;;  %v17141_v40 = vld [vmem:[#allocation14 + $0x978] ss:$40 sps:$4 sm:$0xff]  }
 0x653   :  { %11976 = vmatprep.subr.bf16.mxu0 %v17089_v39  ;;  %v17138_v39 = vld [vmem:[#allocation14 + $0xdd8] ss:$40 sps:$4 sm:$0xff]  }
 0x654   :  { %12022 = vmatpush1.bf16.msra.mxu1 %v17084_v52  ;;  %v17146_v52 = vld [vmem:[#allocation14 + $0xd8c] ss:$40 sps:$4 sm:$0xff]  }
 0x655   :  { %v11682_v11 = vpop.f32.mrf.mxu0  ;;  %11927 = vmatmul.mubr.bf16.vlgmr.msra.gmra.mxu0 %v18208_v53  ;;  %12023 = vmatprep.subr.bf16.mxu1 %v17092_v41  ;;  %v17149_v41 = vld [vmem:[#allocation14 + $0x92c] ss:$40 sps:$4 sm:$0xff]  }
 0x656   :  { %v11683_v62 = vadd.f32 %v11682_v11, %v18267_v63  ;;  %11977 = vmatpush1.bf16.msra.mxu0 %v17087_v60  ;;  %12008 = vmatprep.mubr.bf16.mxu0 %v18152_v25  ;;  %v17099_v63 = vld [vmem:[#allocation14 + $0x6a8] ss:$40 sps:$4 sm:$0xff]   ;;  %v17155_v11 = vld [vmem:[#allocation14 + $0x8dc] ss:$40 sps:$4 sm:$0xff]  }
 0x657   :  { %v11684_v44 = vpop.f32.mrf.mxu0  ;;  %11978 = vmatprep.subr.bf16.mxu0 %v17095_v15  ;;  %v17144_v60 = vld [vmem:[#allocation14 + $0xd88] ss:$40 sps:$4 sm:$0xff]   ;;  %v17152_v15 = vld [vmem:[#allocation14 + $0xd3c] ss:$40 sps:$4 sm:$0xff]  }
 0x658   :  { %v18276_v19 = vadd.f32 %v11723_v47, %v11683_v62  ;;  %v11685_v27 = vadd.f32 %v11684_v44, %v18269_v5  ;;  %12024 = vmatpush1.bf16.msra.mxu1 %v17090_v22  ;;  %v17113_v5 = vld [vmem:[#allocation14 + $0x60c] ss:$40 sps:$4 sm:$0xff]   ;;  %v17147_v22 = vld [vmem:[#allocation14 + $0x928] ss:$40 sps:$4 sm:$0xff]  }
 0x659   :  { %v11686_v55 = vpop.f32.mrf.mxu0  ;;  %12025 = vmatprep.subr.bf16.mxu1 %v17098_v13  ;;  %v17134_v47 = vld [vmem:[#allocation14 + $0xe2c] ss:$40 sps:$4 sm:$0xff]   ;;  %v17150_v13 = vld [vmem:[#allocation14 + $0xd38] ss:$40 sps:$4 sm:$0xff]  }
 0x65a   :  { %v18279_v50 = vadd.f32 %v11725_v58, %v11685_v27  ;;  %11979 = vmatpush1.bf16.msra.mxu0 %v17093_v9  ;;  %v17132_v58 = vld [vmem:[#allocation14 + $0xe28] ss:$40 sps:$4 sm:$0xff]   ;;  %v17158_v62 = vld [vmem:[#allocation14 + $0xcec] ss:$40 sps:$4 sm:$0xff]   ;;  %v17153_v9 = vld [vmem:[#allocation14 + $0x8d8] ss:$40 sps:$4 sm:$0xff]  }
 0x65b   :  { %v11687_v33 = vpop.f32.mrf.mxu0  ;;  %11980 = vmatprep.subr.bf16.mxu0 %v17101_v46  ;;  %v17161_v44 = vld [vmem:[#allocation14 + $0x88c] ss:$40 sps:$4 sm:$0xff]   ;;  %v17156_v46 = vld [vmem:[#allocation14 + $0xce8] ss:$40 sps:$4 sm:$0xff]   ;;  %v17164_v27 = vld [vmem:[#allocation14 + $0xc9c] ss:$40 sps:$4 sm:$0xff]  }
 0x65c   :  { %12026 = vmatpush1.bf16.msra.mxu1 %v17096_v45  ;;  %v17159_v45 = vld [vmem:[#allocation14 + $0x888] ss:$40 sps:$4 sm:$0xff]   ;;  %v17167_v55 = vld [vmem:[#allocation14 + $0x83c] ss:$40 sps:$4 sm:$0xff]   ;;  %v17165_v33 = vld [vmem:[#allocation14 + $0x838] ss:$40 sps:$4 sm:$0xff]  }
 0x65d   :  { %12027 = vmatprep.subr.bf16.mxu1 %v17104_v36  ;;  %v17162_v36 = vld [vmem:[#allocation14 + $0xc98] ss:$40 sps:$4 sm:$0xff]  }
 0x65e   :  { %11981 = vmatpush1.bf16.msra.mxu0 %v17099_v63  ;;  %v17170_v63 = vld [vmem:[#allocation14 + $0x164c] ss:$40 sps:$4 sm:$0xff]  }
 0x65f   :  { %11982 = vmatprep.subr.bf16.mxu0 %v17107_v61  ;;  %v17173_v61 = vld [vmem:[#allocation14 + $0x7ec] ss:$40 sps:$4 sm:$0xff]  }
 0x660   :  { %12028 = vmatpush1.bf16.msra.mxu1 %v17102_v34  ;;  %v17168_v34 = vld [vmem:[#allocation14 + $0x1648] ss:$40 sps:$4 sm:$0xff]  }
 0x661   :  { %12029 = vmatprep.subr.bf16.mxu1 %v17110_v10  ;;  %v17176_v10 = vld [vmem:[#allocation14 + $0x15fc] ss:$40 sps:$4 sm:$0xff]  }
 0x662   :  { %11983 = vmatpush1.bf16.msra.mxu0 %v17105_v1  ;;  %v17171_v1 = vld [vmem:[#allocation14 + $0x7e8] ss:$40 sps:$4 sm:$0xff]  }
 0x663   :  { %11984 = vmatprep.subr.bf16.mxu0 %v17113_v5 }
 0x664   :  { %12030 = vmatpush1.bf16.msra.mxu1 %v17108_v37  ;;  %v17179_v37 = vld [vmem:[#allocation14 + $0x79c] ss:$40 sps:$4 sm:$0xff]  }
 0x665   :  { %12031 = vmatprep.subr.bf16.mxu1 %v17116_v7  ;;  %v17174_v7 = vld [vmem:[#allocation14 + $0x15f8] ss:$40 sps:$4 sm:$0xff]  }
 0x666   :  { %11985 = vmatpush1.bf16.msra.mxu0 %v17111_v8 }
 0x667   :  { %11986 = vmatprep.subr.bf16.mxu0 %v17119_v14  ;;  %v17182_v14 = vld [vmem:[#allocation14 + $0x15ac] ss:$40 sps:$4 sm:$0xff]  }
 0x668   :  { %12032 = vmatpush1.bf16.msra.mxu1 %v17114_v51  ;;  %v17177_v51 = vld [vmem:[#allocation14 + $0x798] ss:$40 sps:$4 sm:$0xff]  }
 0x669   :  { %12033 = vmatprep.subr.bf16.mxu1 %v17122_v2 }
 0x66a   :  { %11987 = vmatpush1.bf16.msra.mxu0 %v17117_v16  ;;  %v17185_v16 = vld [vmem:[#allocation14 + $0x114c] ss:$40 sps:$4 sm:$0xff]  }
 0x66b   :  { %11988 = vmatprep.subr.bf16.mxu0 %v17125_v3  ;;  %v17180_v3 = vld [vmem:[#allocation14 + $0x15a8] ss:$40 sps:$4 sm:$0xff]  }
 0x66c   :  { %12034 = vmatpush2.bf16.msra.mxu1 %v17120_v56 }
 0x66d   :  { %12035 = vmatprep.subr.bf16.mxu1 %v17128_v17  ;;  %v17188_v17 = vld [vmem:[#allocation14 + $0x155c] ss:$40 sps:$4 sm:$0xff]  }
 0x66e   :  { %11989 = vmatpush1.bf16.msra.mxu0 %v17123_v18  ;;  %v18283_v18 = vld [vmem:[#allocation16] sm:$0xff] }
 0x66f   :  { %11990 = vmatprep.subr.bf16.mxu0 %v17131_v48  ;;  %v7289_v48 = vrot.slane %v18283_v18, %v18011_v12  ;;  %v17197_v12 = vld [vmem:[#allocation14 + $0x10ac] ss:$40 sps:$4 sm:$0xff]  }
 0x670   :  { %12036 = vmatpush2.bf16.msra.mxu1 %v17126_v35  ;;  %v17183_v35 = vld [vmem:[#allocation14 + $0x1148] ss:$40 sps:$4 sm:$0xff]  }
 0x671   :  { %12037 = vmatprep.subr.bf16.mxu1 %v17134_v47  ;;  %v17191_v47 = vld [vmem:[#allocation14 + $0x10fc] ss:$40 sps:$4 sm:$0xff]  }
 0x672   :  { %11991 = vmatpush1.bf16.msra.mxu0 %v17129_v23  ;;  %v7293_v23 = vrot.slane %v18283_v18, %v17988_v57 }
 0x673   :  { %11992 = vmatprep.subr.bf16.mxu0 %v17137_v49  ;;  %v17186_v49 = vld [vmem:[#allocation14 + $0x1558] ss:$40 sps:$4 sm:$0xff]  }
 0x674   :  { %12038 = vmatpush2.bf16.msra.mxu1 %v17132_v58 }
 0x675   :  { %12039 = vmatprep.subr.bf16.mxu1 %v17140_v38  ;;  %v17194_v38 = vld [vmem:[#allocation14 + $0x150c] ss:$40 sps:$4 sm:$0xff]  }
 0x676   :  { %11993 = vmatpush2.bf16.msra.mxu0 %v17135_v32 }
 0x677   :  { %11994 = vmatprep.subr.bf16.mxu0 %v17143_v54  ;;  %v17189_v54 = vld [vmem:[#allocation14 + $0x10f8] ss:$40 sps:$4 sm:$0xff]  }
 0x678   :  { %12040 = vmatpush2.bf16.msra.mxu1 %v17138_v39 }
 0x679   :  { %12041 = vmatprep.subr.bf16.mxu1 %v17146_v52 }
 0x67a   :  { %11995 = vmatpush2.bf16.msra.mxu0 %v17141_v40  ;;  %v17192_v40 = vld [vmem:[#allocation14 + $0x1508] ss:$40 sps:$4 sm:$0xff]  }
 0x67b   :  { %11996 = vmatprep.subr.bf16.mxu0 %v17149_v41 }
 0x67c   :  { %12042 = vmatpush2.bf16.msra.mxu1 %v17144_v60  ;;  %v17200_v60 = vld [vmem:[#allocation14 + $0x14bc] ss:$40 sps:$4 sm:$0xff]  }
 0x67d   :  { %12043 = vmatprep.subr.bf16.mxu1 %v17152_v15  ;;  %v17195_v15 = vld [vmem:[#allocation14 + $0x10a8] ss:$40 sps:$4 sm:$0xff]  }
 0x67e   :  { %11997 = vmatpush2.bf16.msra.mxu0 %v17147_v22 }
 0x67f   :  { %11998 = vmatprep.subr.bf16.mxu0 %v17155_v11 }
 0x680   :  { %12044 = vmatpush2.bf16.msra.mxu1 %v17150_v13  ;;  %v17203_v13 = vld [vmem:[#allocation14 + $0x105c] ss:$40 sps:$4 sm:$0xff]  }
 0x681   :  { %12045 = vmatprep.subr.bf16.mxu1 %v17158_v62  ;;  %v17198_v62 = vld [vmem:[#allocation14 + $0x14b8] ss:$40 sps:$4 sm:$0xff]  }
 0x682   :  { %11999 = vmatpush2.bf16.msra.mxu0 %v17153_v9  ;;  %v17206_v9 = vld [vmem:[#allocation14 + $0x146c] ss:$40 sps:$4 sm:$0xff]  }
 0x683   :  { %12000 = vmatprep.subr.bf16.mxu0 %v17161_v44  ;;  %v17201_v44 = vld [vmem:[#allocation14 + $0x1058] ss:$40 sps:$4 sm:$0xff]  }
 0x684   :  { %12046 = vmatpush2.bf16.msra.mxu1 %v17156_v46  ;;  %v17209_v46 = vld [vmem:[#allocation14 + $0x100c] ss:$40 sps:$4 sm:$0xff]  }
 0x685   :  { %12047 = vmatprep.subr.bf16.mxu1 %v17164_v27  ;;  %v17204_v27 = vld [vmem:[#allocation14 + $0x1468] ss:$40 sps:$4 sm:$0xff]  }
 0x686   :  { %12001 = vmatpush2.bf16.msra.mxu0 %v17159_v45  ;;  %v17212_v45 = vld [vmem:[#allocation14 + $0x141c] ss:$40 sps:$4 sm:$0xff]  }
 0x687   :  { %12002 = vmatprep.subr.bf16.mxu0 %v17167_v55  ;;  %v17207_v55 = vld [vmem:[#allocation14 + $0x1008] ss:$40 sps:$4 sm:$0xff]  }
 0x688   :  { %12048 = vmatpush2.bf16.msra.mxu1 %v17162_v36  ;;  %v17215_v36 = vld [vmem:[#allocation14 + $0xfbc] ss:$40 sps:$4 sm:$0xff]  }
 0x689   :  { %12099 = vmatprep.subr.bf16.mxu1 %v17170_v63  ;;  %v17210_v63 = vld [vmem:[#allocation14 + $0x1418] ss:$40 sps:$4 sm:$0xff]  }
 0x68a   :  { %12003 = vmatpush2.bf16.msra.mxu0 %v17165_v33  ;;  %v17218_v33 = vld [vmem:[#allocation14 + $0x18cc] ss:$40 sps:$4 sm:$0xff]  }
 0x68b   :  { %v11805_v5 = vpop.f32.mrf.mxu1  ;;  %12050 = vmatmul.mubr.bf16.vlgmr.msra.gmra.mxu1 %v18184_v24  ;;  %12004 = vmatprep.subr.bf16.mxu0 %v17173_v61  ;;  %v17213_v61 = vld [vmem:[#allocation14 + $0xfb8] ss:$40 sps:$4 sm:$0xff]  }
 0x68c   :  { %12100 = vmatpush1.bf16.msra.mxu1 %v17168_v34  ;;  %12131 = vmatprep.mubr.bf16.mxu1 %v18206_v26  ;;  %v17221_v34 = vld [vmem:[#allocation14 + $0xf6c] ss:$40 sps:$4 sm:$0xff]  }
 0x68d   :  { %v11807_v8 = vpop.f32.mrf.mxu1  ;;  %12101 = vmatprep.subr.bf16.mxu1 %v17176_v10  ;;  %v17216_v10 = vld [vmem:[#allocation14 + $0x18c8] ss:$40 sps:$4 sm:$0xff]  }
 0x68e   :  { %12005 = vmatpush2.bf16.msra.mxu0 %v17171_v1  ;;  %v17224_v1 = vld [vmem:[#allocation14 + $0x187c] ss:$40 sps:$4 sm:$0xff]  }
 0x68f   :  { %v11809_v2 = vpop.f32.mrf.mxu1  ;;  %12006 = vmatprep.subr.bf16.mxu0 %v17179_v37  ;;  %v17227_v37 = vld [vmem:[#allocation14 + $0xf1c] ss:$40 sps:$4 sm:$0xff]  }
 0x690   :  { %12102 = vmatpush1.bf16.msra.mxu1 %v17174_v7  ;;  %v17222_v7 = vld [vmem:[#allocation14 + $0x1878] ss:$40 sps:$4 sm:$0xff]   ;;  %v17228_v2 = vld [vmem:[#allocation14 + $0x1828] ss:$40 sps:$4 sm:$0xff]  }
 0x691   :  { %v11810_v56 = vpop.f32.mrf.mxu1  ;;  %12103 = vmatprep.subr.bf16.mxu1 %v17182_v14  ;;  %v17225_v14 = vld [vmem:[#allocation14 + $0xf18] ss:$40 sps:$4 sm:$0xff]  }
 0x692   :  { %12007 = vmatpush2.bf16.msra.mxu0 %v17177_v51  ;;  %v17233_v51 = vld [vmem:[#allocation14 + $0x13cc] ss:$40 sps:$4 sm:$0xff]   ;;  %v17239_v56 = vld [vmem:[#allocation14 + $0x137c] ss:$40 sps:$4 sm:$0xff]  }
 0x693   :  { %12058 = vmatprep.subr.bf16.mxu0 %v17185_v16  ;;  %v17236_v16 = vld [vmem:[#allocation14 + $0x17dc] ss:$40 sps:$4 sm:$0xff]  }
 0x694   :  { %12104 = vmatpush1.bf16.msra.mxu1 %v17180_v3  ;;  %v17231_v3 = vld [vmem:[#allocation14 + $0x13c8] ss:$40 sps:$4 sm:$0xff]  }
 0x695   :  { %v11764_v58 = vpop.f32.mrf.mxu0  ;;  %12009 = vmatmul.mubr.bf16.vlgmr.msra.gmra.mxu0 %v18175_v31  ;;  %12105 = vmatprep.subr.bf16.mxu1 %v17188_v17  ;;  %v17234_v17 = vld [vmem:[#allocation14 + $0x17d8] ss:$40 sps:$4 sm:$0xff]  }
 0x696   :  { %v11765_v32 = vadd.f32 %v11764_v58, %v7289_v48  ;;  %12059 = vmatpush1.bf16.msra.mxu0 %v17183_v35  ;;  %12090 = vmatprep.mubr.bf16.mxu0 %v18177_v6  ;;  %v17242_v48 = vld [vmem:[#allocation14 + $0x178c] ss:$40 sps:$4 sm:$0xff]   ;;  %v17237_v35 = vld [vmem:[#allocation14 + $0x1378] ss:$40 sps:$4 sm:$0xff]   ;;  %v17243_v58 = vld [vmem:[#allocation14 + $0x1328] ss:$40 sps:$4 sm:$0xff]  }
 0x697   :  { %v11766_v39 = vpop.f32.mrf.mxu0  ;;  %12060 = vmatprep.subr.bf16.mxu0 %v17191_v47  ;;  %v17245_v47 = vld [vmem:[#allocation14 + $0x132c] ss:$40 sps:$4 sm:$0xff]  }
 0x698   :  { %v11767_v52 = vadd.f32 %v11766_v39, %v7293_v23  ;;  %12106 = vmatpush1.bf16.msra.mxu1 %v17186_v49  ;;  %v18291_v41 = vadd.f32 %v11805_v5, %v11765_v32  ;;  %v17219_v5 = vld [vmem:[#allocation14 + $0xf68] ss:$40 sps:$4 sm:$0xff]   ;;  %v17248_v49 = vld [vmem:[#allocation14 + $0x173c] ss:$40 sps:$4 sm:$0xff]   ;;  %v17246_v32 = vld [vmem:[#allocation14 + $0x1738] ss:$40 sps:$4 sm:$0xff]  }
 0x699   :  { %v11768_v57 = vpop.f32.mrf.mxu0  ;;  %12107 = vmatprep.subr.bf16.mxu1 %v17194_v38  ;;  %v17240_v23 = vld [vmem:[#allocation14 + $0x1788] ss:$40 sps:$4 sm:$0xff]   ;;  %v17251_v38 = vld [vmem:[#allocation14 + $0x12dc] ss:$40 sps:$4 sm:$0xff]   ;;  %v17249_v39 = vld [vmem:[#allocation14 + $0x12d8] ss:$40 sps:$4 sm:$0xff]  }
 0x69a   :  { %12061 = vmatpush1.bf16.msra.mxu0 %v17189_v54  ;;  %v18293_v22 = vadd.f32 %v11807_v8, %v11767_v52  ;;  %v17230_v8 = vld [vmem:[#allocation14 + $0x182c] ss:$40 sps:$4 sm:$0xff]   ;;  %v17252_v52 = vld [vmem:[#allocation14 + $0x16e8] ss:$40 sps:$4 sm:$0xff]  }
 0x69b   :  { %v11769_v11 = vpop.f32.mrf.mxu0  ;;  %12062 = vmatprep.subr.bf16.mxu0 %v17197_v12  ;;  %v17254_v54 = vld [vmem:[#allocation14 + $0x16ec] ss:$40 sps:$4 sm:$0xff]   ;;  %v17255_v57 = vld [vmem:[#allocation14 + $0x1288] ss:$40 sps:$4 sm:$0xff]  }
 0x69c   :  { %12108 = vmatpush1.bf16.msra.mxu1 %v17192_v40  ;;  %v17257_v12 = vld [vmem:[#allocation14 + $0x128c] ss:$40 sps:$4 sm:$0xff]   ;;  %v17260_v40 = vld [vmem:[#allocation14 + $0x169c] ss:$40 sps:$4 sm:$0xff]  }
 0x69d   :  { %12109 = vmatprep.subr.bf16.mxu1 %v17200_v60  ;;  %v17263_v60 = vld [vmem:[#allocation14 + $0x123c] ss:$40 sps:$4 sm:$0xff]  }
 0x69e   :  { %12063 = vmatpush1.bf16.msra.mxu0 %v17195_v15  ;;  %v17258_v15 = vld [vmem:[#allocation14 + $0x1698] ss:$40 sps:$4 sm:$0xff]   ;;  %v17266_v11 = vld [vmem:[#allocation14 + $0x754] ss:$40 sps:$4 sm:$0xff]  }
 0x69f   :  { %12064 = vmatprep.subr.bf16.mxu0 %v17203_v13  ;;  %v17261_v13 = vld [vmem:[#allocation14 + $0x1238] ss:$40 sps:$4 sm:$0xff]  }
 0x6a0   :  { %12110 = vmatpush1.bf16.msra.mxu1 %v17198_v62  ;;  %v17269_v62 = vld [vmem:[#allocation14 + $0x11ec] ss:$40 sps:$4 sm:$0xff]  }
 0x6a1   :  { %12111 = vmatprep.subr.bf16.mxu1 %v17206_v9  ;;  %v17264_v9 = vld [vmem:[#allocation14 + $0x750] ss:$40 sps:$4 sm:$0xff]  }
 0x6a2   :  { %12065 = vmatpush1.bf16.msra.mxu0 %v17201_v44  ;;  %v17272_v44 = vld [vmem:[#allocation14 + $0x704] ss:$40 sps:$4 sm:$0xff]  }
 0x6a3   :  { %12066 = vmatprep.subr.bf16.mxu0 %v17209_v46  ;;  %v17267_v46 = vld [vmem:[#allocation14 + $0x11e8] ss:$40 sps:$4 sm:$0xff]  }
 0x6a4   :  { %12112 = vmatpush1.bf16.msra.mxu1 %v17204_v27 }
 0x6a5   :  { %12113 = vmatprep.subr.bf16.mxu1 %v17212_v45  ;;  %v17275_v45 = vld [vmem:[#allocation14 + $0x119c] ss:$40 sps:$4 sm:$0xff]  }
 0x6a6   :  { %12067 = vmatpush1.bf16.msra.mxu0 %v17207_v55  ;;  %v17270_v55 = vld [vmem:[#allocation14 + $0x700] ss:$40 sps:$4 sm:$0xff]  }
 0x6a7   :  { %12068 = vmatprep.subr.bf16.mxu0 %v17215_v36 }
 0x6a8   :  { %12114 = vmatpush1.bf16.msra.mxu1 %v17210_v63  ;;  %v17278_v63 = vld [vmem:[#allocation14 + $0x6b4] ss:$40 sps:$4 sm:$0xff]  }
 0x6a9   :  { %12115 = vmatprep.subr.bf16.mxu1 %v17218_v33  ;;  %v17273_v33 = vld [vmem:[#allocation14 + $0x1198] ss:$40 sps:$4 sm:$0xff]  }
 0x6aa   :  { %12069 = vmatpush1.bf16.msra.mxu0 %v17213_v61 }
 0x6ab   :  { %12070 = vmatprep.subr.bf16.mxu0 %v17221_v34  ;;  %v17281_v34 = vld [vmem:[#allocation14 + $0x254] ss:$40 sps:$4 sm:$0xff]  }
 0x6ac   :  { %12116 = vmatpush2.bf16.msra.mxu1 %v17216_v10  ;;  %v17276_v10 = vld [vmem:[#allocation14 + $0x6b0] ss:$40 sps:$4 sm:$0xff]  }
 0x6ad   :  { %12117 = vmatprep.subr.bf16.mxu1 %v17224_v1 }
 0x6ae   :  { %12071 = vmatpush1.bf16.msra.mxu0 %v17219_v5  ;;  %v17284_v5 = vld [vmem:[#allocation14 + $0x664] ss:$40 sps:$4 sm:$0xff]  }
 0x6af   :  { %12072 = vmatprep.subr.bf16.mxu0 %v17227_v37  ;;  %v17279_v37 = vld [vmem:[#allocation14 + $0x250] ss:$40 sps:$4 sm:$0xff]  }
 0x6b0   :  { %12118 = vmatpush2.bf16.msra.mxu1 %v17222_v7  ;;  %v17287_v7 = vld [vmem:[#allocation14 + $0x204] ss:$40 sps:$4 sm:$0xff]  }
 0x6b1   :  { %12119 = vmatprep.subr.bf16.mxu1 %v17230_v8 }
 0x6b2   :  { %12073 = vmatpush1.bf16.msra.mxu0 %v17225_v14  ;;  %v17290_v14 = vld [vmem:[#allocation14 + $0x614] ss:$40 sps:$4 sm:$0xff]  }
 0x6b3   :  { %12074 = vmatprep.subr.bf16.mxu0 %v17233_v51 }
 0x6b4   :  { %12120 = vmatpush2.bf16.msra.mxu1 %v17228_v2  ;;  %v17285_v2 = vld [vmem:[#allocation14 + $0x200] ss:$40 sps:$4 sm:$0xff]  }
 0x6b5   :  { %12121 = vmatprep.subr.bf16.mxu1 %v17236_v16 }
 0x6b6   :  { %12075 = vmatpush2.bf16.msra.mxu0 %v17231_v3  ;;  %v17293_v3 = vld [vmem:[#allocation14 + $0x1b4] ss:$40 sps:$4 sm:$0xff]  }
 0x6b7   :  { %12076 = vmatprep.subr.bf16.mxu0 %v17239_v56 }
 0x6b8   :  { %12122 = vmatpush2.bf16.msra.mxu1 %v17234_v17  ;;  %v17288_v17 = vld [vmem:[#allocation14 + $0x610] ss:$40 sps:$4 sm:$0xff]  }
 0x6b9   :  { %12123 = vmatprep.subr.bf16.mxu1 %v17242_v48 }
 0x6ba   :  { %12077 = vmatpush2.bf16.msra.mxu0 %v17237_v35 }
 0x6bb   :  { %12078 = vmatprep.subr.bf16.mxu0 %v17245_v47  ;;  %v17296_v47 = vld [vmem:[#allocation14 + $0x5c4] ss:$40 sps:$4 sm:$0xff]  }
 0x6bc   :  { %12124 = vmatpush2.bf16.msra.mxu1 %v17240_v23  ;;  %v17291_v23 = vld [vmem:[#allocation14 + $0x1b0] ss:$40 sps:$4 sm:$0xff]  }
 0x6bd   :  { %12125 = vmatprep.subr.bf16.mxu1 %v17248_v49 }
 0x6be   :  { %12079 = vmatpush2.bf16.msra.mxu0 %v17243_v58  ;;  %v17294_v58 = vld [vmem:[#allocation14 + $0x5c0] ss:$40 sps:$4 sm:$0xff]  }
 0x6bf   :  { %12080 = vmatprep.subr.bf16.mxu0 %v17251_v38  ;;  %v17302_v38 = vld [vmem:[#allocation14 + $0x574] ss:$40 sps:$4 sm:$0xff]  }
 0x6c0   :  { %12126 = vmatpush2.bf16.msra.mxu1 %v17246_v32  ;;  %v17305_v32 = vld [vmem:[#allocation14 + $0x114] ss:$40 sps:$4 sm:$0xff]  }
 0x6c1   :  { %12127 = vmatprep.subr.bf16.mxu1 %v17254_v54  ;;  %v17300_v54 = vld [vmem:[#allocation14 + $0x570] ss:$40 sps:$4 sm:$0xff]  }
 0x6c2   :  { %12081 = vmatpush2.bf16.msra.mxu0 %v17249_v39  ;;  %v17308_v39 = vld [vmem:[#allocation14 + $0x524] ss:$40 sps:$4 sm:$0xff]  }
 0x6c3   :  { %12082 = vmatprep.subr.bf16.mxu0 %v17257_v12  ;;  %v17303_v12 = vld [vmem:[#allocation14 + $0x110] ss:$40 sps:$4 sm:$0xff]  }
 0x6c4   :  { %12128 = vmatpush2.bf16.msra.mxu1 %v17252_v52  ;;  %v17311_v52 = vld [vmem:[#allocation14 + $0xc4] ss:$40 sps:$4 sm:$0xff]  }
 0x6c5   :  { %12129 = vmatprep.subr.bf16.mxu1 %v17260_v40  ;;  %v17306_v40 = vld [vmem:[#allocation14 + $0x520] ss:$40 sps:$4 sm:$0xff]  }
 0x6c6   :  { %12083 = vmatpush2.bf16.msra.mxu0 %v17255_v57  ;;  %v17314_v57 = vld [vmem:[#allocation14 + $0x9d4] ss:$40 sps:$4 sm:$0xff]  }
 0x6c7   :  { %12084 = vmatprep.subr.bf16.mxu0 %v17263_v60  ;;  %v17309_v60 = vld [vmem:[#allocation14 + $0xc0] ss:$40 sps:$4 sm:$0xff]  }
 0x6c8   :  { %12130 = vmatpush2.bf16.msra.mxu1 %v17258_v15  ;;  %v17317_v15 = vld [vmem:[#allocation14 + $0x74] ss:$40 sps:$4 sm:$0xff]  }
 0x6c9   :  { %12181 = vmatprep.subr.bf16.mxu1 %v17266_v11  ;;  %v17312_v11 = vld [vmem:[#allocation14 + $0x9d0] ss:$40 sps:$4 sm:$0xff]  }
 0x6ca   :  { %12085 = vmatpush2.bf16.msra.mxu0 %v17261_v13  ;;  %v17320_v13 = vld [vmem:[#allocation14 + $0x984] ss:$40 sps:$4 sm:$0xff]  }
 0x6cb   :  { %v11887_v27 = vpop.f32.mrf.mxu1  ;;  %12132 = vmatmul.mubr.bf16.vlgmr.msra.gmra.mxu1 %v18208_v53  ;;  %12086 = vmatprep.subr.bf16.mxu0 %v17269_v62  ;;  %v17315_v62 = vld [vmem:[#allocation14 + $0x70] ss:$40 sps:$4 sm:$0xff]  }
 0x6cc   :  { %12182 = vmatpush1.bf16.msra.mxu1 %v17264_v9  ;;  %12213 = vmatprep.mubr.bf16.mxu1 %v18152_v25  ;;  %v17282_v25 = vld [vmem:[#allocation14 + $0x660] ss:$40 sps:$4 sm:$0xff]   ;;  %v17323_v9 = vld [vmem:[#allocation14 + $0x24] ss:$40 sps:$4 sm:$0xff]  }
 0x6cd   :  { %v11889_v36 = vpop.f32.mrf.mxu1  ;;  %12183 = vmatprep.subr.bf16.mxu1 %v17272_v44  ;;  %v17318_v44 = vld [vmem:[#allocation14 + $0x980] ss:$40 sps:$4 sm:$0xff]  }
 0x6ce   :  { %12087 = vmatpush2.bf16.msra.mxu0 %v17267_v46  ;;  %v17326_v46 = vld [vmem:[#allocation14 + $0x934] ss:$40 sps:$4 sm:$0xff]  }
 0x6cf   :  { %v11891_v61 = vpop.f32.mrf.mxu1  ;;  %12088 = vmatprep.subr.bf16.mxu0 %v17275_v45  ;;  %v17329_v45 = vld [vmem:[#allocation14 + $0x4d4] ss:$40 sps:$4 sm:$0xff]  }
 0x6d0   :  { %12184 = vmatpush1.bf16.msra.mxu1 %v17270_v55  ;;  %v17324_v55 = vld [vmem:[#allocation14 + $0x930] ss:$40 sps:$4 sm:$0xff]   ;;  %v17330_v61 = vld [vmem:[#allocation14 + $0x8e0] ss:$40 sps:$4 sm:$0xff]  }
 0x6d1   :  { %v11892_v1 = vpop.f32.mrf.mxu1  ;;  %12185 = vmatprep.subr.bf16.mxu1 %v17278_v63  ;;  %v17327_v63 = vld [vmem:[#allocation14 + $0x4d0] ss:$40 sps:$4 sm:$0xff]  }
 0x6d2   :  { %12089 = vmatpush2.bf16.msra.mxu0 %v17273_v33  ;;  %v17335_v33 = vld [vmem:[#allocation14 + $0x484] ss:$40 sps:$4 sm:$0xff]   ;;  %v17341_v1 = vld [vmem:[#allocation14 + $0x434] ss:$40 sps:$4 sm:$0xff]  }
 0x6d3   :  { %12140 = vmatprep.subr.bf16.mxu0 %v17281_v34  ;;  %v17338_v34 = vld [vmem:[#allocation14 + $0x894] ss:$40 sps:$4 sm:$0xff]  }
 0x6d4   :  { %12186 = vmatpush1.bf16.msra.mxu1 %v17276_v10  ;;  %v17333_v10 = vld [vmem:[#allocation14 + $0x480] ss:$40 sps:$4 sm:$0xff]  }
 0x6d5   :  { %v11846_v8 = vpop.f32.mrf.mxu0  ;;  %12091 = vmatmul.mubr.bf16.vlgmr.msra.gmra.mxu0 %v18192_v30  ;;  %12187 = vmatprep.subr.bf16.mxu1 %v17284_v5  ;;  %v17336_v5 = vld [vmem:[#allocation14 + $0x890] ss:$40 sps:$4 sm:$0xff]  }
 0x6d6   :  { %v11847_v51 = vadd.f32 %v11846_v8, %v18291_v41  ;;  %12141 = vmatpush1.bf16.msra.mxu0 %v17279_v37  ;;  %12172 = vmatprep.mubr.bf16.mxu0 %v18143_v0  ;;  %v17299_v0 = vld [vmem:[#allocation14 + $0x164] ss:$40 sps:$4 sm:$0xff]   ;;  %v17342_v8 = vld [vmem:[#allocation14 + $0x840] ss:$40 sps:$4 sm:$0xff]  }
 0x6d7   :  { %v11848_v16 = vpop.f32.mrf.mxu0  ;;  %12142 = vmatprep.subr.bf16.mxu0 %v17287_v7  ;;  %v17344_v37 = vld [vmem:[#allocation14 + $0x844] ss:$40 sps:$4 sm:$0xff]   ;;  %v17339_v7 = vld [vmem:[#allocation14 + $0x430] ss:$40 sps:$4 sm:$0xff]  }
 0x6d8   :  { %v11849_v56 = vadd.f32 %v11848_v16, %v18293_v22  ;;  %12188 = vmatpush1.bf16.msra.mxu1 %v17282_v25  ;;  %v18301_v48 = vadd.f32 %v11887_v27, %v11847_v51  ;;  %v17297_v22 = vld [vmem:[#allocation14 + $0x160] ss:$40 sps:$4 sm:$0xff]   ;;  %v17347_v25 = vld [vmem:[#allocation14 + $0x3e4] ss:$40 sps:$4 sm:$0xff]   ;;  %v17348_v16 = vld [vmem:[#allocation14 + $0x7f0] ss:$40 sps:$4 sm:$0xff]  }
 0x6d9   :  { %v11850_v35 = vpop.f32.mrf.mxu0  ;;  %12189 = vmatprep.subr.bf16.mxu1 %v17290_v14  ;;  %v17321_v27 = vld [vmem:[#allocation14 + $0x20] ss:$40 sps:$4 sm:$0xff]   ;;  %v17350_v14 = vld [vmem:[#allocation14 + $0x7f4] ss:$40 sps:$4 sm:$0xff]  }
 0x6da   :  { %12143 = vmatpush1.bf16.msra.mxu0 %v17285_v2  ;;  %v18303_v49 = vadd.f32 %v11889_v36, %v11849_v56  ;;  %v17332_v36 = vld [vmem:[#allocation14 + $0x8e4] ss:$40 sps:$4 sm:$0xff]   ;;  %v17345_v51 = vld [vmem:[#allocation14 + $0x3e0] ss:$40 sps:$4 sm:$0xff]   ;;  %v17353_v2 = vld [vmem:[#allocation14 + $0x394] ss:$40 sps:$4 sm:$0xff]  }
 0x6db   :  { %v11851_v41 = vpop.f32.mrf.mxu0  ;;  %12144 = vmatprep.subr.bf16.mxu0 %v17293_v3  ;;  %v17356_v3 = vld [vmem:[#allocation14 + $0x7a4] ss:$40 sps:$4 sm:$0xff]   ;;  %v17351_v56 = vld [vmem:[#allocation14 + $0x390] ss:$40 sps:$4 sm:$0xff]   ;;  %v17354_v35 = vld [vmem:[#allocation14 + $0x7a0] ss:$40 sps:$4 sm:$0xff]  }
 0x6dc   :  { %12190 = vmatpush1.bf16.msra.mxu1 %v17288_v17  ;;  %v17359_v17 = vld [vmem:[#allocation14 + $0x344] ss:$40 sps:$4 sm:$0xff]   ;;  %v17365_v41 = vld [vmem:[#allocation14 + $0x2f4] ss:$40 sps:$4 sm:$0xff]  }
 0x6dd   :  { %12191 = vmatprep.subr.bf16.mxu1 %v17296_v47  ;;  %v17362_v47 = vld [vmem:[#allocation14 + $0x1154] ss:$40 sps:$4 sm:$0xff]  }
 0x6de   :  { %12145 = vmatpush1.bf16.msra.mxu0 %v17291_v23  ;;  %v17357_v23 = vld [vmem:[#allocation14 + $0x340] ss:$40 sps:$4 sm:$0xff]  }
 0x6df   :  { %12146 = vmatprep.subr.bf16.mxu0 %v17299_v0  ;;  %v17360_v0 = vld [vmem:[#allocation14 + $0x1150] ss:$40 sps:$4 sm:$0xff]  }
 0x6e0   :  { %12192 = vmatpush1.bf16.msra.mxu1 %v17294_v58  ;;  %v17368_v58 = vld [vmem:[#allocation14 + $0x1104] ss:$40 sps:$4 sm:$0xff]  }
 0x6e1   :  { %12193 = vmatprep.subr.bf16.mxu1 %v17302_v38  ;;  %v17363_v38 = vld [vmem:[#allocation14 + $0x2f0] ss:$40 sps:$4 sm:$0xff]  }
 0x6e2   :  { %12147 = vmatpush1.bf16.msra.mxu0 %v17297_v22 }
 0x6e3   :  { %12148 = vmatprep.subr.bf16.mxu0 %v17305_v32  ;;  %v17371_v32 = vld [vmem:[#allocation14 + $0x2a4] ss:$40 sps:$4 sm:$0xff]  }
 0x6e4   :  { %12194 = vmatpush1.bf16.msra.mxu1 %v17300_v54  ;;  %v17366_v54 = vld [vmem:[#allocation14 + $0x1100] ss:$40 sps:$4 sm:$0xff]  }
 0x6e5   :  { %12195 = vmatprep.subr.bf16.mxu1 %v17308_v39 }
 0x6e6   :  { %12149 = vmatpush1.bf16.msra.mxu0 %v17303_v12  ;;  %v17374_v12 = vld [vmem:[#allocation14 + $0x10b4] ss:$40 sps:$4 sm:$0xff]  }
 0x6e7   :  { %12150 = vmatprep.subr.bf16.mxu0 %v17311_v52  ;;  %v17369_v52 = vld [vmem:[#allocation14 + $0x2a0] ss:$40 sps:$4 sm:$0xff]  }
 0x6e8   :  { %12196 = vmatpush1.bf16.msra.mxu1 %v17306_v40 }
 0x6e9   :  { %12197 = vmatprep.subr.bf16.mxu1 %v17314_v57  ;;  %v17377_v57 = vld [vmem:[#allocation14 + $0xc54] ss:$40 sps:$4 sm:$0xff]  }
 0x6ea   :  { %12151 = vmatpush1.bf16.msra.mxu0 %v17309_v60  ;;  %v17372_v60 = vld [vmem:[#allocation14 + $0x10b0] ss:$40 sps:$4 sm:$0xff]  }
 0x6eb   :  { %12152 = vmatprep.subr.bf16.mxu0 %v17317_v15 }
 0x6ec   :  { %12198 = vmatpush2.bf16.msra.mxu1 %v17312_v11  ;;  %v17375_v11 = vld [vmem:[#allocation14 + $0xc50] ss:$40 sps:$4 sm:$0xff]  }
 0x6ed   :  { %12199 = vmatprep.subr.bf16.mxu1 %v17320_v13  ;;  %v17383_v13 = vld [vmem:[#allocation14 + $0xc04] ss:$40 sps:$4 sm:$0xff]  }
 0x6ee   :  { %12153 = vmatpush1.bf16.msra.mxu0 %v17315_v62 }
 0x6ef   :  { %12154 = vmatprep.subr.bf16.mxu0 %v17323_v9  ;;  %v17386_v9 = vld [vmem:[#allocation14 + $0x1014] ss:$40 sps:$4 sm:$0xff]  }
 0x6f0   :  { %12200 = vmatpush2.bf16.msra.mxu1 %v17318_v44 }
 0x6f1   :  { %12201 = vmatprep.subr.bf16.mxu1 %v17326_v46  ;;  %v17381_v46 = vld [vmem:[#allocation14 + $0xc00] ss:$40 sps:$4 sm:$0xff]  }
 0x6f2   :  { %12155 = vmatpush1.bf16.msra.mxu0 %v17321_v27 }
 0x6f3   :  { %12156 = vmatprep.subr.bf16.mxu0 %v17329_v45  ;;  %v17389_v45 = vld [vmem:[#allocation14 + $0xbb4] ss:$40 sps:$4 sm:$0xff]  }
 0x6f4   :  { %12202 = vmatpush2.bf16.msra.mxu1 %v17324_v55 }
 0x6f5   :  { %12203 = vmatprep.subr.bf16.mxu1 %v17332_v36  ;;  %v17384_v36 = vld [vmem:[#allocation14 + $0x1010] ss:$40 sps:$4 sm:$0xff]  }
 0x6f6   :  { %12157 = vmatpush2.bf16.msra.mxu0 %v17327_v63 }
 0x6f7   :  { %12158 = vmatprep.subr.bf16.mxu0 %v17335_v33  ;;  %v17387_v33 = vld [vmem:[#allocation14 + $0xbb0] ss:$40 sps:$4 sm:$0xff]  }
 0x6f8   :  { %12204 = vmatpush2.bf16.msra.mxu1 %v17330_v61 }
 0x6f9   :  { %12205 = vmatprep.subr.bf16.mxu1 %v17338_v34  ;;  %v17390_v34 = vld [vmem:[#allocation14 + $0xfc0] ss:$40 sps:$4 sm:$0xff]  }
 0x6fa   :  { %12159 = vmatpush2.bf16.msra.mxu0 %v17333_v10  ;;  %v17393_v10 = vld [vmem:[#allocation14 + $0xb60] ss:$40 sps:$4 sm:$0xff]  }
 0x6fb   :  { %12160 = vmatprep.subr.bf16.mxu0 %v17341_v1  ;;  %v17401_v1 = vld [vmem:[#allocation14 + $0xb14] ss:$40 sps:$4 sm:$0xff]  }
 0x6fc   :  { %12206 = vmatpush2.bf16.msra.mxu1 %v17336_v5  ;;  %v17404_v5 = vld [vmem:[#allocation14 + $0xf24] ss:$40 sps:$4 sm:$0xff]  }
 0x6fd   :  { %12207 = vmatprep.subr.bf16.mxu1 %v17344_v37  ;;  %v17399_v37 = vld [vmem:[#allocation14 + $0xb10] ss:$40 sps:$4 sm:$0xff]  }
 0x6fe   :  { %12161 = vmatpush2.bf16.msra.mxu0 %v17339_v7  ;;  %v17407_v7 = vld [vmem:[#allocation14 + $0xac4] ss:$40 sps:$4 sm:$0xff]  }
 0x6ff   :  { %12162 = vmatprep.subr.bf16.mxu0 %v17347_v25  ;;  %v17402_v25 = vld [vmem:[#allocation14 + $0xf20] ss:$40 sps:$4 sm:$0xff]  }
 0x700   :  { %12208 = vmatpush2.bf16.msra.mxu1 %v17342_v8  ;;  %v17410_v8 = vld [vmem:[#allocation14 + $0x13d4] ss:$40 sps:$4 sm:$0xff]  }
 0x701   :  { %12209 = vmatprep.subr.bf16.mxu1 %v17350_v14  ;;  %v17405_v14 = vld [vmem:[#allocation14 + $0xac0] ss:$40 sps:$4 sm:$0xff]  }
 0x702   :  { %12163 = vmatpush2.bf16.msra.mxu0 %v17345_v51  ;;  %v17413_v51 = vld [vmem:[#allocation14 + $0xa74] ss:$40 sps:$4 sm:$0xff]  }
 0x703   :  { %12164 = vmatprep.subr.bf16.mxu0 %v17353_v2  ;;  %v17408_v2 = vld [vmem:[#allocation14 + $0x13d0] ss:$40 sps:$4 sm:$0xff]  }
 0x704   :  { %12210 = vmatpush2.bf16.msra.mxu1 %v17348_v16  ;;  %v17416_v16 = vld [vmem:[#allocation14 + $0x1384] ss:$40 sps:$4 sm:$0xff]  }
 0x705   :  { %12211 = vmatprep.subr.bf16.mxu1 %v17356_v3  ;;  %v17411_v3 = vld [vmem:[#allocation14 + $0xa70] ss:$40 sps:$4 sm:$0xff]  }
 0x706   :  { %12165 = vmatpush2.bf16.msra.mxu0 %v17351_v56  ;;  %v17419_v56 = vld [vmem:[#allocation14 + $0xa24] ss:$40 sps:$4 sm:$0xff]  }
 0x707   :  { %12166 = vmatprep.subr.bf16.mxu0 %v17359_v17  ;;  %v17414_v17 = vld [vmem:[#allocation14 + $0x1380] ss:$40 sps:$4 sm:$0xff]  }
 0x708   :  { %12212 = vmatpush2.bf16.msra.mxu1 %v17354_v35  ;;  %v17422_v35 = vld [vmem:[#allocation14 + $0x1334] ss:$40 sps:$4 sm:$0xff]  }
 0x709   :  { %12263 = vmatprep.subr.bf16.mxu1 %v17362_v47  ;;  %v17417_v47 = vld [vmem:[#allocation14 + $0xa20] ss:$40 sps:$4 sm:$0xff]  }
 0x70a   :  { %12167 = vmatpush2.bf16.msra.mxu0 %v17357_v23  ;;  %v17425_v23 = vld [vmem:[#allocation14 + $0xed4] ss:$40 sps:$4 sm:$0xff]  }
 0x70b   :  { %v18305_v22 = vpop.f32.mrf.mxu1  ;;  %12214 = vmatmul.mubr.bf16.vlgmr.msra.gmra.mxu1 %v18175_v31  ;;  %12168 = vmatprep.subr.bf16.mxu0 %v17365_v41  ;;  %v17380_v31 = vld [vmem:[#allocation14 + $0x1064] ss:$40 sps:$4 sm:$0xff]   ;;  %v17420_v41 = vld [vmem:[#allocation14 + $0x1330] ss:$40 sps:$4 sm:$0xff]  }
 0x70c   :  { %12264 = vmatpush1.bf16.msra.mxu1 %v17360_v0  ;;  %12295 = vmatprep.mubr.bf16.mxu1 %v18177_v6  ;;  %v17378_v6 = vld [vmem:[#allocation14 + $0x1060] ss:$40 sps:$4 sm:$0xff]   ;;  %v17428_v0 = vld [vmem:[#allocation14 + $0x12e4] ss:$40 sps:$4 sm:$0xff]  }
 0x70d   :  { %v18309_v39 = vpop.f32.mrf.mxu1  ;;  %12265 = vmatprep.subr.bf16.mxu1 %v17368_v58  ;;  %v17423_v58 = vld [vmem:[#allocation14 + $0xed0] ss:$40 sps:$4 sm:$0xff]  }
 0x70e   :  { %12169 = vmatpush2.bf16.msra.mxu0 %v17363_v38  ;;  %v17431_v38 = vld [vmem:[#allocation14 + $0xe84] ss:$40 sps:$4 sm:$0xff]  }
 0x70f   :  { %v11973_v40 = vpop.f32.mrf.mxu1  ;;  %12170 = vmatprep.subr.bf16.mxu0 %v17371_v32  ;;  %v17426_v32 = vld [vmem:[#allocation14 + $0x12e0] ss:$40 sps:$4 sm:$0xff]  }
 0x710   :  { %12266 = vmatpush1.bf16.msra.mxu1 %v17366_v54  ;;  %v17434_v54 = vld [vmem:[#allocation14 + $0x1294] ss:$40 sps:$4 sm:$0xff]   ;;  %v17432_v40 = vld [vmem:[#allocation14 + $0x1290] ss:$40 sps:$4 sm:$0xff]  }
 0x711   :  { %v11974_v15 = vpop.f32.mrf.mxu1  ;;  %12267 = vmatprep.subr.bf16.mxu1 %v17374_v12  ;;  %v17429_v12 = vld [vmem:[#allocation14 + $0xe80] ss:$40 sps:$4 sm:$0xff]  }
 0x712   :  { %12171 = vmatpush2.bf16.msra.mxu0 %v17369_v52  ;;  %v17437_v52 = vld [vmem:[#allocation14 + $0xe34] ss:$40 sps:$4 sm:$0xff]   ;;  %v17443_v15 = vld [vmem:[#allocation14 + $0xde4] ss:$40 sps:$4 sm:$0xff]  }
 0x713   :  { %12222 = vmatprep.subr.bf16.mxu0 %v17377_v57  ;;  %v17440_v57 = vld [vmem:[#allocation14 + $0x1244] ss:$40 sps:$4 sm:$0xff]  }
 0x714   :  { %12268 = vmatpush1.bf16.msra.mxu1 %v17372_v60  ;;  %v17435_v60 = vld [vmem:[#allocation14 + $0xe30] ss:$40 sps:$4 sm:$0xff]  }
 0x715   :  { %v11928_v62 = vpop.f32.mrf.mxu0  ;;  %12173 = vmatmul.mubr.bf16.vlgmr.msra.gmra.mxu0 %v18161_v42  ;;  %12269 = vmatprep.subr.bf16.mxu1 %v17380_v31  ;;  %v17392_v42 = vld [vmem:[#allocation14 + $0xfc4] ss:$40 sps:$4 sm:$0xff]   ;;  %v17438_v31 = vld [vmem:[#allocation14 + $0x1240] ss:$40 sps:$4 sm:$0xff]  }
 0x716   :  { %v18313_v44 = vadd.f32 %v11928_v62, %v18301_v48  ;;  %12223 = vmatpush1.bf16.msra.mxu0 %v17375_v11  ;;  %12254 = vmatprep.mubr.bf16.mxu0 %v18163_v59  ;;  %v17395_v48 = vld [vmem:[#allocation14 + $0xb64] ss:$40 sps:$4 sm:$0xff]   ;;  %v17398_v59 = vld [vmem:[#allocation14 + $0xf74] ss:$40 sps:$4 sm:$0xff]   ;;  %v17444_v62 = vld [vmem:[#allocation14 + $0x11f0] ss:$40 sps:$4 sm:$0xff]  }
 0x717   :  { %v11930_v27 = vpop.f32.mrf.mxu0  ;;  %12224 = vmatprep.subr.bf16.mxu0 %v17383_v13  ;;  %v17446_v11 = vld [vmem:[#allocation14 + $0x11f4] ss:$40 sps:$4 sm:$0xff]   ;;  %v17441_v13 = vld [vmem:[#allocation14 + $0xde0] ss:$40 sps:$4 sm:$0xff]  }
 0x718   :  { %v18317_v55 = vadd.f32 %v11930_v27, %v18303_v49  ;;  %12270 = vmatpush1.bf16.msra.mxu1 %v17378_v6  ;;  %v17396_v49 = vld [vmem:[#allocation14 + $0xf70] ss:$40 sps:$4 sm:$0xff]   ;;  %v17449_v6 = vld [vmem:[#allocation14 + $0xd94] ss:$40 sps:$4 sm:$0xff]   ;;  %v17455_v27 = vld [vmem:[#allocation14 + $0xd44] ss:$40 sps:$4 sm:$0xff]  }
 0x719   :  { %v11932_v63 = vpop.f32.mrf.mxu0  ;;  %12271 = vmatprep.subr.bf16.mxu1 %v17386_v9  ;;  %v17452_v9 = vld [vmem:[#allocation14 + $0x11a4] ss:$40 sps:$4 sm:$0xff]  }
 0x71a   :  { %12225 = vmatpush1.bf16.msra.mxu0 %v17381_v46  ;;  %v17447_v46 = vld [vmem:[#allocation14 + $0xd90] ss:$40 sps:$4 sm:$0xff]   ;;  %v12346_v63 = vmax.f32 %v18255_v20, 0.0  ;;  %v17464_v20 = vld [vmem:[#allocation14 + $0xca4] ss:$40 sps:$4 sm:$0xff]  }
 0x71b   :  { %v11933_v61 = vpop.f32.mrf.mxu0  ;;  %12226 = vmatprep.subr.bf16.mxu0 %v17389_v45  ;;  %v17450_v45 = vld [vmem:[#allocation14 + $0x11a0] ss:$40 sps:$4 sm:$0xff]  }
 0x71c   :  { %12272 = vmatpush1.bf16.msra.mxu1 %v17384_v36  ;;  %v17456_v36 = vld [vmem:[%s18601_s9 + $0x78] sm:$0xff]  }
 0x71d   :  { %12273 = vmatprep.subr.bf16.mxu1 %v17392_v42  ;;  %v17453_v42 = vld [vmem:[#allocation14 + $0xd40] ss:$40 sps:$4 sm:$0xff]   ;;  %v17460_v61 = vld [vmem:[%s18601_s9 + $0x38] sm:$0xff]  }
 0x71e   :  { %12227 = vmatpush1.bf16.msra.mxu0 %v17387_v33  ;;  %v17459_v33 = vld [vmem:[#allocation14 + $0xcf4] ss:$40 sps:$4 sm:$0xff]  }
 0x71f   :  { %12228 = vmatprep.subr.bf16.mxu0 %v17395_v48  ;;  %v17461_v48 = vld [vmem:[%s18601_s9 + $0x70] sm:$0xff]  }
 0x720   :  { %12274 = vmatpush1.bf16.msra.mxu1 %v17390_v34  ;;  %v12356_v34 = vpack.c.bf16 %v12346_v63, %v12346_v63 }
 0x721   :  { %12275 = vmatprep.subr.bf16.mxu1 %v17398_v59  ;;  %v17457_v59 = vld [vmem:[#allocation14 + $0xcf0] ss:$40 sps:$4 sm:$0xff]  }
 0x722   :  { %12229 = vmatpush1.bf16.msra.mxu0 %v17393_v10 }
 0x723   :  { %12230 = vmatprep.subr.bf16.mxu0 %v17401_v1  ;;  %v17465_v1 = vld [vmem:[%s18601_s9 + $0x30] sm:$0xff]  }
 0x724   :  { %12276 = vmatpush1.bf16.msra.mxu1 %v17396_v49 }
 0x725   :  { %12277 = vmatprep.subr.bf16.mxu1 %v17404_v5  ;;  %v17466_v5 = vld [vmem:[%s18601_s9 + $0x68] sm:$0xff]  }
 0x726   :  { %12231 = vmatpush1.bf16.msra.mxu0 %v17399_v37  ;;  %v17462_v37 = vld [vmem:[#allocation14 + $0xca0] ss:$40 sps:$4 sm:$0xff]  }
 0x727   :  { %12232 = vmatprep.subr.bf16.mxu0 %v17407_v7 }
 0x728   :  { %12278 = vmatpush1.bf16.msra.mxu1 %v17402_v25  ;;  %v17469_v25 = vld [vmem:[#allocation14 + $0x1654] ss:$40 sps:$4 sm:$0xff]  }
 0x729   :  { %12279 = vmatprep.subr.bf16.mxu1 %v17410_v8  ;;  %v17470_v8 = vld [vmem:[%s18601_s9 + $0x28] sm:$0xff]  }
 0x72a   :  { %12233 = vmatpush1.bf16.msra.mxu0 %v17405_v14 }
 0x72b   :  { %12234 = vmatprep.subr.bf16.mxu0 %v17413_v51  ;;  %v17471_v51 = vld [vmem:[%s18601_s9 + $0x60] sm:$0xff]  }
 0x72c   :  { %12280 = vmatpush2.bf16.msra.mxu1 %v17408_v2  ;;  %v7301_v2 = vrot.slane %v18283_v18, %v17973_v43 }
 0x72d   :  { %12281 = vmatprep.subr.bf16.mxu1 %v17416_v16  ;;  %v17467_v16 = vld [vmem:[#allocation14 + $0x1650] ss:$40 sps:$4 sm:$0xff]  }
 0x72e   :  { %12235 = vmatpush1.bf16.msra.mxu0 %v17411_v3  ;;  %v17474_v3 = vld [vmem:[#allocation14 + $0x1604] ss:$40 sps:$4 sm:$0xff]   ;;  %v11972_v43 = vadd.f32 %v18309_v39, %v7301_v2  ;;  %v17526_v2 = vld [vmem:[%s18601_s9 + $0x148] sm:$0xff]  }
 0x72f   :  { %12236 = vmatprep.subr.bf16.mxu0 %v17419_v56  ;;  %v17475_v56 = vld [vmem:[%s18601_s9 + $0x20] sm:$0xff]   ;;  %v17481_v39 = vld [vmem:[%s18601_s9 + $0x50] sm:$0xff]  }
 0x730   :  { %12282 = vmatpush2.bf16.msra.mxu1 %v17414_v17 }
 0x731   :  { %12283 = vmatprep.subr.bf16.mxu1 %v17422_v35  ;;  %v17476_v35 = vld [vmem:[%s18601_s9 + $0x58] sm:$0xff]  }
 0x732   :  { %12237 = vmatpush1.bf16.msra.mxu0 %v17417_v47 }
 0x733   :  { %12238 = vmatprep.subr.bf16.mxu0 %v17425_v23  ;;  %v17479_v23 = vld [vmem:[#allocation14 + $0x15b4] ss:$40 sps:$4 sm:$0xff]  }
 0x734   :  { %12284 = vmatpush2.bf16.msra.mxu1 %v17420_v41 }
 0x735   :  { %12285 = vmatprep.subr.bf16.mxu1 %v17428_v0 }
 0x736   :  { %12239 = vmatpush2.bf16.msra.mxu0 %v17423_v58 }
 0x737   :  { %12240 = vmatprep.subr.bf16.mxu0 %v17431_v38 }
 0x738   :  { %12286 = vmatpush2.bf16.msra.mxu1 %v17426_v32 }
 0x739   :  { %12287 = vmatprep.subr.bf16.mxu1 %v17434_v54  ;;  %v17484_v54 = vld [vmem:[#allocation14 + $0x1564] ss:$40 sps:$4 sm:$0xff]  }
 0x73a   :  { %12241 = vmatpush2.bf16.msra.mxu0 %v17429_v12  ;;  %v17485_v12 = vld [vmem:[%s18601_s9 + $0x10] sm:$0xff]  }
 0x73b   :  { %12242 = vmatprep.subr.bf16.mxu0 %v17437_v52  ;;  %v17486_v52 = vld [vmem:[%s18601_s9 + $0x48] sm:$0xff]  }
 0x73c   :  { %12288 = vmatpush2.bf16.msra.mxu1 %v17432_v40  ;;  %v17482_v40 = vld [vmem:[#allocation14 + $0x1560] ss:$40 sps:$4 sm:$0xff]  }
 0x73d   :  { %12289 = vmatprep.subr.bf16.mxu1 %v17440_v57  ;;  %v17489_v57 = vld [vmem:[#allocation14 + $0x1514] ss:$40 sps:$4 sm:$0xff]  }
 0x73e   :  { %12243 = vmatpush2.bf16.msra.mxu0 %v17435_v60  ;;  %v17490_v60 = vld [vmem:[%s18601_s9 + $0x8] sm:$0xff]  }
 0x73f   :  { %12244 = vmatprep.subr.bf16.mxu0 %v17443_v15  ;;  %v17491_v15 = vld [vmem:[%s18601_s9 + $0x40] sm:$0xff]  }
 0x740   :  { %12290 = vmatpush2.bf16.msra.mxu1 %v17438_v31  ;;  %v17487_v31 = vld [vmem:[#allocation14 + $0x1510] ss:$40 sps:$4 sm:$0xff]  }
 0x741   :  { %12291 = vmatprep.subr.bf16.mxu1 %v17446_v11  ;;  %v17494_v11 = vld [vmem:[#allocation14 + $0x14c4] ss:$40 sps:$4 sm:$0xff]  }
 0x742   :  { %12245 = vmatpush2.bf16.msra.mxu0 %v17441_v13  ;;  %v17495_v13 = vld [vmem:[%s18601_s9] sm:$0xff]  }
 0x743   :  { %12246 = vmatprep.subr.bf16.mxu0 %v17449_v6  ;;  %v12345_v6 = vmax.f32 %v18251_v4, 0.0  ;;  %v17501_v4 = vld [vmem:[%s18601_s9 + $0x170] sm:$0xff]  }
 0x744   :  { %12292 = vmatpush2.bf16.msra.mxu1 %v17444_v62  ;;  %v17496_v62 = vld [vmem:[%s18601_s9 + $0x178] sm:$0xff]  }
 0x745   :  { %12293 = vmatprep.subr.bf16.mxu1 %v17452_v9  ;;  %v12350_v9 = vmax.f32 %v18317_v55, 0.0  ;;  %v17504_v55 = vld [vmem:[#allocation14 + $0x1424] ss:$40 sps:$4 sm:$0xff]  }
 0x746   :  { %12247 = vmatpush2.bf16.msra.mxu0 %v17447_v46  ;;  %v17492_v46 = vld [vmem:[#allocation14 + $0x14c0] ss:$40 sps:$4 sm:$0xff]  }
 0x747   :  { %12248 = vmatprep.subr.bf16.mxu0 %v17455_v27  ;;  %v17499_v27 = vld [vmem:[#allocation14 + $0x1474] ss:$40 sps:$4 sm:$0xff]   ;;  %v12360_v63 = vpack.c.bf16 %v12350_v9, %v12350_v9 }
 0x748   :  { %12294 = vmatpush2.bf16.msra.mxu1 %v17450_v45  ;;  %v17500_v45 = vld [vmem:[%s18601_s9 + $0x138] sm:$0xff]   ;;  %v17549_v9 = vld [vmem:[%s18601_s9 + $0xa0] sm:$0xff]  }
 0x749   :  { %14956 = vmatprep.subr.bf16.mxu1 %v17456_v36  ;;  %v12355_v36 = vpack.c.bf16 %v12345_v6, %v12345_v6 }
 0x74a   :  { %12249 = vmatpush2.bf16.msra.mxu0 %v17453_v42  ;;  %v17497_v42 = vld [vmem:[#allocation14 + $0x1470] ss:$40 sps:$4 sm:$0xff]  }
 0x74b   :  { %v12051_v10 = vpop.f32.mrf.mxu1  ;;  %12296 = vmatmul.mubr.bf16.vlgmr.msra.gmra.mxu1 %v18192_v30  ;;  %12250 = vmatprep.subr.bf16.mxu0 %v17459_v33  ;;  %v7297_v30 = vrot.slane %v18283_v18, %v18020_v21  ;;  %v17505_v33 = vld [vmem:[%s18601_s9 + $0x130] sm:$0xff]  }
 0x74c   :  { %14957 = vmatpush3.bf16.msra.mxu1 %v17460_v61  ;;  %13044 = vmatprep.mubr.bf16.mxu1 %v12356_v34  ;;  %v17506_v61 = vld [vmem:[%s18601_s9 + $0x168] sm:$0xff]  }
 0x74d   :  { %v12053_v49 = vpop.f32.mrf.mxu1  ;;  %14958 = vmatprep.subr.bf16.mxu1 %v17461_v48  ;;  %v11970_v21 = vadd.f32 %v18305_v22, %v7297_v30  ;;  %v17472_v22 = vld [vmem:[#allocation14 + $0x1600] ss:$40 sps:$4 sm:$0xff]   ;;  %v17509_v34 = vld [vmem:[#allocation14 + $0x18d4] ss:$40 sps:$4 sm:$0xff]  }
 0x74e   :  { %12251 = vmatpush2.bf16.msra.mxu0 %v17457_v59  ;;  %v17502_v48 = vld [vmem:[#allocation14 + $0x1420] ss:$40 sps:$4 sm:$0xff]  }
 0x74f   :  { %v12055_v7 = vpop.f32.mrf.mxu1  ;;  %12252 = vmatprep.subr.bf16.mxu0 %v17464_v20  ;;  %v17510_v59 = vld [vmem:[%s18601_s9 + $0x128] sm:$0xff]   ;;  %v17507_v20 = vld [vmem:[#allocation14 + $0x18d0] ss:$40 sps:$4 sm:$0xff]   ;;  %v17521_v30 = vld [vmem:[%s18601_s9 + $0x150] sm:$0xff]  }
 0x750   :  { %14959 = vmatpush3.bf16.msra.mxu1 %v17465_v1  ;;  %v17514_v1 = vld [vmem:[#allocation14 + $0x1884] ss:$40 sps:$4 sm:$0xff]   ;;  %v17519_v7 = vld [vmem:[#allocation14 + $0x1834] ss:$40 sps:$4 sm:$0xff]  }
 0x751   :  { %v12056_v14 = vpop.f32.mrf.mxu1  ;;  %14960 = vmatprep.subr.bf16.mxu1 %v17466_v5  ;;  %v17516_v5 = vld [vmem:[%s18601_s9 + $0x158] sm:$0xff]  }
 0x752   :  { %12253 = vmatpush2.bf16.msra.mxu0 %v17462_v37  ;;  %v17512_v37 = vld [vmem:[#allocation14 + $0x1880] ss:$40 sps:$4 sm:$0xff]   ;;  %v17524_v14 = vld [vmem:[#allocation14 + $0x17e4] ss:$40 sps:$4 sm:$0xff]  }
 0x753   :  { %12304 = vmatprep.subr.bf16.mxu0 %v17469_v25  ;;  %v17520_v25 = vld [vmem:[%s18601_s9 + $0x118] sm:$0xff]  }
 0x754   :  { %14961 = vmatpush3.bf16.msra.mxu1 %v17470_v8  ;;  %v17517_v8 = vld [vmem:[#allocation14 + $0x1830] ss:$40 sps:$4 sm:$0xff]  }
 0x755   :  { %v12010_v17 = vpop.f32.mrf.mxu0  ;;  %12255 = vmatmul.mubr.bf16.vlgmr.msra.gmra.mxu0 %v18184_v24  ;;  %14962 = vmatprep.subr.bf16.mxu1 %v17471_v51  ;;  %v17480_v24 = vld [vmem:[%s18601_s9 + $0x18] sm:$0xff]   ;;  %v17525_v51 = vld [vmem:[%s18601_s9 + $0x110] sm:$0xff]  }
 0x756   :  { %v12011_v18 = vadd.f32 %v12010_v17, %v11970_v21  ;;  %12305 = vmatpush1.bf16.msra.mxu0 %v17467_v16  ;;  %12336 = vmatprep.mubr.bf16.mxu0 %v18206_v26  ;;  %v17477_v26 = vld [vmem:[#allocation14 + $0x15b0] ss:$40 sps:$4 sm:$0xff]   ;;  %v17522_v16 = vld [vmem:[#allocation14 + $0x17e0] ss:$40 sps:$4 sm:$0xff]  }
 0x757   :  { %v12012_v47 = vpop.f32.mrf.mxu0  ;;  %12306 = vmatprep.subr.bf16.mxu0 %v17474_v3  ;;  %v17529_v3 = vld [vmem:[#allocation14 + $0x1794] ss:$40 sps:$4 sm:$0xff]   ;;  %v17527_v17 = vld [vmem:[#allocation14 + $0x1790] ss:$40 sps:$4 sm:$0xff]  }
 0x758   :  { %v12013_v41 = vadd.f32 %v12012_v47, %v11972_v43  ;;  %14963 = vmatpush3.bf16.msra.mxu1 %v17475_v56  ;;  %v18359_v0 = vadd.f32 %v12051_v10, %v12011_v18  ;;  %v17511_v10 = vld [vmem:[%s18601_s9 + $0x160] sm:$0xff]   ;;  %v17530_v21 = vld [vmem:[%s18601_s9 + $0x108] sm:$0xff]   ;;  %v12349_v18 = vmax.f32 %v18313_v44, 0.0  ;;  %v17542_v44 = vld [vmem:[%s18601_s9 + $0xf8] sm:$0xff]  }
 0x759   :  { %v12014_v58 = vpop.f32.mrf.mxu0  ;;  %14964 = vmatprep.subr.bf16.mxu1 %v17476_v35  ;;  %v17531_v56 = vld [vmem:[%s18601_s9 + $0x140] sm:$0xff]   ;;  %v17534_v35 = vld [vmem:[#allocation14 + $0x1744] ss:$40 sps:$4 sm:$0xff]  }
 0x75a   :  { %12307 = vmatpush1.bf16.msra.mxu0 %v17472_v22  ;;  %v18364_v38 = vadd.f32 %v12053_v49, %v12013_v41  ;;  %v17515_v49 = vld [vmem:[%s18601_s9 + $0x120] sm:$0xff]   ;;  %v17532_v22 = vld [vmem:[#allocation14 + $0x1740] ss:$40 sps:$4 sm:$0xff]   ;;  %v17541_v58 = vld [vmem:[#allocation14 + $0x16a4] ss:$40 sps:$4 sm:$0xff]  }
 0x75b   :  { %v12015_v32 = vpop.f32.mrf.mxu0  ;;  %12308 = vmatprep.subr.bf16.mxu0 %v17479_v23  ;;  %v17535_v43 = vld [vmem:[%s18601_s9 + $0x100] sm:$0xff]   ;;  %v12359_v23 = vpack.c.bf16 %v12349_v18, %v12349_v18 }
 0x75c   :  { %14965 = vmatpush3.bf16.msra.mxu1 %v17480_v24  ;;  %v17538_v47 = vld [vmem:[#allocation14 + $0x16f4] ss:$40 sps:$4 sm:$0xff]   ;;  %v17536_v41 = vld [vmem:[#allocation14 + $0x16f0] ss:$40 sps:$4 sm:$0xff]  }
 0x75d   :  { %14966 = vmatprep.subr.bf16.mxu1 %v17481_v39  ;;  %v17581_v18 = vld [vmem:[%s18601_s9 + $0x220] sm:$0xff]  }
 0x75e   :  { %12309 = vmatpush1.bf16.msra.mxu0 %v17477_v26  ;;  %v17539_v26 = vld [vmem:[#allocation14 + $0x16a0] ss:$40 sps:$4 sm:$0xff]  }
 0x75f   :  { %12310 = vmatprep.subr.bf16.mxu0 %v17484_v54  ;;  %v12348_v54 = vmax.f32 %v18279_v50, 0.0  ;;  %v17545_v50 = vld [vmem:[%s18601_s9 + $0xb0] sm:$0xff]  }
 0x760   :  { %14967 = vmatpush3.bf16.msra.mxu1 %v17485_v12 }
 0x761   :  { %14968 = vmatprep.subr.bf16.mxu1 %v17486_v52  ;;  %v17543_v52 = vld [vmem:[%s18601_s9 + $0xb8] sm:$0xff]  }
 0x762   :  { %12311 = vmatpush1.bf16.msra.mxu0 %v17482_v40  ;;  %v17544_v40 = vld [vmem:[%s18601_s9 + $0xf0] sm:$0xff]  }
 0x763   :  { %12312 = vmatprep.subr.bf16.mxu0 %v17489_v57  ;;  %v12358_v57 = vpack.c.bf16 %v12348_v54, %v12348_v54  ;;  %v17584_v54 = vld [vmem:[%s18601_s9 + $0x250] sm:$0xff]  }
 0x764   :  { %14969 = vmatpush3.bf16.msra.mxu1 %v17490_v60 }
 0x765   :  { %14970 = vmatprep.subr.bf16.mxu1 %v17491_v15 }
 0x766   :  { %12313 = vmatpush1.bf16.msra.mxu0 %v17487_v31 }
 0x767   :  { %12314 = vmatprep.subr.bf16.mxu0 %v17494_v11  ;;  %v17546_v11 = vld [vmem:[%s18601_s9 + $0xe8] sm:$0xff]  }
 0x768   :  { %14971 = vmatpush3.bf16.msra.mxu1 %v17495_v13 }
 0x769   :  { %15000 = vmatprep.subr.bf16.mxu1 %v17496_v62  ;;  %v17548_v62 = vld [vmem:[%s18601_s9 + $0xe0] sm:$0xff]  }
 0x76a   :  { %12315 = vmatpush1.bf16.msra.mxu0 %v17492_v46  ;;  %v17550_v46 = vld [vmem:[%s18601_s9 + $0xd8] sm:$0xff]  }
 0x76b   :  { %13045 = vmatmul.mubr.bf16.vlgmr.msra.gmra.mxu1 %v12355_v36  ;;  %12316 = vmatprep.subr.bf16.mxu0 %v17499_v27  ;;  %v17551_v27 = vld [vmem:[%s18601_s9 + $0x98] sm:$0xff]   ;;  %v17553_v36 = vld [vmem:[%s18601_s9 + $0x90] sm:$0xff]  }
 0x76c   :  { %15001 = vmatpush3.bf16.msra.mxu1 %v17500_v45  ;;  %13124 = vmatprep.mubr.bf16.mxu1 %v12360_v63  ;;  %v17552_v45 = vld [vmem:[%s18601_s9 + $0xd0] sm:$0xff]  }
 0x76d   :  { %15002 = vmatprep.subr.bf16.mxu1 %v17501_v4  ;;  %v17554_v4 = vld [vmem:[%s18601_s9 + $0xc8] sm:$0xff]  }
 0x76e   :  { %12317 = vmatpush1.bf16.msra.mxu0 %v17497_v42  ;;  %v17555_v42 = vld [vmem:[%s18601_s9 + $0x88] sm:$0xff]  }
 0x76f   :  { %12318 = vmatprep.subr.bf16.mxu0 %v17504_v55  ;;  %v17556_v55 = vld [vmem:[%s18601_s9 + $0xc0] sm:$0xff]  }
 0x770   :  { %15003 = vmatpush3.bf16.msra.mxu1 %v17505_v33 }
 0x771   :  { %15004 = vmatprep.subr.bf16.mxu1 %v17506_v61  ;;  %v17557_v61 = vld [vmem:[%s18601_s9 + $0x80] sm:$0xff]  }
 0x772   :  { %12319 = vmatpush1.bf16.msra.mxu0 %v17502_v48  ;;  %v12347_v48 = vmax.f32 %v18276_v19, 0.0  ;;  %v17559_v19 = vld [vmem:[%s18601_s9 + $0x1b8] sm:$0xff]  }
 0x773   :  { %12320 = vmatprep.subr.bf16.mxu0 %v17509_v34 }
 0x774   :  { %15005 = vmatpush3.bf16.msra.mxu1 %v17510_v59  ;;  %v17574_v59 = vld [vmem:[%s18601_s9 + $0x278] sm:$0xff]  }
 0x775   :  { %15006 = vmatprep.subr.bf16.mxu1 %v17511_v10  ;;  %v17575_v10 = vld [vmem:[%s18601_s9 + $0x238] sm:$0xff]  }
 0x776   :  { %12321 = vmatpush2.bf16.msra.mxu0 %v17507_v20  ;;  %v17576_v20 = vld [vmem:[%s18601_s9 + $0x270] sm:$0xff]  }
 0x777   :  { %12322 = vmatprep.subr.bf16.mxu0 %v17514_v1  ;;  %v12357_v1 = vpack.c.bf16 %v12347_v48, %v12347_v48 }
 0x778   :  { %15007 = vmatpush3.bf16.msra.mxu1 %v17515_v49  ;;  %v17560_v49 = vld [vmem:[%s18601_s9 + $0x1f0] sm:$0xff]  }
 0x779   :  { %15008 = vmatprep.subr.bf16.mxu1 %v17516_v5 }
 0x77a   :  { %12323 = vmatpush2.bf16.msra.mxu0 %v17512_v37  ;;  %v17577_v37 = vld [vmem:[%s18601_s9 + $0x230] sm:$0xff]  }
 0x77b   :  { %12324 = vmatprep.subr.bf16.mxu0 %v17519_v7  ;;  %v17578_v7 = vld [vmem:[%s18601_s9 + $0x268] sm:$0xff]  }
 0x77c   :  { %15009 = vmatpush3.bf16.msra.mxu1 %v17520_v25  ;;  %v17561_v25 = vld [vmem:[%s18601_s9 + $0x1b0] sm:$0xff]  }
 0x77d   :  { %15010 = vmatprep.subr.bf16.mxu1 %v17521_v30  ;;  %v17562_v30 = vld [vmem:[%s18601_s9 + $0x1e8] sm:$0xff]  }
 0x77e   :  { %12325 = vmatpush2.bf16.msra.mxu0 %v17517_v8  ;;  %v17579_v8 = vld [vmem:[%s18601_s9 + $0x228] sm:$0xff]  }
 0x77f   :  { %12326 = vmatprep.subr.bf16.mxu0 %v17524_v14  ;;  %v17580_v14 = vld [vmem:[%s18601_s9 + $0x260] sm:$0xff]  }
 0x780   :  { %15011 = vmatpush3.bf16.msra.mxu1 %v17525_v51  ;;  %v17563_v51 = vld [vmem:[%s18601_s9 + $0x1a8] sm:$0xff]  }
 0x781   :  { %15012 = vmatprep.subr.bf16.mxu1 %v17526_v2  ;;  %v17564_v2 = vld [vmem:[%s18601_s9 + $0x1e0] sm:$0xff]  }
 0x782   :  { %12327 = vmatpush2.bf16.msra.mxu0 %v17522_v16  ;;  %v17565_v16 = vld [vmem:[%s18601_s9 + $0x1a0] sm:$0xff]  }
 0x783   :  { %12328 = vmatprep.subr.bf16.mxu0 %v17529_v3  ;;  %v17566_v3 = vld [vmem:[%s18601_s9 + $0x1d8] sm:$0xff]  }
 0x784   :  { %15013 = vmatpush3.bf16.msra.mxu1 %v17530_v21  ;;  %v17567_v21 = vld [vmem:[%s18601_s9 + $0x198] sm:$0xff]  }
 0x785   :  { %15014 = vmatprep.subr.bf16.mxu1 %v17531_v56  ;;  %v17568_v56 = vld [vmem:[%s18601_s9 + $0x1d0] sm:$0xff]  }
 0x786   :  { %12329 = vmatpush2.bf16.msra.mxu0 %v17527_v17  ;;  %v17569_v17 = vld [vmem:[%s18601_s9 + $0x190] sm:$0xff]  }
 0x787   :  { %12330 = vmatprep.subr.bf16.mxu0 %v17534_v35  ;;  %v17570_v35 = vld [vmem:[%s18601_s9 + $0x1c8] sm:$0xff]  }
 0x788   :  { %15015 = vmatpush3.bf16.msra.mxu1 %v17535_v43  ;;  %v17571_v43 = vld [vmem:[%s18601_s9 + $0x188] sm:$0xff]  }
 0x789   :  { %15044 = vmatprep.subr.bf16.mxu1 %v17574_v59 }
 0x78a   :  { %12331 = vmatpush2.bf16.msra.mxu0 %v17532_v22 }
 0x78b   :  { %v12133_v24 = vpop.f32.mrf.mxu1  ;;  %13125 = vmatmul.mubr.bf16.vlgmr.msra.gmra.mxu1 %v12359_v23  ;;  %12332 = vmatprep.subr.bf16.mxu0 %v17538_v47  ;;  %v17572_v47 = vld [vmem:[%s18601_s9 + $0x1c0] sm:$0xff]  }
 0x78c   :  { %15045 = vmatpush3.bf16.msra.mxu1 %v17575_v10 }
 0x78d   :  { %v12135_v39 = vpop.f32.mrf.mxu1  ;;  %15046 = vmatprep.subr.bf16.mxu1 %v17576_v20 }
 0x78e   :  { %12333 = vmatpush2.bf16.msra.mxu0 %v17536_v41  ;;  %v17582_v41 = vld [vmem:[%s18601_s9 + $0x258] sm:$0xff]  }
 0x78f   :  { %v12137_v32 = vpop.f32.mrf.mxu1  ;;  %12334 = vmatprep.subr.bf16.mxu0 %v17541_v58  ;;  %v17583_v58 = vld [vmem:[%s18601_s9 + $0x218] sm:$0xff]  }
 0x790   :  { %15047 = vmatpush3.bf16.msra.mxu1 %v17577_v37  ;;  %v7267_v32 = vld [vmem:[#allocation16 + $0x8] sm:$0x3] }
 0x791   :  { %v12138_v12 = vpop.f32.mrf.mxu1  ;;  %15048 = vmatprep.subr.bf16.mxu1 %v17578_v7 }
 0x792   :  { %12335 = vmatpush2.bf16.msra.mxu0 %v17539_v26  ;;  %v17585_v12 = vld [vmem:[%s18601_s9 + $0x210] sm:$0xff]  }
 0x793   :  { %14978 = vmatprep.subr.bf16.mxu0 %v17542_v44 }
 0x794   :  { %15049 = vmatpush3.bf16.msra.mxu1 %v17579_v8 }
 0x795   :  { %v12092_v60 = vpop.f32.mrf.mxu0  ;;  %12337 = vmatmul.mubr.bf16.vlgmr.msra.gmra.mxu0 %v18208_v53  ;;  %v17547_v53 = vld [vmem:[%s18601_s9 + $0xa8] sm:$0xff]   ;;  %15050 = vmatprep.subr.bf16.mxu1 %v17580_v14 }
 0x796   :  { %v12093_v15 = vadd.f32 %v12092_v60, %v18359_v0  ;;  %14979 = vmatpush3.bf16.msra.mxu0 %v17543_v52  ;;  %13084 = vmatprep.mubr.bf16.mxu0 %v12358_v57  ;;  %v7305_v52 = vrot.slane %v7267_v32, %v17955_v28  ;;  %v7309_v57 = vrot.slane %v7267_v32, %v17958_v29  ;;  %v17588_v29 = vld [vmem:[%s18601_s9 + $0x240] sm:$0xff]  }
 0x797   :  { %v12094_v31 = vpop.f32.mrf.mxu0  ;;  %14980 = vmatprep.subr.bf16.mxu0 %v17544_v40 }
 0x798   :  { %v18450_v13 = vadd.f32 %v12133_v24, %v12093_v15  ;;  %v12095_v63 = vadd.f32 %v12094_v31, %v18364_v38  ;;  %v17558_v38 = vld [vmem:[%s18601_s9 + $0x1f8] sm:$0xff]   ;;  %15051 = vmatpush3.bf16.msra.mxu1 %v17581_v18  ;;  %v17573_v24 = vld [vmem:[%s18601_s9 + $0x180] sm:$0xff]   ;;  %v17586_v15 = vld [vmem:[%s18601_s9 + $0x248] sm:$0xff]  }
 0x799   :  { %v12096_v6 = vpop.f32.mrf.mxu0  ;;  %15052 = vmatprep.subr.bf16.mxu1 %v17582_v41  ;;  %v17587_v31 = vld [vmem:[%s18601_s9 + $0x208] sm:$0xff]  }
 0x79a   :  { %14981 = vmatpush3.bf16.msra.mxu0 %v17545_v50  ;;  %v12136_v33 = vadd.f32 %v12135_v39, %v12095_v63  ;;  %v12351_v39 = vmax.f32 %v18450_v13, 0.0 }
 0x79b   :  { %v12097_v0 = vpop.f32.mrf.mxu0  ;;  %14982 = vmatprep.subr.bf16.mxu0 %v17546_v11 }
 0x79c   :  { %v12352_v34 = vmax.f32 %v12136_v33, 0.0  ;;  %15053 = vmatpush3.bf16.msra.mxu1 %v17583_v58  ;;  %v12361_v40 = vpack.c.bf16 %v12351_v39, %v12351_v39  ;;  %v17589_v0 = vld [vmem:[%s18601_s9 + $0x200] sm:$0xff]   ;;  %s17847_s9 = smov [#allocation19]  }
 0x79d   :  { %15054 = vmatprep.subr.bf16.mxu1 %v17584_v54  ;;  %s13236_s13 = sshll.u32 %s17847_s9, 4  ;;  %s13237_s13 = int_to_ptr.vmem [resolvable:$true] %s13236_s13 }
 0x79e   :  { %14983 = vmatpush3.bf16.msra.mxu0 %v17547_v53  ;;  %v12362_v5 = vpack.c.bf16 %v12352_v34, %v12352_v34  ;;  %s17800_s2 = scalar_lea.vmem %s13237_s13, 128  ;;  %p17805_p9 = scmp.lt.s32.totalorder %s13237_s13, %s13237_s13 }
 0x79f   :  { %14984 = vmatprep.subr.bf16.mxu0 %v17548_v62  ;;  %p17801_p8 = scmp.ne.s32.totalorder %s13237_s13, %s17800_s2  ;;  %p17806_p10 = scmp.lt.s32.totalorder %s17800_s2, %s17800_s2 }
 0x7a0   :  { %15055 = vmatpush3.bf16.msra.mxu1 %v17585_v12 }
 0x7a1   :  { %15056 = vmatprep.subr.bf16.mxu1 %v17586_v15  ;;  %v13213_v15 = vld [vmem:[#allocation5] sm:$0xff]  ;;  %p17807_p11 = por %p17806_p10, %p17805_p9 }
 0x7a2   :  { %14985 = vmatpush3.bf16.msra.mxu0 %v17549_v9 }
 0x7a3   :  { %14986 = vmatprep.subr.bf16.mxu0 %v17550_v46  ;;  %p17808_p12 = pnand %p17807_p11, %p17801_p8 }
 0x7a4   :  { %15057 = vmatpush3.bf16.msra.mxu1 %v17587_v31  ;;  %v13215_v31 = vld [vmem:[#allocation7] sm:$0xff] }
 0x7a5   :  { %15058 = vmatprep.subr.bf16.mxu1 %v17588_v29 }
 0x7a6   :  { %14987 = vmatpush3.bf16.msra.mxu0 %v17551_v27 }
 0x7a7   :  { %14988 = vmatprep.subr.bf16.mxu0 %v17552_v45 }
 0x7a8   :  { %15059 = vmatpush3.bf16.msra.mxu1 %v17589_v0 }
 0x7aa   :  { %14989 = vmatpush3.bf16.msra.mxu0 %v17553_v36 }
 0x7ab   :  { %14990 = vmatprep.subr.bf16.mxu0 %v17554_v4 }
 0x7ae   :  { %14991 = vmatpush3.bf16.msra.mxu0 %v17555_v42 }
 0x7af   :  { %14992 = vmatprep.subr.bf16.mxu0 %v17556_v55 }
 0x7b2   :  { %14993 = vmatpush3.bf16.msra.mxu0 %v17557_v61 }
 0x7b3   :  { %15022 = vmatprep.subr.bf16.mxu0 %v17558_v38 }
 0x7b5   :  { %13085 = vmatmul.mubr.bf16.vlgmr.msra.gmra.mxu0 %v12357_v1 }
 0x7b6   :  { %15023 = vmatpush3.bf16.msra.mxu0 %v17559_v19  ;;  %13164 = vmatprep.mubr.bf16.mxu0 %v12362_v5 }
 0x7b7   :  { %15024 = vmatprep.subr.bf16.mxu0 %v17560_v49 }
 0x7ba   :  { %15025 = vmatpush3.bf16.msra.mxu0 %v17561_v25 }
 0x7bb   :  { %15026 = vmatprep.subr.bf16.mxu0 %v17562_v30 }
 0x7be   :  { %15027 = vmatpush3.bf16.msra.mxu0 %v17563_v51 }
 0x7bf   :  { %15028 = vmatprep.subr.bf16.mxu0 %v17564_v2 }
 0x7c2   :  { %15029 = vmatpush3.bf16.msra.mxu0 %v17565_v16 }
 0x7c3   :  { %15030 = vmatprep.subr.bf16.mxu0 %v17566_v3 }
 0x7c6   :  { %15031 = vmatpush3.bf16.msra.mxu0 %v17567_v21 }
 0x7c7   :  { %15032 = vmatprep.subr.bf16.mxu0 %v17568_v56  ;;  %v14875_v56 = vld [vmem:[#allocation17] ss:$0 sm:$0xff] }
 0x7ca   :  { %15033 = vmatpush3.bf16.msra.mxu0 %v17569_v17 }
 0x7cb   :  { %v12215_v22 = vpop.f32.mrf.mxu1  ;;  %15034 = vmatprep.subr.bf16.mxu0 %v17570_v35 }
 0x7cd   :  { %v12217_v23 = vpop.f32.mrf.mxu1 }
 0x7ce   :  { %15035 = vmatpush3.bf16.msra.mxu0 %v17571_v43 }
 0x7cf   :  { %v12219_v26 = vpop.f32.mrf.mxu1  ;;  %15036 = vmatprep.subr.bf16.mxu0 %v17572_v47 }
 0x7d1   :  { %v12220_v44 = vpop.f32.mrf.mxu1 }
 0x7d2   :  { %15037 = vmatpush3.bf16.msra.mxu0 %v17573_v24 }
 0x7d5   :  { %v12174_v60 = vpop.f32.mrf.mxu0  ;;  %13165 = vmatmul.mubr.bf16.vlgmr.msra.gmra.mxu0 %v12361_v40 }
 0x7d6   :  { %v12175_v50 = vadd.f32 %v12174_v60, %v7305_v52 }
 0x7d7   :  { %v12176_v11 = vpop.f32.mrf.mxu0 }
 0x7d8   :  { %v12177_v13 = vadd.f32 %v12176_v11, %v7309_v57  ;;  %v12216_v28 = vadd.f32 %v12215_v22, %v12175_v50 }
 0x7d9   :  { %v12178_v6 = vpop.f32.mrf.mxu0 }
 0x7da   :  { %v12218_v53 = vadd.f32 %v12217_v23, %v12177_v13 }
 0x7db   :  { %v12179_v62 = vpop.f32.mrf.mxu0 }
 0x80b   :  { %v12297_v9 = vpop.f32.mrf.mxu1 }
 0x80d   :  { %v12299_v46 = vpop.f32.mrf.mxu1 }
 0x80f   :  { %v12301_v27 = vpop.f32.mrf.mxu1 }
 0x811   :  { %v12302_v45 = vpop.f32.mrf.mxu1 }
 0x815   :  { %v12256_v36 = vpop.f32.mrf.mxu0 }
 0x816   :  { %v12257_v4 = vadd.f32 %v12256_v36, %v12216_v28 }
 0x817   :  { %v12258_v63 = vpop.f32.mrf.mxu0 }
 0x818   :  { %v12259_v42 = vadd.f32 %v12258_v63, %v12218_v53  ;;  %v12298_v55 = vadd.f32 %v12297_v9, %v12257_v4 }
 0x819   :  { %v12260_v33 = vpop.f32.mrf.mxu0 }
 0x81a   :  { %v12300_v61 = vadd.f32 %v12299_v46, %v12259_v42 }
 0x81b   :  { %v12261_v48 = vpop.f32.mrf.mxu0 }
 0x82b   :  { %v14972_v38 = vpop.f32.mrf.mxu1 }
 0x82d   :  { %v14973_v34 = vpop.f32.mrf.mxu1 }
 0x82e   :  { %v14974_v59 = vadd.f32 %v14973_v34, %v14972_v38 }
 0x82f   :  { %v14975_v10 = vpop.f32.mrf.mxu1 }
 0x830   :  { %v13047_v43 = vadd.f32 %v14974_v59, %v14875_v56 }
 0x831   :  { %v14976_v20 = vpop.f32.mrf.mxu1 }
 0x84b   :  { %v15016_v19 = vpop.f32.mrf.mxu1 }
 0x84d   :  { %v15017_v1 = vpop.f32.mrf.mxu1 }
 0x84e   :  { %v15018_v49 = vadd.f32 %v15017_v1, %v15016_v19 }
 0x84f   :  { %v15019_v5 = vpop.f32.mrf.mxu1 }
 0x851   :  { %v15020_v37 = vpop.f32.mrf.mxu1 }
 0x855   :  { %v12338_v7 = vpop.f32.mrf.mxu0 }
 0x856   :  { %v12339_v25 = vadd.f32 %v12338_v7, %v12298_v55 }
 0x857   :  { %v12340_v30 = vpop.f32.mrf.mxu0 }
 0x858   :  { %v12341_v8 = vadd.f32 %v12340_v30, %v12300_v61  ;;  %v12353_v14 = vmax.f32 %v12339_v25, 0.0 }
 0x859   :  { %v12342_v51 = vpop.f32.mrf.mxu0 }
 0x85a   :  { %v12354_v2 = vmax.f32 %v12341_v8, 0.0  ;;  %v12363_v21 = vpack.c.bf16 %v12353_v14, %v12353_v14 }
 0x85b   :  { %v12343_v16 = vpop.f32.mrf.mxu0 }
 0x85c   :  { %v12364_v3 = vpack.c.bf16 %v12354_v2, %v12354_v2 }
 0x85e   :  { %13204 = vmatprep.mubr.bf16.mxu1 %v12364_v3 }
 0x85f   :  { %13205 = vmatmul.mubr.bf16.vlgmr.msra.gmra.mxu1 %v12363_v21 }
 0x875   :  { %v14994_v17 = vpop.f32.mrf.mxu0 }
 0x877   :  { %v14995_v35 = vpop.f32.mrf.mxu0 }
 0x878   :  { %v14996_v18 = vadd.f32 %v14995_v35, %v14994_v17 }
 0x879   :  { %v14997_v22 = vpop.f32.mrf.mxu0 }
 0x87a   :  { %v13087_v47 = vadd.f32 %v14996_v18, %v13047_v43 }
 0x87b   :  { %v14998_v23 = vpop.f32.mrf.mxu0 }
 0x87c   :  { %v13127_v41 = vadd.f32 %v15018_v49, %v13087_v47 }
 0x895   :  { %v15038_v24 = vpop.f32.mrf.mxu0 }
 0x897   :  { %v15039_v58 = vpop.f32.mrf.mxu0 }
 0x898   :  { %v15040_v39 = vadd.f32 %v15039_v58, %v15038_v24 }
 0x899   :  { %v15041_v26 = vpop.f32.mrf.mxu0 }
 0x89a   :  { %v13167_v32 = vadd.f32 %v15040_v39, %v13127_v41 }
 0x89b   :  { %v15042_v44 = vpop.f32.mrf.mxu0 }
 0x91f   :  { %v15060_v54 = vpop.f32.mrf.mxu1 }
 0x921   :  { %v15061_v12 = vpop.f32.mrf.mxu1 }
 0x922   :  { %v15062_v52 = vadd.f32 %v15061_v12, %v15060_v54 }
 0x923   :  { %v15063_v40 = vpop.f32.mrf.mxu1 }
 0x924   :  { %v13207_v57 = vadd.f32 %v15062_v52, %v13167_v32 }
 0x925   :  { %v15064_v60 = vpop.f32.mrf.mxu1 }
 0x926   :  { %17590 = vtanh.f32 %v13207_v57 }
 0x933   :  { %v17591_v50 = vpop.eup %17590 }
 0x934   :  { %v13214_v11 = vmul.f32 %v17591_v50, %v13213_v15 }
 0x936   :  { %v13216_v13 = vadd.f32 %v13215_v31, %v13214_v11 }
 0x938   :  { %v13218_v28 = vsel %vm13217_vm1, %v13216_v13, -inf }
 0x939   :  { %13219 = vmax.xlane.f32.xlu0 %v13218_v28 }
 0x9c2   :  { %v13220_v6 = vpop.xlane.xlu0 %13219 }
 0x9c3   :  { %v13221_v29 = vsub.f32 %v13216_v13, %v13220_v6 }
 0x9c5   :  { %v13222_v53 = vmul.f32 1.442695, %v13221_v29 }
 0x9c7   :  { %17592 = vpow2.f32 %v13222_v53 }
 0x9d4   :  { %v17593_v0 = vpop.eup %17592 }
 0x9d5   :  { %v13224_v62 = vsel %vm13217_vm1, %v17593_v0, 0.0 }
 0x9d6   :  { %13225 = vadd.xlane.f32.xlu0 %v13224_v62 }
 0xa5f   :  { %v13226_v9 = vpop.xlane.xlu0 %13225 }
 0xa60   :  { %17594 = vrcp.f32 %v13226_v9 }
 0xa6d   :  { %v17595_v46 = vpop.eup %17594 }
 0xa6e   :  { %v13228_v27 = vmul.f32 %v17595_v46, %v17593_v0 }
 0xa70   :  { %13229 = vst.msk [vmem:[#allocation19] sm:$0xff] %vm13217_vm1, %v13228_v27 }
 0xa71   :  { %17811 = shalt.err (!%p17808_p12)
}
 0xa72   :  { %13239 = dma.vmem_to_hbm [thread:$0]  %s13237_s13, 128, %s18603_s11, [#allocation4]  }
 0xa73   :  { %17832 = dma.done.wait [#allocation4], 128  }
 0xa74   :  { %17833 = vsyncadd [#allocation4], 4294967168 }
 0xa75   :  { %13243 = vsyncpa [#allocation3], 1 }
 0xa76   :  { %13244 = vsyncpa [#allocation6], 1 }
 0xa77   :  { %13245 = vsyncpa [#allocation9], 1 }
 0xa78   :  { %13246 = vsyncpa [#allocation12], 1 }
 0xa79   :  { %13247 = vsyncpa [#allocation15], 1 }
 0xa7a   :  { %13248 = vsyncpa [#allocation18], 1 }
 0xa7b   :  { %13249 = vsyncpa [#allocation4], 1 }

</bundles_post_ra>
